<compile_context>
chip_gen: v7x
topology: tpu7x:2x2x1
jax: 0.10.0
libtpu: 0.0.40
codegen_flags: <defaults>
</compile_context>

<pallas_src>
import functools

import jax
import jax.numpy as jnp
from jax.experimental import pallas as pl
from jax.experimental.pallas import tpu as pltpu


# --------------------------------------------------------------------------
# tiling helper
# --------------------------------------------------------------------------


def _pick_tile(n, cap):
    """Largest divisor of n that is <= cap, preferring to keep >= 2 grid steps."""
    divs = [d for d in range(1, min(n, cap) + 1) if n % d == 0]
    multi = [d for d in divs if n // d >= 2]
    return max(multi) if multi else max(divs)


# --------------------------------------------------------------------------
# features kernel (conv trunk for a group of G images)
# --------------------------------------------------------------------------
# Per-image "flat plane" layouts (rows = spatial, lanes = channels):
#   conv1 out slab : rows i*32 + j   (i,j in [0,28)),          stride 896/image
#   conv2 in plane : rows (pi+1)*16 + (pj+1) of a zeroed 16x16, stride 256/image
#   conv2 out slab : rows oi*16 + oj,                           stride 256/image
#   conv3 in plane : rows (qi+1)*9 + (qj+1) of a zeroed 9x9,    stride  88/image
#   conv3 out slab : rows oi*9 + oj,                            stride  88/image


def _features_kernel(p1_ref, w1_ref, b1_ref, w2_ref, b2_ref, w3_ref, b3_ref,
                     out_ref,
                     slab1_ref, colmax1_ref, xp2_ref, p2_ref, out2_ref,
                     colmax2_ref, xp3_ref, p3_ref, out3_ref, *, G):
    f32 = jnp.float32
    bf16 = jnp.bfloat16

    # ---- conv1: one MXU matmul on the prebuilt im2col (M=G*896, K=9, N=32) ----
    c1 = jnp.dot(p1_ref[...], w1_ref[...], preferred_element_type=f32)
    slab1_ref[...] = jnp.maximum(c1 + b1_ref[...], 0.0)

    # ---- pool1 step 1: max over horizontal pairs -> rows k = i*16 + pj --------
    colmax1_ref[...] = jnp.maximum(
        slab1_ref[pl.ds(0, G * 448, stride=2), :],
        slab1_ref[pl.ds(1, G * 448, stride=2), :]).astype(bf16)

    # ---- pool1 step 2: vertical pairs + scatter into zero-padded 16x16 plane --
    xp2_ref[...] = jnp.zeros_like(xp2_ref)
    for g in range(G):
        for pi in range(14):
            a = colmax1_ref[pl.ds(g * 448 + (2 * pi) * 16, 14), :]
            b = colmax1_ref[pl.ds(g * 448 + (2 * pi + 1) * 16, 14), :]
            xp2_ref[pl.ds(g * 256 + (pi + 1) * 16 + 1, 14), :] = (
                jnp.maximum(a, b).astype(f32))

    # ---- conv2: build fused-tap im2col (K = 9*32 = 288), one MXU matmul -------
    for kh in range(3):
        for kw in range(3):
            t = kh * 3 + kw
            p2_ref[:, t * 32:(t + 1) * 32] = (
                xp2_ref[pl.ds(kh * 16 + kw, G * 256), :].astype(bf16))
    c2 = jnp.dot(p2_ref[...], w2_ref[...], preferred_element_type=f32)
    out2_ref[...] = jnp.maximum(c2 + b2_ref[...], 0.0)

    # ---- pool2 (same two-step structure) -> zero-padded 9x9 conv3 plane -------
    colmax2_ref[...] = jnp.maximum(
        out2_ref[pl.ds(0, G * 128, stride=2), :],
        out2_ref[pl.ds(1, G * 128, stride=2), :]).astype(bf16)
    xp3_ref[...] = jnp.zeros_like(xp3_ref)
    for g in range(G):
        for qi in range(7):
            a = colmax2_ref[pl.ds(g * 128 + (2 * qi) * 8, 7), :]
            b = colmax2_ref[pl.ds(g * 128 + (2 * qi + 1) * 8, 7), :]
            xp3_ref[pl.ds(g * 88 + (qi + 1) * 9 + 1, 7), :] = (
                jnp.maximum(a, b).astype(f32))

    # ---- conv3: fused-tap im2col (K = 9*64 = 576), one MXU matmul (no pool) ---
    for kh in range(3):
        for kw in range(3):
            t = kh * 3 + kw
            p3_ref[:, t * 64:(t + 1) * 64] = (
                xp3_ref[pl.ds(kh * 9 + kw, G * 88), :].astype(bf16))
    c3 = jnp.dot(p3_ref[...], w3_ref[...], preferred_element_type=f32)
    out3_ref[...] = jnp.maximum(c3 + b3_ref[...], 0.0)

    # ---- relayout (spatial rows, 64 lanes) -> lane-dense (G, 3136) bf16 -------
    for q in range(49):
        oi, oj = q // 7, q % 7
        out_ref[:, 0, q * 64:(q + 1) * 64] = (
            out3_ref[pl.ds(oi * 9 + oj, G, stride=88), :].astype(bf16))


def _features_call(p1, B, prep):
    G = _pick_tile(B, 8)
    kernel = functools.partial(_features_kernel, G=G)
    return pl.pallas_call(
        kernel,
        out_shape=jax.ShapeDtypeStruct((B, 1, 3136), jnp.bfloat16),
        grid=(B // G,),
        in_specs=[
            pl.BlockSpec((G * 896, 9), lambda s: (s, 0)),      # conv1 im2col
            pl.BlockSpec((9, 32), lambda s: (0, 0)),           # conv1 w (taps)
            pl.BlockSpec((1, 32), lambda s: (0, 0)),           # conv1 b
            pl.BlockSpec((288, 64), lambda s: (0, 0)),         # conv2 w (fused K)
            pl.BlockSpec((1, 64), lambda s: (0, 0)),           # conv2 b
            pl.BlockSpec((576, 64), lambda s: (0, 0)),         # conv3 w (fused K)
            pl.BlockSpec((1, 64), lambda s: (0, 0)),           # conv3 b
        ],
        out_specs=pl.BlockSpec((G, 1, 3136), lambda s: (s, 0, 0)),
        scratch_shapes=[
            pltpu.VMEM((G * 896, 32), jnp.float32),        # relu(conv1) slab
            pltpu.VMEM((G * 448, 32), jnp.bfloat16),       # pool1 col-pair max
            pltpu.VMEM((G * 256 + 40, 32), jnp.float32),   # padded conv2 input
            pltpu.VMEM((G * 256, 288), jnp.bfloat16),      # conv2 im2col
            pltpu.VMEM((G * 256, 64), jnp.float32),        # relu(conv2) slab
            pltpu.VMEM((G * 128, 64), jnp.bfloat16),       # pool2 col-pair max
            pltpu.VMEM((G * 88 + 24, 64), jnp.float32),    # padded conv3 input
            pltpu.VMEM((G * 88, 576), jnp.bfloat16),       # conv3 im2col
            pltpu.VMEM((G * 88, 64), jnp.float32),         # relu(conv3) slab
        ],
        compiler_params=pltpu.CompilerParams(
            dimension_semantics=("parallel",)),
    )(p1, prep["conv1_w"], prep["conv1_b"], prep["conv2_w"], prep["conv2_b"],
      prep["conv3_w"], prep["conv3_b"])


# --------------------------------------------------------------------------
# head kernel: fc1 -> relu -> fc2 (fc2 padded to 128 output lanes)
# --------------------------------------------------------------------------


def _head_kernel(f_ref, w1_ref, b1_ref, w2_ref, b2_ref, o_ref):
    h = jnp.dot(f_ref[:, 0, :], w1_ref[...], preferred_element_type=jnp.float32)
    h = jnp.maximum(h + b1_ref[...], 0.0)
    o_ref[:, 0, :] = jnp.dot(h.astype(jnp.bfloat16), w2_ref[...],
                             preferred_element_type=jnp.float32) + b2_ref[...]


def _head_call(feats, prep):
    B = feats.shape[0]
    tm = _pick_tile(B, 128)
    return pl.pallas_call(
        _head_kernel,
        out_shape=jax.ShapeDtypeStruct((B, 1, 128), jnp.float32),
        grid=(B // tm,),
        in_specs=[
            pl.BlockSpec((tm, 1, 3136), lambda m: (m, 0, 0)),
            pl.BlockSpec((3136, 512), lambda m: (0, 0)),
            pl.BlockSpec((1, 512), lambda m: (0, 0)),
            pl.BlockSpec((512, 128), lambda m: (0, 0)),
            pl.BlockSpec((1, 128), lambda m: (0, 0)),
        ],
        out_specs=pl.BlockSpec((tm, 1, 128), lambda m: (m, 0, 0)),
        compiler_params=pltpu.CompilerParams(
            dimension_semantics=("parallel",)),
    )(feats, prep["fc1_w"], prep["fc1_b"], prep["fc2_w"], prep["fc2_b"])


# --------------------------------------------------------------------------
# one-time (outside-jit) weight preparation
# --------------------------------------------------------------------------


def prepare_params(params):
    """Fold all layout work (tap fusion, .T, NCHW-flatten permutation, fc2 pad)
    into the weights once, outside the jitted forward."""

    def conv_taps(w):  # (Cout, Cin, 3, 3) -> (9*Cin, Cout); row = (kh*3+kw)*Cin+cin
        cout, cin = w.shape[0], w.shape[1]
        return jnp.transpose(w, (2, 3, 1, 0)).reshape(9 * cin, cout)

    # fc1 consumes features in (i, j, c) order; PyTorch's view(-1, 64*7*7) is
    # (c, i, j) order -> fold that permutation into the fc1 weight rows.
    fc1_eff = jnp.transpose(params["fc1_w"].reshape(512, 64, 49),
                            (2, 1, 0)).reshape(3136, 512)
    fc2_eff = jnp.pad(params["fc2_w"].T, ((0, 0), (0, 118)))     # (512, 128)
    fc2_b = jnp.pad(params["fc2_b"], (0, 118)).reshape(1, 128)

    return {
        "conv1_w": conv_taps(params["conv1_w"]).astype(jnp.float32),   # (9, 32)
        "conv1_b": params["conv1_b"].reshape(1, 32).astype(jnp.float32),
        "conv2_w": conv_taps(params["conv2_w"]).astype(jnp.bfloat16),  # (288, 64)
        "conv2_b": params["conv2_b"].reshape(1, 64).astype(jnp.float32),
        "conv3_w": conv_taps(params["conv3_w"]).astype(jnp.bfloat16),  # (576, 64)
        "conv3_b": params["conv3_b"].reshape(1, 64).astype(jnp.float32),
        "fc1_w": fc1_eff.astype(jnp.bfloat16),
        "fc1_b": params["fc1_b"].reshape(1, 512).astype(jnp.float32),
        "fc2_w": fc2_eff.astype(jnp.bfloat16),
        "fc2_b": fc2_b.astype(jnp.float32),
    }


# --------------------------------------------------------------------------
# forward
# --------------------------------------------------------------------------


def mnist_classifier_forward(x_nchw, prep):
    B = x_nchw.shape[0]
    x = x_nchw.reshape(B, 28, 28).astype(jnp.float32)
    # Zero-pad ("same" conv) and build the tiny 9-tap conv1 im2col in XLA; rows
    # are laid out on a 32-stride grid (i*32 + j) so the kernel's pooling
    # gathers stay aligned.  This is the only per-call input layout glue.
    xpad = jnp.pad(x, ((0, 0), (1, 1), (1, 5)))                 # (B, 30, 34)
    taps = [xpad[:, kh:kh + 28, kw:kw + 32]
            for kh in range(3) for kw in range(3)]              # 9 x (B, 28, 32)
    p1 = jnp.stack(taps, axis=-1).reshape(B * 896, 9)           # (B*896, 9) f32

    feats = _features_call(p1, B, prep)                         # (B, 1, 3136) bf16
    logits = _head_call(feats, prep)                            # (B, 1, 128) f32
    return logits.reshape(B, 128)[:, :10]


# --------------------------------------------------------------------------
# pure-JAX reference
# --------------------------------------------------------------------------


def reference_forward(x, params):
    hi = jax.lax.Precision.HIGHEST

    def conv(x, w, b):
        y = jax.lax.conv_general_dilated(
            x, w, (1, 1), ((1, 1), (1, 1)),
            dimension_numbers=("NCHW", "OIHW", "NCHW"), precision=hi)
        return jnp.maximum(y + b[None, :, None, None], 0.0)

    def pool(x):
        B, C, H, W = x.shape
        return x.reshape(B, C, H // 2, 2, W // 2, 2).max(axis=(3, 5))

    x = pool(conv(x, params["conv1_w"], params["conv1_b"]))
    x = pool(conv(x, params["conv2_w"], params["conv2_b"]))
    x = conv(x, params["conv3_w"], params["conv3_b"])
    x = x.reshape(x.shape[0], -1)
    x = jnp.maximum(jnp.dot(x, params["fc1_w"].T, precision=hi)
                    + params["fc1_b"], 0.0)
    return jnp.dot(x, params["fc2_w"].T, precision=hi) + params["fc2_b"]


# --------------------------------------------------------------------------
# main
# --------------------------------------------------------------------------

if __name__ == "__main__":
    key = jax.random.PRNGKey(0)
    ks = jax.random.split(key, 11)

    def init(k, shape, fan_in):
        return jax.random.normal(k, shape, jnp.float32) / jnp.sqrt(float(fan_in))

    params = {
        "conv1_w": init(ks[0], (32, 1, 3, 3), 9),
        "conv1_b": init(ks[1], (32,), 9),
        "conv2_w": init(ks[2], (64, 32, 3, 3), 9 * 32),
        "conv2_b": init(ks[3], (64,), 9 * 32),
        "conv3_w": init(ks[4], (64, 64, 3, 3), 9 * 64),
        "conv3_b": init(ks[5], (64,), 9 * 64),
        "fc1_w": init(ks[6], (512, 3136), 3136),
        "fc1_b": init(ks[7], (512,), 3136),
        "fc2_w": init(ks[8], (10, 512), 512),
        "fc2_b": init(ks[9], (10,), 512),
    }

    # fc1 expects 64*7*7, so spatial must be 28x28 (MNIST); small batch = 2.
    x = jax.random.normal(ks[10], (2, 1, 28, 28), jnp.float32)

    prep = prepare_params(params)                 # one-time, outside jit
    fwd = jax.jit(mnist_classifier_forward)
    out = jax.block_until_ready(fwd(x, prep))

    assert out.shape == (2, 10)
    assert bool(jnp.all(jnp.isfinite(out)))

    ref = reference_forward(x, params)
    max_err = float(jnp.max(jnp.abs(out - ref)))
    # bf16 MXU operands with f32 accumulation -> relaxed tolerance vs pure f32.
    assert bool(jnp.allclose(out, ref, atol=3e-2, rtol=3e-2)), (max_err, out, ref)

    print("KERNEL_OK")
</pallas_src>

<mosaic_0001>
module attributes {stable_mosaic.version = 11 : i64} {
  func.func @_head_kernel(%arg0: i32, %arg1: memref<1x1x3136xbf16, #tpu.memory_space<vmem>>, %arg2: memref<3136x512xbf16, #tpu.memory_space<vmem>>, %arg3: memref<1x512xf32, #tpu.memory_space<vmem>>, %arg4: memref<512x128xbf16, #tpu.memory_space<vmem>>, %arg5: memref<1x128xf32, #tpu.memory_space<vmem>>, %arg6: memref<1x1x128xf32, #tpu.memory_space<vmem>>) attributes {dimension_semantics = [#tpu.dimension_semantics<parallel>], iteration_bounds = array<i64: 2>, scalar_prefetch = 0 : i64, scratch_operands = 0 : i64, tpu.core_type = #tpu.core_type<tc>, window_params = [{transform_indices = @transform_0, window_bounds = array<i64: 1, 1, 3136>}, {pipeline_mode = #tpu.pipeline_mode<synchronous>, transform_indices = @transform_1, window_bounds = array<i64: 3136, 512>}, {pipeline_mode = #tpu.pipeline_mode<synchronous>, transform_indices = @transform_2, window_bounds = array<i64: 1, 512>}, {pipeline_mode = #tpu.pipeline_mode<synchronous>, transform_indices = @transform_3, window_bounds = array<i64: 512, 128>}, {pipeline_mode = #tpu.pipeline_mode<synchronous>, transform_indices = @transform_4, window_bounds = array<i64: 1, 128>}, {transform_indices = @transform_5, window_bounds = array<i64: 1, 1, 128>}]} {
    %c0 = arith.constant 0 : index
    %c0_0 = arith.constant 0 : index
    %c0_1 = arith.constant 0 : index
    %0 = vector.load %arg1[%c0, %c0_0, %c0_1] : memref<1x1x3136xbf16, #tpu.memory_space<vmem>>, vector<1x1x3136xbf16>
    %1 = vector.shape_cast %0 : vector<1x1x3136xbf16> to vector<1x3136xbf16>
    %c0_2 = arith.constant 0 : index
    %c0_3 = arith.constant 0 : index
    %2 = vector.load %arg2[%c0_2, %c0_3] : memref<3136x512xbf16, #tpu.memory_space<vmem>>, vector<3136x512xbf16>
    %cst = arith.constant dense<0.000000e+00> : vector<1x512xf32>
    %3 = tpu.matmul %1, %2, %cst {dimension_numbers = #tpu.dot_dimension_numbers<[1], [0], [0], [1], [0, 0, 1, 1], [], []>} : vector<1x3136xbf16>, vector<3136x512xbf16>, vector<1x512xf32> -> vector<1x512xf32>
    %c0_4 = arith.constant 0 : index
    %c0_5 = arith.constant 0 : index
    %4 = vector.load %arg3[%c0_4, %c0_5] : memref<1x512xf32, #tpu.memory_space<vmem>>, vector<1x512xf32>
    %5 = arith.addf %3, %4 : vector<1x512xf32>
    %cst_6 = arith.constant 0.000000e+00 : f32
    %6 = vector.broadcast %cst_6 : f32 to vector<1x512xf32>
    %7 = arith.maximumf %5, %6 : vector<1x512xf32>
    %8 = arith.truncf %7 : vector<1x512xf32> to vector<1x512xbf16>
    %c0_7 = arith.constant 0 : index
    %c0_8 = arith.constant 0 : index
    %9 = vector.load %arg4[%c0_7, %c0_8] : memref<512x128xbf16, #tpu.memory_space<vmem>>, vector<512x128xbf16>
    %cst_9 = arith.constant dense<0.000000e+00> : vector<1x128xf32>
    %10 = tpu.matmul %8, %9, %cst_9 {dimension_numbers = #tpu.dot_dimension_numbers<[1], [0], [0], [1], [0, 0, 1, 1], [], []>} : vector<1x512xbf16>, vector<512x128xbf16>, vector<1x128xf32> -> vector<1x128xf32>
    %c0_10 = arith.constant 0 : index
    %c0_11 = arith.constant 0 : index
    %11 = vector.load %arg5[%c0_10, %c0_11] : memref<1x128xf32, #tpu.memory_space<vmem>>, vector<1x128xf32>
    %12 = arith.addf %10, %11 : vector<1x128xf32>
    %c0_12 = arith.constant 0 : index
    %c0_13 = arith.constant 0 : index
    %c0_14 = arith.constant 0 : index
    %13 = vector.load %arg6[%c0_12, %c0_13, %c0_14] : memref<1x1x128xf32, #tpu.memory_space<vmem>>, vector<1x1x128xf32>
    %14 = vector.shape_cast %13 : vector<1x1x128xf32> to vector<1x128xf32>
    %15 = vector.shape_cast %12 : vector<1x128xf32> to vector<1x1x128xf32>
    tpu.vector_store %arg6[%c0_12, %c0_13, %c0_14], %15 {strides = array<i32>} : memref<1x1x128xf32, #tpu.memory_space<vmem>>, vector<1x1x128xf32>,
    return
  }
  func.func @transform_0(%arg0: i32) -> (i32, i32, i32) {
    %c0_i32 = arith.constant 0 : i32
    %c0_i32_0 = arith.constant 0 : i32
    %c0_i32_1 = arith.constant 0 : i32
    return %arg0, %c0_i32, %c0_i32_0 : i32, i32, i32
  }
  func.func @transform_1(%arg0: i32) -> (i32, i32) {
    %c0_i32 = arith.constant 0 : i32
    %c0_i32_0 = arith.constant 0 : i32
    %c0_i32_1 = arith.constant 0 : i32
    return %c0_i32, %c0_i32_0 : i32, i32
  }
  func.func @transform_2(%arg0: i32) -> (i32, i32) {
    %c0_i32 = arith.constant 0 : i32
    %c0_i32_0 = arith.constant 0 : i32
    %c0_i32_1 = arith.constant 0 : i32
    return %c0_i32, %c0_i32_0 : i32, i32
  }
  func.func @transform_3(%arg0: i32) -> (i32, i32) {
    %c0_i32 = arith.constant 0 : i32
    %c0_i32_0 = arith.constant 0 : i32
    %c0_i32_1 = arith.constant 0 : i32
    return %c0_i32, %c0_i32_0 : i32, i32
  }
  func.func @transform_4(%arg0: i32) -> (i32, i32) {
    %c0_i32 = arith.constant 0 : i32
    %c0_i32_0 = arith.constant 0 : i32
    %c0_i32_1 = arith.constant 0 : i32
    return %c0_i32, %c0_i32_0 : i32, i32
  }
  func.func @transform_5(%arg0: i32) -> (i32, i32, i32) {
    %c0_i32 = arith.constant 0 : i32
    %c0_i32_0 = arith.constant 0 : i32
    %c0_i32_1 = arith.constant 0 : i32
    return %arg0, %c0_i32, %c0_i32_0 : i32, i32, i32
  }
}

module attributes {stable_mosaic.version = 11 : i64} {
  func.func @_features_kernel(%arg0: i32, %arg1: memref<896x9xf32, #tpu.memory_space<vmem>>, %arg2: memref<9x32xf32, #tpu.memory_space<vmem>>, %arg3: memref<1x32xf32, #tpu.memory_space<vmem>>, %arg4: memref<288x64xbf16, #tpu.memory_space<vmem>>, %arg5: memref<1x64xf32, #tpu.memory_space<vmem>>, %arg6: memref<576x64xbf16, #tpu.memory_space<vmem>>, %arg7: memref<1x64xf32, #tpu.memory_space<vmem>>, %arg8: memref<1x1x3136xbf16, #tpu.memory_space<vmem>>, %arg9: memref<896x32xf32, #tpu.memory_space<vmem>>, %arg10: memref<448x32xbf16, #tpu.memory_space<vmem>>, %arg11: memref<296x32xf32, #tpu.memory_space<vmem>>, %arg12: memref<256x288xbf16, #tpu.memory_space<vmem>>, %arg13: memref<256x64xf32, #tpu.memory_space<vmem>>, %arg14: memref<128x64xbf16, #tpu.memory_space<vmem>>, %arg15: memref<112x64xf32, #tpu.memory_space<vmem>>, %arg16: memref<88x576xbf16, #tpu.memory_space<vmem>>, %arg17: memref<88x64xf32, #tpu.memory_space<vmem>>) attributes {dimension_semantics = [#tpu.dimension_semantics<parallel>], iteration_bounds = array<i64: 2>, scalar_prefetch = 0 : i64, scratch_operands = 9 : i64, tpu.core_type = #tpu.core_type<tc>, window_params = [{transform_indices = @transform_0, window_bounds = array<i64: 896, 9>}, {pipeline_mode = #tpu.pipeline_mode<synchronous>, transform_indices = @transform_1, window_bounds = array<i64: 9, 32>}, {pipeline_mode = #tpu.pipeline_mode<synchronous>, transform_indices = @transform_2, window_bounds = array<i64: 1, 32>}, {pipeline_mode = #tpu.pipeline_mode<synchronous>, transform_indices = @transform_3, window_bounds = array<i64: 288, 64>}, {pipeline_mode = #tpu.pipeline_mode<synchronous>, transform_indices = @transform_4, window_bounds = array<i64: 1, 64>}, {pipeline_mode = #tpu.pipeline_mode<synchronous>, transform_indices = @transform_5, window_bounds = array<i64: 576, 64>}, {pipeline_mode = #tpu.pipeline_mode<synchronous>, transform_indices = @transform_6, window_bounds = array<i64: 1, 64>}, {transform_indices = @transform_7, window_bounds = array<i64: 1, 1, 3136>}]} {
    %c0 = arith.constant 0 : index
    %c0_0 = arith.constant 0 : index
    %0 = vector.load %arg1[%c0, %c0_0] : memref<896x9xf32, #tpu.memory_space<vmem>>, vector<896x9xf32>
    %c0_1 = arith.constant 0 : index
    %c0_2 = arith.constant 0 : index
    %1 = vector.load %arg2[%c0_1, %c0_2] : memref<9x32xf32, #tpu.memory_space<vmem>>, vector<9x32xf32>
    %cst = arith.constant dense<0.000000e+00> : vector<896x32xf32>
    %2 = tpu.matmul %0, %1, %cst {dimension_numbers = #tpu.dot_dimension_numbers<[1], [0], [0], [1], [0, 0, 1, 1], [], []>} : vector<896x9xf32>, vector<9x32xf32>, vector<896x32xf32> -> vector<896x32xf32>
    %c0_3 = arith.constant 0 : index
    %c0_4 = arith.constant 0 : index
    %3 = vector.load %arg3[%c0_3, %c0_4] : memref<1x32xf32, #tpu.memory_space<vmem>>, vector<1x32xf32>
    %4 = vector.broadcast %3 : vector<1x32xf32> to vector<896x32xf32>
    %5 = arith.addf %2, %4 : vector<896x32xf32>
    %cst_5 = arith.constant 0.000000e+00 : f32
    %6 = vector.broadcast %cst_5 : f32 to vector<896x32xf32>
    %7 = arith.maximumf %5, %6 : vector<896x32xf32>
    %c0_6 = arith.constant 0 : index
    %c0_7 = arith.constant 0 : index
    %8 = vector.load %arg9[%c0_6, %c0_7] : memref<896x32xf32, #tpu.memory_space<vmem>>, vector<896x32xf32>
    tpu.vector_store %arg9[%c0_6, %c0_7], %7 {strides = array<i32>} : memref<896x32xf32, #tpu.memory_space<vmem>>, vector<896x32xf32>,
    %c0_8 = arith.constant 0 : index
    %c0_9 = arith.constant 0 : index
    %9 = tpu.strided_load %arg9[%c0_8, %c0_9] {strides = array<i32: 2, 1>} : memref<896x32xf32, #tpu.memory_space<vmem>>, vector<448x32xf32>
    %c1 = arith.constant 1 : index
    %c0_10 = arith.constant 0 : index
    %10 = tpu.strided_load %arg9[%c1, %c0_10] {strides = array<i32: 2, 1>} : memref<896x32xf32, #tpu.memory_space<vmem>>, vector<448x32xf32>
    %11 = arith.maximumf %9, %10 : vector<448x32xf32>
    %12 = arith.truncf %11 : vector<448x32xf32> to vector<448x32xbf16>
    %c0_11 = arith.constant 0 : index
    %c0_12 = arith.constant 0 : index
    %13 = vector.load %arg10[%c0_11, %c0_12] : memref<448x32xbf16, #tpu.memory_space<vmem>>, vector<448x32xbf16>
    tpu.vector_store %arg10[%c0_11, %c0_12], %12 {strides = array<i32>} : memref<448x32xbf16, #tpu.memory_space<vmem>>, vector<448x32xbf16>,
    %cst_13 = arith.constant 0.000000e+00 : f32
    %14 = vector.broadcast %cst_13 : f32 to vector<296x32xf32>
    %c0_14 = arith.constant 0 : index
    %c0_15 = arith.constant 0 : index
    %15 = vector.load %arg11[%c0_14, %c0_15] : memref<296x32xf32, #tpu.memory_space<vmem>>, vector<296x32xf32>
    tpu.vector_store %arg11[%c0_14, %c0_15], %14 {strides = array<i32>} : memref<296x32xf32, #tpu.memory_space<vmem>>, vector<296x32xf32>,
    %c0_16 = arith.constant 0 : index
    %c0_17 = arith.constant 0 : index
    %16 = vector.load %arg10[%c0_16, %c0_17] : memref<448x32xbf16, #tpu.memory_space<vmem>>, vector<14x32xbf16>
    %c16 = arith.constant 16 : index
    %c0_18 = arith.constant 0 : index
    %17 = vector.load %arg10[%c16, %c0_18] : memref<448x32xbf16, #tpu.memory_space<vmem>>, vector<14x32xbf16>
    %18 = arith.maximumf %16, %17 : vector<14x32xbf16>
    %19 = arith.extf %18 : vector<14x32xbf16> to vector<14x32xf32>
    %c17 = arith.constant 17 : index
    %c0_19 = arith.constant 0 : index
    %20 = vector.load %arg11[%c17, %c0_19] : memref<296x32xf32, #tpu.memory_space<vmem>>, vector<14x32xf32>
    tpu.vector_store %arg11[%c17, %c0_19], %19 {strides = array<i32>} : memref<296x32xf32, #tpu.memory_space<vmem>>, vector<14x32xf32>,
    %c32 = arith.constant 32 : index
    %c0_20 = arith.constant 0 : index
    %21 = vector.load %arg10[%c32, %c0_20] : memref<448x32xbf16, #tpu.memory_space<vmem>>, vector<14x32xbf16>
    %c48 = arith.constant 48 : index
    %c0_21 = arith.constant 0 : index
    %22 = vector.load %arg10[%c48, %c0_21] : memref<448x32xbf16, #tpu.memory_space<vmem>>, vector<14x32xbf16>
    %23 = arith.maximumf %21, %22 : vector<14x32xbf16>
    %24 = arith.extf %23 : vector<14x32xbf16> to vector<14x32xf32>
    %c33 = arith.constant 33 : index
    %c0_22 = arith.constant 0 : index
    %25 = vector.load %arg11[%c33, %c0_22] : memref<296x32xf32, #tpu.memory_space<vmem>>, vector<14x32xf32>
    tpu.vector_store %arg11[%c33, %c0_22], %24 {strides = array<i32>} : memref<296x32xf32, #tpu.memory_space<vmem>>, vector<14x32xf32>,
    %c64 = arith.constant 64 : index
    %c0_23 = arith.constant 0 : index
    %26 = vector.load %arg10[%c64, %c0_23] : memref<448x32xbf16, #tpu.memory_space<vmem>>, vector<14x32xbf16>
    %c80 = arith.constant 80 : index
    %c0_24 = arith.constant 0 : index
    %27 = vector.load %arg10[%c80, %c0_24] : memref<448x32xbf16, #tpu.memory_space<vmem>>, vector<14x32xbf16>
    %28 = arith.maximumf %26, %27 : vector<14x32xbf16>
    %29 = arith.extf %28 : vector<14x32xbf16> to vector<14x32xf32>
    %c49 = arith.constant 49 : index
    %c0_25 = arith.constant 0 : index
    %30 = vector.load %arg11[%c49, %c0_25] : memref<296x32xf32, #tpu.memory_space<vmem>>, vector<14x32xf32>
    tpu.vector_store %arg11[%c49, %c0_25], %29 {strides = array<i32>} : memref<296x32xf32, #tpu.memory_space<vmem>>, vector<14x32xf32>,
    %c96 = arith.constant 96 : index
    %c0_26 = arith.constant 0 : index
    %31 = vector.load %arg10[%c96, %c0_26] : memref<448x32xbf16, #tpu.memory_space<vmem>>, vector<14x32xbf16>
    %c112 = arith.constant 112 : index
    %c0_27 = arith.constant 0 : index
    %32 = vector.load %arg10[%c112, %c0_27] : memref<448x32xbf16, #tpu.memory_space<vmem>>, vector<14x32xbf16>
    %33 = arith.maximumf %31, %32 : vector<14x32xbf16>
    %34 = arith.extf %33 : vector<14x32xbf16> to vector<14x32xf32>
    %c65 = arith.constant 65 : index
    %c0_28 = arith.constant 0 : index
    %35 = vector.load %arg11[%c65, %c0_28] : memref<296x32xf32, #tpu.memory_space<vmem>>, vector<14x32xf32>
    tpu.vector_store %arg11[%c65, %c0_28], %34 {strides = array<i32>} : memref<296x32xf32, #tpu.memory_space<vmem>>, vector<14x32xf32>,
    %c128 = arith.constant 128 : index
    %c0_29 = arith.constant 0 : index
    %36 = vector.load %arg10[%c128, %c0_29] : memref<448x32xbf16, #tpu.memory_space<vmem>>, vector<14x32xbf16>
    %c144 = arith.constant 144 : index
    %c0_30 = arith.constant 0 : index
    %37 = vector.load %arg10[%c144, %c0_30] : memref<448x32xbf16, #tpu.memory_space<vmem>>, vector<14x32xbf16>
    %38 = arith.maximumf %36, %37 : vector<14x32xbf16>
    %39 = arith.extf %38 : vector<14x32xbf16> to vector<14x32xf32>
    %c81 = arith.constant 81 : index
    %c0_31 = arith.constant 0 : index
    %40 = vector.load %arg11[%c81, %c0_31] : memref<296x32xf32, #tpu.memory_space<vmem>>, vector<14x32xf32>
    tpu.vector_store %arg11[%c81, %c0_31], %39 {strides = array<i32>} : memref<296x32xf32, #tpu.memory_space<vmem>>, vector<14x32xf32>,
    %c160 = arith.constant 160 : index
    %c0_32 = arith.constant 0 : index
    %41 = vector.load %arg10[%c160, %c0_32] : memref<448x32xbf16, #tpu.memory_space<vmem>>, vector<14x32xbf16>
    %c176 = arith.constant 176 : index
    %c0_33 = arith.constant 0 : index
    %42 = vector.load %arg10[%c176, %c0_33] : memref<448x32xbf16, #tpu.memory_space<vmem>>, vector<14x32xbf16>
    %43 = arith.maximumf %41, %42 : vector<14x32xbf16>
    %44 = arith.extf %43 : vector<14x32xbf16> to vector<14x32xf32>
    %c97 = arith.constant 97 : index
    %c0_34 = arith.constant 0 : index
    %45 = vector.load %arg11[%c97, %c0_34] : memref<296x32xf32, #tpu.memory_space<vmem>>, vector<14x32xf32>
    tpu.vector_store %arg11[%c97, %c0_34], %44 {strides = array<i32>} : memref<296x32xf32, #tpu.memory_space<vmem>>, vector<14x32xf32>,
    %c192 = arith.constant 192 : index
    %c0_35 = arith.constant 0 : index
    %46 = vector.load %arg10[%c192, %c0_35] : memref<448x32xbf16, #tpu.memory_space<vmem>>, vector<14x32xbf16>
    %c208 = arith.constant 208 : index
    %c0_36 = arith.constant 0 : index
    %47 = vector.load %arg10[%c208, %c0_36] : memref<448x32xbf16, #tpu.memory_space<vmem>>, vector<14x32xbf16>
    %48 = arith.maximumf %46, %47 : vector<14x32xbf16>
    %49 = arith.extf %48 : vector<14x32xbf16> to vector<14x32xf32>
    %c113 = arith.constant 113 : index
    %c0_37 = arith.constant 0 : index
    %50 = vector.load %arg11[%c113, %c0_37] : memref<296x32xf32, #tpu.memory_space<vmem>>, vector<14x32xf32>
    tpu.vector_store %arg11[%c113, %c0_37], %49 {strides = array<i32>} : memref<296x32xf32, #tpu.memory_space<vmem>>, vector<14x32xf32>,
    %c224 = arith.constant 224 : index
    %c0_38 = arith.constant 0 : index
    %51 = vector.load %arg10[%c224, %c0_38] : memref<448x32xbf16, #tpu.memory_space<vmem>>, vector<14x32xbf16>
    %c240 = arith.constant 240 : index
    %c0_39 = arith.constant 0 : index
    %52 = vector.load %arg10[%c240, %c0_39] : memref<448x32xbf16, #tpu.memory_space<vmem>>, vector<14x32xbf16>
    %53 = arith.maximumf %51, %52 : vector<14x32xbf16>
    %54 = arith.extf %53 : vector<14x32xbf16> to vector<14x32xf32>
    %c129 = arith.constant 129 : index
    %c0_40 = arith.constant 0 : index
    %55 = vector.load %arg11[%c129, %c0_40] : memref<296x32xf32, #tpu.memory_space<vmem>>, vector<14x32xf32>
    tpu.vector_store %arg11[%c129, %c0_40], %54 {strides = array<i32>} : memref<296x32xf32, #tpu.memory_space<vmem>>, vector<14x32xf32>,
    %c256 = arith.constant 256 : index
    %c0_41 = arith.constant 0 : index
    %56 = vector.load %arg10[%c256, %c0_41] : memref<448x32xbf16, #tpu.memory_space<vmem>>, vector<14x32xbf16>
    %c272 = arith.constant 272 : index
    %c0_42 = arith.constant 0 : index
    %57 = vector.load %arg10[%c272, %c0_42] : memref<448x32xbf16, #tpu.memory_space<vmem>>, vector<14x32xbf16>
    %58 = arith.maximumf %56, %57 : vector<14x32xbf16>
    %59 = arith.extf %58 : vector<14x32xbf16> to vector<14x32xf32>
    %c145 = arith.constant 145 : index
    %c0_43 = arith.constant 0 : index
    %60 = vector.load %arg11[%c145, %c0_43] : memref<296x32xf32, #tpu.memory_space<vmem>>, vector<14x32xf32>
    tpu.vector_store %arg11[%c145, %c0_43], %59 {strides = array<i32>} : memref<296x32xf32, #tpu.memory_space<vmem>>, vector<14x32xf32>,
    %c288 = arith.constant 288 : index
    %c0_44 = arith.constant 0 : index
    %61 = vector.load %arg10[%c288, %c0_44] : memref<448x32xbf16, #tpu.memory_space<vmem>>, vector<14x32xbf16>
    %c304 = arith.constant 304 : index
    %c0_45 = arith.constant 0 : index
    %62 = vector.load %arg10[%c304, %c0_45] : memref<448x32xbf16, #tpu.memory_space<vmem>>, vector<14x32xbf16>
    %63 = arith.maximumf %61, %62 : vector<14x32xbf16>
    %64 = arith.extf %63 : vector<14x32xbf16> to vector<14x32xf32>
    %c161 = arith.constant 161 : index
    %c0_46 = arith.constant 0 : index
    %65 = vector.load %arg11[%c161, %c0_46] : memref<296x32xf32, #tpu.memory_space<vmem>>, vector<14x32xf32>
    tpu.vector_store %arg11[%c161, %c0_46], %64 {strides = array<i32>} : memref<296x32xf32, #tpu.memory_space<vmem>>, vector<14x32xf32>,
    %c320 = arith.constant 320 : index
    %c0_47 = arith.constant 0 : index
    %66 = vector.load %arg10[%c320, %c0_47] : memref<448x32xbf16, #tpu.memory_space<vmem>>, vector<14x32xbf16>
    %c336 = arith.constant 336 : index
    %c0_48 = arith.constant 0 : index
    %67 = vector.load %arg10[%c336, %c0_48] : memref<448x32xbf16, #tpu.memory_space<vmem>>, vector<14x32xbf16>
    %68 = arith.maximumf %66, %67 : vector<14x32xbf16>
    %69 = arith.extf %68 : vector<14x32xbf16> to vector<14x32xf32>
    %c177 = arith.constant 177 : index
    %c0_49 = arith.constant 0 : index
    %70 = vector.load %arg11[%c177, %c0_49] : memref<296x32xf32, #tpu.memory_space<vmem>>, vector<14x32xf32>
    tpu.vector_store %arg11[%c177, %c0_49], %69 {strides = array<i32>} : memref<296x32xf32, #tpu.memory_space<vmem>>, vector<14x32xf32>,
    %c352 = arith.constant 352 : index
    %c0_50 = arith.constant 0 : index
    %71 = vector.load %arg10[%c352, %c0_50] : memref<448x32xbf16, #tpu.memory_space<vmem>>, vector<14x32xbf16>
    %c368 = arith.constant 368 : index
    %c0_51 = arith.constant 0 : index
    %72 = vector.load %arg10[%c368, %c0_51] : memref<448x32xbf16, #tpu.memory_space<vmem>>, vector<14x32xbf16>
    %73 = arith.maximumf %71, %72 : vector<14x32xbf16>
    %74 = arith.extf %73 : vector<14x32xbf16> to vector<14x32xf32>
    %c193 = arith.constant 193 : index
    %c0_52 = arith.constant 0 : index
    %75 = vector.load %arg11[%c193, %c0_52] : memref<296x32xf32, #tpu.memory_space<vmem>>, vector<14x32xf32>
    tpu.vector_store %arg11[%c193, %c0_52], %74 {strides = array<i32>} : memref<296x32xf32, #tpu.memory_space<vmem>>, vector<14x32xf32>,
    %c384 = arith.constant 384 : index
    %c0_53 = arith.constant 0 : index
    %76 = vector.load %arg10[%c384, %c0_53] : memref<448x32xbf16, #tpu.memory_space<vmem>>, vector<14x32xbf16>
    %c400 = arith.constant 400 : index
    %c0_54 = arith.constant 0 : index
    %77 = vector.load %arg10[%c400, %c0_54] : memref<448x32xbf16, #tpu.memory_space<vmem>>, vector<14x32xbf16>
    %78 = arith.maximumf %76, %77 : vector<14x32xbf16>
    %79 = arith.extf %78 : vector<14x32xbf16> to vector<14x32xf32>
    %c209 = arith.constant 209 : index
    %c0_55 = arith.constant 0 : index
    %80 = vector.load %arg11[%c209, %c0_55] : memref<296x32xf32, #tpu.memory_space<vmem>>, vector<14x32xf32>
    tpu.vector_store %arg11[%c209, %c0_55], %79 {strides = array<i32>} : memref<296x32xf32, #tpu.memory_space<vmem>>, vector<14x32xf32>,
    %c416 = arith.constant 416 : index
    %c0_56 = arith.constant 0 : index
    %81 = vector.load %arg10[%c416, %c0_56] : memref<448x32xbf16, #tpu.memory_space<vmem>>, vector<14x32xbf16>
    %c432 = arith.constant 432 : index
    %c0_57 = arith.constant 0 : index
    %82 = vector.load %arg10[%c432, %c0_57] : memref<448x32xbf16, #tpu.memory_space<vmem>>, vector<14x32xbf16>
    %83 = arith.maximumf %81, %82 : vector<14x32xbf16>
    %84 = arith.extf %83 : vector<14x32xbf16> to vector<14x32xf32>
    %c225 = arith.constant 225 : index
    %c0_58 = arith.constant 0 : index
    %85 = vector.load %arg11[%c225, %c0_58] : memref<296x32xf32, #tpu.memory_space<vmem>>, vector<14x32xf32>
    tpu.vector_store %arg11[%c225, %c0_58], %84 {strides = array<i32>} : memref<296x32xf32, #tpu.memory_space<vmem>>, vector<14x32xf32>,
    %c0_59 = arith.constant 0 : index
    %c0_60 = arith.constant 0 : index
    %86 = vector.load %arg11[%c0_59, %c0_60] : memref<296x32xf32, #tpu.memory_space<vmem>>, vector<256x32xf32>
    %87 = arith.truncf %86 : vector<256x32xf32> to vector<256x32xbf16>
    %c0_61 = arith.constant 0 : index
    %c0_62 = arith.constant 0 : index
    %88 = vector.load %arg12[%c0_61, %c0_62] : memref<256x288xbf16, #tpu.memory_space<vmem>>, vector<256x32xbf16>
    tpu.vector_store %arg12[%c0_61, %c0_62], %87 {strides = array<i32>} : memref<256x288xbf16, #tpu.memory_space<vmem>>, vector<256x32xbf16>,
    %c1_63 = arith.constant 1 : index
    %c0_64 = arith.constant 0 : index
    %89 = vector.load %arg11[%c1_63, %c0_64] : memref<296x32xf32, #tpu.memory_space<vmem>>, vector<256x32xf32>
    %90 = arith.truncf %89 : vector<256x32xf32> to vector<256x32xbf16>
    %c0_65 = arith.constant 0 : index
    %c32_66 = arith.constant 32 : index
    %91 = vector.load %arg12[%c0_65, %c32_66] : memref<256x288xbf16, #tpu.memory_space<vmem>>, vector<256x32xbf16>
    tpu.vector_store %arg12[%c0_65, %c32_66], %90 {strides = array<i32>} : memref<256x288xbf16, #tpu.memory_space<vmem>>, vector<256x32xbf16>,
    %c2 = arith.constant 2 : index
    %c0_67 = arith.constant 0 : index
    %92 = vector.load %arg11[%c2, %c0_67] : memref<296x32xf32, #tpu.memory_space<vmem>>, vector<256x32xf32>
    %93 = arith.truncf %92 : vector<256x32xf32> to vector<256x32xbf16>
    %c0_68 = arith.constant 0 : index
    %c64_69 = arith.constant 64 : index
    %94 = vector.load %arg12[%c0_68, %c64_69] : memref<256x288xbf16, #tpu.memory_space<vmem>>, vector<256x32xbf16>
    tpu.vector_store %arg12[%c0_68, %c64_69], %93 {strides = array<i32>} : memref<256x288xbf16, #tpu.memory_space<vmem>>, vector<256x32xbf16>,
    %c16_70 = arith.constant 16 : index
    %c0_71 = arith.constant 0 : index
    %95 = vector.load %arg11[%c16_70, %c0_71] : memref<296x32xf32, #tpu.memory_space<vmem>>, vector<256x32xf32>
    %96 = arith.truncf %95 : vector<256x32xf32> to vector<256x32xbf16>
    %c0_72 = arith.constant 0 : index
    %c96_73 = arith.constant 96 : index
    %97 = vector.load %arg12[%c0_72, %c96_73] : memref<256x288xbf16, #tpu.memory_space<vmem>>, vector<256x32xbf16>
    tpu.vector_store %arg12[%c0_72, %c96_73], %96 {strides = array<i32>} : memref<256x288xbf16, #tpu.memory_space<vmem>>, vector<256x32xbf16>,
    %c17_74 = arith.constant 17 : index
    %c0_75 = arith.constant 0 : index
    %98 = vector.load %arg11[%c17_74, %c0_75] : memref<296x32xf32, #tpu.memory_space<vmem>>, vector<256x32xf32>
    %99 = arith.truncf %98 : vector<256x32xf32> to vector<256x32xbf16>
    %c0_76 = arith.constant 0 : index
    %c128_77 = arith.constant 128 : index
    %100 = vector.load %arg12[%c0_76, %c128_77] : memref<256x288xbf16, #tpu.memory_space<vmem>>, vector<256x32xbf16>
    tpu.vector_store %arg12[%c0_76, %c128_77], %99 {strides = array<i32>} : memref<256x288xbf16, #tpu.memory_space<vmem>>, vector<256x32xbf16>,
    %c18 = arith.constant 18 : index
    %c0_78 = arith.constant 0 : index
    %101 = vector.load %arg11[%c18, %c0_78] : memref<296x32xf32, #tpu.memory_space<vmem>>, vector<256x32xf32>
    %102 = arith.truncf %101 : vector<256x32xf32> to vector<256x32xbf16>
    %c0_79 = arith.constant 0 : index
    %c160_80 = arith.constant 160 : index
    %103 = vector.load %arg12[%c0_79, %c160_80] : memref<256x288xbf16, #tpu.memory_space<vmem>>, vector<256x32xbf16>
    tpu.vector_store %arg12[%c0_79, %c160_80], %102 {strides = array<i32>} : memref<256x288xbf16, #tpu.memory_space<vmem>>, vector<256x32xbf16>,
    %c32_81 = arith.constant 32 : index
    %c0_82 = arith.constant 0 : index
    %104 = vector.load %arg11[%c32_81, %c0_82] : memref<296x32xf32, #tpu.memory_space<vmem>>, vector<256x32xf32>
    %105 = arith.truncf %104 : vector<256x32xf32> to vector<256x32xbf16>
    %c0_83 = arith.constant 0 : index
    %c192_84 = arith.constant 192 : index
    %106 = vector.load %arg12[%c0_83, %c192_84] : memref<256x288xbf16, #tpu.memory_space<vmem>>, vector<256x32xbf16>
    tpu.vector_store %arg12[%c0_83, %c192_84], %105 {strides = array<i32>} : memref<256x288xbf16, #tpu.memory_space<vmem>>, vector<256x32xbf16>,
    %c33_85 = arith.constant 33 : index
    %c0_86 = arith.constant 0 : index
    %107 = vector.load %arg11[%c33_85, %c0_86] : memref<296x32xf32, #tpu.memory_space<vmem>>, vector<256x32xf32>
    %108 = arith.truncf %107 : vector<256x32xf32> to vector<256x32xbf16>
    %c0_87 = arith.constant 0 : index
    %c224_88 = arith.constant 224 : index
    %109 = vector.load %arg12[%c0_87, %c224_88] : memref<256x288xbf16, #tpu.memory_space<vmem>>, vector<256x32xbf16>
    tpu.vector_store %arg12[%c0_87, %c224_88], %108 {strides = array<i32>} : memref<256x288xbf16, #tpu.memory_space<vmem>>, vector<256x32xbf16>,
    %c34 = arith.constant 34 : index
    %c0_89 = arith.constant 0 : index
    %110 = vector.load %arg11[%c34, %c0_89] : memref<296x32xf32, #tpu.memory_space<vmem>>, vector<256x32xf32>
    %111 = arith.truncf %110 : vector<256x32xf32> to vector<256x32xbf16>
    %c0_90 = arith.constant 0 : index
    %c256_91 = arith.constant 256 : index
    %112 = vector.load %arg12[%c0_90, %c256_91] : memref<256x288xbf16, #tpu.memory_space<vmem>>, vector<256x32xbf16>
    tpu.vector_store %arg12[%c0_90, %c256_91], %111 {strides = array<i32>} : memref<256x288xbf16, #tpu.memory_space<vmem>>, vector<256x32xbf16>,
    %c0_92 = arith.constant 0 : index
    %c0_93 = arith.constant 0 : index
    %113 = vector.load %arg12[%c0_92, %c0_93] : memref<256x288xbf16, #tpu.memory_space<vmem>>, vector<256x288xbf16>
    %c0_94 = arith.constant 0 : index
    %c0_95 = arith.constant 0 : index
    %114 = vector.load %arg4[%c0_94, %c0_95] : memref<288x64xbf16, #tpu.memory_space<vmem>>, vector<288x64xbf16>
    %cst_96 = arith.constant dense<0.000000e+00> : vector<256x64xf32>
    %115 = tpu.matmul %113, %114, %cst_96 {dimension_numbers = #tpu.dot_dimension_numbers<[1], [0], [0], [1], [0, 0, 1, 1], [], []>} : vector<256x288xbf16>, vector<288x64xbf16>, vector<256x64xf32> -> vector<256x64xf32>
    %c0_97 = arith.constant 0 : index
    %c0_98 = arith.constant 0 : index
    %116 = vector.load %arg5[%c0_97, %c0_98] : memref<1x64xf32, #tpu.memory_space<vmem>>, vector<1x64xf32>
    %117 = vector.broadcast %116 : vector<1x64xf32> to vector<256x64xf32>
    %118 = arith.addf %115, %117 : vector<256x64xf32>
    %cst_99 = arith.constant 0.000000e+00 : f32
    %119 = vector.broadcast %cst_99 : f32 to vector<256x64xf32>
    %120 = arith.maximumf %118, %119 : vector<256x64xf32>
    %c0_100 = arith.constant 0 : index
    %c0_101 = arith.constant 0 : index
    %121 = vector.load %arg13[%c0_100, %c0_101] : memref<256x64xf32, #tpu.memory_space<vmem>>, vector<256x64xf32>
    tpu.vector_store %arg13[%c0_100, %c0_101], %120 {strides = array<i32>} : memref<256x64xf32, #tpu.memory_space<vmem>>, vector<256x64xf32>,
    %c0_102 = arith.constant 0 : index
    %c0_103 = arith.constant 0 : index
    %122 = tpu.strided_load %arg13[%c0_102, %c0_103] {strides = array<i32: 2, 1>} : memref<256x64xf32, #tpu.memory_space<vmem>>, vector<128x64xf32>
    %c1_104 = arith.constant 1 : index
    %c0_105 = arith.constant 0 : index
    %123 = tpu.strided_load %arg13[%c1_104, %c0_105] {strides = array<i32: 2, 1>} : memref<256x64xf32, #tpu.memory_space<vmem>>, vector<128x64xf32>
    %124 = arith.maximumf %122, %123 : vector<128x64xf32>
    %125 = arith.truncf %124 : vector<128x64xf32> to vector<128x64xbf16>
    %c0_106 = arith.constant 0 : index
    %c0_107 = arith.constant 0 : index
    %126 = vector.load %arg14[%c0_106, %c0_107] : memref<128x64xbf16, #tpu.memory_space<vmem>>, vector<128x64xbf16>
    tpu.vector_store %arg14[%c0_106, %c0_107], %125 {strides = array<i32>} : memref<128x64xbf16, #tpu.memory_space<vmem>>, vector<128x64xbf16>,
    %cst_108 = arith.constant 0.000000e+00 : f32
    %127 = vector.broadcast %cst_108 : f32 to vector<112x64xf32>
    %c0_109 = arith.constant 0 : index
    %c0_110 = arith.constant 0 : index
    %128 = vector.load %arg15[%c0_109, %c0_110] : memref<112x64xf32, #tpu.memory_space<vmem>>, vector<112x64xf32>
    tpu.vector_store %arg15[%c0_109, %c0_110], %127 {strides = array<i32>} : memref<112x64xf32, #tpu.memory_space<vmem>>, vector<112x64xf32>,
    %c0_111 = arith.constant 0 : index
    %c0_112 = arith.constant 0 : index
    %129 = vector.load %arg14[%c0_111, %c0_112] : memref<128x64xbf16, #tpu.memory_space<vmem>>, vector<7x64xbf16>
    %c8 = arith.constant 8 : index
    %c0_113 = arith.constant 0 : index
    %130 = vector.load %arg14[%c8, %c0_113] : memref<128x64xbf16, #tpu.memory_space<vmem>>, vector<7x64xbf16>
    %131 = arith.maximumf %129, %130 : vector<7x64xbf16>
    %132 = arith.extf %131 : vector<7x64xbf16> to vector<7x64xf32>
    %c10 = arith.constant 10 : index
    %c0_114 = arith.constant 0 : index
    %133 = vector.load %arg15[%c10, %c0_114] : memref<112x64xf32, #tpu.memory_space<vmem>>, vector<7x64xf32>
    tpu.vector_store %arg15[%c10, %c0_114], %132 {strides = array<i32>} : memref<112x64xf32, #tpu.memory_space<vmem>>, vector<7x64xf32>,
    %c16_115 = arith.constant 16 : index
    %c0_116 = arith.constant 0 : index
    %134 = vector.load %arg14[%c16_115, %c0_116] : memref<128x64xbf16, #tpu.memory_space<vmem>>, vector<7x64xbf16>
    %c24 = arith.constant 24 : index
    %c0_117 = arith.constant 0 : index
    %135 = vector.load %arg14[%c24, %c0_117] : memref<128x64xbf16, #tpu.memory_space<vmem>>, vector<7x64xbf16>
    %136 = arith.maximumf %134, %135 : vector<7x64xbf16>
    %137 = arith.extf %136 : vector<7x64xbf16> to vector<7x64xf32>
    %c19 = arith.constant 19 : index
    %c0_118 = arith.constant 0 : index
    %138 = vector.load %arg15[%c19, %c0_118] : memref<112x64xf32, #tpu.memory_space<vmem>>, vector<7x64xf32>
    tpu.vector_store %arg15[%c19, %c0_118], %137 {strides = array<i32>} : memref<112x64xf32, #tpu.memory_space<vmem>>, vector<7x64xf32>,
    %c32_119 = arith.constant 32 : index
    %c0_120 = arith.constant 0 : index
    %139 = vector.load %arg14[%c32_119, %c0_120] : memref<128x64xbf16, #tpu.memory_space<vmem>>, vector<7x64xbf16>
    %c40 = arith.constant 40 : index
    %c0_121 = arith.constant 0 : index
    %140 = vector.load %arg14[%c40, %c0_121] : memref<128x64xbf16, #tpu.memory_space<vmem>>, vector<7x64xbf16>
    %141 = arith.maximumf %139, %140 : vector<7x64xbf16>
    %142 = arith.extf %141 : vector<7x64xbf16> to vector<7x64xf32>
    %c28 = arith.constant 28 : index
    %c0_122 = arith.constant 0 : index
    %143 = vector.load %arg15[%c28, %c0_122] : memref<112x64xf32, #tpu.memory_space<vmem>>, vector<7x64xf32>
    tpu.vector_store %arg15[%c28, %c0_122], %142 {strides = array<i32>} : memref<112x64xf32, #tpu.memory_space<vmem>>, vector<7x64xf32>,
    %c48_123 = arith.constant 48 : index
    %c0_124 = arith.constant 0 : index
    %144 = vector.load %arg14[%c48_123, %c0_124] : memref<128x64xbf16, #tpu.memory_space<vmem>>, vector<7x64xbf16>
    %c56 = arith.constant 56 : index
    %c0_125 = arith.constant 0 : index
    %145 = vector.load %arg14[%c56, %c0_125] : memref<128x64xbf16, #tpu.memory_space<vmem>>, vector<7x64xbf16>
    %146 = arith.maximumf %144, %145 : vector<7x64xbf16>
    %147 = arith.extf %146 : vector<7x64xbf16> to vector<7x64xf32>
    %c37 = arith.constant 37 : index
    %c0_126 = arith.constant 0 : index
    %148 = vector.load %arg15[%c37, %c0_126] : memref<112x64xf32, #tpu.memory_space<vmem>>, vector<7x64xf32>
    tpu.vector_store %arg15[%c37, %c0_126], %147 {strides = array<i32>} : memref<112x64xf32, #tpu.memory_space<vmem>>, vector<7x64xf32>,
    %c64_127 = arith.constant 64 : index
    %c0_128 = arith.constant 0 : index
    %149 = vector.load %arg14[%c64_127, %c0_128] : memref<128x64xbf16, #tpu.memory_space<vmem>>, vector<7x64xbf16>
    %c72 = arith.constant 72 : index
    %c0_129 = arith.constant 0 : index
    %150 = vector.load %arg14[%c72, %c0_129] : memref<128x64xbf16, #tpu.memory_space<vmem>>, vector<7x64xbf16>
    %151 = arith.maximumf %149, %150 : vector<7x64xbf16>
    %152 = arith.extf %151 : vector<7x64xbf16> to vector<7x64xf32>
    %c46 = arith.constant 46 : index
    %c0_130 = arith.constant 0 : index
    %153 = vector.load %arg15[%c46, %c0_130] : memref<112x64xf32, #tpu.memory_space<vmem>>, vector<7x64xf32>
    tpu.vector_store %arg15[%c46, %c0_130], %152 {strides = array<i32>} : memref<112x64xf32, #tpu.memory_space<vmem>>, vector<7x64xf32>,
    %c80_131 = arith.constant 80 : index
    %c0_132 = arith.constant 0 : index
    %154 = vector.load %arg14[%c80_131, %c0_132] : memref<128x64xbf16, #tpu.memory_space<vmem>>, vector<7x64xbf16>
    %c88 = arith.constant 88 : index
    %c0_133 = arith.constant 0 : index
    %155 = vector.load %arg14[%c88, %c0_133] : memref<128x64xbf16, #tpu.memory_space<vmem>>, vector<7x64xbf16>
    %156 = arith.maximumf %154, %155 : vector<7x64xbf16>
    %157 = arith.extf %156 : vector<7x64xbf16> to vector<7x64xf32>
    %c55 = arith.constant 55 : index
    %c0_134 = arith.constant 0 : index
    %158 = vector.load %arg15[%c55, %c0_134] : memref<112x64xf32, #tpu.memory_space<vmem>>, vector<7x64xf32>
    tpu.vector_store %arg15[%c55, %c0_134], %157 {strides = array<i32>} : memref<112x64xf32, #tpu.memory_space<vmem>>, vector<7x64xf32>,
    %c96_135 = arith.constant 96 : index
    %c0_136 = arith.constant 0 : index
    %159 = vector.load %arg14[%c96_135, %c0_136] : memref<128x64xbf16, #tpu.memory_space<vmem>>, vector<7x64xbf16>
    %c104 = arith.constant 104 : index
    %c0_137 = arith.constant 0 : index
    %160 = vector.load %arg14[%c104, %c0_137] : memref<128x64xbf16, #tpu.memory_space<vmem>>, vector<7x64xbf16>
    %161 = arith.maximumf %159, %160 : vector<7x64xbf16>
    %162 = arith.extf %161 : vector<7x64xbf16> to vector<7x64xf32>
    %c64_138 = arith.constant 64 : index
    %c0_139 = arith.constant 0 : index
    %163 = vector.load %arg15[%c64_138, %c0_139] : memref<112x64xf32, #tpu.memory_space<vmem>>, vector<7x64xf32>
    tpu.vector_store %arg15[%c64_138, %c0_139], %162 {strides = array<i32>} : memref<112x64xf32, #tpu.memory_space<vmem>>, vector<7x64xf32>,
    %c0_140 = arith.constant 0 : index
    %c0_141 = arith.constant 0 : index
    %164 = vector.load %arg15[%c0_140, %c0_141] : memref<112x64xf32, #tpu.memory_space<vmem>>, vector<88x64xf32>
    %165 = arith.truncf %164 : vector<88x64xf32> to vector<88x64xbf16>
    %c0_142 = arith.constant 0 : index
    %c0_143 = arith.constant 0 : index
    %166 = vector.load %arg16[%c0_142, %c0_143] : memref<88x576xbf16, #tpu.memory_space<vmem>>, vector<88x64xbf16>
    tpu.vector_store %arg16[%c0_142, %c0_143], %165 {strides = array<i32>} : memref<88x576xbf16, #tpu.memory_space<vmem>>, vector<88x64xbf16>,
    %c1_144 = arith.constant 1 : index
    %c0_145 = arith.constant 0 : index
    %167 = vector.load %arg15[%c1_144, %c0_145] : memref<112x64xf32, #tpu.memory_space<vmem>>, vector<88x64xf32>
    %168 = arith.truncf %167 : vector<88x64xf32> to vector<88x64xbf16>
    %c0_146 = arith.constant 0 : index
    %c64_147 = arith.constant 64 : index
    %169 = vector.load %arg16[%c0_146, %c64_147] : memref<88x576xbf16, #tpu.memory_space<vmem>>, vector<88x64xbf16>
    tpu.vector_store %arg16[%c0_146, %c64_147], %168 {strides = array<i32>} : memref<88x576xbf16, #tpu.memory_space<vmem>>, vector<88x64xbf16>,
    %c2_148 = arith.constant 2 : index
    %c0_149 = arith.constant 0 : index
    %170 = vector.load %arg15[%c2_148, %c0_149] : memref<112x64xf32, #tpu.memory_space<vmem>>, vector<88x64xf32>
    %171 = arith.truncf %170 : vector<88x64xf32> to vector<88x64xbf16>
    %c0_150 = arith.constant 0 : index
    %c128_151 = arith.constant 128 : index
    %172 = vector.load %arg16[%c0_150, %c128_151] : memref<88x576xbf16, #tpu.memory_space<vmem>>, vector<88x64xbf16>
    tpu.vector_store %arg16[%c0_150, %c128_151], %171 {strides = array<i32>} : memref<88x576xbf16, #tpu.memory_space<vmem>>, vector<88x64xbf16>,
    %c9 = arith.constant 9 : index
    %c0_152 = arith.constant 0 : index
    %173 = vector.load %arg15[%c9, %c0_152] : memref<112x64xf32, #tpu.memory_space<vmem>>, vector<88x64xf32>
    %174 = arith.truncf %173 : vector<88x64xf32> to vector<88x64xbf16>
    %c0_153 = arith.constant 0 : index
    %c192_154 = arith.constant 192 : index
    %175 = vector.load %arg16[%c0_153, %c192_154] : memref<88x576xbf16, #tpu.memory_space<vmem>>, vector<88x64xbf16>
    tpu.vector_store %arg16[%c0_153, %c192_154], %174 {strides = array<i32>} : memref<88x576xbf16, #tpu.memory_space<vmem>>, vector<88x64xbf16>,
    %c10_155 = arith.constant 10 : index
    %c0_156 = arith.constant 0 : index
    %176 = vector.load %arg15[%c10_155, %c0_156] : memref<112x64xf32, #tpu.memory_space<vmem>>, vector<88x64xf32>
    %177 = arith.truncf %176 : vector<88x64xf32> to vector<88x64xbf16>
    %c0_157 = arith.constant 0 : index
    %c256_158 = arith.constant 256 : index
    %178 = vector.load %arg16[%c0_157, %c256_158] : memref<88x576xbf16, #tpu.memory_space<vmem>>, vector<88x64xbf16>
    tpu.vector_store %arg16[%c0_157, %c256_158], %177 {strides = array<i32>} : memref<88x576xbf16, #tpu.memory_space<vmem>>, vector<88x64xbf16>,
    %c11 = arith.constant 11 : index
    %c0_159 = arith.constant 0 : index
    %179 = vector.load %arg15[%c11, %c0_159] : memref<112x64xf32, #tpu.memory_space<vmem>>, vector<88x64xf32>
    %180 = arith.truncf %179 : vector<88x64xf32> to vector<88x64xbf16>
    %c0_160 = arith.constant 0 : index
    %c320_161 = arith.constant 320 : index
    %181 = vector.load %arg16[%c0_160, %c320_161] : memref<88x576xbf16, #tpu.memory_space<vmem>>, vector<88x64xbf16>
    tpu.vector_store %arg16[%c0_160, %c320_161], %180 {strides = array<i32>} : memref<88x576xbf16, #tpu.memory_space<vmem>>, vector<88x64xbf16>,
    %c18_162 = arith.constant 18 : index
    %c0_163 = arith.constant 0 : index
    %182 = vector.load %arg15[%c18_162, %c0_163] : memref<112x64xf32, #tpu.memory_space<vmem>>, vector<88x64xf32>
    %183 = arith.truncf %182 : vector<88x64xf32> to vector<88x64xbf16>
    %c0_164 = arith.constant 0 : index
    %c384_165 = arith.constant 384 : index
    %184 = vector.load %arg16[%c0_164, %c384_165] : memref<88x576xbf16, #tpu.memory_space<vmem>>, vector<88x64xbf16>
    tpu.vector_store %arg16[%c0_164, %c384_165], %183 {strides = array<i32>} : memref<88x576xbf16, #tpu.memory_space<vmem>>, vector<88x64xbf16>,
    %c19_166 = arith.constant 19 : index
    %c0_167 = arith.constant 0 : index
    %185 = vector.load %arg15[%c19_166, %c0_167] : memref<112x64xf32, #tpu.memory_space<vmem>>, vector<88x64xf32>
    %186 = arith.truncf %185 : vector<88x64xf32> to vector<88x64xbf16>
    %c0_168 = arith.constant 0 : index
    %c448 = arith.constant 448 : index
    %187 = vector.load %arg16[%c0_168, %c448] : memref<88x576xbf16, #tpu.memory_space<vmem>>, vector<88x64xbf16>
    tpu.vector_store %arg16[%c0_168, %c448], %186 {strides = array<i32>} : memref<88x576xbf16, #tpu.memory_space<vmem>>, vector<88x64xbf16>,
    %c20 = arith.constant 20 : index
    %c0_169 = arith.constant 0 : index
    %188 = vector.load %arg15[%c20, %c0_169] : memref<112x64xf32, #tpu.memory_space<vmem>>, vector<88x64xf32>
    %189 = arith.truncf %188 : vector<88x64xf32> to vector<88x64xbf16>
    %c0_170 = arith.constant 0 : index
    %c512 = arith.constant 512 : index
    %190 = vector.load %arg16[%c0_170, %c512] : memref<88x576xbf16, #tpu.memory_space<vmem>>, vector<88x64xbf16>
    tpu.vector_store %arg16[%c0_170, %c512], %189 {strides = array<i32>} : memref<88x576xbf16, #tpu.memory_space<vmem>>, vector<88x64xbf16>,
    %c0_171 = arith.constant 0 : index
    %c0_172 = arith.constant 0 : index
    %191 = vector.load %arg16[%c0_171, %c0_172] : memref<88x576xbf16, #tpu.memory_space<vmem>>, vector<88x576xbf16>
    %c0_173 = arith.constant 0 : index
    %c0_174 = arith.constant 0 : index
    %192 = vector.load %arg6[%c0_173, %c0_174] : memref<576x64xbf16, #tpu.memory_space<vmem>>, vector<576x64xbf16>
    %cst_175 = arith.constant dense<0.000000e+00> : vector<88x64xf32>
    %193 = tpu.matmul %191, %192, %cst_175 {dimension_numbers = #tpu.dot_dimension_numbers<[1], [0], [0], [1], [0, 0, 1, 1], [], []>} : vector<88x576xbf16>, vector<576x64xbf16>, vector<88x64xf32> -> vector<88x64xf32>
    %c0_176 = arith.constant 0 : index
    %c0_177 = arith.constant 0 : index
    %194 = vector.load %arg7[%c0_176, %c0_177] : memref<1x64xf32, #tpu.memory_space<vmem>>, vector<1x64xf32>
    %195 = vector.broadcast %194 : vector<1x64xf32> to vector<88x64xf32>
    %196 = arith.addf %193, %195 : vector<88x64xf32>
    %cst_178 = arith.constant 0.000000e+00 : f32
    %197 = vector.broadcast %cst_178 : f32 to vector<88x64xf32>
    %198 = arith.maximumf %196, %197 : vector<88x64xf32>
    %c0_179 = arith.constant 0 : index
    %c0_180 = arith.constant 0 : index
    %199 = vector.load %arg17[%c0_179, %c0_180] : memref<88x64xf32, #tpu.memory_space<vmem>>, vector<88x64xf32>
    tpu.vector_store %arg17[%c0_179, %c0_180], %198 {strides = array<i32>} : memref<88x64xf32, #tpu.memory_space<vmem>>, vector<88x64xf32>,
    %c0_181 = arith.constant 0 : index
    %c0_182 = arith.constant 0 : index
    %200 = tpu.strided_load %arg17[%c0_181, %c0_182] {strides = array<i32: 88, 1>} : memref<88x64xf32, #tpu.memory_space<vmem>>, vector<1x64xf32>
    %201 = arith.truncf %200 : vector<1x64xf32> to vector<1x64xbf16>
    %c0_183 = arith.constant 0 : index
    %c0_184 = arith.constant 0 : index
    %c0_185 = arith.constant 0 : index
    %202 = vector.load %arg8[%c0_183, %c0_184, %c0_185] : memref<1x1x3136xbf16, #tpu.memory_space<vmem>>, vector<1x1x64xbf16>
    %203 = vector.shape_cast %202 : vector<1x1x64xbf16> to vector<1x64xbf16>
    %204 = vector.shape_cast %201 : vector<1x64xbf16> to vector<1x1x64xbf16>
    tpu.vector_store %arg8[%c0_183, %c0_184, %c0_185], %204 {strides = array<i32>} : memref<1x1x3136xbf16, #tpu.memory_space<vmem>>, vector<1x1x64xbf16>,
    %c1_186 = arith.constant 1 : index
    %c0_187 = arith.constant 0 : index
    %205 = tpu.strided_load %arg17[%c1_186, %c0_187] {strides = array<i32: 88, 1>} : memref<88x64xf32, #tpu.memory_space<vmem>>, vector<1x64xf32>
    %206 = arith.truncf %205 : vector<1x64xf32> to vector<1x64xbf16>
    %c0_188 = arith.constant 0 : index
    %c0_189 = arith.constant 0 : index
    %c64_190 = arith.constant 64 : index
    %207 = vector.load %arg8[%c0_188, %c0_189, %c64_190] : memref<1x1x3136xbf16, #tpu.memory_space<vmem>>, vector<1x1x64xbf16>
    %208 = vector.shape_cast %207 : vector<1x1x64xbf16> to vector<1x64xbf16>
    %209 = vector.shape_cast %206 : vector<1x64xbf16> to vector<1x1x64xbf16>
    tpu.vector_store %arg8[%c0_188, %c0_189, %c64_190], %209 {strides = array<i32>} : memref<1x1x3136xbf16, #tpu.memory_space<vmem>>, vector<1x1x64xbf16>,
    %c2_191 = arith.constant 2 : index
    %c0_192 = arith.constant 0 : index
    %210 = tpu.strided_load %arg17[%c2_191, %c0_192] {strides = array<i32: 88, 1>} : memref<88x64xf32, #tpu.memory_space<vmem>>, vector<1x64xf32>
    %211 = arith.truncf %210 : vector<1x64xf32> to vector<1x64xbf16>
    %c0_193 = arith.constant 0 : index
    %c0_194 = arith.constant 0 : index
    %c128_195 = arith.constant 128 : index
    %212 = vector.load %arg8[%c0_193, %c0_194, %c128_195] : memref<1x1x3136xbf16, #tpu.memory_space<vmem>>, vector<1x1x64xbf16>
    %213 = vector.shape_cast %212 : vector<1x1x64xbf16> to vector<1x64xbf16>
    %214 = vector.shape_cast %211 : vector<1x64xbf16> to vector<1x1x64xbf16>
    tpu.vector_store %arg8[%c0_193, %c0_194, %c128_195], %214 {strides = array<i32>} : memref<1x1x3136xbf16, #tpu.memory_space<vmem>>, vector<1x1x64xbf16>,
    %c3 = arith.constant 3 : index
    %c0_196 = arith.constant 0 : index
    %215 = tpu.strided_load %arg17[%c3, %c0_196] {strides = array<i32: 88, 1>} : memref<88x64xf32, #tpu.memory_space<vmem>>, vector<1x64xf32>
    %216 = arith.truncf %215 : vector<1x64xf32> to vector<1x64xbf16>
    %c0_197 = arith.constant 0 : index
    %c0_198 = arith.constant 0 : index
    %c192_199 = arith.constant 192 : index
    %217 = vector.load %arg8[%c0_197, %c0_198, %c192_199] : memref<1x1x3136xbf16, #tpu.memory_space<vmem>>, vector<1x1x64xbf16>
    %218 = vector.shape_cast %217 : vector<1x1x64xbf16> to vector<1x64xbf16>
    %219 = vector.shape_cast %216 : vector<1x64xbf16> to vector<1x1x64xbf16>
    tpu.vector_store %arg8[%c0_197, %c0_198, %c192_199], %219 {strides = array<i32>} : memref<1x1x3136xbf16, #tpu.memory_space<vmem>>, vector<1x1x64xbf16>,
    %c4 = arith.constant 4 : index
    %c0_200 = arith.constant 0 : index
    %220 = tpu.strided_load %arg17[%c4, %c0_200] {strides = array<i32: 88, 1>} : memref<88x64xf32, #tpu.memory_space<vmem>>, vector<1x64xf32>
    %221 = arith.truncf %220 : vector<1x64xf32> to vector<1x64xbf16>
    %c0_201 = arith.constant 0 : index
    %c0_202 = arith.constant 0 : index
    %c256_203 = arith.constant 256 : index
    %222 = vector.load %arg8[%c0_201, %c0_202, %c256_203] : memref<1x1x3136xbf16, #tpu.memory_space<vmem>>, vector<1x1x64xbf16>
    %223 = vector.shape_cast %222 : vector<1x1x64xbf16> to vector<1x64xbf16>
    %224 = vector.shape_cast %221 : vector<1x64xbf16> to vector<1x1x64xbf16>
    tpu.vector_store %arg8[%c0_201, %c0_202, %c256_203], %224 {strides = array<i32>} : memref<1x1x3136xbf16, #tpu.memory_space<vmem>>, vector<1x1x64xbf16>,
    %c5 = arith.constant 5 : index
    %c0_204 = arith.constant 0 : index
    %225 = tpu.strided_load %arg17[%c5, %c0_204] {strides = array<i32: 88, 1>} : memref<88x64xf32, #tpu.memory_space<vmem>>, vector<1x64xf32>
    %226 = arith.truncf %225 : vector<1x64xf32> to vector<1x64xbf16>
    %c0_205 = arith.constant 0 : index
    %c0_206 = arith.constant 0 : index
    %c320_207 = arith.constant 320 : index
    %227 = vector.load %arg8[%c0_205, %c0_206, %c320_207] : memref<1x1x3136xbf16, #tpu.memory_space<vmem>>, vector<1x1x64xbf16>
    %228 = vector.shape_cast %227 : vector<1x1x64xbf16> to vector<1x64xbf16>
    %229 = vector.shape_cast %226 : vector<1x64xbf16> to vector<1x1x64xbf16>
    tpu.vector_store %arg8[%c0_205, %c0_206, %c320_207], %229 {strides = array<i32>} : memref<1x1x3136xbf16, #tpu.memory_space<vmem>>, vector<1x1x64xbf16>,
    %c6 = arith.constant 6 : index
    %c0_208 = arith.constant 0 : index
    %230 = tpu.strided_load %arg17[%c6, %c0_208] {strides = array<i32: 88, 1>} : memref<88x64xf32, #tpu.memory_space<vmem>>, vector<1x64xf32>
    %231 = arith.truncf %230 : vector<1x64xf32> to vector<1x64xbf16>
    %c0_209 = arith.constant 0 : index
    %c0_210 = arith.constant 0 : index
    %c384_211 = arith.constant 384 : index
    %232 = vector.load %arg8[%c0_209, %c0_210, %c384_211] : memref<1x1x3136xbf16, #tpu.memory_space<vmem>>, vector<1x1x64xbf16>
    %233 = vector.shape_cast %232 : vector<1x1x64xbf16> to vector<1x64xbf16>
    %234 = vector.shape_cast %231 : vector<1x64xbf16> to vector<1x1x64xbf16>
    tpu.vector_store %arg8[%c0_209, %c0_210, %c384_211], %234 {strides = array<i32>} : memref<1x1x3136xbf16, #tpu.memory_space<vmem>>, vector<1x1x64xbf16>,
    %c9_212 = arith.constant 9 : index
    %c0_213 = arith.constant 0 : index
    %235 = tpu.strided_load %arg17[%c9_212, %c0_213] {strides = array<i32: 88, 1>} : memref<88x64xf32, #tpu.memory_space<vmem>>, vector<1x64xf32>
    %236 = arith.truncf %235 : vector<1x64xf32> to vector<1x64xbf16>
    %c0_214 = arith.constant 0 : index
    %c0_215 = arith.constant 0 : index
    %c448_216 = arith.constant 448 : index
    %237 = vector.load %arg8[%c0_214, %c0_215, %c448_216] : memref<1x1x3136xbf16, #tpu.memory_space<vmem>>, vector<1x1x64xbf16>
    %238 = vector.shape_cast %237 : vector<1x1x64xbf16> to vector<1x64xbf16>
    %239 = vector.shape_cast %236 : vector<1x64xbf16> to vector<1x1x64xbf16>
    tpu.vector_store %arg8[%c0_214, %c0_215, %c448_216], %239 {strides = array<i32>} : memref<1x1x3136xbf16, #tpu.memory_space<vmem>>, vector<1x1x64xbf16>,
    %c10_217 = arith.constant 10 : index
    %c0_218 = arith.constant 0 : index
    %240 = tpu.strided_load %arg17[%c10_217, %c0_218] {strides = array<i32: 88, 1>} : memref<88x64xf32, #tpu.memory_space<vmem>>, vector<1x64xf32>
    %241 = arith.truncf %240 : vector<1x64xf32> to vector<1x64xbf16>
    %c0_219 = arith.constant 0 : index
    %c0_220 = arith.constant 0 : index
    %c512_221 = arith.constant 512 : index
    %242 = vector.load %arg8[%c0_219, %c0_220, %c512_221] : memref<1x1x3136xbf16, #tpu.memory_space<vmem>>, vector<1x1x64xbf16>
    %243 = vector.shape_cast %242 : vector<1x1x64xbf16> to vector<1x64xbf16>
    %244 = vector.shape_cast %241 : vector<1x64xbf16> to vector<1x1x64xbf16>
    tpu.vector_store %arg8[%c0_219, %c0_220, %c512_221], %244 {strides = array<i32>} : memref<1x1x3136xbf16, #tpu.memory_space<vmem>>, vector<1x1x64xbf16>,
    %c11_222 = arith.constant 11 : index
    %c0_223 = arith.constant 0 : index
    %245 = tpu.strided_load %arg17[%c11_222, %c0_223] {strides = array<i32: 88, 1>} : memref<88x64xf32, #tpu.memory_space<vmem>>, vector<1x64xf32>
    %246 = arith.truncf %245 : vector<1x64xf32> to vector<1x64xbf16>
    %c0_224 = arith.constant 0 : index
    %c0_225 = arith.constant 0 : index
    %c576 = arith.constant 576 : index
    %247 = vector.load %arg8[%c0_224, %c0_225, %c576] : memref<1x1x3136xbf16, #tpu.memory_space<vmem>>, vector<1x1x64xbf16>
    %248 = vector.shape_cast %247 : vector<1x1x64xbf16> to vector<1x64xbf16>
    %249 = vector.shape_cast %246 : vector<1x64xbf16> to vector<1x1x64xbf16>
    tpu.vector_store %arg8[%c0_224, %c0_225, %c576], %249 {strides = array<i32>} : memref<1x1x3136xbf16, #tpu.memory_space<vmem>>, vector<1x1x64xbf16>,
    %c12 = arith.constant 12 : index
    %c0_226 = arith.constant 0 : index
    %250 = tpu.strided_load %arg17[%c12, %c0_226] {strides = array<i32: 88, 1>} : memref<88x64xf32, #tpu.memory_space<vmem>>, vector<1x64xf32>
    %251 = arith.truncf %250 : vector<1x64xf32> to vector<1x64xbf16>
    %c0_227 = arith.constant 0 : index
    %c0_228 = arith.constant 0 : index
    %c640 = arith.constant 640 : index
    %252 = vector.load %arg8[%c0_227, %c0_228, %c640] : memref<1x1x3136xbf16, #tpu.memory_space<vmem>>, vector<1x1x64xbf16>
    %253 = vector.shape_cast %252 : vector<1x1x64xbf16> to vector<1x64xbf16>
    %254 = vector.shape_cast %251 : vector<1x64xbf16> to vector<1x1x64xbf16>
    tpu.vector_store %arg8[%c0_227, %c0_228, %c640], %254 {strides = array<i32>} : memref<1x1x3136xbf16, #tpu.memory_space<vmem>>, vector<1x1x64xbf16>,
    %c13 = arith.constant 13 : index
    %c0_229 = arith.constant 0 : index
    %255 = tpu.strided_load %arg17[%c13, %c0_229] {strides = array<i32: 88, 1>} : memref<88x64xf32, #tpu.memory_space<vmem>>, vector<1x64xf32>
    %256 = arith.truncf %255 : vector<1x64xf32> to vector<1x64xbf16>
    %c0_230 = arith.constant 0 : index
    %c0_231 = arith.constant 0 : index
    %c704 = arith.constant 704 : index
    %257 = vector.load %arg8[%c0_230, %c0_231, %c704] : memref<1x1x3136xbf16, #tpu.memory_space<vmem>>, vector<1x1x64xbf16>
    %258 = vector.shape_cast %257 : vector<1x1x64xbf16> to vector<1x64xbf16>
    %259 = vector.shape_cast %256 : vector<1x64xbf16> to vector<1x1x64xbf16>
    tpu.vector_store %arg8[%c0_230, %c0_231, %c704], %259 {strides = array<i32>} : memref<1x1x3136xbf16, #tpu.memory_space<vmem>>, vector<1x1x64xbf16>,
    %c14 = arith.constant 14 : index
    %c0_232 = arith.constant 0 : index
    %260 = tpu.strided_load %arg17[%c14, %c0_232] {strides = array<i32: 88, 1>} : memref<88x64xf32, #tpu.memory_space<vmem>>, vector<1x64xf32>
    %261 = arith.truncf %260 : vector<1x64xf32> to vector<1x64xbf16>
    %c0_233 = arith.constant 0 : index
    %c0_234 = arith.constant 0 : index
    %c768 = arith.constant 768 : index
    %262 = vector.load %arg8[%c0_233, %c0_234, %c768] : memref<1x1x3136xbf16, #tpu.memory_space<vmem>>, vector<1x1x64xbf16>
    %263 = vector.shape_cast %262 : vector<1x1x64xbf16> to vector<1x64xbf16>
    %264 = vector.shape_cast %261 : vector<1x64xbf16> to vector<1x1x64xbf16>
    tpu.vector_store %arg8[%c0_233, %c0_234, %c768], %264 {strides = array<i32>} : memref<1x1x3136xbf16, #tpu.memory_space<vmem>>, vector<1x1x64xbf16>,
    %c15 = arith.constant 15 : index
    %c0_235 = arith.constant 0 : index
    %265 = tpu.strided_load %arg17[%c15, %c0_235] {strides = array<i32: 88, 1>} : memref<88x64xf32, #tpu.memory_space<vmem>>, vector<1x64xf32>
    %266 = arith.truncf %265 : vector<1x64xf32> to vector<1x64xbf16>
    %c0_236 = arith.constant 0 : index
    %c0_237 = arith.constant 0 : index
    %c832 = arith.constant 832 : index
    %267 = vector.load %arg8[%c0_236, %c0_237, %c832] : memref<1x1x3136xbf16, #tpu.memory_space<vmem>>, vector<1x1x64xbf16>
    %268 = vector.shape_cast %267 : vector<1x1x64xbf16> to vector<1x64xbf16>
    %269 = vector.shape_cast %266 : vector<1x64xbf16> to vector<1x1x64xbf16>
    tpu.vector_store %arg8[%c0_236, %c0_237, %c832], %269 {strides = array<i32>} : memref<1x1x3136xbf16, #tpu.memory_space<vmem>>, vector<1x1x64xbf16>,
    %c18_238 = arith.constant 18 : index
    %c0_239 = arith.constant 0 : index
    %270 = tpu.strided_load %arg17[%c18_238, %c0_239] {strides = array<i32: 88, 1>} : memref<88x64xf32, #tpu.memory_space<vmem>>, vector<1x64xf32>
    %271 = arith.truncf %270 : vector<1x64xf32> to vector<1x64xbf16>
    %c0_240 = arith.constant 0 : index
    %c0_241 = arith.constant 0 : index
    %c896 = arith.constant 896 : index
    %272 = vector.load %arg8[%c0_240, %c0_241, %c896] : memref<1x1x3136xbf16, #tpu.memory_space<vmem>>, vector<1x1x64xbf16>
    %273 = vector.shape_cast %272 : vector<1x1x64xbf16> to vector<1x64xbf16>
    %274 = vector.shape_cast %271 : vector<1x64xbf16> to vector<1x1x64xbf16>
    tpu.vector_store %arg8[%c0_240, %c0_241, %c896], %274 {strides = array<i32>} : memref<1x1x3136xbf16, #tpu.memory_space<vmem>>, vector<1x1x64xbf16>,
    %c19_242 = arith.constant 19 : index
    %c0_243 = arith.constant 0 : index
    %275 = tpu.strided_load %arg17[%c19_242, %c0_243] {strides = array<i32: 88, 1>} : memref<88x64xf32, #tpu.memory_space<vmem>>, vector<1x64xf32>
    %276 = arith.truncf %275 : vector<1x64xf32> to vector<1x64xbf16>
    %c0_244 = arith.constant 0 : index
    %c0_245 = arith.constant 0 : index
    %c960 = arith.constant 960 : index
    %277 = vector.load %arg8[%c0_244, %c0_245, %c960] : memref<1x1x3136xbf16, #tpu.memory_space<vmem>>, vector<1x1x64xbf16>
    %278 = vector.shape_cast %277 : vector<1x1x64xbf16> to vector<1x64xbf16>
    %279 = vector.shape_cast %276 : vector<1x64xbf16> to vector<1x1x64xbf16>
    tpu.vector_store %arg8[%c0_244, %c0_245, %c960], %279 {strides = array<i32>} : memref<1x1x3136xbf16, #tpu.memory_space<vmem>>, vector<1x1x64xbf16>,
    %c20_246 = arith.constant 20 : index
    %c0_247 = arith.constant 0 : index
    %280 = tpu.strided_load %arg17[%c20_246, %c0_247] {strides = array<i32: 88, 1>} : memref<88x64xf32, #tpu.memory_space<vmem>>, vector<1x64xf32>
    %281 = arith.truncf %280 : vector<1x64xf32> to vector<1x64xbf16>
    %c0_248 = arith.constant 0 : index
    %c0_249 = arith.constant 0 : index
    %c1024 = arith.constant 1024 : index
    %282 = vector.load %arg8[%c0_248, %c0_249, %c1024] : memref<1x1x3136xbf16, #tpu.memory_space<vmem>>, vector<1x1x64xbf16>
    %283 = vector.shape_cast %282 : vector<1x1x64xbf16> to vector<1x64xbf16>
    %284 = vector.shape_cast %281 : vector<1x64xbf16> to vector<1x1x64xbf16>
    tpu.vector_store %arg8[%c0_248, %c0_249, %c1024], %284 {strides = array<i32>} : memref<1x1x3136xbf16, #tpu.memory_space<vmem>>, vector<1x1x64xbf16>,
    %c21 = arith.constant 21 : index
    %c0_250 = arith.constant 0 : index
    %285 = tpu.strided_load %arg17[%c21, %c0_250] {strides = array<i32: 88, 1>} : memref<88x64xf32, #tpu.memory_space<vmem>>, vector<1x64xf32>
    %286 = arith.truncf %285 : vector<1x64xf32> to vector<1x64xbf16>
    %c0_251 = arith.constant 0 : index
    %c0_252 = arith.constant 0 : index
    %c1088 = arith.constant 1088 : index
    %287 = vector.load %arg8[%c0_251, %c0_252, %c1088] : memref<1x1x3136xbf16, #tpu.memory_space<vmem>>, vector<1x1x64xbf16>
    %288 = vector.shape_cast %287 : vector<1x1x64xbf16> to vector<1x64xbf16>
    %289 = vector.shape_cast %286 : vector<1x64xbf16> to vector<1x1x64xbf16>
    tpu.vector_store %arg8[%c0_251, %c0_252, %c1088], %289 {strides = array<i32>} : memref<1x1x3136xbf16, #tpu.memory_space<vmem>>, vector<1x1x64xbf16>,
    %c22 = arith.constant 22 : index
    %c0_253 = arith.constant 0 : index
    %290 = tpu.strided_load %arg17[%c22, %c0_253] {strides = array<i32: 88, 1>} : memref<88x64xf32, #tpu.memory_space<vmem>>, vector<1x64xf32>
    %291 = arith.truncf %290 : vector<1x64xf32> to vector<1x64xbf16>
    %c0_254 = arith.constant 0 : index
    %c0_255 = arith.constant 0 : index
    %c1152 = arith.constant 1152 : index
    %292 = vector.load %arg8[%c0_254, %c0_255, %c1152] : memref<1x1x3136xbf16, #tpu.memory_space<vmem>>, vector<1x1x64xbf16>
    %293 = vector.shape_cast %292 : vector<1x1x64xbf16> to vector<1x64xbf16>
    %294 = vector.shape_cast %291 : vector<1x64xbf16> to vector<1x1x64xbf16>
    tpu.vector_store %arg8[%c0_254, %c0_255, %c1152], %294 {strides = array<i32>} : memref<1x1x3136xbf16, #tpu.memory_space<vmem>>, vector<1x1x64xbf16>,
    %c23 = arith.constant 23 : index
    %c0_256 = arith.constant 0 : index
    %295 = tpu.strided_load %arg17[%c23, %c0_256] {strides = array<i32: 88, 1>} : memref<88x64xf32, #tpu.memory_space<vmem>>, vector<1x64xf32>
    %296 = arith.truncf %295 : vector<1x64xf32> to vector<1x64xbf16>
    %c0_257 = arith.constant 0 : index
    %c0_258 = arith.constant 0 : index
    %c1216 = arith.constant 1216 : index
    %297 = vector.load %arg8[%c0_257, %c0_258, %c1216] : memref<1x1x3136xbf16, #tpu.memory_space<vmem>>, vector<1x1x64xbf16>
    %298 = vector.shape_cast %297 : vector<1x1x64xbf16> to vector<1x64xbf16>
    %299 = vector.shape_cast %296 : vector<1x64xbf16> to vector<1x1x64xbf16>
    tpu.vector_store %arg8[%c0_257, %c0_258, %c1216], %299 {strides = array<i32>} : memref<1x1x3136xbf16, #tpu.memory_space<vmem>>, vector<1x1x64xbf16>,
    %c24_259 = arith.constant 24 : index
    %c0_260 = arith.constant 0 : index
    %300 = tpu.strided_load %arg17[%c24_259, %c0_260] {strides = array<i32: 88, 1>} : memref<88x64xf32, #tpu.memory_space<vmem>>, vector<1x64xf32>
    %301 = arith.truncf %300 : vector<1x64xf32> to vector<1x64xbf16>
    %c0_261 = arith.constant 0 : index
    %c0_262 = arith.constant 0 : index
    %c1280 = arith.constant 1280 : index
    %302 = vector.load %arg8[%c0_261, %c0_262, %c1280] : memref<1x1x3136xbf16, #tpu.memory_space<vmem>>, vector<1x1x64xbf16>
    %303 = vector.shape_cast %302 : vector<1x1x64xbf16> to vector<1x64xbf16>
    %304 = vector.shape_cast %301 : vector<1x64xbf16> to vector<1x1x64xbf16>
    tpu.vector_store %arg8[%c0_261, %c0_262, %c1280], %304 {strides = array<i32>} : memref<1x1x3136xbf16, #tpu.memory_space<vmem>>, vector<1x1x64xbf16>,
    %c27 = arith.constant 27 : index
    %c0_263 = arith.constant 0 : index
    %305 = tpu.strided_load %arg17[%c27, %c0_263] {strides = array<i32: 88, 1>} : memref<88x64xf32, #tpu.memory_space<vmem>>, vector<1x64xf32>
    %306 = arith.truncf %305 : vector<1x64xf32> to vector<1x64xbf16>
    %c0_264 = arith.constant 0 : index
    %c0_265 = arith.constant 0 : index
    %c1344 = arith.constant 1344 : index
    %307 = vector.load %arg8[%c0_264, %c0_265, %c1344] : memref<1x1x3136xbf16, #tpu.memory_space<vmem>>, vector<1x1x64xbf16>
    %308 = vector.shape_cast %307 : vector<1x1x64xbf16> to vector<1x64xbf16>
    %309 = vector.shape_cast %306 : vector<1x64xbf16> to vector<1x1x64xbf16>
    tpu.vector_store %arg8[%c0_264, %c0_265, %c1344], %309 {strides = array<i32>} : memref<1x1x3136xbf16, #tpu.memory_space<vmem>>, vector<1x1x64xbf16>,
    %c28_266 = arith.constant 28 : index
    %c0_267 = arith.constant 0 : index
    %310 = tpu.strided_load %arg17[%c28_266, %c0_267] {strides = array<i32: 88, 1>} : memref<88x64xf32, #tpu.memory_space<vmem>>, vector<1x64xf32>
    %311 = arith.truncf %310 : vector<1x64xf32> to vector<1x64xbf16>
    %c0_268 = arith.constant 0 : index
    %c0_269 = arith.constant 0 : index
    %c1408 = arith.constant 1408 : index
    %312 = vector.load %arg8[%c0_268, %c0_269, %c1408] : memref<1x1x3136xbf16, #tpu.memory_space<vmem>>, vector<1x1x64xbf16>
    %313 = vector.shape_cast %312 : vector<1x1x64xbf16> to vector<1x64xbf16>
    %314 = vector.shape_cast %311 : vector<1x64xbf16> to vector<1x1x64xbf16>
    tpu.vector_store %arg8[%c0_268, %c0_269, %c1408], %314 {strides = array<i32>} : memref<1x1x3136xbf16, #tpu.memory_space<vmem>>, vector<1x1x64xbf16>,
    %c29 = arith.constant 29 : index
    %c0_270 = arith.constant 0 : index
    %315 = tpu.strided_load %arg17[%c29, %c0_270] {strides = array<i32: 88, 1>} : memref<88x64xf32, #tpu.memory_space<vmem>>, vector<1x64xf32>
    %316 = arith.truncf %315 : vector<1x64xf32> to vector<1x64xbf16>
    %c0_271 = arith.constant 0 : index
    %c0_272 = arith.constant 0 : index
    %c1472 = arith.constant 1472 : index
    %317 = vector.load %arg8[%c0_271, %c0_272, %c1472] : memref<1x1x3136xbf16, #tpu.memory_space<vmem>>, vector<1x1x64xbf16>
    %318 = vector.shape_cast %317 : vector<1x1x64xbf16> to vector<1x64xbf16>
    %319 = vector.shape_cast %316 : vector<1x64xbf16> to vector<1x1x64xbf16>
    tpu.vector_store %arg8[%c0_271, %c0_272, %c1472], %319 {strides = array<i32>} : memref<1x1x3136xbf16, #tpu.memory_space<vmem>>, vector<1x1x64xbf16>,
    %c30 = arith.constant 30 : index
    %c0_273 = arith.constant 0 : index
    %320 = tpu.strided_load %arg17[%c30, %c0_273] {strides = array<i32: 88, 1>} : memref<88x64xf32, #tpu.memory_space<vmem>>, vector<1x64xf32>
    %321 = arith.truncf %320 : vector<1x64xf32> to vector<1x64xbf16>
    %c0_274 = arith.constant 0 : index
    %c0_275 = arith.constant 0 : index
    %c1536 = arith.constant 1536 : index
    %322 = vector.load %arg8[%c0_274, %c0_275, %c1536] : memref<1x1x3136xbf16, #tpu.memory_space<vmem>>, vector<1x1x64xbf16>
    %323 = vector.shape_cast %322 : vector<1x1x64xbf16> to vector<1x64xbf16>
    %324 = vector.shape_cast %321 : vector<1x64xbf16> to vector<1x1x64xbf16>
    tpu.vector_store %arg8[%c0_274, %c0_275, %c1536], %324 {strides = array<i32>} : memref<1x1x3136xbf16, #tpu.memory_space<vmem>>, vector<1x1x64xbf16>,
    %c31 = arith.constant 31 : index
    %c0_276 = arith.constant 0 : index
    %325 = tpu.strided_load %arg17[%c31, %c0_276] {strides = array<i32: 88, 1>} : memref<88x64xf32, #tpu.memory_space<vmem>>, vector<1x64xf32>
    %326 = arith.truncf %325 : vector<1x64xf32> to vector<1x64xbf16>
    %c0_277 = arith.constant 0 : index
    %c0_278 = arith.constant 0 : index
    %c1600 = arith.constant 1600 : index
    %327 = vector.load %arg8[%c0_277, %c0_278, %c1600] : memref<1x1x3136xbf16, #tpu.memory_space<vmem>>, vector<1x1x64xbf16>
    %328 = vector.shape_cast %327 : vector<1x1x64xbf16> to vector<1x64xbf16>
    %329 = vector.shape_cast %326 : vector<1x64xbf16> to vector<1x1x64xbf16>
    tpu.vector_store %arg8[%c0_277, %c0_278, %c1600], %329 {strides = array<i32>} : memref<1x1x3136xbf16, #tpu.memory_space<vmem>>, vector<1x1x64xbf16>,
    %c32_279 = arith.constant 32 : index
    %c0_280 = arith.constant 0 : index
    %330 = tpu.strided_load %arg17[%c32_279, %c0_280] {strides = array<i32: 88, 1>} : memref<88x64xf32, #tpu.memory_space<vmem>>, vector<1x64xf32>
    %331 = arith.truncf %330 : vector<1x64xf32> to vector<1x64xbf16>
    %c0_281 = arith.constant 0 : index
    %c0_282 = arith.constant 0 : index
    %c1664 = arith.constant 1664 : index
    %332 = vector.load %arg8[%c0_281, %c0_282, %c1664] : memref<1x1x3136xbf16, #tpu.memory_space<vmem>>, vector<1x1x64xbf16>
    %333 = vector.shape_cast %332 : vector<1x1x64xbf16> to vector<1x64xbf16>
    %334 = vector.shape_cast %331 : vector<1x64xbf16> to vector<1x1x64xbf16>
    tpu.vector_store %arg8[%c0_281, %c0_282, %c1664], %334 {strides = array<i32>} : memref<1x1x3136xbf16, #tpu.memory_space<vmem>>, vector<1x1x64xbf16>,
    %c33_283 = arith.constant 33 : index
    %c0_284 = arith.constant 0 : index
    %335 = tpu.strided_load %arg17[%c33_283, %c0_284] {strides = array<i32: 88, 1>} : memref<88x64xf32, #tpu.memory_space<vmem>>, vector<1x64xf32>
    %336 = arith.truncf %335 : vector<1x64xf32> to vector<1x64xbf16>
    %c0_285 = arith.constant 0 : index
    %c0_286 = arith.constant 0 : index
    %c1728 = arith.constant 1728 : index
    %337 = vector.load %arg8[%c0_285, %c0_286, %c1728] : memref<1x1x3136xbf16, #tpu.memory_space<vmem>>, vector<1x1x64xbf16>
    %338 = vector.shape_cast %337 : vector<1x1x64xbf16> to vector<1x64xbf16>
    %339 = vector.shape_cast %336 : vector<1x64xbf16> to vector<1x1x64xbf16>
    tpu.vector_store %arg8[%c0_285, %c0_286, %c1728], %339 {strides = array<i32>} : memref<1x1x3136xbf16, #tpu.memory_space<vmem>>, vector<1x1x64xbf16>,
    %c36 = arith.constant 36 : index
    %c0_287 = arith.constant 0 : index
    %340 = tpu.strided_load %arg17[%c36, %c0_287] {strides = array<i32: 88, 1>} : memref<88x64xf32, #tpu.memory_space<vmem>>, vector<1x64xf32>
    %341 = arith.truncf %340 : vector<1x64xf32> to vector<1x64xbf16>
    %c0_288 = arith.constant 0 : index
    %c0_289 = arith.constant 0 : index
    %c1792 = arith.constant 1792 : index
    %342 = vector.load %arg8[%c0_288, %c0_289, %c1792] : memref<1x1x3136xbf16, #tpu.memory_space<vmem>>, vector<1x1x64xbf16>
    %343 = vector.shape_cast %342 : vector<1x1x64xbf16> to vector<1x64xbf16>
    %344 = vector.shape_cast %341 : vector<1x64xbf16> to vector<1x1x64xbf16>
    tpu.vector_store %arg8[%c0_288, %c0_289, %c1792], %344 {strides = array<i32>} : memref<1x1x3136xbf16, #tpu.memory_space<vmem>>, vector<1x1x64xbf16>,
    %c37_290 = arith.constant 37 : index
    %c0_291 = arith.constant 0 : index
    %345 = tpu.strided_load %arg17[%c37_290, %c0_291] {strides = array<i32: 88, 1>} : memref<88x64xf32, #tpu.memory_space<vmem>>, vector<1x64xf32>
    %346 = arith.truncf %345 : vector<1x64xf32> to vector<1x64xbf16>
    %c0_292 = arith.constant 0 : index
    %c0_293 = arith.constant 0 : index
    %c1856 = arith.constant 1856 : index
    %347 = vector.load %arg8[%c0_292, %c0_293, %c1856] : memref<1x1x3136xbf16, #tpu.memory_space<vmem>>, vector<1x1x64xbf16>
    %348 = vector.shape_cast %347 : vector<1x1x64xbf16> to vector<1x64xbf16>
    %349 = vector.shape_cast %346 : vector<1x64xbf16> to vector<1x1x64xbf16>
    tpu.vector_store %arg8[%c0_292, %c0_293, %c1856], %349 {strides = array<i32>} : memref<1x1x3136xbf16, #tpu.memory_space<vmem>>, vector<1x1x64xbf16>,
    %c38 = arith.constant 38 : index
    %c0_294 = arith.constant 0 : index
    %350 = tpu.strided_load %arg17[%c38, %c0_294] {strides = array<i32: 88, 1>} : memref<88x64xf32, #tpu.memory_space<vmem>>, vector<1x64xf32>
    %351 = arith.truncf %350 : vector<1x64xf32> to vector<1x64xbf16>
    %c0_295 = arith.constant 0 : index
    %c0_296 = arith.constant 0 : index
    %c1920 = arith.constant 1920 : index
    %352 = vector.load %arg8[%c0_295, %c0_296, %c1920] : memref<1x1x3136xbf16, #tpu.memory_space<vmem>>, vector<1x1x64xbf16>
    %353 = vector.shape_cast %352 : vector<1x1x64xbf16> to vector<1x64xbf16>
    %354 = vector.shape_cast %351 : vector<1x64xbf16> to vector<1x1x64xbf16>
    tpu.vector_store %arg8[%c0_295, %c0_296, %c1920], %354 {strides = array<i32>} : memref<1x1x3136xbf16, #tpu.memory_space<vmem>>, vector<1x1x64xbf16>,
    %c39 = arith.constant 39 : index
    %c0_297 = arith.constant 0 : index
    %355 = tpu.strided_load %arg17[%c39, %c0_297] {strides = array<i32: 88, 1>} : memref<88x64xf32, #tpu.memory_space<vmem>>, vector<1x64xf32>
    %356 = arith.truncf %355 : vector<1x64xf32> to vector<1x64xbf16>
    %c0_298 = arith.constant 0 : index
    %c0_299 = arith.constant 0 : index
    %c1984 = arith.constant 1984 : index
    %357 = vector.load %arg8[%c0_298, %c0_299, %c1984] : memref<1x1x3136xbf16, #tpu.memory_space<vmem>>, vector<1x1x64xbf16>
    %358 = vector.shape_cast %357 : vector<1x1x64xbf16> to vector<1x64xbf16>
    %359 = vector.shape_cast %356 : vector<1x64xbf16> to vector<1x1x64xbf16>
    tpu.vector_store %arg8[%c0_298, %c0_299, %c1984], %359 {strides = array<i32>} : memref<1x1x3136xbf16, #tpu.memory_space<vmem>>, vector<1x1x64xbf16>,
    %c40_300 = arith.constant 40 : index
    %c0_301 = arith.constant 0 : index
    %360 = tpu.strided_load %arg17[%c40_300, %c0_301] {strides = array<i32: 88, 1>} : memref<88x64xf32, #tpu.memory_space<vmem>>, vector<1x64xf32>
    %361 = arith.truncf %360 : vector<1x64xf32> to vector<1x64xbf16>
    %c0_302 = arith.constant 0 : index
    %c0_303 = arith.constant 0 : index
    %c2048 = arith.constant 2048 : index
    %362 = vector.load %arg8[%c0_302, %c0_303, %c2048] : memref<1x1x3136xbf16, #tpu.memory_space<vmem>>, vector<1x1x64xbf16>
    %363 = vector.shape_cast %362 : vector<1x1x64xbf16> to vector<1x64xbf16>
    %364 = vector.shape_cast %361 : vector<1x64xbf16> to vector<1x1x64xbf16>
    tpu.vector_store %arg8[%c0_302, %c0_303, %c2048], %364 {strides = array<i32>} : memref<1x1x3136xbf16, #tpu.memory_space<vmem>>, vector<1x1x64xbf16>,
    %c41 = arith.constant 41 : index
    %c0_304 = arith.constant 0 : index
    %365 = tpu.strided_load %arg17[%c41, %c0_304] {strides = array<i32: 88, 1>} : memref<88x64xf32, #tpu.memory_space<vmem>>, vector<1x64xf32>
    %366 = arith.truncf %365 : vector<1x64xf32> to vector<1x64xbf16>
    %c0_305 = arith.constant 0 : index
    %c0_306 = arith.constant 0 : index
    %c2112 = arith.constant 2112 : index
    %367 = vector.load %arg8[%c0_305, %c0_306, %c2112] : memref<1x1x3136xbf16, #tpu.memory_space<vmem>>, vector<1x1x64xbf16>
    %368 = vector.shape_cast %367 : vector<1x1x64xbf16> to vector<1x64xbf16>
    %369 = vector.shape_cast %366 : vector<1x64xbf16> to vector<1x1x64xbf16>
    tpu.vector_store %arg8[%c0_305, %c0_306, %c2112], %369 {strides = array<i32>} : memref<1x1x3136xbf16, #tpu.memory_space<vmem>>, vector<1x1x64xbf16>,
    %c42 = arith.constant 42 : index
    %c0_307 = arith.constant 0 : index
    %370 = tpu.strided_load %arg17[%c42, %c0_307] {strides = array<i32: 88, 1>} : memref<88x64xf32, #tpu.memory_space<vmem>>, vector<1x64xf32>
    %371 = arith.truncf %370 : vector<1x64xf32> to vector<1x64xbf16>
    %c0_308 = arith.constant 0 : index
    %c0_309 = arith.constant 0 : index
    %c2176 = arith.constant 2176 : index
    %372 = vector.load %arg8[%c0_308, %c0_309, %c2176] : memref<1x1x3136xbf16, #tpu.memory_space<vmem>>, vector<1x1x64xbf16>
    %373 = vector.shape_cast %372 : vector<1x1x64xbf16> to vector<1x64xbf16>
    %374 = vector.shape_cast %371 : vector<1x64xbf16> to vector<1x1x64xbf16>
    tpu.vector_store %arg8[%c0_308, %c0_309, %c2176], %374 {strides = array<i32>} : memref<1x1x3136xbf16, #tpu.memory_space<vmem>>, vector<1x1x64xbf16>,
    %c45 = arith.constant 45 : index
    %c0_310 = arith.constant 0 : index
    %375 = tpu.strided_load %arg17[%c45, %c0_310] {strides = array<i32: 88, 1>} : memref<88x64xf32, #tpu.memory_space<vmem>>, vector<1x64xf32>
    %376 = arith.truncf %375 : vector<1x64xf32> to vector<1x64xbf16>
    %c0_311 = arith.constant 0 : index
    %c0_312 = arith.constant 0 : index
    %c2240 = arith.constant 2240 : index
    %377 = vector.load %arg8[%c0_311, %c0_312, %c2240] : memref<1x1x3136xbf16, #tpu.memory_space<vmem>>, vector<1x1x64xbf16>
    %378 = vector.shape_cast %377 : vector<1x1x64xbf16> to vector<1x64xbf16>
    %379 = vector.shape_cast %376 : vector<1x64xbf16> to vector<1x1x64xbf16>
    tpu.vector_store %arg8[%c0_311, %c0_312, %c2240], %379 {strides = array<i32>} : memref<1x1x3136xbf16, #tpu.memory_space<vmem>>, vector<1x1x64xbf16>,
    %c46_313 = arith.constant 46 : index
    %c0_314 = arith.constant 0 : index
    %380 = tpu.strided_load %arg17[%c46_313, %c0_314] {strides = array<i32: 88, 1>} : memref<88x64xf32, #tpu.memory_space<vmem>>, vector<1x64xf32>
    %381 = arith.truncf %380 : vector<1x64xf32> to vector<1x64xbf16>
    %c0_315 = arith.constant 0 : index
    %c0_316 = arith.constant 0 : index
    %c2304 = arith.constant 2304 : index
    %382 = vector.load %arg8[%c0_315, %c0_316, %c2304] : memref<1x1x3136xbf16, #tpu.memory_space<vmem>>, vector<1x1x64xbf16>
    %383 = vector.shape_cast %382 : vector<1x1x64xbf16> to vector<1x64xbf16>
    %384 = vector.shape_cast %381 : vector<1x64xbf16> to vector<1x1x64xbf16>
    tpu.vector_store %arg8[%c0_315, %c0_316, %c2304], %384 {strides = array<i32>} : memref<1x1x3136xbf16, #tpu.memory_space<vmem>>, vector<1x1x64xbf16>,
    %c47 = arith.constant 47 : index
    %c0_317 = arith.constant 0 : index
    %385 = tpu.strided_load %arg17[%c47, %c0_317] {strides = array<i32: 88, 1>} : memref<88x64xf32, #tpu.memory_space<vmem>>, vector<1x64xf32>
    %386 = arith.truncf %385 : vector<1x64xf32> to vector<1x64xbf16>
    %c0_318 = arith.constant 0 : index
    %c0_319 = arith.constant 0 : index
    %c2368 = arith.constant 2368 : index
    %387 = vector.load %arg8[%c0_318, %c0_319, %c2368] : memref<1x1x3136xbf16, #tpu.memory_space<vmem>>, vector<1x1x64xbf16>
    %388 = vector.shape_cast %387 : vector<1x1x64xbf16> to vector<1x64xbf16>
    %389 = vector.shape_cast %386 : vector<1x64xbf16> to vector<1x1x64xbf16>
    tpu.vector_store %arg8[%c0_318, %c0_319, %c2368], %389 {strides = array<i32>} : memref<1x1x3136xbf16, #tpu.memory_space<vmem>>, vector<1x1x64xbf16>,
    %c48_320 = arith.constant 48 : index
    %c0_321 = arith.constant 0 : index
    %390 = tpu.strided_load %arg17[%c48_320, %c0_321] {strides = array<i32: 88, 1>} : memref<88x64xf32, #tpu.memory_space<vmem>>, vector<1x64xf32>
    %391 = arith.truncf %390 : vector<1x64xf32> to vector<1x64xbf16>
    %c0_322 = arith.constant 0 : index
    %c0_323 = arith.constant 0 : index
    %c2432 = arith.constant 2432 : index
    %392 = vector.load %arg8[%c0_322, %c0_323, %c2432] : memref<1x1x3136xbf16, #tpu.memory_space<vmem>>, vector<1x1x64xbf16>
    %393 = vector.shape_cast %392 : vector<1x1x64xbf16> to vector<1x64xbf16>
    %394 = vector.shape_cast %391 : vector<1x64xbf16> to vector<1x1x64xbf16>
    tpu.vector_store %arg8[%c0_322, %c0_323, %c2432], %394 {strides = array<i32>} : memref<1x1x3136xbf16, #tpu.memory_space<vmem>>, vector<1x1x64xbf16>,
    %c49_324 = arith.constant 49 : index
    %c0_325 = arith.constant 0 : index
    %395 = tpu.strided_load %arg17[%c49_324, %c0_325] {strides = array<i32: 88, 1>} : memref<88x64xf32, #tpu.memory_space<vmem>>, vector<1x64xf32>
    %396 = arith.truncf %395 : vector<1x64xf32> to vector<1x64xbf16>
    %c0_326 = arith.constant 0 : index
    %c0_327 = arith.constant 0 : index
    %c2496 = arith.constant 2496 : index
    %397 = vector.load %arg8[%c0_326, %c0_327, %c2496] : memref<1x1x3136xbf16, #tpu.memory_space<vmem>>, vector<1x1x64xbf16>
    %398 = vector.shape_cast %397 : vector<1x1x64xbf16> to vector<1x64xbf16>
    %399 = vector.shape_cast %396 : vector<1x64xbf16> to vector<1x1x64xbf16>
    tpu.vector_store %arg8[%c0_326, %c0_327, %c2496], %399 {strides = array<i32>} : memref<1x1x3136xbf16, #tpu.memory_space<vmem>>, vector<1x1x64xbf16>,
    %c50 = arith.constant 50 : index
    %c0_328 = arith.constant 0 : index
    %400 = tpu.strided_load %arg17[%c50, %c0_328] {strides = array<i32: 88, 1>} : memref<88x64xf32, #tpu.memory_space<vmem>>, vector<1x64xf32>
    %401 = arith.truncf %400 : vector<1x64xf32> to vector<1x64xbf16>
    %c0_329 = arith.constant 0 : index
    %c0_330 = arith.constant 0 : index
    %c2560 = arith.constant 2560 : index
    %402 = vector.load %arg8[%c0_329, %c0_330, %c2560] : memref<1x1x3136xbf16, #tpu.memory_space<vmem>>, vector<1x1x64xbf16>
    %403 = vector.shape_cast %402 : vector<1x1x64xbf16> to vector<1x64xbf16>
    %404 = vector.shape_cast %401 : vector<1x64xbf16> to vector<1x1x64xbf16>
    tpu.vector_store %arg8[%c0_329, %c0_330, %c2560], %404 {strides = array<i32>} : memref<1x1x3136xbf16, #tpu.memory_space<vmem>>, vector<1x1x64xbf16>,
    %c51 = arith.constant 51 : index
    %c0_331 = arith.constant 0 : index
    %405 = tpu.strided_load %arg17[%c51, %c0_331] {strides = array<i32: 88, 1>} : memref<88x64xf32, #tpu.memory_space<vmem>>, vector<1x64xf32>
    %406 = arith.truncf %405 : vector<1x64xf32> to vector<1x64xbf16>
    %c0_332 = arith.constant 0 : index
    %c0_333 = arith.constant 0 : index
    %c2624 = arith.constant 2624 : index
    %407 = vector.load %arg8[%c0_332, %c0_333, %c2624] : memref<1x1x3136xbf16, #tpu.memory_space<vmem>>, vector<1x1x64xbf16>
    %408 = vector.shape_cast %407 : vector<1x1x64xbf16> to vector<1x64xbf16>
    %409 = vector.shape_cast %406 : vector<1x64xbf16> to vector<1x1x64xbf16>
    tpu.vector_store %arg8[%c0_332, %c0_333, %c2624], %409 {strides = array<i32>} : memref<1x1x3136xbf16, #tpu.memory_space<vmem>>, vector<1x1x64xbf16>,
    %c54 = arith.constant 54 : index
    %c0_334 = arith.constant 0 : index
    %410 = tpu.strided_load %arg17[%c54, %c0_334] {strides = array<i32: 88, 1>} : memref<88x64xf32, #tpu.memory_space<vmem>>, vector<1x64xf32>
    %411 = arith.truncf %410 : vector<1x64xf32> to vector<1x64xbf16>
    %c0_335 = arith.constant 0 : index
    %c0_336 = arith.constant 0 : index
    %c2688 = arith.constant 2688 : index
    %412 = vector.load %arg8[%c0_335, %c0_336, %c2688] : memref<1x1x3136xbf16, #tpu.memory_space<vmem>>, vector<1x1x64xbf16>
    %413 = vector.shape_cast %412 : vector<1x1x64xbf16> to vector<1x64xbf16>
    %414 = vector.shape_cast %411 : vector<1x64xbf16> to vector<1x1x64xbf16>
    tpu.vector_store %arg8[%c0_335, %c0_336, %c2688], %414 {strides = array<i32>} : memref<1x1x3136xbf16, #tpu.memory_space<vmem>>, vector<1x1x64xbf16>,
    %c55_337 = arith.constant 55 : index
    %c0_338 = arith.constant 0 : index
    %415 = tpu.strided_load %arg17[%c55_337, %c0_338] {strides = array<i32: 88, 1>} : memref<88x64xf32, #tpu.memory_space<vmem>>, vector<1x64xf32>
    %416 = arith.truncf %415 : vector<1x64xf32> to vector<1x64xbf16>
    %c0_339 = arith.constant 0 : index
    %c0_340 = arith.constant 0 : index
    %c2752 = arith.constant 2752 : index
    %417 = vector.load %arg8[%c0_339, %c0_340, %c2752] : memref<1x1x3136xbf16, #tpu.memory_space<vmem>>, vector<1x1x64xbf16>
    %418 = vector.shape_cast %417 : vector<1x1x64xbf16> to vector<1x64xbf16>
    %419 = vector.shape_cast %416 : vector<1x64xbf16> to vector<1x1x64xbf16>
    tpu.vector_store %arg8[%c0_339, %c0_340, %c2752], %419 {strides = array<i32>} : memref<1x1x3136xbf16, #tpu.memory_space<vmem>>, vector<1x1x64xbf16>,
    %c56_341 = arith.constant 56 : index
    %c0_342 = arith.constant 0 : index
    %420 = tpu.strided_load %arg17[%c56_341, %c0_342] {strides = array<i32: 88, 1>} : memref<88x64xf32, #tpu.memory_space<vmem>>, vector<1x64xf32>
    %421 = arith.truncf %420 : vector<1x64xf32> to vector<1x64xbf16>
    %c0_343 = arith.constant 0 : index
    %c0_344 = arith.constant 0 : index
    %c2816 = arith.constant 2816 : index
    %422 = vector.load %arg8[%c0_343, %c0_344, %c2816] : memref<1x1x3136xbf16, #tpu.memory_space<vmem>>, vector<1x1x64xbf16>
    %423 = vector.shape_cast %422 : vector<1x1x64xbf16> to vector<1x64xbf16>
    %424 = vector.shape_cast %421 : vector<1x64xbf16> to vector<1x1x64xbf16>
    tpu.vector_store %arg8[%c0_343, %c0_344, %c2816], %424 {strides = array<i32>} : memref<1x1x3136xbf16, #tpu.memory_space<vmem>>, vector<1x1x64xbf16>,
    %c57 = arith.constant 57 : index
    %c0_345 = arith.constant 0 : index
    %425 = tpu.strided_load %arg17[%c57, %c0_345] {strides = array<i32: 88, 1>} : memref<88x64xf32, #tpu.memory_space<vmem>>, vector<1x64xf32>
    %426 = arith.truncf %425 : vector<1x64xf32> to vector<1x64xbf16>
    %c0_346 = arith.constant 0 : index
    %c0_347 = arith.constant 0 : index
    %c2880 = arith.constant 2880 : index
    %427 = vector.load %arg8[%c0_346, %c0_347, %c2880] : memref<1x1x3136xbf16, #tpu.memory_space<vmem>>, vector<1x1x64xbf16>
    %428 = vector.shape_cast %427 : vector<1x1x64xbf16> to vector<1x64xbf16>
    %429 = vector.shape_cast %426 : vector<1x64xbf16> to vector<1x1x64xbf16>
    tpu.vector_store %arg8[%c0_346, %c0_347, %c2880], %429 {strides = array<i32>} : memref<1x1x3136xbf16, #tpu.memory_space<vmem>>, vector<1x1x64xbf16>,
    %c58 = arith.constant 58 : index
    %c0_348 = arith.constant 0 : index
    %430 = tpu.strided_load %arg17[%c58, %c0_348] {strides = array<i32: 88, 1>} : memref<88x64xf32, #tpu.memory_space<vmem>>, vector<1x64xf32>
    %431 = arith.truncf %430 : vector<1x64xf32> to vector<1x64xbf16>
    %c0_349 = arith.constant 0 : index
    %c0_350 = arith.constant 0 : index
    %c2944 = arith.constant 2944 : index
    %432 = vector.load %arg8[%c0_349, %c0_350, %c2944] : memref<1x1x3136xbf16, #tpu.memory_space<vmem>>, vector<1x1x64xbf16>
    %433 = vector.shape_cast %432 : vector<1x1x64xbf16> to vector<1x64xbf16>
    %434 = vector.shape_cast %431 : vector<1x64xbf16> to vector<1x1x64xbf16>
    tpu.vector_store %arg8[%c0_349, %c0_350, %c2944], %434 {strides = array<i32>} : memref<1x1x3136xbf16, #tpu.memory_space<vmem>>, vector<1x1x64xbf16>,
    %c59 = arith.constant 59 : index
    %c0_351 = arith.constant 0 : index
    %435 = tpu.strided_load %arg17[%c59, %c0_351] {strides = array<i32: 88, 1>} : memref<88x64xf32, #tpu.memory_space<vmem>>, vector<1x64xf32>
    %436 = arith.truncf %435 : vector<1x64xf32> to vector<1x64xbf16>
    %c0_352 = arith.constant 0 : index
    %c0_353 = arith.constant 0 : index
    %c3008 = arith.constant 3008 : index
    %437 = vector.load %arg8[%c0_352, %c0_353, %c3008] : memref<1x1x3136xbf16, #tpu.memory_space<vmem>>, vector<1x1x64xbf16>
    %438 = vector.shape_cast %437 : vector<1x1x64xbf16> to vector<1x64xbf16>
    %439 = vector.shape_cast %436 : vector<1x64xbf16> to vector<1x1x64xbf16>
    tpu.vector_store %arg8[%c0_352, %c0_353, %c3008], %439 {strides = array<i32>} : memref<1x1x3136xbf16, #tpu.memory_space<vmem>>, vector<1x1x64xbf16>,
    %c60 = arith.constant 60 : index
    %c0_354 = arith.constant 0 : index
    %440 = tpu.strided_load %arg17[%c60, %c0_354] {strides = array<i32: 88, 1>} : memref<88x64xf32, #tpu.memory_space<vmem>>, vector<1x64xf32>
    %441 = arith.truncf %440 : vector<1x64xf32> to vector<1x64xbf16>
    %c0_355 = arith.constant 0 : index
    %c0_356 = arith.constant 0 : index
    %c3072 = arith.constant 3072 : index
    %442 = vector.load %arg8[%c0_355, %c0_356, %c3072] : memref<1x1x3136xbf16, #tpu.memory_space<vmem>>, vector<1x1x64xbf16>
    %443 = vector.shape_cast %442 : vector<1x1x64xbf16> to vector<1x64xbf16>
    %444 = vector.shape_cast %441 : vector<1x64xbf16> to vector<1x1x64xbf16>
    tpu.vector_store %arg8[%c0_355, %c0_356, %c3072], %444 {strides = array<i32>} : memref<1x1x3136xbf16, #tpu.memory_space<vmem>>, vector<1x1x64xbf16>,
    return
  }
  func.func @transform_0(%arg0: i32) -> (i32, i32) {
    %c0_i32 = arith.constant 0 : i32
    %c0_i32_0 = arith.constant 0 : i32
    return %arg0, %c0_i32 : i32, i32
  }
  func.func @transform_1(%arg0: i32) -> (i32, i32) {
    %c0_i32 = arith.constant 0 : i32
    %c0_i32_0 = arith.constant 0 : i32
    %c0_i32_1 = arith.constant 0 : i32
    return %c0_i32, %c0_i32_0 : i32, i32
  }
  func.func @transform_2(%arg0: i32) -> (i32, i32) {
    %c0_i32 = arith.constant 0 : i32
    %c0_i32_0 = arith.constant 0 : i32
    %c0_i32_1 = arith.constant 0 : i32
    return %c0_i32, %c0_i32_0 : i32, i32
  }
  func.func @transform_3(%arg0: i32) -> (i32, i32) {
    %c0_i32 = arith.constant 0 : i32
    %c0_i32_0 = arith.constant 0 : i32
    %c0_i32_1 = arith.constant 0 : i32
    return %c0_i32, %c0_i32_0 : i32, i32
  }
  func.func @transform_4(%arg0: i32) -> (i32, i32) {
    %c0_i32 = arith.constant 0 : i32
    %c0_i32_0 = arith.constant 0 : i32
    %c0_i32_1 = arith.constant 0 : i32
    return %c0_i32, %c0_i32_0 : i32, i32
  }
  func.func @transform_5(%arg0: i32) -> (i32, i32) {
    %c0_i32 = arith.constant 0 : i32
    %c0_i32_0 = arith.constant 0 : i32
    %c0_i32_1 = arith.constant 0 : i32
    return %c0_i32, %c0_i32_0 : i32, i32
  }
  func.func @transform_6(%arg0: i32) -> (i32, i32) {
    %c0_i32 = arith.constant 0 : i32
    %c0_i32_0 = arith.constant 0 : i32
    %c0_i32_1 = arith.constant 0 : i32
    return %c0_i32, %c0_i32_0 : i32, i32
  }
  func.func @transform_7(%arg0: i32) -> (i32, i32, i32) {
    %c0_i32 = arith.constant 0 : i32
    %c0_i32_0 = arith.constant 0 : i32
    %c0_i32_1 = arith.constant 0 : i32
    return %arg0, %c0_i32, %c0_i32_0 : i32, i32, i32
  }
}

</mosaic_0001>

<bundles_post_ra>
// kernel: mnist_classifier_forward.3
= control target key start
LH: loop header
LB: loop body
LE: loop exit
PB: predicated region body
PF: predicated region fallthrough
CT: control target
= control target key end

     0   :  { %10 = vsyncpa [#allocation3], 0  ;;  %s11634_s0 = inlined_call_operand.vmem [shape: bf16[2,1,3136], index: 0, kind: input, shape index: {}]   ;;  %s11635_s1 = inlined_call_operand.vmem [shape: bf16[3136,512], index: 1, kind: input, shape index: {}]   ;;  %s11636_s2 = inlined_call_operand.vmem [shape: f32[1,512], index: 2, kind: input, shape index: {}]   ;;  %s11637_s3 = inlined_call_operand.vmem [shape: bf16[512,128], index: 3, kind: input, shape index: {}]   ;;  %s11638_s4 = inlined_call_operand.vmem [shape: f32[1,128], index: 4, kind: input, shape index: {}]   ;;  %s11639_s5 = inlined_call_operand.hbm [shape: f32[2,1,128], index: 5, kind: output, shape index: {}]  }
   0x1   :  { %12 = vsyncpa [#allocation3 + $0x1], 0  ;;  %s8945_s18 = smov 0   ;;  %s8947_s19 = smov 0  }
   0x2   :  { %s8949_s20 = smov 0   ;;  %s8951_s21 = smov 0  }
   0x3 LB: > { %s8966_s22 = sadd.s32 4294967295, %s8910_s21   ;;  %s6623_s23 = sadd.s32 4294967294, %s8910_s21   ;;  %s8910_s21 = sphi %s8951_s21, %s11645_s21   ;;  %s8906_s20 = sphi %s8949_s20, %s11644_s20   ;;  %s8902_s19 = sphi %s8947_s19, %s11643_s19   ;;  %s8898_s18 = sphi %s8945_s18, %s11642_s18  }
   0x4   : > { %s8970_s24 = sadd.s32 1, %s8910_s21   ;;  %s135_s25 = sadd.s32 1, %s8906_s20 }
   0x5   : > { %s132_s26 = ssub.s32 %s8910_s21, %s8970_s24  ;;  %p145_p0 = scmp.ne.s32.totalorder %s8906_s20, %s8902_s19 }
   0x6   : > { %p133_p1 = scmp.eq.s32.totalorder %s132_s26, 0  ;;  %p146_p2 = scmp.eq.s32.totalorder %s8966_s22, 1 }
   0x7   : > { %p151_p3 = scmp.ne.s32.totalorder %s8902_s19, %s8898_s18  ;;  %p152_p4 = scmp.eq.s32.totalorder %s6623_s23, 1 }
   0x8   : > { %s8981_s27 = scalar_select %p133_p1, %s8906_s20, %s135_s25  }
   0x9   : > { %p8983_p5 = por %p146_p2, %p145_p0  ;;  %p8987_p6 = por %p152_p4, %p151_p3 }
   0xa   : > { %p6626_p7 = scmp.ge.s32.totalorder %s8910_s21, 1  ;;  %p189_p8 = scmp.lt.s32.totalorder %s8910_s21, 3 }
   0xc   : > { %p190_p9 = pnand %p6626_p7, %p189_p8 }
   0xd   : > { %v7635_v0 = vld [vmem:[%s11635_s1 + $0x4] ss:$16 sps:$4 sm:$0xff] (!%p190_p9)   ;;  %v7637_v1 = vld [vmem:[%s11635_s1 + $0xc] ss:$16 sps:$4 sm:$0xff] (!%p190_p9)   ;;  %v7639_v2 = vld [vmem:[%s11635_s1] ss:$16 sps:$4 sm:$0xff] (!%p190_p9)   ;;  %v1017_v38 = vlaneseq (!%p190_p9) }
   0xe   : > { %193 = sbr.rel (%p190_p9) target bundleno = 1251 (0x4e3), region = 40  ;;  %5143 = vmatprep.subr.bf16.mxu0 (!%p190_p9), %v7635_v0  ;;  %v7640_v3 = vld [vmem:[%s11635_s1 + $0x8] ss:$16 sps:$4 sm:$0xff] (!%p190_p9)   ;;  %5676 = vmatprep.subr.bf16.mxu1 (!%p190_p9), %v7637_v1  ;;  %v7641_v4 = vld [vmem:[%s11635_s1 + $0x24] ss:$16 sps:$4 sm:$0xff] (!%p190_p9)   ;;  %p215_p10 = scmp.lt.s32.totalorder (!%p190_p9), %s8966_s22, 1 }
   0xf   : > { %5144 = vmatpush1.bf16.msra.mxu0 (!%p190_p9), %v7639_v2  ;;  %5677 = vmatpush1.bf16.msra.mxu1 (!%p190_p9), %v7640_v3  ;;  %v7643_v5 = vld [vmem:[%s11635_s1 + $0x2c] ss:$16 sps:$4 sm:$0xff] (!%p190_p9)   ;;  %v7645_v6 = vld [vmem:[%s11635_s1 + $0x20] ss:$16 sps:$4 sm:$0xff] (!%p190_p9)   ;;  %v7646_v7 = vld [vmem:[%s11635_s1 + $0x28] ss:$16 sps:$4 sm:$0xff] (!%p190_p9)  }
  0x10   : > { %5145 = vmatprep.subr.bf16.mxu0 (!%p190_p9), %v7641_v4  ;;  %5678 = vmatprep.subr.bf16.mxu1 (!%p190_p9), %v7643_v5  ;;  %v7647_v8 = vld [vmem:[%s11635_s1 + $0x44] ss:$16 sps:$4 sm:$0xff] (!%p190_p9)   ;;  %v7649_v9 = vld [vmem:[%s11635_s1 + $0x4c] ss:$16 sps:$4 sm:$0xff] (!%p190_p9)   ;;  %v7651_v10 = vld [vmem:[%s11635_s1 + $0x40] ss:$16 sps:$4 sm:$0xff] (!%p190_p9)  }
  0x11   : > { %v7652_v11 = vld [vmem:[%s11635_s1 + $0x48] ss:$16 sps:$4 sm:$0xff] (!%p190_p9)   ;;  %v7653_v12 = vld [vmem:[%s11635_s1 + $0x64] ss:$16 sps:$4 sm:$0xff] (!%p190_p9)   ;;  %v7655_v13 = vld [vmem:[%s11635_s1 + $0x6c] ss:$16 sps:$4 sm:$0xff] (!%p190_p9)  }
  0x12   : > { %v7657_v14 = vld [vmem:[%s11635_s1 + $0x60] ss:$16 sps:$4 sm:$0xff] (!%p190_p9)   ;;  %v7658_v15 = vld [vmem:[%s11635_s1 + $0x68] ss:$16 sps:$4 sm:$0xff] (!%p190_p9)   ;;  %v7659_v16 = vld [vmem:[%s11635_s1 + $0x84] ss:$16 sps:$4 sm:$0xff] (!%p190_p9)  }
  0x13   : > { %5146 = vmatpush1.bf16.msra.mxu0 (!%p190_p9), %v7645_v6  ;;  %5679 = vmatpush1.bf16.msra.mxu1 (!%p190_p9), %v7646_v7  ;;  %v7661_v17 = vld [vmem:[%s11635_s1 + $0x8c] ss:$16 sps:$4 sm:$0xff] (!%p190_p9)   ;;  %v7663_v18 = vld [vmem:[%s11635_s1 + $0x80] ss:$16 sps:$4 sm:$0xff] (!%p190_p9)   ;;  %v7664_v19 = vld [vmem:[%s11635_s1 + $0x88] ss:$16 sps:$4 sm:$0xff] (!%p190_p9)  }
  0x14   : > { %5147 = vmatprep.subr.bf16.mxu0 (!%p190_p9), %v7647_v8  ;;  %5680 = vmatprep.subr.bf16.mxu1 (!%p190_p9), %v7649_v9  ;;  %v7665_v20 = vld [vmem:[%s11635_s1 + $0xa4] ss:$16 sps:$4 sm:$0xff] (!%p190_p9)   ;;  %v7667_v21 = vld [vmem:[%s11635_s1 + $0xac] ss:$16 sps:$4 sm:$0xff] (!%p190_p9)   ;;  %v7669_v22 = vld [vmem:[%s11635_s1 + $0xa0] ss:$16 sps:$4 sm:$0xff] (!%p190_p9)  }
  0x15   : > { %v7670_v23 = vld [vmem:[%s11635_s1 + $0xa8] ss:$16 sps:$4 sm:$0xff]   ;;  %v7671_v24 = vld [vmem:[%s11635_s1 + $0xc4] ss:$16 sps:$4 sm:$0xff]   ;;  %v7673_v25 = vld [vmem:[%s11635_s1 + $0xcc] ss:$16 sps:$4 sm:$0xff]  }
  0x16   : > { %v7675_v26 = vld [vmem:[%s11635_s1 + $0xc0] ss:$16 sps:$4 sm:$0xff]   ;;  %v7676_v27 = vld [vmem:[%s11635_s1 + $0xc8] ss:$16 sps:$4 sm:$0xff]   ;;  %v7677_v28 = vld [vmem:[%s11635_s1 + $0xe4] ss:$16 sps:$4 sm:$0xff]  }
  0x17   : > { %5148 = vmatpush1.bf16.msra.mxu0 %v7651_v10  ;;  %5681 = vmatpush1.bf16.msra.mxu1 %v7652_v11  ;;  %v7679_v29 = vld [vmem:[%s11635_s1 + $0xec] ss:$16 sps:$4 sm:$0xff]   ;;  %v7681_v30 = vld [vmem:[%s11635_s1 + $0xe0] ss:$16 sps:$4 sm:$0xff]   ;;  %v7682_v31 = vld [vmem:[%s11635_s1 + $0xe8] ss:$16 sps:$4 sm:$0xff]  }
  0x18   : > { %5149 = vmatprep.subr.bf16.mxu0 %v7653_v12  ;;  %5682 = vmatprep.subr.bf16.mxu1 %v7655_v13  ;;  %v7683_v32 = vld [vmem:[%s11635_s1 + $0x104] ss:$16 sps:$4 sm:$0xff]   ;;  %v7685_v33 = vld [vmem:[%s11635_s1 + $0x10c] ss:$16 sps:$4 sm:$0xff]   ;;  %v7687_v34 = vld [vmem:[%s11635_s1 + $0x100] ss:$16 sps:$4 sm:$0xff]  }
  0x19   : > { %v7688_v35 = vld [vmem:[%s11635_s1 + $0x108] ss:$16 sps:$4 sm:$0xff]   ;;  %s216_s13 = scalar_select %p215_p10, %s8966_s22, 1  ;;  %v8912_v36 = vmov 1966171168   ;;  %v9112_v43 = vshrl.u32 %v1017_v38, 7 }
  0x1a   : > { %v1015_v37 = vunpack.c.l.s4 %v8912_v36  ;;  %v7689_v39 = vld [vmem:[%s11635_s1 + $0x124] ss:$16 sps:$4 sm:$0xff]   ;;  %v7691_v40 = vld [vmem:[%s11635_s1 + $0x12c] ss:$16 sps:$4 sm:$0xff]   ;;  %v7693_v41 = vld [vmem:[%s11635_s1 + $0x120] ss:$16 sps:$4 sm:$0xff]  }
  0x1b   : > { %5150 = vmatpush1.bf16.msra.mxu0 %v7657_v14  ;;  %5683 = vmatpush1.bf16.msra.mxu1 %v7658_v15  ;;  %s7593_s26 = smul.u32 25, %s216_s13  ;;  %v7694_v44 = vld [vmem:[%s11635_s1 + $0x128] ss:$16 sps:$4 sm:$0xff]   ;;  %v7695_v45 = vld [vmem:[%s11635_s1 + $0x144] ss:$16 sps:$4 sm:$0xff]   ;;  %vm5139_vm0 = vcmask 523264  }
  0x1c   : > { %5151 = vmatprep.subr.bf16.mxu0 %v7659_v16  ;;  %5684 = vmatprep.subr.bf16.mxu1 %v7661_v17  ;;  %v1016_v42 = vunpack.c.0.s8 %v1015_v37  ;;  %v7697_v46 = vld [vmem:[%s11635_s1 + $0x14c] ss:$16 sps:$4 sm:$0xff]   ;;  %v7699_v47 = vld [vmem:[%s11635_s1 + $0x140] ss:$16 sps:$4 sm:$0xff]   ;;  %v7700_v48 = vld [vmem:[%s11635_s1 + $0x148] ss:$16 sps:$4 sm:$0xff]  }
  0x1d   : > { %s9132_s17 = scalar_lea.vmem %s11634_s0, %s7593_s26  ;;  %v7701_v50 = vld [vmem:[%s11635_s1 + $0x164] ss:$16 sps:$4 sm:$0xff]   ;;  %v7703_v51 = vld [vmem:[%s11635_s1 + $0x16c] ss:$16 sps:$4 sm:$0xff]   ;;  %v7705_v53 = vld [vmem:[%s11635_s1 + $0x160] ss:$16 sps:$4 sm:$0xff]  }
  0x1e   : > { %v9135_v49 = vsub.s32 %v1016_v42, %v9112_v43  ;;  %v9144_v52 = vld [vmem:[%s9132_s17] sm:$0xff]  ;;  %v7706_v55 = vld [vmem:[%s11635_s1 + $0x168] ss:$16 sps:$4 sm:$0xff]   ;;  %v7709_v57 = vld [vmem:[%s11635_s1 + $0x18c] ss:$16 sps:$4 sm:$0xff]   ;;  %s213_s14 = sand.u32 1, %s8902_s19  }
  0x1f   : > { %5152 = vmatpush1.bf16.msra.mxu0 %v7663_v18  ;;  %5685 = vmatpush1.bf16.msra.mxu1 %v7664_v19  ;;  %v7707_v56 = vld [vmem:[%s11635_s1 + $0x184] ss:$16 sps:$4 sm:$0xff]   ;;  %v7711_v59 = vld [vmem:[%s11635_s1 + $0x180] ss:$16 sps:$4 sm:$0xff]   ;;  %v7712_v61 = vld [vmem:[%s11635_s1 + $0x188] ss:$16 sps:$4 sm:$0xff]  }
  0x20   : > { %5153 = vmatprep.subr.bf16.mxu0 %v7665_v20  ;;  %5686 = vmatprep.subr.bf16.mxu1 %v7667_v21  ;;  %v1020_v54 = vrot.slane %v9144_v52, %v9135_v49  ;;  %v7713_v62 = vld [vmem:[%s11635_s1 + $0x1a4] ss:$16 sps:$4 sm:$0xff]   ;;  %v7715_v63 = vld [vmem:[%s11635_s1 + $0x1ac] ss:$16 sps:$4 sm:$0xff]   ;;  %v7717_v0 = vld [vmem:[%s11635_s1 + $0x1a0] ss:$16 sps:$4 sm:$0xff]  }
  0x21   : > { %v7718_v1 = vld [vmem:[%s11635_s1 + $0x1a8] ss:$16 sps:$4 sm:$0xff]   ;;  %v7719_v2 = vld [vmem:[%s11635_s1 + $0x1c4] ss:$16 sps:$4 sm:$0xff]   ;;  %v7721_v3 = vld [vmem:[%s11635_s1 + $0x1cc] ss:$16 sps:$4 sm:$0xff]  }
  0x22   : > { %v1028_v58 = vcombine.high %v1020_v54, %v1020_v54  ;;  %v7723_v4 = vld [vmem:[%s11635_s1 + $0x1c0] ss:$16 sps:$4 sm:$0xff]   ;;  %v7724_v5 = vld [vmem:[%s11635_s1 + $0x1c8] ss:$16 sps:$4 sm:$0xff]   ;;  %v7725_v6 = vld [vmem:[%s11635_s1 + $0x1e4] ss:$16 sps:$4 sm:$0xff]   ;;  %v9213_v13 = vrot.slane %v1020_v54, %v9135_v49 }
  0x23   : > { %5154 = vmatpush1.bf16.msra.mxu0 %v7669_v22  ;;  %5687 = vmatpush1.bf16.msra.mxu1 %v7670_v23  ;;  %v7727_v7 = vld [vmem:[%s11635_s1 + $0x1ec] ss:$16 sps:$4 sm:$0xff]   ;;  %v7729_v8 = vld [vmem:[%s11635_s1 + $0x1e0] ss:$16 sps:$4 sm:$0xff]   ;;  %v7730_v9 = vld [vmem:[%s11635_s1 + $0x1e8] ss:$16 sps:$4 sm:$0xff]  }
  0x24   : > { %5155 = vmatprep.subr.bf16.mxu0 %v7671_v24  ;;  %5688 = vmatprep.subr.bf16.mxu1 %v7673_v25  ;;  %v1050_v60 = vrot.slane %v1028_v58, %v9135_v49  ;;  %v7733_v10 = vld [vmem:[%s11635_s1 + $0x204] ss:$16 sps:$4 sm:$0xff]   ;;  %v7736_v11 = vld [vmem:[%s11635_s1 + $0x20c] ss:$16 sps:$4 sm:$0xff]   ;;  %v7731_v12 = vld [vmem:[%s11635_s1 + $0x200] ss:$16 sps:$4 sm:$0xff]  }
  0x25   : > { %v7734_v14 = vld [vmem:[%s11635_s1 + $0x208] ss:$16 sps:$4 sm:$0xff]   ;;  %v7739_v15 = vld [vmem:[%s11635_s1 + $0x224] ss:$16 sps:$4 sm:$0xff]   ;;  %v7742_v16 = vld [vmem:[%s11635_s1 + $0x22c] ss:$16 sps:$4 sm:$0xff]  }
  0x26   : > { %5175 = vmatprep.mubr.bf16.mxu0 %v1050_v60  ;;  %5708 = vmatprep.mubr.bf16.mxu1 %v1050_v60  ;;  %v1060_v17 = vcombine.high %v1050_v60, %v1050_v60  ;;  %v7737_v18 = vld [vmem:[%s11635_s1 + $0x220] ss:$16 sps:$4 sm:$0xff]   ;;  %v7740_v19 = vld [vmem:[%s11635_s1 + $0x228] ss:$16 sps:$4 sm:$0xff]   ;;  %v7745_v20 = vld [vmem:[%s11635_s1 + $0x244] ss:$16 sps:$4 sm:$0xff]  }
  0x27   : > { %5156 = vmatpush1.bf16.msra.mxu0 %v7675_v26  ;;  %5689 = vmatpush1.bf16.msra.mxu1 %v7676_v27  ;;  %v7748_v21 = vld [vmem:[%s11635_s1 + $0x24c] ss:$16 sps:$4 sm:$0xff]   ;;  %v7743_v22 = vld [vmem:[%s11635_s1 + $0x240] ss:$16 sps:$4 sm:$0xff]   ;;  %v7746_v23 = vld [vmem:[%s11635_s1 + $0x248] ss:$16 sps:$4 sm:$0xff]  }
  0x28   : > { %5157 = vmatprep.subr.bf16.mxu0 %v7677_v28  ;;  %5690 = vmatprep.subr.bf16.mxu1 %v7679_v29  ;;  %v7751_v24 = vld [vmem:[%s11635_s1 + $0x264] ss:$16 sps:$4 sm:$0xff]   ;;  %v7754_v25 = vld [vmem:[%s11635_s1 + $0x26c] ss:$16 sps:$4 sm:$0xff]   ;;  %v7749_v26 = vld [vmem:[%s11635_s1 + $0x260] ss:$16 sps:$4 sm:$0xff]  }
  0x29   : > { %v7752_v27 = vld [vmem:[%s11635_s1 + $0x268] ss:$16 sps:$4 sm:$0xff]   ;;  %v7757_v28 = vld [vmem:[%s11635_s1 + $0x284] ss:$16 sps:$4 sm:$0xff]   ;;  %v7760_v29 = vld [vmem:[%s11635_s1 + $0x28c] ss:$16 sps:$4 sm:$0xff]  }
  0x2a   : > { %v7769_v36 = vld [vmem:[%s11635_s1 + $0x2c4] ss:$16 sps:$4 sm:$0xff]   ;;  %v7772_v37 = vld [vmem:[%s11635_s1 + $0x2cc] ss:$16 sps:$4 sm:$0xff]   ;;  %v7767_v38 = vld [vmem:[%s11635_s1 + $0x2c0] ss:$16 sps:$4 sm:$0xff]  }
  0x2b   : > { %5158 = vmatpush1.bf16.msra.mxu0 %v7681_v30  ;;  %5691 = vmatpush1.bf16.msra.mxu1 %v7682_v31  ;;  %v7755_v30 = vld [vmem:[%s11635_s1 + $0x280] ss:$16 sps:$4 sm:$0xff]   ;;  %v7758_v31 = vld [vmem:[%s11635_s1 + $0x288] ss:$16 sps:$4 sm:$0xff]   ;;  %v7802_v60 = vld [vmem:[%s11635_s1 + $0x36c] ss:$16 sps:$4 sm:$0xff]  }
  0x2c   : > { %5159 = vmatprep.subr.bf16.mxu0 %v7683_v32  ;;  %5692 = vmatprep.subr.bf16.mxu1 %v7685_v33  ;;  %v7763_v32 = vld [vmem:[%s11635_s1 + $0x2a4] ss:$16 sps:$4 sm:$0xff]   ;;  %v7766_v33 = vld [vmem:[%s11635_s1 + $0x2ac] ss:$16 sps:$4 sm:$0xff]   ;;  %v7773_v42 = vld [vmem:[%s11635_s1 + $0x2e0] ss:$16 sps:$4 sm:$0xff]  }
  0x2d   : > { %v7788_v54 = vld [vmem:[%s11635_s1 + $0x328] ss:$16 sps:$4 sm:$0xff]   ;;  %s7446_s23 = sshll.u32 %s8966_s22, 4  ;;  %s6556_s7 = scalar_lea.sflag [#allocation3], %s213_s14 }
  0x2e   : > { %v7794_v58 = vld [vmem:[%s11635_s1 + $0x348] ss:$16 sps:$4 sm:$0xff]   ;;  %s11592_s26 = scalar_lea.hbm %s11639_s5, %s7446_s23  ;;  %s8914_s22 = smov [#allocation2]  }
  0x2f   : > { %5160 = vmatpush1.bf16.msra.mxu0 %v7687_v34  ;;  %5693 = vmatpush1.bf16.msra.mxu1 %v7688_v35  ;;  %v7761_v34 = vld [vmem:[%s11635_s1 + $0x2a0] ss:$16 sps:$4 sm:$0xff]   ;;  %v7764_v35 = vld [vmem:[%s11635_s1 + $0x2a8] ss:$16 sps:$4 sm:$0xff]   ;;  %s8852_s9 = sshll.u32 %s8914_s22, 4  ;;  %s8853_s9 = int_to_ptr.vmem [resolvable:$false] %s8852_s9 }
  0x30   : > { %5161 = vmatprep.subr.bf16.mxu0 %v7689_v39  ;;  %5694 = vmatprep.subr.bf16.mxu1 %v7691_v40  ;;  %v7770_v39 = vld [vmem:[%s11635_s1 + $0x2c8] ss:$16 sps:$4 sm:$0xff]   ;;  %v7775_v40 = vld [vmem:[%s11635_s1 + $0x2e4] ss:$16 sps:$4 sm:$0xff]   ;;  %s8854_s10 = scalar_lea.vmem %s8853_s9, 32 }
  0x33   : > { %5162 = vmatpush1.bf16.msra.mxu0 %v7693_v41  ;;  %5695 = vmatpush1.bf16.msra.mxu1 %v7694_v44  ;;  %v7778_v41 = vld [vmem:[%s11635_s1 + $0x2ec] ss:$16 sps:$4 sm:$0xff]   ;;  %v7776_v44 = vld [vmem:[%s11635_s1 + $0x2e8] ss:$16 sps:$4 sm:$0xff]  }
  0x34   : > { %5163 = vmatprep.subr.bf16.mxu0 %v7695_v45  ;;  %5696 = vmatprep.subr.bf16.mxu1 %v7697_v46  ;;  %v7781_v45 = vld [vmem:[%s11635_s1 + $0x304] ss:$16 sps:$4 sm:$0xff]   ;;  %v7784_v46 = vld [vmem:[%s11635_s1 + $0x30c] ss:$16 sps:$4 sm:$0xff]  }
  0x37   : > { %5164 = vmatpush1.bf16.msra.mxu0 %v7699_v47  ;;  %5697 = vmatpush1.bf16.msra.mxu1 %v7700_v48  ;;  %v7779_v47 = vld [vmem:[%s11635_s1 + $0x300] ss:$16 sps:$4 sm:$0xff]   ;;  %v7782_v48 = vld [vmem:[%s11635_s1 + $0x308] ss:$16 sps:$4 sm:$0xff]  }
  0x38   : > { %5165 = vmatprep.subr.bf16.mxu0 %v7701_v50  ;;  %5698 = vmatprep.subr.bf16.mxu1 %v7703_v51  ;;  %v7787_v50 = vld [vmem:[%s11635_s1 + $0x324] ss:$16 sps:$4 sm:$0xff]   ;;  %v7790_v51 = vld [vmem:[%s11635_s1 + $0x32c] ss:$16 sps:$4 sm:$0xff]  }
  0x3b   : > { %5166 = vmatpush1.bf16.msra.mxu0 %v7705_v53  ;;  %5699 = vmatpush1.bf16.msra.mxu1 %v7706_v55  ;;  %v7785_v53 = vld [vmem:[%s11635_s1 + $0x320] ss:$16 sps:$4 sm:$0xff]   ;;  %v7793_v55 = vld [vmem:[%s11635_s1 + $0x344] ss:$16 sps:$4 sm:$0xff]  }
  0x3c   : > { %5167 = vmatprep.subr.bf16.mxu0 %v7707_v56  ;;  %5700 = vmatprep.subr.bf16.mxu1 %v7709_v57  ;;  %v7796_v56 = vld [vmem:[%s11635_s1 + $0x34c] ss:$16 sps:$4 sm:$0xff]   ;;  %v7791_v57 = vld [vmem:[%s11635_s1 + $0x340] ss:$16 sps:$4 sm:$0xff]  }
  0x3f   : > { %5168 = vmatpush1.bf16.msra.mxu0 %v7711_v59  ;;  %5701 = vmatpush1.bf16.msra.mxu1 %v7712_v61  ;;  %v7799_v59 = vld [vmem:[%s11635_s1 + $0x364] ss:$16 sps:$4 sm:$0xff]   ;;  %v7797_v61 = vld [vmem:[%s11635_s1 + $0x360] ss:$16 sps:$4 sm:$0xff]  }
  0x40   : > { %5169 = vmatprep.subr.bf16.mxu0 %v7713_v62  ;;  %5702 = vmatprep.subr.bf16.mxu1 %v7715_v63  ;;  %v7800_v62 = vld [vmem:[%s11635_s1 + $0x368] ss:$16 sps:$4 sm:$0xff]   ;;  %v7805_v63 = vld [vmem:[%s11635_s1 + $0x384] ss:$16 sps:$4 sm:$0xff]  }
  0x43   : > { %5170 = vmatpush1.bf16.msra.mxu0 %v7717_v0  ;;  %5703 = vmatpush1.bf16.msra.mxu1 %v7718_v1  ;;  %v7808_v0 = vld [vmem:[%s11635_s1 + $0x38c] ss:$16 sps:$4 sm:$0xff]   ;;  %v7803_v1 = vld [vmem:[%s11635_s1 + $0x380] ss:$16 sps:$4 sm:$0xff]  }
  0x44   : > { %5171 = vmatprep.subr.bf16.mxu0 %v7719_v2  ;;  %5704 = vmatprep.subr.bf16.mxu1 %v7721_v3  ;;  %v7806_v2 = vld [vmem:[%s11635_s1 + $0x388] ss:$16 sps:$4 sm:$0xff]   ;;  %v7811_v3 = vld [vmem:[%s11635_s1 + $0x3a4] ss:$16 sps:$4 sm:$0xff]  }
  0x47   : > { %5172 = vmatpush1.bf16.msra.mxu0 %v7723_v4  ;;  %5705 = vmatpush1.bf16.msra.mxu1 %v7724_v5  ;;  %v7814_v4 = vld [vmem:[%s11635_s1 + $0x3ac] ss:$16 sps:$4 sm:$0xff]   ;;  %v7809_v5 = vld [vmem:[%s11635_s1 + $0x3a0] ss:$16 sps:$4 sm:$0xff]  }
  0x48   : > { %5173 = vmatprep.subr.bf16.mxu0 %v7725_v6  ;;  %5706 = vmatprep.subr.bf16.mxu1 %v7727_v7  ;;  %v7812_v6 = vld [vmem:[%s11635_s1 + $0x3a8] ss:$16 sps:$4 sm:$0xff]   ;;  %v7817_v7 = vld [vmem:[%s11635_s1 + $0x3c4] ss:$16 sps:$4 sm:$0xff]  }
  0x4b   : > { %5174 = vmatpush1.bf16.msra.mxu0 %v7729_v8  ;;  %5707 = vmatpush1.bf16.msra.mxu1 %v7730_v9  ;;  %v7820_v8 = vld [vmem:[%s11635_s1 + $0x3cc] ss:$16 sps:$4 sm:$0xff]   ;;  %v1013_v9 = vcombine.high %v9144_v52, %v9144_v52 }
  0x4c   : > { %5184 = vmatprep.subr.bf16.mxu0 %v7733_v10  ;;  %5717 = vmatprep.subr.bf16.mxu1 %v7736_v11  ;;  %v7815_v10 = vld [vmem:[%s11635_s1 + $0x3c0] ss:$16 sps:$4 sm:$0xff]   ;;  %v7818_v11 = vld [vmem:[%s11635_s1 + $0x3c8] ss:$16 sps:$4 sm:$0xff]   ;;  %v7826_v52 = vld [vmem:[%s11635_s1 + $0x3ec] ss:$16 sps:$4 sm:$0xff]  }
  0x4e   : > { %5176 = vmatmul.mubr.bf16.vlgmr.msra.gmra.mrb[0].mxu0 %v9213_v13  ;;  %5709 = vmatmul.mubr.bf16.vlgmr.msra.gmra.mrb[0].mxu1 %v9213_v13 }
  0x4f   : > { %5185 = vmatpush1.bf16.msra.mxu0 %v7731_v12  ;;  %5718 = vmatpush1.bf16.msra.mxu1 %v7734_v14  ;;  %v7823_v12 = vld [vmem:[%s11635_s1 + $0x3e4] ss:$16 sps:$4 sm:$0xff]   ;;  %v9397_v14 = vrot.slane %v1013_v9, %v9135_v49  ;;  %v7902_v9 = vld [vmem:[%s11635_s1 + $0x588] ss:$16 sps:$4 sm:$0xff]  }
  0x50   : > { %5186 = vmatprep.subr.bf16.mxu0 %v7739_v15  ;;  %5719 = vmatprep.subr.bf16.mxu1 %v7742_v16  ;;  %v7821_v15 = vld [vmem:[%s11635_s1 + $0x3e0] ss:$16 sps:$4 sm:$0xff]   ;;  %v7824_v16 = vld [vmem:[%s11635_s1 + $0x3e8] ss:$16 sps:$4 sm:$0xff]  }
  0x51   : > { %5216 = vmatprep.mubr.bf16.mxu0 %v1060_v17  ;;  %5749 = vmatprep.mubr.bf16.mxu1 %v1060_v17  ;;  %v7829_v17 = vld [vmem:[%s11635_s1 + $0x404] ss:$16 sps:$4 sm:$0xff]  }
  0x53   : > { %5187 = vmatpush1.bf16.msra.mxu0 %v7737_v18  ;;  %5720 = vmatpush1.bf16.msra.mxu1 %v7740_v19  ;;  %v7832_v18 = vld [vmem:[%s11635_s1 + $0x40c] ss:$16 sps:$4 sm:$0xff]   ;;  %v1029_v19 = vcombine.high %v9397_v14, %v9397_v14 }
  0x54   : > { %5188 = vmatprep.subr.bf16.mxu0 %v7745_v20  ;;  %5721 = vmatprep.subr.bf16.mxu1 %v7748_v21  ;;  %v7827_v20 = vld [vmem:[%s11635_s1 + $0x400] ss:$16 sps:$4 sm:$0xff]   ;;  %v1058_v21 = vcombine.high %v9213_v13, %v9213_v13 }
  0x55   : > { %v7833_v13 = vld [vmem:[%s11635_s1 + $0x420] ss:$16 sps:$4 sm:$0xff]  }
  0x57   : > { %5189 = vmatpush1.bf16.msra.mxu0 %v7743_v22  ;;  %5722 = vmatpush1.bf16.msra.mxu1 %v7746_v23  ;;  %v7830_v22 = vld [vmem:[%s11635_s1 + $0x408] ss:$16 sps:$4 sm:$0xff]   ;;  %v7835_v23 = vld [vmem:[%s11635_s1 + $0x424] ss:$16 sps:$4 sm:$0xff]  }
  0x58   : > { %5190 = vmatprep.subr.bf16.mxu0 %v7751_v24  ;;  %5723 = vmatprep.subr.bf16.mxu1 %v7754_v25  ;;  %v7838_v24 = vld [vmem:[%s11635_s1 + $0x42c] ss:$16 sps:$4 sm:$0xff]   ;;  %v9428_v25 = vrot.slane %v1029_v19, %v9135_v49  ;;  %v7919_v19 = vld [vmem:[%s11635_s1 + $0x5e4] ss:$16 sps:$4 sm:$0xff]  }
  0x5b   : > { %5191 = vmatpush1.bf16.msra.mxu0 %v7749_v26  ;;  %5724 = vmatpush1.bf16.msra.mxu1 %v7752_v27  ;;  %v7836_v26 = vld [vmem:[%s11635_s1 + $0x428] ss:$16 sps:$4 sm:$0xff]   ;;  %v7841_v27 = vld [vmem:[%s11635_s1 + $0x444] ss:$16 sps:$4 sm:$0xff]  }
  0x5c   : > { %5192 = vmatprep.subr.bf16.mxu0 %v7757_v28  ;;  %5725 = vmatprep.subr.bf16.mxu1 %v7760_v29  ;;  %v7844_v28 = vld [vmem:[%s11635_s1 + $0x44c] ss:$16 sps:$4 sm:$0xff]   ;;  %v7839_v29 = vld [vmem:[%s11635_s1 + $0x440] ss:$16 sps:$4 sm:$0xff]  }
  0x5f   : > { %5193 = vmatpush1.bf16.msra.mxu0 %v7755_v30  ;;  %5726 = vmatpush1.bf16.msra.mxu1 %v7758_v31  ;;  %v7842_v30 = vld [vmem:[%s11635_s1 + $0x448] ss:$16 sps:$4 sm:$0xff]   ;;  %v7847_v31 = vld [vmem:[%s11635_s1 + $0x464] ss:$16 sps:$4 sm:$0xff]  }
  0x60   : > { %5194 = vmatprep.subr.bf16.mxu0 %v7763_v32  ;;  %5727 = vmatprep.subr.bf16.mxu1 %v7766_v33  ;;  %v7850_v32 = vld [vmem:[%s11635_s1 + $0x46c] ss:$16 sps:$4 sm:$0xff]   ;;  %v7845_v33 = vld [vmem:[%s11635_s1 + $0x460] ss:$16 sps:$4 sm:$0xff]  }
  0x63   : > { %5195 = vmatpush1.bf16.msra.mxu0 %v7761_v34  ;;  %5728 = vmatpush1.bf16.msra.mxu1 %v7764_v35  ;;  %v7848_v34 = vld [vmem:[%s11635_s1 + $0x468] ss:$16 sps:$4 sm:$0xff]   ;;  %v7853_v35 = vld [vmem:[%s11635_s1 + $0x484] ss:$16 sps:$4 sm:$0xff]  }
  0x64   : > { %5196 = vmatprep.subr.bf16.mxu0 %v7769_v36  ;;  %5729 = vmatprep.subr.bf16.mxu1 %v7772_v37  ;;  %v7856_v36 = vld [vmem:[%s11635_s1 + $0x48c] ss:$16 sps:$4 sm:$0xff]   ;;  %v7851_v37 = vld [vmem:[%s11635_s1 + $0x480] ss:$16 sps:$4 sm:$0xff]  }
  0x67   : > { %5197 = vmatpush1.bf16.msra.mxu0 %v7767_v38  ;;  %5730 = vmatpush1.bf16.msra.mxu1 %v7770_v39  ;;  %v7854_v38 = vld [vmem:[%s11635_s1 + $0x488] ss:$16 sps:$4 sm:$0xff]   ;;  %v7859_v39 = vld [vmem:[%s11635_s1 + $0x4a4] ss:$16 sps:$4 sm:$0xff]  }
  0x68   : > { %5198 = vmatprep.subr.bf16.mxu0 %v7775_v40  ;;  %5731 = vmatprep.subr.bf16.mxu1 %v7778_v41  ;;  %v7862_v40 = vld [vmem:[%s11635_s1 + $0x4ac] ss:$16 sps:$4 sm:$0xff]   ;;  %v7857_v41 = vld [vmem:[%s11635_s1 + $0x4a0] ss:$16 sps:$4 sm:$0xff]  }
  0x6b   : > { %5199 = vmatpush1.bf16.msra.mxu0 %v7773_v42  ;;  %5732 = vmatpush1.bf16.msra.mxu1 %v7776_v44  ;;  %v7860_v42 = vld [vmem:[%s11635_s1 + $0x4a8] ss:$16 sps:$4 sm:$0xff]   ;;  %v7865_v44 = vld [vmem:[%s11635_s1 + $0x4c4] ss:$16 sps:$4 sm:$0xff]  }
  0x6c   : > { %5200 = vmatprep.subr.bf16.mxu0 %v7781_v45  ;;  %5733 = vmatprep.subr.bf16.mxu1 %v7784_v46  ;;  %v7868_v45 = vld [vmem:[%s11635_s1 + $0x4cc] ss:$16 sps:$4 sm:$0xff]   ;;  %v7863_v46 = vld [vmem:[%s11635_s1 + $0x4c0] ss:$16 sps:$4 sm:$0xff]  }
  0x6f   : > { %5201 = vmatpush1.bf16.msra.mxu0 %v7779_v47  ;;  %5734 = vmatpush1.bf16.msra.mxu1 %v7782_v48  ;;  %v7866_v47 = vld [vmem:[%s11635_s1 + $0x4c8] ss:$16 sps:$4 sm:$0xff]   ;;  %v7871_v48 = vld [vmem:[%s11635_s1 + $0x4e4] ss:$16 sps:$4 sm:$0xff]  }
  0x70   : > { %5202 = vmatprep.subr.bf16.mxu0 %v7787_v50  ;;  %5735 = vmatprep.subr.bf16.mxu1 %v7790_v51  ;;  %v7874_v50 = vld [vmem:[%s11635_s1 + $0x4ec] ss:$16 sps:$4 sm:$0xff]   ;;  %v7869_v51 = vld [vmem:[%s11635_s1 + $0x4e0] ss:$16 sps:$4 sm:$0xff]  }
  0x73   : > { %5203 = vmatpush1.bf16.msra.mxu0 %v7785_v53  ;;  %5736 = vmatpush1.bf16.msra.mxu1 %v7788_v54  ;;  %v7872_v53 = vld [vmem:[%s11635_s1 + $0x4e8] ss:$16 sps:$4 sm:$0xff]   ;;  %v7877_v54 = vld [vmem:[%s11635_s1 + $0x504] ss:$16 sps:$4 sm:$0xff]  }
  0x74   : > { %5204 = vmatprep.subr.bf16.mxu0 %v7793_v55  ;;  %5737 = vmatprep.subr.bf16.mxu1 %v7796_v56  ;;  %v7880_v55 = vld [vmem:[%s11635_s1 + $0x50c] ss:$16 sps:$4 sm:$0xff]   ;;  %v7875_v56 = vld [vmem:[%s11635_s1 + $0x500] ss:$16 sps:$4 sm:$0xff]  }
  0x77   : > { %5205 = vmatpush1.bf16.msra.mxu0 %v7791_v57  ;;  %5738 = vmatpush1.bf16.msra.mxu1 %v7794_v58  ;;  %v7878_v57 = vld [vmem:[%s11635_s1 + $0x508] ss:$16 sps:$4 sm:$0xff]   ;;  %v7883_v58 = vld [vmem:[%s11635_s1 + $0x524] ss:$16 sps:$4 sm:$0xff]  }
  0x78   : > { %5206 = vmatprep.subr.bf16.mxu0 %v7799_v59  ;;  %5739 = vmatprep.subr.bf16.mxu1 %v7802_v60  ;;  %v7886_v59 = vld [vmem:[%s11635_s1 + $0x52c] ss:$16 sps:$4 sm:$0xff]   ;;  %v7881_v60 = vld [vmem:[%s11635_s1 + $0x520] ss:$16 sps:$4 sm:$0xff]  }
  0x7b   : > { %5207 = vmatpush1.bf16.msra.mxu0 %v7797_v61  ;;  %5740 = vmatpush1.bf16.msra.mxu1 %v7800_v62  ;;  %v7884_v61 = vld [vmem:[%s11635_s1 + $0x528] ss:$16 sps:$4 sm:$0xff]   ;;  %v7889_v62 = vld [vmem:[%s11635_s1 + $0x544] ss:$16 sps:$4 sm:$0xff]  }
  0x7c   : > { %5208 = vmatprep.subr.bf16.mxu0 %v7805_v63  ;;  %5741 = vmatprep.subr.bf16.mxu1 %v7808_v0  ;;  %v7892_v63 = vld [vmem:[%s11635_s1 + $0x54c] ss:$16 sps:$4 sm:$0xff]   ;;  %v7887_v0 = vld [vmem:[%s11635_s1 + $0x540] ss:$16 sps:$4 sm:$0xff]  }
  0x7f   : > { %5209 = vmatpush1.bf16.msra.mxu0 %v7803_v1  ;;  %5742 = vmatpush1.bf16.msra.mxu1 %v7806_v2  ;;  %v7890_v1 = vld [vmem:[%s11635_s1 + $0x548] ss:$16 sps:$4 sm:$0xff]   ;;  %v7895_v2 = vld [vmem:[%s11635_s1 + $0x564] ss:$16 sps:$4 sm:$0xff]  }
  0x80   : > { %5210 = vmatprep.subr.bf16.mxu0 %v7811_v3  ;;  %5743 = vmatprep.subr.bf16.mxu1 %v7814_v4  ;;  %v7898_v3 = vld [vmem:[%s11635_s1 + $0x56c] ss:$16 sps:$4 sm:$0xff]   ;;  %v7893_v4 = vld [vmem:[%s11635_s1 + $0x560] ss:$16 sps:$4 sm:$0xff]  }
  0x83   : > { %5211 = vmatpush1.bf16.msra.mxu0 %v7809_v5  ;;  %5744 = vmatpush1.bf16.msra.mxu1 %v7812_v6  ;;  %v7896_v5 = vld [vmem:[%s11635_s1 + $0x568] ss:$16 sps:$4 sm:$0xff]   ;;  %v7901_v6 = vld [vmem:[%s11635_s1 + $0x584] ss:$16 sps:$4 sm:$0xff]  }
  0x84   : > { %5212 = vmatprep.subr.bf16.mxu0 %v7817_v7  ;;  %5745 = vmatprep.subr.bf16.mxu1 %v7820_v8  ;;  %v7904_v7 = vld [vmem:[%s11635_s1 + $0x58c] ss:$16 sps:$4 sm:$0xff]   ;;  %v7899_v8 = vld [vmem:[%s11635_s1 + $0x580] ss:$16 sps:$4 sm:$0xff]  }
  0x87   : > { %5213 = vmatpush1.bf16.msra.mxu0 %v7815_v10  ;;  %5746 = vmatpush1.bf16.msra.mxu1 %v7818_v11  ;;  %v7907_v10 = vld [vmem:[%s11635_s1 + $0x5a4] ss:$16 sps:$4 sm:$0xff]   ;;  %v7910_v11 = vld [vmem:[%s11635_s1 + $0x5ac] ss:$16 sps:$4 sm:$0xff]  }
  0x88   : > { %5214 = vmatprep.subr.bf16.mxu0 %v7823_v12  ;;  %5747 = vmatprep.subr.bf16.mxu1 %v7826_v52  ;;  %v7905_v12 = vld [vmem:[%s11635_s1 + $0x5a0] ss:$16 sps:$4 sm:$0xff]   ;;  %v7908_v52 = vld [vmem:[%s11635_s1 + $0x5a8] ss:$16 sps:$4 sm:$0xff]  }
  0x8b   : > { %5215 = vmatpush1.bf16.msra.mxu0 %v7821_v15  ;;  %5748 = vmatpush1.bf16.msra.mxu1 %v7824_v16  ;;  %v7913_v15 = vld [vmem:[%s11635_s1 + $0x5c4] ss:$16 sps:$4 sm:$0xff]   ;;  %v7916_v16 = vld [vmem:[%s11635_s1 + $0x5cc] ss:$16 sps:$4 sm:$0xff]  }
  0x8c   : > { %5225 = vmatprep.subr.bf16.mxu0 %v7829_v17  ;;  %5758 = vmatprep.subr.bf16.mxu1 %v7832_v18  ;;  %v7911_v17 = vld [vmem:[%s11635_s1 + $0x5c0] ss:$16 sps:$4 sm:$0xff]   ;;  %v7914_v18 = vld [vmem:[%s11635_s1 + $0x5c8] ss:$16 sps:$4 sm:$0xff]  }
  0x8e   : > { %5217 = vmatmul.mubr.bf16.vlgmr.msra.gmra.mrb[0].mxu0 %v1058_v21  ;;  %5750 = vmatmul.mubr.bf16.vlgmr.msra.gmra.mrb[0].mxu1 %v1058_v21  ;;  %v7917_v21 = vld [vmem:[%s11635_s1 + $0x5e0] ss:$16 sps:$4 sm:$0xff]  }
  0x8f   : > { %5226 = vmatpush1.bf16.msra.mxu0 %v7827_v20  ;;  %5759 = vmatpush1.bf16.msra.mxu1 %v7830_v22  ;;  %v7922_v20 = vld [vmem:[%s11635_s1 + $0x5ec] ss:$16 sps:$4 sm:$0xff]   ;;  %v7920_v22 = vld [vmem:[%s11635_s1 + $0x5e8] ss:$16 sps:$4 sm:$0xff]  }
  0x90   : > { %5227 = vmatprep.subr.bf16.mxu0 %v7835_v23  ;;  %5760 = vmatprep.subr.bf16.mxu1 %v7838_v24  ;;  %v7926_v23 = vld [vmem:[%s11635_s1 + $0x604] ss:$16 sps:$4 sm:$0xff]   ;;  %v7929_v24 = vld [vmem:[%s11635_s1 + $0x60c] ss:$16 sps:$4 sm:$0xff]  }
  0x91   : > { %5257 = vmatprep.mubr.bf16.mxu0 %v9428_v25  ;;  %5790 = vmatprep.mubr.bf16.mxu1 %v9428_v25 }
  0x93   : > { %5228 = vmatpush1.bf16.msra.mxu0 %v7833_v13  ;;  %5761 = vmatpush1.bf16.msra.mxu1 %v7836_v26  ;;  %v7924_v13 = vld [vmem:[%s11635_s1 + $0x600] ss:$16 sps:$4 sm:$0xff]   ;;  %v9617_v26 = vrot.slane %v9397_v14, %v9135_v49  ;;  %v1061_v14 = vcombine.high %v9428_v25, %v9428_v25  ;;  %v7938_v25 = vld [vmem:[%s11635_s1 + $0x644] ss:$16 sps:$4 sm:$0xff]  }
  0x94   : > { %5229 = vmatprep.subr.bf16.mxu0 %v7841_v27  ;;  %5762 = vmatprep.subr.bf16.mxu1 %v7844_v28  ;;  %v7927_v27 = vld [vmem:[%s11635_s1 + $0x608] ss:$16 sps:$4 sm:$0xff]   ;;  %v7932_v28 = vld [vmem:[%s11635_s1 + $0x624] ss:$16 sps:$4 sm:$0xff]  }
  0x97   : > { %5230 = vmatpush1.bf16.msra.mxu0 %v7839_v29  ;;  %5763 = vmatpush1.bf16.msra.mxu1 %v7842_v30  ;;  %v7935_v29 = vld [vmem:[%s11635_s1 + $0x62c] ss:$16 sps:$4 sm:$0xff]   ;;  %v7930_v30 = vld [vmem:[%s11635_s1 + $0x620] ss:$16 sps:$4 sm:$0xff]  }
  0x98   : > { %5231 = vmatprep.subr.bf16.mxu0 %v7847_v31  ;;  %5764 = vmatprep.subr.bf16.mxu1 %v7850_v32  ;;  %v7933_v31 = vld [vmem:[%s11635_s1 + $0x628] ss:$16 sps:$4 sm:$0xff]   ;;  %v7941_v32 = vld [vmem:[%s11635_s1 + $0x64c] ss:$16 sps:$4 sm:$0xff]  }
  0x9b   : > { %5232 = vmatpush1.bf16.msra.mxu0 %v7845_v33  ;;  %5765 = vmatpush1.bf16.msra.mxu1 %v7848_v34  ;;  %v7936_v33 = vld [vmem:[%s11635_s1 + $0x640] ss:$16 sps:$4 sm:$0xff]   ;;  %v7939_v34 = vld [vmem:[%s11635_s1 + $0x648] ss:$16 sps:$4 sm:$0xff]  }
  0x9c   : > { %5233 = vmatprep.subr.bf16.mxu0 %v7853_v35  ;;  %5766 = vmatprep.subr.bf16.mxu1 %v7856_v36  ;;  %v7944_v35 = vld [vmem:[%s11635_s1 + $0x664] ss:$16 sps:$4 sm:$0xff]   ;;  %v7947_v36 = vld [vmem:[%s11635_s1 + $0x66c] ss:$16 sps:$4 sm:$0xff]  }
  0x9f   : > { %5234 = vmatpush1.bf16.msra.mxu0 %v7851_v37  ;;  %5767 = vmatpush1.bf16.msra.mxu1 %v7854_v38  ;;  %v7942_v37 = vld [vmem:[%s11635_s1 + $0x660] ss:$16 sps:$4 sm:$0xff]   ;;  %v7945_v38 = vld [vmem:[%s11635_s1 + $0x668] ss:$16 sps:$4 sm:$0xff]  }
  0xa0   : > { %5235 = vmatprep.subr.bf16.mxu0 %v7859_v39  ;;  %5768 = vmatprep.subr.bf16.mxu1 %v7862_v40  ;;  %v7950_v39 = vld [vmem:[%s11635_s1 + $0x684] ss:$16 sps:$4 sm:$0xff]   ;;  %v7953_v40 = vld [vmem:[%s11635_s1 + $0x68c] ss:$16 sps:$4 sm:$0xff]  }
  0xa3   : > { %5236 = vmatpush1.bf16.msra.mxu0 %v7857_v41  ;;  %5769 = vmatpush1.bf16.msra.mxu1 %v7860_v42  ;;  %v7948_v41 = vld [vmem:[%s11635_s1 + $0x680] ss:$16 sps:$4 sm:$0xff]   ;;  %v7951_v42 = vld [vmem:[%s11635_s1 + $0x688] ss:$16 sps:$4 sm:$0xff]  }
  0xa4   : > { %5237 = vmatprep.subr.bf16.mxu0 %v7865_v44  ;;  %5770 = vmatprep.subr.bf16.mxu1 %v7868_v45  ;;  %v7956_v44 = vld [vmem:[%s11635_s1 + $0x6a4] ss:$16 sps:$4 sm:$0xff]   ;;  %v7959_v45 = vld [vmem:[%s11635_s1 + $0x6ac] ss:$16 sps:$4 sm:$0xff]  }
  0xa7   : > { %5238 = vmatpush1.bf16.msra.mxu0 %v7863_v46  ;;  %5771 = vmatpush1.bf16.msra.mxu1 %v7866_v47  ;;  %v7954_v46 = vld [vmem:[%s11635_s1 + $0x6a0] ss:$16 sps:$4 sm:$0xff]   ;;  %v7957_v47 = vld [vmem:[%s11635_s1 + $0x6a8] ss:$16 sps:$4 sm:$0xff]  }
  0xa8   : > { %5239 = vmatprep.subr.bf16.mxu0 %v7871_v48  ;;  %5772 = vmatprep.subr.bf16.mxu1 %v7874_v50  ;;  %v7962_v48 = vld [vmem:[%s11635_s1 + $0x6c4] ss:$16 sps:$4 sm:$0xff]   ;;  %v7965_v50 = vld [vmem:[%s11635_s1 + $0x6cc] ss:$16 sps:$4 sm:$0xff]  }
  0xab   : > { %5240 = vmatpush1.bf16.msra.mxu0 %v7869_v51  ;;  %5773 = vmatpush1.bf16.msra.mxu1 %v7872_v53  ;;  %v7960_v51 = vld [vmem:[%s11635_s1 + $0x6c0] ss:$16 sps:$4 sm:$0xff]   ;;  %v7963_v53 = vld [vmem:[%s11635_s1 + $0x6c8] ss:$16 sps:$4 sm:$0xff]  }
  0xac   : > { %5241 = vmatprep.subr.bf16.mxu0 %v7877_v54  ;;  %5774 = vmatprep.subr.bf16.mxu1 %v7880_v55  ;;  %v7968_v54 = vld [vmem:[%s11635_s1 + $0x6e4] ss:$16 sps:$4 sm:$0xff]   ;;  %v7971_v55 = vld [vmem:[%s11635_s1 + $0x6ec] ss:$16 sps:$4 sm:$0xff]  }
  0xaf   : > { %5242 = vmatpush1.bf16.msra.mxu0 %v7875_v56  ;;  %5775 = vmatpush1.bf16.msra.mxu1 %v7878_v57  ;;  %v7966_v56 = vld [vmem:[%s11635_s1 + $0x6e0] ss:$16 sps:$4 sm:$0xff]   ;;  %v7969_v57 = vld [vmem:[%s11635_s1 + $0x6e8] ss:$16 sps:$4 sm:$0xff]  }
  0xb0   : > { %5243 = vmatprep.subr.bf16.mxu0 %v7883_v58  ;;  %5776 = vmatprep.subr.bf16.mxu1 %v7886_v59  ;;  %v7974_v58 = vld [vmem:[%s11635_s1 + $0x704] ss:$16 sps:$4 sm:$0xff]   ;;  %v7977_v59 = vld [vmem:[%s11635_s1 + $0x70c] ss:$16 sps:$4 sm:$0xff]  }
  0xb3   : > { %5244 = vmatpush1.bf16.msra.mxu0 %v7881_v60  ;;  %5777 = vmatpush1.bf16.msra.mxu1 %v7884_v61  ;;  %v7972_v60 = vld [vmem:[%s11635_s1 + $0x700] ss:$16 sps:$4 sm:$0xff]   ;;  %v7975_v61 = vld [vmem:[%s11635_s1 + $0x708] ss:$16 sps:$4 sm:$0xff]  }
  0xb4   : > { %5245 = vmatprep.subr.bf16.mxu0 %v7889_v62  ;;  %5778 = vmatprep.subr.bf16.mxu1 %v7892_v63  ;;  %v7980_v62 = vld [vmem:[%s11635_s1 + $0x724] ss:$16 sps:$4 sm:$0xff]   ;;  %v7983_v63 = vld [vmem:[%s11635_s1 + $0x72c] ss:$16 sps:$4 sm:$0xff]  }
  0xb7   : > { %5246 = vmatpush1.bf16.msra.mxu0 %v7887_v0  ;;  %5779 = vmatpush1.bf16.msra.mxu1 %v7890_v1  ;;  %v7978_v0 = vld [vmem:[%s11635_s1 + $0x720] ss:$16 sps:$4 sm:$0xff]   ;;  %v7981_v1 = vld [vmem:[%s11635_s1 + $0x728] ss:$16 sps:$4 sm:$0xff]  }
  0xb8   : > { %5247 = vmatprep.subr.bf16.mxu0 %v7895_v2  ;;  %5780 = vmatprep.subr.bf16.mxu1 %v7898_v3  ;;  %v7986_v2 = vld [vmem:[%s11635_s1 + $0x744] ss:$16 sps:$4 sm:$0xff]   ;;  %v7989_v3 = vld [vmem:[%s11635_s1 + $0x74c] ss:$16 sps:$4 sm:$0xff]  }
  0xbb   : > { %5248 = vmatpush1.bf16.msra.mxu0 %v7893_v4  ;;  %5781 = vmatpush1.bf16.msra.mxu1 %v7896_v5  ;;  %v7984_v4 = vld [vmem:[%s11635_s1 + $0x740] ss:$16 sps:$4 sm:$0xff]   ;;  %v7987_v5 = vld [vmem:[%s11635_s1 + $0x748] ss:$16 sps:$4 sm:$0xff]  }
  0xbc   : > { %5249 = vmatprep.subr.bf16.mxu0 %v7901_v6  ;;  %5782 = vmatprep.subr.bf16.mxu1 %v7904_v7  ;;  %v7992_v6 = vld [vmem:[%s11635_s1 + $0x764] ss:$16 sps:$4 sm:$0xff]   ;;  %v7995_v7 = vld [vmem:[%s11635_s1 + $0x76c] ss:$16 sps:$4 sm:$0xff]  }
  0xbf   : > { %5250 = vmatpush1.bf16.msra.mxu0 %v7899_v8  ;;  %5783 = vmatpush1.bf16.msra.mxu1 %v7902_v9  ;;  %v7990_v8 = vld [vmem:[%s11635_s1 + $0x760] ss:$16 sps:$4 sm:$0xff]   ;;  %v7993_v9 = vld [vmem:[%s11635_s1 + $0x768] ss:$16 sps:$4 sm:$0xff]  }
  0xc0   : > { %5251 = vmatprep.subr.bf16.mxu0 %v7907_v10  ;;  %5784 = vmatprep.subr.bf16.mxu1 %v7910_v11  ;;  %v7998_v10 = vld [vmem:[%s11635_s1 + $0x784] ss:$16 sps:$4 sm:$0xff]   ;;  %v8001_v11 = vld [vmem:[%s11635_s1 + $0x78c] ss:$16 sps:$4 sm:$0xff]  }
  0xc3   : > { %5252 = vmatpush1.bf16.msra.mxu0 %v7905_v12  ;;  %5785 = vmatpush1.bf16.msra.mxu1 %v7908_v52  ;;  %v7996_v12 = vld [vmem:[%s11635_s1 + $0x780] ss:$16 sps:$4 sm:$0xff]   ;;  %v7999_v52 = vld [vmem:[%s11635_s1 + $0x788] ss:$16 sps:$4 sm:$0xff]  }
  0xc4   : > { %5253 = vmatprep.subr.bf16.mxu0 %v7913_v15  ;;  %5786 = vmatprep.subr.bf16.mxu1 %v7916_v16  ;;  %v8004_v15 = vld [vmem:[%s11635_s1 + $0x7a4] ss:$16 sps:$4 sm:$0xff]   ;;  %v8007_v16 = vld [vmem:[%s11635_s1 + $0x7ac] ss:$16 sps:$4 sm:$0xff]  }
  0xc7   : > { %5254 = vmatpush1.bf16.msra.mxu0 %v7911_v17  ;;  %5787 = vmatpush1.bf16.msra.mxu1 %v7914_v18  ;;  %v8002_v17 = vld [vmem:[%s11635_s1 + $0x7a0] ss:$16 sps:$4 sm:$0xff]   ;;  %v8005_v18 = vld [vmem:[%s11635_s1 + $0x7a8] ss:$16 sps:$4 sm:$0xff]  }
  0xc8   : > { %5255 = vmatprep.subr.bf16.mxu0 %v7919_v19  ;;  %5788 = vmatprep.subr.bf16.mxu1 %v7922_v20  ;;  %v8010_v19 = vld [vmem:[%s11635_s1 + $0x7c4] ss:$16 sps:$4 sm:$0xff]   ;;  %v8013_v20 = vld [vmem:[%s11635_s1 + $0x7cc] ss:$16 sps:$4 sm:$0xff]  }
  0xcb   : > { %5256 = vmatpush1.bf16.msra.mxu0 %v7917_v21  ;;  %5789 = vmatpush1.bf16.msra.mxu1 %v7920_v22  ;;  %v9789_v21 = vld.sshfl [vmem:[%s9132_s17 + $0x8] sm:$0xff pattern:$0x75316420]  ;;  %v8008_v22 = vld [vmem:[%s11635_s1 + $0x7c0] ss:$16 sps:$4 sm:$0xff]  }
  0xcc   : > { %5266 = vmatprep.subr.bf16.mxu0 %v7926_v23  ;;  %5799 = vmatprep.subr.bf16.mxu1 %v7929_v24  ;;  %v8011_v23 = vld [vmem:[%s11635_s1 + $0x7c8] ss:$16 sps:$4 sm:$0xff]   ;;  %v8016_v24 = vld [vmem:[%s11635_s1 + $0x7e4] ss:$16 sps:$4 sm:$0xff]  }
  0xce   : > { %5258 = vmatmul.mubr.bf16.vlgmr.msra.gmra.mrb[0].mxu0 %v9617_v26  ;;  %5791 = vmatmul.mubr.bf16.vlgmr.msra.gmra.mrb[0].mxu1 %v9617_v26 }
  0xcf   : > { %5267 = vmatpush1.bf16.msra.mxu0 %v7924_v13  ;;  %5800 = vmatpush1.bf16.msra.mxu1 %v7927_v27  ;;  %v8019_v13 = vld [vmem:[%s11635_s1 + $0x7ec] ss:$16 sps:$4 sm:$0xff]   ;;  %v8014_v27 = vld [vmem:[%s11635_s1 + $0x7e0] ss:$16 sps:$4 sm:$0xff]  }
  0xd0   : > { %5268 = vmatprep.subr.bf16.mxu0 %v7932_v28  ;;  %5801 = vmatprep.subr.bf16.mxu1 %v7935_v29  ;;  %v8017_v28 = vld [vmem:[%s11635_s1 + $0x7e8] ss:$16 sps:$4 sm:$0xff]   ;;  %v8022_v29 = vld [vmem:[%s11635_s1 + $0x804] ss:$16 sps:$4 sm:$0xff]  }
  0xd1   : > { %5298 = vmatprep.mubr.bf16.mxu0 %v1061_v14  ;;  %5831 = vmatprep.mubr.bf16.mxu1 %v1061_v14  ;;  %v8025_v14 = vld [vmem:[%s11635_s1 + $0x80c] ss:$16 sps:$4 sm:$0xff]  }
  0xd3   : > { %5269 = vmatpush1.bf16.msra.mxu0 %v7930_v30  ;;  %5802 = vmatpush1.bf16.msra.mxu1 %v7933_v31  ;;  %v1077_v30 = vcombine.high %v9789_v21, %v9789_v21  ;;  %v1059_v31 = vcombine.high %v9617_v26, %v9617_v26  ;;  %v8031_v26 = vld [vmem:[%s11635_s1 + $0x82c] ss:$16 sps:$4 sm:$0xff]  }
  0xd4   : > { %5270 = vmatprep.subr.bf16.mxu0 %v7938_v25  ;;  %5803 = vmatprep.subr.bf16.mxu1 %v7941_v32  ;;  %v8020_v25 = vld [vmem:[%s11635_s1 + $0x800] ss:$16 sps:$4 sm:$0xff]   ;;  %v8023_v32 = vld [vmem:[%s11635_s1 + $0x808] ss:$16 sps:$4 sm:$0xff]  }
  0xd7   : > { %5271 = vmatpush1.bf16.msra.mxu0 %v7936_v33  ;;  %5804 = vmatpush1.bf16.msra.mxu1 %v7939_v34  ;;  %v8028_v33 = vld [vmem:[%s11635_s1 + $0x824] ss:$16 sps:$4 sm:$0xff]   ;;  %v9832_v34 = vrot.slane %v1077_v30, %v9135_v49 }
  0xd8   : > { %5272 = vmatprep.subr.bf16.mxu0 %v7944_v35  ;;  %5805 = vmatprep.subr.bf16.mxu1 %v7947_v36  ;;  %v8026_v35 = vld [vmem:[%s11635_s1 + $0x820] ss:$16 sps:$4 sm:$0xff]   ;;  %v8029_v36 = vld [vmem:[%s11635_s1 + $0x828] ss:$16 sps:$4 sm:$0xff]   ;;  %v8112_v30 = vld [vmem:[%s11635_s1 + $0x9e4] ss:$16 sps:$4 sm:$0xff]  }
  0xdb   : > { %5273 = vmatpush1.bf16.msra.mxu0 %v7942_v37  ;;  %5806 = vmatpush1.bf16.msra.mxu1 %v7945_v38  ;;  %v8034_v37 = vld [vmem:[%s11635_s1 + $0x844] ss:$16 sps:$4 sm:$0xff]   ;;  %v8037_v38 = vld [vmem:[%s11635_s1 + $0x84c] ss:$16 sps:$4 sm:$0xff]  }
  0xdc   : > { %5274 = vmatprep.subr.bf16.mxu0 %v7950_v39  ;;  %5807 = vmatprep.subr.bf16.mxu1 %v7953_v40  ;;  %v8032_v39 = vld [vmem:[%s11635_s1 + $0x840] ss:$16 sps:$4 sm:$0xff]   ;;  %v8035_v40 = vld [vmem:[%s11635_s1 + $0x848] ss:$16 sps:$4 sm:$0xff]  }
  0xdf   : > { %5275 = vmatpush1.bf16.msra.mxu0 %v7948_v41  ;;  %5808 = vmatpush1.bf16.msra.mxu1 %v7951_v42  ;;  %v8040_v41 = vld [vmem:[%s11635_s1 + $0x864] ss:$16 sps:$4 sm:$0xff]   ;;  %v8043_v42 = vld [vmem:[%s11635_s1 + $0x86c] ss:$16 sps:$4 sm:$0xff]  }
  0xe0   : > { %5276 = vmatprep.subr.bf16.mxu0 %v7956_v44  ;;  %5809 = vmatprep.subr.bf16.mxu1 %v7959_v45  ;;  %v8038_v44 = vld [vmem:[%s11635_s1 + $0x860] ss:$16 sps:$4 sm:$0xff]   ;;  %v8041_v45 = vld [vmem:[%s11635_s1 + $0x868] ss:$16 sps:$4 sm:$0xff]  }
  0xe3   : > { %5277 = vmatpush1.bf16.msra.mxu0 %v7954_v46  ;;  %5810 = vmatpush1.bf16.msra.mxu1 %v7957_v47  ;;  %v8046_v46 = vld [vmem:[%s11635_s1 + $0x884] ss:$16 sps:$4 sm:$0xff]   ;;  %v8049_v47 = vld [vmem:[%s11635_s1 + $0x88c] ss:$16 sps:$4 sm:$0xff]  }
  0xe4   : > { %5278 = vmatprep.subr.bf16.mxu0 %v7962_v48  ;;  %5811 = vmatprep.subr.bf16.mxu1 %v7965_v50  ;;  %v8044_v48 = vld [vmem:[%s11635_s1 + $0x880] ss:$16 sps:$4 sm:$0xff]   ;;  %v8047_v50 = vld [vmem:[%s11635_s1 + $0x888] ss:$16 sps:$4 sm:$0xff]  }
  0xe7   : > { %5279 = vmatpush1.bf16.msra.mxu0 %v7960_v51  ;;  %5812 = vmatpush1.bf16.msra.mxu1 %v7963_v53  ;;  %v8052_v51 = vld [vmem:[%s11635_s1 + $0x8a4] ss:$16 sps:$4 sm:$0xff]   ;;  %v8055_v53 = vld [vmem:[%s11635_s1 + $0x8ac] ss:$16 sps:$4 sm:$0xff]  }
  0xe8   : > { %5280 = vmatprep.subr.bf16.mxu0 %v7968_v54  ;;  %5813 = vmatprep.subr.bf16.mxu1 %v7971_v55  ;;  %v8050_v54 = vld [vmem:[%s11635_s1 + $0x8a0] ss:$16 sps:$4 sm:$0xff]   ;;  %v8053_v55 = vld [vmem:[%s11635_s1 + $0x8a8] ss:$16 sps:$4 sm:$0xff]  }
  0xeb   : > { %5281 = vmatpush1.bf16.msra.mxu0 %v7966_v56  ;;  %5814 = vmatpush1.bf16.msra.mxu1 %v7969_v57  ;;  %v8058_v56 = vld [vmem:[%s11635_s1 + $0x8c4] ss:$16 sps:$4 sm:$0xff]   ;;  %v8061_v57 = vld [vmem:[%s11635_s1 + $0x8cc] ss:$16 sps:$4 sm:$0xff]  }
  0xec   : > { %5282 = vmatprep.subr.bf16.mxu0 %v7974_v58  ;;  %5815 = vmatprep.subr.bf16.mxu1 %v7977_v59  ;;  %v8056_v58 = vld [vmem:[%s11635_s1 + $0x8c0] ss:$16 sps:$4 sm:$0xff]   ;;  %v8059_v59 = vld [vmem:[%s11635_s1 + $0x8c8] ss:$16 sps:$4 sm:$0xff]  }
  0xef   : > { %5283 = vmatpush1.bf16.msra.mxu0 %v7972_v60  ;;  %5816 = vmatpush1.bf16.msra.mxu1 %v7975_v61  ;;  %v8064_v60 = vld [vmem:[%s11635_s1 + $0x8e4] ss:$16 sps:$4 sm:$0xff]   ;;  %v8067_v61 = vld [vmem:[%s11635_s1 + $0x8ec] ss:$16 sps:$4 sm:$0xff]  }
  0xf0   : > { %5284 = vmatprep.subr.bf16.mxu0 %v7980_v62  ;;  %5817 = vmatprep.subr.bf16.mxu1 %v7983_v63  ;;  %v8062_v62 = vld [vmem:[%s11635_s1 + $0x8e0] ss:$16 sps:$4 sm:$0xff]   ;;  %v8065_v63 = vld [vmem:[%s11635_s1 + $0x8e8] ss:$16 sps:$4 sm:$0xff]  }
  0xf3   : > { %5285 = vmatpush1.bf16.msra.mxu0 %v7978_v0  ;;  %5818 = vmatpush1.bf16.msra.mxu1 %v7981_v1  ;;  %v8070_v0 = vld [vmem:[%s11635_s1 + $0x904] ss:$16 sps:$4 sm:$0xff]   ;;  %v8073_v1 = vld [vmem:[%s11635_s1 + $0x90c] ss:$16 sps:$4 sm:$0xff]  }
  0xf4   : > { %5286 = vmatprep.subr.bf16.mxu0 %v7986_v2  ;;  %5819 = vmatprep.subr.bf16.mxu1 %v7989_v3  ;;  %v8068_v2 = vld [vmem:[%s11635_s1 + $0x900] ss:$16 sps:$4 sm:$0xff]   ;;  %v8071_v3 = vld [vmem:[%s11635_s1 + $0x908] ss:$16 sps:$4 sm:$0xff]  }
  0xf7   : > { %5287 = vmatpush1.bf16.msra.mxu0 %v7984_v4  ;;  %5820 = vmatpush1.bf16.msra.mxu1 %v7987_v5  ;;  %v8076_v4 = vld [vmem:[%s11635_s1 + $0x924] ss:$16 sps:$4 sm:$0xff]   ;;  %v8079_v5 = vld [vmem:[%s11635_s1 + $0x92c] ss:$16 sps:$4 sm:$0xff]  }
  0xf8   : > { %5288 = vmatprep.subr.bf16.mxu0 %v7992_v6  ;;  %5821 = vmatprep.subr.bf16.mxu1 %v7995_v7  ;;  %v8074_v6 = vld [vmem:[%s11635_s1 + $0x920] ss:$16 sps:$4 sm:$0xff]   ;;  %v8077_v7 = vld [vmem:[%s11635_s1 + $0x928] ss:$16 sps:$4 sm:$0xff]  }
  0xfb   : > { %5289 = vmatpush1.bf16.msra.mxu0 %v7990_v8  ;;  %5822 = vmatpush1.bf16.msra.mxu1 %v7993_v9  ;;  %v8082_v8 = vld [vmem:[%s11635_s1 + $0x944] ss:$16 sps:$4 sm:$0xff]   ;;  %v8085_v9 = vld [vmem:[%s11635_s1 + $0x94c] ss:$16 sps:$4 sm:$0xff]  }
  0xfc   : > { %5290 = vmatprep.subr.bf16.mxu0 %v7998_v10  ;;  %5823 = vmatprep.subr.bf16.mxu1 %v8001_v11  ;;  %v8080_v10 = vld [vmem:[%s11635_s1 + $0x940] ss:$16 sps:$4 sm:$0xff]   ;;  %v8083_v11 = vld [vmem:[%s11635_s1 + $0x948] ss:$16 sps:$4 sm:$0xff]  }
  0xff   : > { %5291 = vmatpush1.bf16.msra.mxu0 %v7996_v12  ;;  %5824 = vmatpush1.bf16.msra.mxu1 %v7999_v52  ;;  %v8088_v12 = vld [vmem:[%s11635_s1 + $0x964] ss:$16 sps:$4 sm:$0xff]   ;;  %v8091_v52 = vld [vmem:[%s11635_s1 + $0x96c] ss:$16 sps:$4 sm:$0xff]  }
 0x100   : > { %5292 = vmatprep.subr.bf16.mxu0 %v8004_v15  ;;  %5825 = vmatprep.subr.bf16.mxu1 %v8007_v16  ;;  %v8086_v15 = vld [vmem:[%s11635_s1 + $0x960] ss:$16 sps:$4 sm:$0xff]   ;;  %v8089_v16 = vld [vmem:[%s11635_s1 + $0x968] ss:$16 sps:$4 sm:$0xff]  }
 0x103   : > { %5293 = vmatpush1.bf16.msra.mxu0 %v8002_v17  ;;  %5826 = vmatpush1.bf16.msra.mxu1 %v8005_v18  ;;  %v8094_v17 = vld [vmem:[%s11635_s1 + $0x984] ss:$16 sps:$4 sm:$0xff]   ;;  %v8097_v18 = vld [vmem:[%s11635_s1 + $0x98c] ss:$16 sps:$4 sm:$0xff]  }
 0x104   : > { %5294 = vmatprep.subr.bf16.mxu0 %v8010_v19  ;;  %5827 = vmatprep.subr.bf16.mxu1 %v8013_v20  ;;  %v8092_v19 = vld [vmem:[%s11635_s1 + $0x980] ss:$16 sps:$4 sm:$0xff]   ;;  %v8095_v20 = vld [vmem:[%s11635_s1 + $0x988] ss:$16 sps:$4 sm:$0xff]  }
 0x107   : > { %5295 = vmatpush1.bf16.msra.mxu0 %v8008_v22  ;;  %5828 = vmatpush1.bf16.msra.mxu1 %v8011_v23  ;;  %v8100_v22 = vld [vmem:[%s11635_s1 + $0x9a4] ss:$16 sps:$4 sm:$0xff]   ;;  %v8103_v23 = vld [vmem:[%s11635_s1 + $0x9ac] ss:$16 sps:$4 sm:$0xff]  }
 0x108   : > { %5296 = vmatprep.subr.bf16.mxu0 %v8016_v24  ;;  %5829 = vmatprep.subr.bf16.mxu1 %v8019_v13  ;;  %v8098_v24 = vld [vmem:[%s11635_s1 + $0x9a0] ss:$16 sps:$4 sm:$0xff]   ;;  %v8101_v13 = vld [vmem:[%s11635_s1 + $0x9a8] ss:$16 sps:$4 sm:$0xff]  }
 0x10b   : > { %5297 = vmatpush1.bf16.msra.mxu0 %v8014_v27  ;;  %5830 = vmatpush1.bf16.msra.mxu1 %v8017_v28  ;;  %v8106_v27 = vld [vmem:[%s11635_s1 + $0x9c4] ss:$16 sps:$4 sm:$0xff]   ;;  %v8109_v28 = vld [vmem:[%s11635_s1 + $0x9cc] ss:$16 sps:$4 sm:$0xff]  }
 0x10c   : > { %5307 = vmatprep.subr.bf16.mxu0 %v8022_v29  ;;  %5840 = vmatprep.subr.bf16.mxu1 %v8025_v14  ;;  %v8104_v29 = vld [vmem:[%s11635_s1 + $0x9c0] ss:$16 sps:$4 sm:$0xff]   ;;  %v8107_v14 = vld [vmem:[%s11635_s1 + $0x9c8] ss:$16 sps:$4 sm:$0xff]  }
 0x10e   : > { %5299 = vmatmul.mubr.bf16.vlgmr.msra.gmra.mrb[0].mxu0 %v1059_v31  ;;  %5832 = vmatmul.mubr.bf16.vlgmr.msra.gmra.mrb[0].mxu1 %v1059_v31  ;;  %v8115_v31 = vld [vmem:[%s11635_s1 + $0x9ec] ss:$16 sps:$4 sm:$0xff]  }
 0x10f   : > { %5308 = vmatpush1.bf16.msra.mxu0 %v8020_v25  ;;  %5841 = vmatpush1.bf16.msra.mxu1 %v8023_v32  ;;  %v8110_v25 = vld [vmem:[%s11635_s1 + $0x9e0] ss:$16 sps:$4 sm:$0xff]   ;;  %v8113_v32 = vld [vmem:[%s11635_s1 + $0x9e8] ss:$16 sps:$4 sm:$0xff]  }
 0x110   : > { %5309 = vmatprep.subr.bf16.mxu0 %v8028_v33  ;;  %5842 = vmatprep.subr.bf16.mxu1 %v8031_v26  ;;  %v8118_v33 = vld [vmem:[%s11635_s1 + $0xa04] ss:$16 sps:$4 sm:$0xff]   ;;  %v8121_v26 = vld [vmem:[%s11635_s1 + $0xa0c] ss:$16 sps:$4 sm:$0xff]  }
 0x111   : > { %5339 = vmatprep.mubr.bf16.mxu0 %v9832_v34  ;;  %5872 = vmatprep.mubr.bf16.mxu1 %v9832_v34 }
 0x113   : > { %5310 = vmatpush1.bf16.msra.mxu0 %v8026_v35  ;;  %5843 = vmatpush1.bf16.msra.mxu1 %v8029_v36  ;;  %v10018_v35 = vrot.slane %v9789_v21, %v9135_v49  ;;  %v8116_v36 = vld [vmem:[%s11635_s1 + $0xa00] ss:$16 sps:$4 sm:$0xff]   ;;  %v8127_v21 = vld [vmem:[%s11635_s1 + $0xa2c] ss:$16 sps:$4 sm:$0xff]  }
 0x114   : > { %5311 = vmatprep.subr.bf16.mxu0 %v8034_v37  ;;  %5844 = vmatprep.subr.bf16.mxu1 %v8037_v38  ;;  %v8119_v37 = vld [vmem:[%s11635_s1 + $0xa08] ss:$16 sps:$4 sm:$0xff]   ;;  %v8124_v38 = vld [vmem:[%s11635_s1 + $0xa24] ss:$16 sps:$4 sm:$0xff]  }
 0x117   : > { %5312 = vmatpush1.bf16.msra.mxu0 %v8032_v39  ;;  %5845 = vmatpush1.bf16.msra.mxu1 %v8035_v40  ;;  %v1109_v39 = vcombine.high %v9832_v34, %v9832_v34  ;;  %v8122_v40 = vld [vmem:[%s11635_s1 + $0xa20] ss:$16 sps:$4 sm:$0xff]   ;;  %v8130_v34 = vld [vmem:[%s11635_s1 + $0xa44] ss:$16 sps:$4 sm:$0xff]  }
 0x118   : > { %5313 = vmatprep.subr.bf16.mxu0 %v8040_v41  ;;  %5846 = vmatprep.subr.bf16.mxu1 %v8043_v42  ;;  %v8125_v41 = vld [vmem:[%s11635_s1 + $0xa28] ss:$16 sps:$4 sm:$0xff]   ;;  %v8133_v42 = vld [vmem:[%s11635_s1 + $0xa4c] ss:$16 sps:$4 sm:$0xff]  }
 0x11b   : > { %5314 = vmatpush1.bf16.msra.mxu0 %v8038_v44  ;;  %5847 = vmatpush1.bf16.msra.mxu1 %v8041_v45  ;;  %v8128_v44 = vld [vmem:[%s11635_s1 + $0xa40] ss:$16 sps:$4 sm:$0xff]   ;;  %v8131_v45 = vld [vmem:[%s11635_s1 + $0xa48] ss:$16 sps:$4 sm:$0xff]  }
 0x11c   : > { %5315 = vmatprep.subr.bf16.mxu0 %v8046_v46  ;;  %5848 = vmatprep.subr.bf16.mxu1 %v8049_v47  ;;  %v8136_v46 = vld [vmem:[%s11635_s1 + $0xa64] ss:$16 sps:$4 sm:$0xff]   ;;  %v8139_v47 = vld [vmem:[%s11635_s1 + $0xa6c] ss:$16 sps:$4 sm:$0xff]  }
 0x11f   : > { %5316 = vmatpush1.bf16.msra.mxu0 %v8044_v48  ;;  %5849 = vmatpush1.bf16.msra.mxu1 %v8047_v50  ;;  %v8134_v48 = vld [vmem:[%s11635_s1 + $0xa60] ss:$16 sps:$4 sm:$0xff]   ;;  %v8137_v50 = vld [vmem:[%s11635_s1 + $0xa68] ss:$16 sps:$4 sm:$0xff]  }
 0x120   : > { %5317 = vmatprep.subr.bf16.mxu0 %v8052_v51  ;;  %5850 = vmatprep.subr.bf16.mxu1 %v8055_v53  ;;  %v8142_v51 = vld [vmem:[%s11635_s1 + $0xa84] ss:$16 sps:$4 sm:$0xff]   ;;  %v8145_v53 = vld [vmem:[%s11635_s1 + $0xa8c] ss:$16 sps:$4 sm:$0xff]  }
 0x123   : > { %5318 = vmatpush1.bf16.msra.mxu0 %v8050_v54  ;;  %5851 = vmatpush1.bf16.msra.mxu1 %v8053_v55  ;;  %v8140_v54 = vld [vmem:[%s11635_s1 + $0xa80] ss:$16 sps:$4 sm:$0xff]   ;;  %v8143_v55 = vld [vmem:[%s11635_s1 + $0xa88] ss:$16 sps:$4 sm:$0xff]  }
 0x124   : > { %5319 = vmatprep.subr.bf16.mxu0 %v8058_v56  ;;  %5852 = vmatprep.subr.bf16.mxu1 %v8061_v57  ;;  %v8148_v56 = vld [vmem:[%s11635_s1 + $0xaa4] ss:$16 sps:$4 sm:$0xff]   ;;  %v8151_v57 = vld [vmem:[%s11635_s1 + $0xaac] ss:$16 sps:$4 sm:$0xff]  }
 0x127   : > { %5320 = vmatpush1.bf16.msra.mxu0 %v8056_v58  ;;  %5853 = vmatpush1.bf16.msra.mxu1 %v8059_v59  ;;  %v8146_v58 = vld [vmem:[%s11635_s1 + $0xaa0] ss:$16 sps:$4 sm:$0xff]   ;;  %v8149_v59 = vld [vmem:[%s11635_s1 + $0xaa8] ss:$16 sps:$4 sm:$0xff]  }
 0x128   : > { %5321 = vmatprep.subr.bf16.mxu0 %v8064_v60  ;;  %5854 = vmatprep.subr.bf16.mxu1 %v8067_v61  ;;  %v8154_v60 = vld [vmem:[%s11635_s1 + $0xac4] ss:$16 sps:$4 sm:$0xff]   ;;  %v8157_v61 = vld [vmem:[%s11635_s1 + $0xacc] ss:$16 sps:$4 sm:$0xff]  }
 0x12b   : > { %5322 = vmatpush1.bf16.msra.mxu0 %v8062_v62  ;;  %5855 = vmatpush1.bf16.msra.mxu1 %v8065_v63  ;;  %v8152_v62 = vld [vmem:[%s11635_s1 + $0xac0] ss:$16 sps:$4 sm:$0xff]   ;;  %v8155_v63 = vld [vmem:[%s11635_s1 + $0xac8] ss:$16 sps:$4 sm:$0xff]  }
 0x12c   : > { %5323 = vmatprep.subr.bf16.mxu0 %v8070_v0  ;;  %5856 = vmatprep.subr.bf16.mxu1 %v8073_v1  ;;  %v8160_v0 = vld [vmem:[%s11635_s1 + $0xae4] ss:$16 sps:$4 sm:$0xff]   ;;  %v8163_v1 = vld [vmem:[%s11635_s1 + $0xaec] ss:$16 sps:$4 sm:$0xff]  }
 0x12f   : > { %5324 = vmatpush1.bf16.msra.mxu0 %v8068_v2  ;;  %5857 = vmatpush1.bf16.msra.mxu1 %v8071_v3  ;;  %v8158_v2 = vld [vmem:[%s11635_s1 + $0xae0] ss:$16 sps:$4 sm:$0xff]   ;;  %v8161_v3 = vld [vmem:[%s11635_s1 + $0xae8] ss:$16 sps:$4 sm:$0xff]  }
 0x130   : > { %5325 = vmatprep.subr.bf16.mxu0 %v8076_v4  ;;  %5858 = vmatprep.subr.bf16.mxu1 %v8079_v5  ;;  %v8166_v4 = vld [vmem:[%s11635_s1 + $0xb04] ss:$16 sps:$4 sm:$0xff]   ;;  %v8169_v5 = vld [vmem:[%s11635_s1 + $0xb0c] ss:$16 sps:$4 sm:$0xff]  }
 0x133   : > { %5326 = vmatpush1.bf16.msra.mxu0 %v8074_v6  ;;  %5859 = vmatpush1.bf16.msra.mxu1 %v8077_v7  ;;  %v8164_v6 = vld [vmem:[%s11635_s1 + $0xb00] ss:$16 sps:$4 sm:$0xff]   ;;  %v8167_v7 = vld [vmem:[%s11635_s1 + $0xb08] ss:$16 sps:$4 sm:$0xff]  }
 0x134   : > { %5327 = vmatprep.subr.bf16.mxu0 %v8082_v8  ;;  %5860 = vmatprep.subr.bf16.mxu1 %v8085_v9  ;;  %v8172_v8 = vld [vmem:[%s11635_s1 + $0xb24] ss:$16 sps:$4 sm:$0xff]   ;;  %v8175_v9 = vld [vmem:[%s11635_s1 + $0xb2c] ss:$16 sps:$4 sm:$0xff]  }
 0x137   : > { %5328 = vmatpush1.bf16.msra.mxu0 %v8080_v10  ;;  %5861 = vmatpush1.bf16.msra.mxu1 %v8083_v11  ;;  %v8170_v10 = vld [vmem:[%s11635_s1 + $0xb20] ss:$16 sps:$4 sm:$0xff]   ;;  %v8173_v11 = vld [vmem:[%s11635_s1 + $0xb28] ss:$16 sps:$4 sm:$0xff]  }
 0x138   : > { %5329 = vmatprep.subr.bf16.mxu0 %v8088_v12  ;;  %5862 = vmatprep.subr.bf16.mxu1 %v8091_v52  ;;  %v8178_v12 = vld [vmem:[%s11635_s1 + $0xb44] ss:$16 sps:$4 sm:$0xff]   ;;  %v8181_v52 = vld [vmem:[%s11635_s1 + $0xb4c] ss:$16 sps:$4 sm:$0xff]  }
 0x13b   : > { %5330 = vmatpush1.bf16.msra.mxu0 %v8086_v15  ;;  %5863 = vmatpush1.bf16.msra.mxu1 %v8089_v16  ;;  %v8176_v15 = vld [vmem:[%s11635_s1 + $0xb40] ss:$16 sps:$4 sm:$0xff]   ;;  %v8179_v16 = vld [vmem:[%s11635_s1 + $0xb48] ss:$16 sps:$4 sm:$0xff]  }
 0x13c   : > { %5331 = vmatprep.subr.bf16.mxu0 %v8094_v17  ;;  %5864 = vmatprep.subr.bf16.mxu1 %v8097_v18  ;;  %v8184_v17 = vld [vmem:[%s11635_s1 + $0xb64] ss:$16 sps:$4 sm:$0xff]   ;;  %v8187_v18 = vld [vmem:[%s11635_s1 + $0xb6c] ss:$16 sps:$4 sm:$0xff]  }
 0x13f   : > { %5332 = vmatpush1.bf16.msra.mxu0 %v8092_v19  ;;  %5865 = vmatpush1.bf16.msra.mxu1 %v8095_v20  ;;  %v8182_v19 = vld [vmem:[%s11635_s1 + $0xb60] ss:$16 sps:$4 sm:$0xff]   ;;  %v8185_v20 = vld [vmem:[%s11635_s1 + $0xb68] ss:$16 sps:$4 sm:$0xff]  }
 0x140   : > { %5333 = vmatprep.subr.bf16.mxu0 %v8100_v22  ;;  %5866 = vmatprep.subr.bf16.mxu1 %v8103_v23  ;;  %v8190_v22 = vld [vmem:[%s11635_s1 + $0xb84] ss:$16 sps:$4 sm:$0xff]   ;;  %v8193_v23 = vld [vmem:[%s11635_s1 + $0xb8c] ss:$16 sps:$4 sm:$0xff]  }
 0x143   : > { %5334 = vmatpush1.bf16.msra.mxu0 %v8098_v24  ;;  %5867 = vmatpush1.bf16.msra.mxu1 %v8101_v13  ;;  %v8188_v24 = vld [vmem:[%s11635_s1 + $0xb80] ss:$16 sps:$4 sm:$0xff]   ;;  %v8191_v13 = vld [vmem:[%s11635_s1 + $0xb88] ss:$16 sps:$4 sm:$0xff]  }
 0x144   : > { %5335 = vmatprep.subr.bf16.mxu0 %v8106_v27  ;;  %5868 = vmatprep.subr.bf16.mxu1 %v8109_v28  ;;  %v8196_v27 = vld [vmem:[%s11635_s1 + $0xba4] ss:$16 sps:$4 sm:$0xff]   ;;  %v8199_v28 = vld [vmem:[%s11635_s1 + $0xbac] ss:$16 sps:$4 sm:$0xff]  }
 0x147   : > { %5336 = vmatpush1.bf16.msra.mxu0 %v8104_v29  ;;  %5869 = vmatpush1.bf16.msra.mxu1 %v8107_v14  ;;  %v8194_v29 = vld [vmem:[%s11635_s1 + $0xba0] ss:$16 sps:$4 sm:$0xff]   ;;  %v8197_v14 = vld [vmem:[%s11635_s1 + $0xba8] ss:$16 sps:$4 sm:$0xff]  }
 0x148   : > { %5337 = vmatprep.subr.bf16.mxu0 %v8112_v30  ;;  %5870 = vmatprep.subr.bf16.mxu1 %v8115_v31  ;;  %v8202_v30 = vld [vmem:[%s11635_s1 + $0xbc4] ss:$16 sps:$4 sm:$0xff]   ;;  %v8205_v31 = vld [vmem:[%s11635_s1 + $0xbcc] ss:$16 sps:$4 sm:$0xff]  }
 0x14b   : > { %5338 = vmatpush1.bf16.msra.mxu0 %v8110_v25  ;;  %5871 = vmatpush1.bf16.msra.mxu1 %v8113_v32  ;;  %v8846_v25 = vld [vmem:[%s9132_s17 + $0x8] sm:$0xff] }
 0x14c   : > { %5348 = vmatprep.subr.bf16.mxu0 %v8118_v33  ;;  %5881 = vmatprep.subr.bf16.mxu1 %v8121_v26  ;;  %v1062_v32 = vcombine.high %v8846_v25, %v8846_v25  ;;  %v8200_v33 = vld [vmem:[%s11635_s1 + $0xbc0] ss:$16 sps:$4 sm:$0xff]   ;;  %v8203_v26 = vld [vmem:[%s11635_s1 + $0xbc8] ss:$16 sps:$4 sm:$0xff]  }
 0x14d   : > { %v8284_v25 = vld [vmem:[%s11635_s1 + $0xd80] ss:$16 sps:$4 sm:$0xff]  }
 0x14e   : > { %5340 = vmatmul.mubr.bf16.vlgmr.msra.gmra.mrb[0].mxu0 %v10018_v35  ;;  %5873 = vmatmul.mubr.bf16.vlgmr.msra.gmra.mrb[0].mxu1 %v10018_v35 }
 0x14f   : > { %5349 = vmatpush1.bf16.msra.mxu0 %v8116_v36  ;;  %5882 = vmatpush1.bf16.msra.mxu1 %v8119_v37  ;;  %v8208_v36 = vld [vmem:[%s11635_s1 + $0xbe4] ss:$16 sps:$4 sm:$0xff]   ;;  %v8211_v37 = vld [vmem:[%s11635_s1 + $0xbec] ss:$16 sps:$4 sm:$0xff]  }
 0x150   : > { %5350 = vmatprep.subr.bf16.mxu0 %v8124_v38  ;;  %5883 = vmatprep.subr.bf16.mxu1 %v8127_v21  ;;  %v10206_v38 = vrot.slane %v1062_v32, %v9135_v49  ;;  %v8206_v21 = vld [vmem:[%s11635_s1 + $0xbe0] ss:$16 sps:$4 sm:$0xff]   ;;  %v8287_v32 = vld [vmem:[%s11635_s1 + $0xd88] ss:$16 sps:$4 sm:$0xff]  }
 0x151   : > { %5380 = vmatprep.mubr.bf16.mxu0 %v1109_v39  ;;  %5913 = vmatprep.mubr.bf16.mxu1 %v1109_v39  ;;  %v8209_v39 = vld [vmem:[%s11635_s1 + $0xbe8] ss:$16 sps:$4 sm:$0xff]  }
 0x153   : > { %5351 = vmatpush1.bf16.msra.mxu0 %v8122_v40  ;;  %5884 = vmatpush1.bf16.msra.mxu1 %v8125_v41  ;;  %v8214_v40 = vld [vmem:[%s11635_s1 + $0xc04] ss:$16 sps:$4 sm:$0xff]   ;;  %v8217_v41 = vld [vmem:[%s11635_s1 + $0xc0c] ss:$16 sps:$4 sm:$0xff]  }
 0x154   : > { %5352 = vmatprep.subr.bf16.mxu0 %v8130_v34  ;;  %5885 = vmatprep.subr.bf16.mxu1 %v8133_v42  ;;  %v1078_v34 = vcombine.high %v10206_v38, %v10206_v38  ;;  %v1107_v42 = vcombine.high %v10018_v35, %v10018_v35  ;;  %v8223_v35 = vld [vmem:[%s11635_s1 + $0xc2c] ss:$16 sps:$4 sm:$0xff]  }
 0x157   : > { %5353 = vmatpush1.bf16.msra.mxu0 %v8128_v44  ;;  %5886 = vmatpush1.bf16.msra.mxu1 %v8131_v45  ;;  %v8212_v44 = vld [vmem:[%s11635_s1 + $0xc00] ss:$16 sps:$4 sm:$0xff]   ;;  %v8215_v45 = vld [vmem:[%s11635_s1 + $0xc08] ss:$16 sps:$4 sm:$0xff]  }
 0x158   : > { %5354 = vmatprep.subr.bf16.mxu0 %v8136_v46  ;;  %5887 = vmatprep.subr.bf16.mxu1 %v8139_v47  ;;  %v8220_v46 = vld [vmem:[%s11635_s1 + $0xc24] ss:$16 sps:$4 sm:$0xff]   ;;  %v10237_v47 = vrot.slane %v1078_v34, %v9135_v49 }
 0x159   : > { %v8304_v34 = vld [vmem:[%s11635_s1 + $0xde4] ss:$16 sps:$4 sm:$0xff]  }
 0x15b   : > { %5355 = vmatpush1.bf16.msra.mxu0 %v8134_v48  ;;  %5888 = vmatpush1.bf16.msra.mxu1 %v8137_v50  ;;  %v8218_v48 = vld [vmem:[%s11635_s1 + $0xc20] ss:$16 sps:$4 sm:$0xff]   ;;  %v8221_v50 = vld [vmem:[%s11635_s1 + $0xc28] ss:$16 sps:$4 sm:$0xff]  }
 0x15c   : > { %5356 = vmatprep.subr.bf16.mxu0 %v8142_v51  ;;  %5889 = vmatprep.subr.bf16.mxu1 %v8145_v53  ;;  %v8226_v51 = vld [vmem:[%s11635_s1 + $0xc44] ss:$16 sps:$4 sm:$0xff]   ;;  %v8229_v53 = vld [vmem:[%s11635_s1 + $0xc4c] ss:$16 sps:$4 sm:$0xff]  }
 0x15f   : > { %5357 = vmatpush1.bf16.msra.mxu0 %v8140_v54  ;;  %5890 = vmatpush1.bf16.msra.mxu1 %v8143_v55  ;;  %v8224_v54 = vld [vmem:[%s11635_s1 + $0xc40] ss:$16 sps:$4 sm:$0xff]   ;;  %v8227_v55 = vld [vmem:[%s11635_s1 + $0xc48] ss:$16 sps:$4 sm:$0xff]  }
 0x160   : > { %5358 = vmatprep.subr.bf16.mxu0 %v8148_v56  ;;  %5891 = vmatprep.subr.bf16.mxu1 %v8151_v57  ;;  %v8232_v56 = vld [vmem:[%s11635_s1 + $0xc64] ss:$16 sps:$4 sm:$0xff]   ;;  %v8235_v57 = vld [vmem:[%s11635_s1 + $0xc6c] ss:$16 sps:$4 sm:$0xff]  }
 0x163   : > { %5359 = vmatpush1.bf16.msra.mxu0 %v8146_v58  ;;  %5892 = vmatpush1.bf16.msra.mxu1 %v8149_v59  ;;  %v8230_v58 = vld [vmem:[%s11635_s1 + $0xc60] ss:$16 sps:$4 sm:$0xff]   ;;  %v8233_v59 = vld [vmem:[%s11635_s1 + $0xc68] ss:$16 sps:$4 sm:$0xff]  }
 0x164   : > { %5360 = vmatprep.subr.bf16.mxu0 %v8154_v60  ;;  %5893 = vmatprep.subr.bf16.mxu1 %v8157_v61  ;;  %v8238_v60 = vld [vmem:[%s11635_s1 + $0xc84] ss:$16 sps:$4 sm:$0xff]   ;;  %v8241_v61 = vld [vmem:[%s11635_s1 + $0xc8c] ss:$16 sps:$4 sm:$0xff]  }
 0x167   : > { %5361 = vmatpush1.bf16.msra.mxu0 %v8152_v62  ;;  %5894 = vmatpush1.bf16.msra.mxu1 %v8155_v63  ;;  %v8236_v62 = vld [vmem:[%s11635_s1 + $0xc80] ss:$16 sps:$4 sm:$0xff]   ;;  %v8239_v63 = vld [vmem:[%s11635_s1 + $0xc88] ss:$16 sps:$4 sm:$0xff]  }
 0x168   : > { %5362 = vmatprep.subr.bf16.mxu0 %v8160_v0  ;;  %5895 = vmatprep.subr.bf16.mxu1 %v8163_v1  ;;  %v8244_v0 = vld [vmem:[%s11635_s1 + $0xca4] ss:$16 sps:$4 sm:$0xff]   ;;  %v8247_v1 = vld [vmem:[%s11635_s1 + $0xcac] ss:$16 sps:$4 sm:$0xff]  }
 0x16b   : > { %5363 = vmatpush1.bf16.msra.mxu0 %v8158_v2  ;;  %5896 = vmatpush1.bf16.msra.mxu1 %v8161_v3  ;;  %v8242_v2 = vld [vmem:[%s11635_s1 + $0xca0] ss:$16 sps:$4 sm:$0xff]   ;;  %v8245_v3 = vld [vmem:[%s11635_s1 + $0xca8] ss:$16 sps:$4 sm:$0xff]  }
 0x16c   : > { %5364 = vmatprep.subr.bf16.mxu0 %v8166_v4  ;;  %5897 = vmatprep.subr.bf16.mxu1 %v8169_v5  ;;  %v8250_v4 = vld [vmem:[%s11635_s1 + $0xcc4] ss:$16 sps:$4 sm:$0xff]   ;;  %v8253_v5 = vld [vmem:[%s11635_s1 + $0xccc] ss:$16 sps:$4 sm:$0xff]  }
 0x16f   : > { %5365 = vmatpush1.bf16.msra.mxu0 %v8164_v6  ;;  %5898 = vmatpush1.bf16.msra.mxu1 %v8167_v7  ;;  %v8248_v6 = vld [vmem:[%s11635_s1 + $0xcc0] ss:$16 sps:$4 sm:$0xff]   ;;  %v8251_v7 = vld [vmem:[%s11635_s1 + $0xcc8] ss:$16 sps:$4 sm:$0xff]  }
 0x170   : > { %5366 = vmatprep.subr.bf16.mxu0 %v8172_v8  ;;  %5899 = vmatprep.subr.bf16.mxu1 %v8175_v9  ;;  %v8256_v8 = vld [vmem:[%s11635_s1 + $0xce4] ss:$16 sps:$4 sm:$0xff]   ;;  %v8259_v9 = vld [vmem:[%s11635_s1 + $0xcec] ss:$16 sps:$4 sm:$0xff]  }
 0x173   : > { %5367 = vmatpush1.bf16.msra.mxu0 %v8170_v10  ;;  %5900 = vmatpush1.bf16.msra.mxu1 %v8173_v11  ;;  %v8254_v10 = vld [vmem:[%s11635_s1 + $0xce0] ss:$16 sps:$4 sm:$0xff]   ;;  %v8257_v11 = vld [vmem:[%s11635_s1 + $0xce8] ss:$16 sps:$4 sm:$0xff]  }
 0x174   : > { %5368 = vmatprep.subr.bf16.mxu0 %v8178_v12  ;;  %5901 = vmatprep.subr.bf16.mxu1 %v8181_v52  ;;  %v8262_v12 = vld [vmem:[%s11635_s1 + $0xd04] ss:$16 sps:$4 sm:$0xff]   ;;  %v8265_v52 = vld [vmem:[%s11635_s1 + $0xd0c] ss:$16 sps:$4 sm:$0xff]  }
 0x177   : > { %5369 = vmatpush1.bf16.msra.mxu0 %v8176_v15  ;;  %5902 = vmatpush1.bf16.msra.mxu1 %v8179_v16  ;;  %v8260_v15 = vld [vmem:[%s11635_s1 + $0xd00] ss:$16 sps:$4 sm:$0xff]   ;;  %v8263_v16 = vld [vmem:[%s11635_s1 + $0xd08] ss:$16 sps:$4 sm:$0xff]  }
 0x178   : > { %5370 = vmatprep.subr.bf16.mxu0 %v8184_v17  ;;  %5903 = vmatprep.subr.bf16.mxu1 %v8187_v18  ;;  %v8268_v17 = vld [vmem:[%s11635_s1 + $0xd24] ss:$16 sps:$4 sm:$0xff]   ;;  %v8271_v18 = vld [vmem:[%s11635_s1 + $0xd2c] ss:$16 sps:$4 sm:$0xff]  }
 0x17b   : > { %5371 = vmatpush1.bf16.msra.mxu0 %v8182_v19  ;;  %5904 = vmatpush1.bf16.msra.mxu1 %v8185_v20  ;;  %v8266_v19 = vld [vmem:[%s11635_s1 + $0xd20] ss:$16 sps:$4 sm:$0xff]   ;;  %v8269_v20 = vld [vmem:[%s11635_s1 + $0xd28] ss:$16 sps:$4 sm:$0xff]  }
 0x17c   : > { %5372 = vmatprep.subr.bf16.mxu0 %v8190_v22  ;;  %5905 = vmatprep.subr.bf16.mxu1 %v8193_v23  ;;  %v8274_v22 = vld [vmem:[%s11635_s1 + $0xd44] ss:$16 sps:$4 sm:$0xff]   ;;  %v8277_v23 = vld [vmem:[%s11635_s1 + $0xd4c] ss:$16 sps:$4 sm:$0xff]  }
 0x17f   : > { %5373 = vmatpush1.bf16.msra.mxu0 %v8188_v24  ;;  %5906 = vmatpush1.bf16.msra.mxu1 %v8191_v13  ;;  %v8272_v24 = vld [vmem:[%s11635_s1 + $0xd40] ss:$16 sps:$4 sm:$0xff]   ;;  %v8275_v13 = vld [vmem:[%s11635_s1 + $0xd48] ss:$16 sps:$4 sm:$0xff]  }
 0x180   : > { %5374 = vmatprep.subr.bf16.mxu0 %v8196_v27  ;;  %5907 = vmatprep.subr.bf16.mxu1 %v8199_v28  ;;  %v8280_v27 = vld [vmem:[%s11635_s1 + $0xd64] ss:$16 sps:$4 sm:$0xff]   ;;  %v8283_v28 = vld [vmem:[%s11635_s1 + $0xd6c] ss:$16 sps:$4 sm:$0xff]  }
 0x183   : > { %5375 = vmatpush1.bf16.msra.mxu0 %v8194_v29  ;;  %5908 = vmatpush1.bf16.msra.mxu1 %v8197_v14  ;;  %v8278_v29 = vld [vmem:[%s11635_s1 + $0xd60] ss:$16 sps:$4 sm:$0xff]   ;;  %v8281_v14 = vld [vmem:[%s11635_s1 + $0xd68] ss:$16 sps:$4 sm:$0xff]  }
 0x184   : > { %5376 = vmatprep.subr.bf16.mxu0 %v8202_v30  ;;  %5909 = vmatprep.subr.bf16.mxu1 %v8205_v31  ;;  %v8286_v30 = vld [vmem:[%s11635_s1 + $0xd84] ss:$16 sps:$4 sm:$0xff]   ;;  %v8289_v31 = vld [vmem:[%s11635_s1 + $0xd8c] ss:$16 sps:$4 sm:$0xff]  }
 0x187   : > { %5377 = vmatpush1.bf16.msra.mxu0 %v8200_v33  ;;  %5910 = vmatpush1.bf16.msra.mxu1 %v8203_v26  ;;  %v8292_v33 = vld [vmem:[%s11635_s1 + $0xda4] ss:$16 sps:$4 sm:$0xff]   ;;  %v8295_v26 = vld [vmem:[%s11635_s1 + $0xdac] ss:$16 sps:$4 sm:$0xff]  }
 0x188   : > { %5378 = vmatprep.subr.bf16.mxu0 %v8208_v36  ;;  %5911 = vmatprep.subr.bf16.mxu1 %v8211_v37  ;;  %v8290_v36 = vld [vmem:[%s11635_s1 + $0xda0] ss:$16 sps:$4 sm:$0xff]   ;;  %v8293_v37 = vld [vmem:[%s11635_s1 + $0xda8] ss:$16 sps:$4 sm:$0xff]  }
 0x18b   : > { %5379 = vmatpush1.bf16.msra.mxu0 %v8206_v21  ;;  %5912 = vmatpush1.bf16.msra.mxu1 %v8209_v39  ;;  %v8298_v21 = vld [vmem:[%s11635_s1 + $0xdc4] ss:$16 sps:$4 sm:$0xff]   ;;  %v8301_v39 = vld [vmem:[%s11635_s1 + $0xdcc] ss:$16 sps:$4 sm:$0xff]  }
 0x18c   : > { %5389 = vmatprep.subr.bf16.mxu0 %v8214_v40  ;;  %5922 = vmatprep.subr.bf16.mxu1 %v8217_v41  ;;  %v8296_v40 = vld [vmem:[%s11635_s1 + $0xdc0] ss:$16 sps:$4 sm:$0xff]   ;;  %v8299_v41 = vld [vmem:[%s11635_s1 + $0xdc8] ss:$16 sps:$4 sm:$0xff]  }
 0x18e   : > { %5381 = vmatmul.mubr.bf16.vlgmr.msra.gmra.mrb[0].mxu0 %v1107_v42  ;;  %5914 = vmatmul.mubr.bf16.vlgmr.msra.gmra.mrb[0].mxu1 %v1107_v42  ;;  %v8307_v42 = vld [vmem:[%s11635_s1 + $0xdec] ss:$16 sps:$4 sm:$0xff]  }
 0x18f   : > { %5390 = vmatpush1.bf16.msra.mxu0 %v8212_v44  ;;  %5923 = vmatpush1.bf16.msra.mxu1 %v8215_v45  ;;  %v8302_v44 = vld [vmem:[%s11635_s1 + $0xde0] ss:$16 sps:$4 sm:$0xff]   ;;  %v8305_v45 = vld [vmem:[%s11635_s1 + $0xde8] ss:$16 sps:$4 sm:$0xff]  }
 0x190   : > { %5391 = vmatprep.subr.bf16.mxu0 %v8220_v46  ;;  %5924 = vmatprep.subr.bf16.mxu1 %v8223_v35  ;;  %v8311_v46 = vld [vmem:[%s11635_s1 + $0xe04] ss:$16 sps:$4 sm:$0xff]   ;;  %v8314_v35 = vld [vmem:[%s11635_s1 + $0xe0c] ss:$16 sps:$4 sm:$0xff]  }
 0x191   : > { %5421 = vmatprep.mubr.bf16.mxu0 %v10237_v47  ;;  %5954 = vmatprep.mubr.bf16.mxu1 %v10237_v47 }
 0x193   : > { %5392 = vmatpush1.bf16.msra.mxu0 %v8218_v48  ;;  %5925 = vmatpush1.bf16.msra.mxu1 %v8221_v50  ;;  %v10423_v48 = vrot.slane %v10206_v38, %v9135_v49  ;;  %v8309_v50 = vld [vmem:[%s11635_s1 + $0xe00] ss:$16 sps:$4 sm:$0xff]   ;;  %v8320_v38 = vld [vmem:[%s11635_s1 + $0xe2c] ss:$16 sps:$4 sm:$0xff]  }
 0x194   : > { %5393 = vmatprep.subr.bf16.mxu0 %v8226_v51  ;;  %5926 = vmatprep.subr.bf16.mxu1 %v8229_v53  ;;  %v8312_v51 = vld [vmem:[%s11635_s1 + $0xe08] ss:$16 sps:$4 sm:$0xff]   ;;  %v8317_v53 = vld [vmem:[%s11635_s1 + $0xe24] ss:$16 sps:$4 sm:$0xff]  }
 0x197   : > { %5394 = vmatpush1.bf16.msra.mxu0 %v8224_v54  ;;  %5927 = vmatpush1.bf16.msra.mxu1 %v8227_v55  ;;  %v1110_v54 = vcombine.high %v10237_v47, %v10237_v47  ;;  %v8315_v55 = vld [vmem:[%s11635_s1 + $0xe20] ss:$16 sps:$4 sm:$0xff]   ;;  %v8323_v47 = vld [vmem:[%s11635_s1 + $0xe44] ss:$16 sps:$4 sm:$0xff]  }
 0x198   : > { %5395 = vmatprep.subr.bf16.mxu0 %v8232_v56  ;;  %5928 = vmatprep.subr.bf16.mxu1 %v8235_v57  ;;  %v8318_v56 = vld [vmem:[%s11635_s1 + $0xe28] ss:$16 sps:$4 sm:$0xff]   ;;  %v8326_v57 = vld [vmem:[%s11635_s1 + $0xe4c] ss:$16 sps:$4 sm:$0xff]  }
 0x19b   : > { %5396 = vmatpush1.bf16.msra.mxu0 %v8230_v58  ;;  %5929 = vmatpush1.bf16.msra.mxu1 %v8233_v59  ;;  %v8321_v58 = vld [vmem:[%s11635_s1 + $0xe40] ss:$16 sps:$4 sm:$0xff]   ;;  %v8324_v59 = vld [vmem:[%s11635_s1 + $0xe48] ss:$16 sps:$4 sm:$0xff]  }
 0x19c   : > { %5397 = vmatprep.subr.bf16.mxu0 %v8238_v60  ;;  %5930 = vmatprep.subr.bf16.mxu1 %v8241_v61  ;;  %v8329_v60 = vld [vmem:[%s11635_s1 + $0xe64] ss:$16 sps:$4 sm:$0xff]   ;;  %v8332_v61 = vld [vmem:[%s11635_s1 + $0xe6c] ss:$16 sps:$4 sm:$0xff]  }
 0x19f   : > { %5398 = vmatpush1.bf16.msra.mxu0 %v8236_v62  ;;  %5931 = vmatpush1.bf16.msra.mxu1 %v8239_v63  ;;  %v8327_v62 = vld [vmem:[%s11635_s1 + $0xe60] ss:$16 sps:$4 sm:$0xff]   ;;  %v8330_v63 = vld [vmem:[%s11635_s1 + $0xe68] ss:$16 sps:$4 sm:$0xff]  }
 0x1a0   : > { %5399 = vmatprep.subr.bf16.mxu0 %v8244_v0  ;;  %5932 = vmatprep.subr.bf16.mxu1 %v8247_v1  ;;  %v8335_v0 = vld [vmem:[%s11635_s1 + $0xe84] ss:$16 sps:$4 sm:$0xff]   ;;  %v8338_v1 = vld [vmem:[%s11635_s1 + $0xe8c] ss:$16 sps:$4 sm:$0xff]  }
 0x1a3   : > { %5400 = vmatpush1.bf16.msra.mxu0 %v8242_v2  ;;  %5933 = vmatpush1.bf16.msra.mxu1 %v8245_v3  ;;  %v8333_v2 = vld [vmem:[%s11635_s1 + $0xe80] ss:$16 sps:$4 sm:$0xff]   ;;  %v8336_v3 = vld [vmem:[%s11635_s1 + $0xe88] ss:$16 sps:$4 sm:$0xff]  }
 0x1a4   : > { %5401 = vmatprep.subr.bf16.mxu0 %v8250_v4  ;;  %5934 = vmatprep.subr.bf16.mxu1 %v8253_v5  ;;  %v8341_v4 = vld [vmem:[%s11635_s1 + $0xea4] ss:$16 sps:$4 sm:$0xff]   ;;  %v8344_v5 = vld [vmem:[%s11635_s1 + $0xeac] ss:$16 sps:$4 sm:$0xff]  }
 0x1a7   : > { %5402 = vmatpush1.bf16.msra.mxu0 %v8248_v6  ;;  %5935 = vmatpush1.bf16.msra.mxu1 %v8251_v7  ;;  %v8339_v6 = vld [vmem:[%s11635_s1 + $0xea0] ss:$16 sps:$4 sm:$0xff]   ;;  %v8342_v7 = vld [vmem:[%s11635_s1 + $0xea8] ss:$16 sps:$4 sm:$0xff]  }
 0x1a8   : > { %5403 = vmatprep.subr.bf16.mxu0 %v8256_v8  ;;  %5936 = vmatprep.subr.bf16.mxu1 %v8259_v9  ;;  %v8347_v8 = vld [vmem:[%s11635_s1 + $0xec4] ss:$16 sps:$4 sm:$0xff]   ;;  %v8350_v9 = vld [vmem:[%s11635_s1 + $0xecc] ss:$16 sps:$4 sm:$0xff]  }
 0x1ab   : > { %5404 = vmatpush1.bf16.msra.mxu0 %v8254_v10  ;;  %5937 = vmatpush1.bf16.msra.mxu1 %v8257_v11  ;;  %v8345_v10 = vld [vmem:[%s11635_s1 + $0xec0] ss:$16 sps:$4 sm:$0xff]   ;;  %v8348_v11 = vld [vmem:[%s11635_s1 + $0xec8] ss:$16 sps:$4 sm:$0xff]  }
 0x1ac   : > { %5405 = vmatprep.subr.bf16.mxu0 %v8262_v12  ;;  %5938 = vmatprep.subr.bf16.mxu1 %v8265_v52  ;;  %v8353_v12 = vld [vmem:[%s11635_s1 + $0xee4] ss:$16 sps:$4 sm:$0xff]   ;;  %v8356_v52 = vld [vmem:[%s11635_s1 + $0xeec] ss:$16 sps:$4 sm:$0xff]  }
 0x1af   : > { %5406 = vmatpush1.bf16.msra.mxu0 %v8260_v15  ;;  %5939 = vmatpush1.bf16.msra.mxu1 %v8263_v16  ;;  %v8351_v15 = vld [vmem:[%s11635_s1 + $0xee0] ss:$16 sps:$4 sm:$0xff]   ;;  %v8354_v16 = vld [vmem:[%s11635_s1 + $0xee8] ss:$16 sps:$4 sm:$0xff]  }
 0x1b0   : > { %5407 = vmatprep.subr.bf16.mxu0 %v8268_v17  ;;  %5940 = vmatprep.subr.bf16.mxu1 %v8271_v18  ;;  %v8359_v17 = vld [vmem:[%s11635_s1 + $0xf04] ss:$16 sps:$4 sm:$0xff]   ;;  %v8362_v18 = vld [vmem:[%s11635_s1 + $0xf0c] ss:$16 sps:$4 sm:$0xff]  }
 0x1b3   : > { %5408 = vmatpush1.bf16.msra.mxu0 %v8266_v19  ;;  %5941 = vmatpush1.bf16.msra.mxu1 %v8269_v20  ;;  %v8357_v19 = vld [vmem:[%s11635_s1 + $0xf00] ss:$16 sps:$4 sm:$0xff]   ;;  %v8360_v20 = vld [vmem:[%s11635_s1 + $0xf08] ss:$16 sps:$4 sm:$0xff]  }
 0x1b4   : > { %5409 = vmatprep.subr.bf16.mxu0 %v8274_v22  ;;  %5942 = vmatprep.subr.bf16.mxu1 %v8277_v23  ;;  %v8365_v22 = vld [vmem:[%s11635_s1 + $0xf24] ss:$16 sps:$4 sm:$0xff]   ;;  %v8368_v23 = vld [vmem:[%s11635_s1 + $0xf2c] ss:$16 sps:$4 sm:$0xff]  }
 0x1b7   : > { %5410 = vmatpush1.bf16.msra.mxu0 %v8272_v24  ;;  %5943 = vmatpush1.bf16.msra.mxu1 %v8275_v13  ;;  %v8363_v24 = vld [vmem:[%s11635_s1 + $0xf20] ss:$16 sps:$4 sm:$0xff]   ;;  %v8366_v13 = vld [vmem:[%s11635_s1 + $0xf28] ss:$16 sps:$4 sm:$0xff]  }
 0x1b8   : > { %5411 = vmatprep.subr.bf16.mxu0 %v8280_v27  ;;  %5944 = vmatprep.subr.bf16.mxu1 %v8283_v28  ;;  %v8371_v27 = vld [vmem:[%s11635_s1 + $0xf44] ss:$16 sps:$4 sm:$0xff]   ;;  %v8374_v28 = vld [vmem:[%s11635_s1 + $0xf4c] ss:$16 sps:$4 sm:$0xff]  }
 0x1bb   : > { %5412 = vmatpush1.bf16.msra.mxu0 %v8278_v29  ;;  %5945 = vmatpush1.bf16.msra.mxu1 %v8281_v14  ;;  %v8369_v29 = vld [vmem:[%s11635_s1 + $0xf40] ss:$16 sps:$4 sm:$0xff]   ;;  %v8372_v14 = vld [vmem:[%s11635_s1 + $0xf48] ss:$16 sps:$4 sm:$0xff]  }
 0x1bc   : > { %5413 = vmatprep.subr.bf16.mxu0 %v8286_v30  ;;  %5946 = vmatprep.subr.bf16.mxu1 %v8289_v31  ;;  %v8377_v30 = vld [vmem:[%s11635_s1 + $0xf64] ss:$16 sps:$4 sm:$0xff]   ;;  %v8380_v31 = vld [vmem:[%s11635_s1 + $0xf6c] ss:$16 sps:$4 sm:$0xff]  }
 0x1bf   : > { %5414 = vmatpush1.bf16.msra.mxu0 %v8284_v25  ;;  %5947 = vmatpush1.bf16.msra.mxu1 %v8287_v32  ;;  %v8375_v25 = vld [vmem:[%s11635_s1 + $0xf60] ss:$16 sps:$4 sm:$0xff]   ;;  %v8378_v32 = vld [vmem:[%s11635_s1 + $0xf68] ss:$16 sps:$4 sm:$0xff]  }
 0x1c0   : > { %5415 = vmatprep.subr.bf16.mxu0 %v8292_v33  ;;  %5948 = vmatprep.subr.bf16.mxu1 %v8295_v26  ;;  %v8383_v33 = vld [vmem:[%s11635_s1 + $0xf84] ss:$16 sps:$4 sm:$0xff]   ;;  %v8386_v26 = vld [vmem:[%s11635_s1 + $0xf8c] ss:$16 sps:$4 sm:$0xff]  }
 0x1c3   : > { %5416 = vmatpush1.bf16.msra.mxu0 %v8290_v36  ;;  %5949 = vmatpush1.bf16.msra.mxu1 %v8293_v37  ;;  %v8381_v36 = vld [vmem:[%s11635_s1 + $0xf80] ss:$16 sps:$4 sm:$0xff]   ;;  %v8384_v37 = vld [vmem:[%s11635_s1 + $0xf88] ss:$16 sps:$4 sm:$0xff]  }
 0x1c4   : > { %5417 = vmatprep.subr.bf16.mxu0 %v8298_v21  ;;  %5950 = vmatprep.subr.bf16.mxu1 %v8301_v39  ;;  %v8389_v21 = vld [vmem:[%s11635_s1 + $0xfa4] ss:$16 sps:$4 sm:$0xff]   ;;  %v8392_v39 = vld [vmem:[%s11635_s1 + $0xfac] ss:$16 sps:$4 sm:$0xff]  }
 0x1c7   : > { %5418 = vmatpush1.bf16.msra.mxu0 %v8296_v40  ;;  %5951 = vmatpush1.bf16.msra.mxu1 %v8299_v41  ;;  %v8387_v40 = vld [vmem:[%s11635_s1 + $0xfa0] ss:$16 sps:$4 sm:$0xff]   ;;  %v8390_v41 = vld [vmem:[%s11635_s1 + $0xfa8] ss:$16 sps:$4 sm:$0xff]  }
 0x1c8   : > { %5419 = vmatprep.subr.bf16.mxu0 %v8304_v34  ;;  %5952 = vmatprep.subr.bf16.mxu1 %v8307_v42  ;;  %v8395_v34 = vld [vmem:[%s11635_s1 + $0xfc4] ss:$16 sps:$4 sm:$0xff]   ;;  %v8398_v42 = vld [vmem:[%s11635_s1 + $0xfcc] ss:$16 sps:$4 sm:$0xff]  }
 0x1cb   : > { %5420 = vmatpush1.bf16.msra.mxu0 %v8302_v44  ;;  %5953 = vmatpush1.bf16.msra.mxu1 %v8305_v45  ;;  %v10598_v44 = vld [vmem:[%s9132_s17 + $0x10] sm:$0xff] }
 0x1cc   : > { %5430 = vmatprep.subr.bf16.mxu0 %v8311_v46  ;;  %5963 = vmatprep.subr.bf16.mxu1 %v8314_v35  ;;  %v8393_v45 = vld [vmem:[%s11635_s1 + $0xfc0] ss:$16 sps:$4 sm:$0xff]   ;;  %v8396_v46 = vld [vmem:[%s11635_s1 + $0xfc8] ss:$16 sps:$4 sm:$0xff]   ;;  %v8401_v35 = vld [vmem:[%s11635_s1 + $0xfe4] ss:$16 sps:$4 sm:$0xff]  }
 0x1ce   : > { %5422 = vmatmul.mubr.bf16.vlgmr.msra.gmra.mrb[0].mxu0 %v10423_v48  ;;  %5955 = vmatmul.mubr.bf16.vlgmr.msra.gmra.mrb[0].mxu1 %v10423_v48 }
 0x1cf   : > { %5431 = vmatpush1.bf16.msra.mxu0 %v8309_v50  ;;  %5964 = vmatpush1.bf16.msra.mxu1 %v8312_v51  ;;  %v8404_v50 = vld [vmem:[%s11635_s1 + $0xfec] ss:$16 sps:$4 sm:$0xff]   ;;  %v10614_v51 = vrot.slane %v10598_v44, %v9135_v49 }
 0x1d0   : > { %5432 = vmatprep.subr.bf16.mxu0 %v8317_v53  ;;  %5965 = vmatprep.subr.bf16.mxu1 %v8320_v38  ;;  %v8399_v53 = vld [vmem:[%s11635_s1 + $0xfe0] ss:$16 sps:$4 sm:$0xff]   ;;  %v8402_v38 = vld [vmem:[%s11635_s1 + $0xfe8] ss:$16 sps:$4 sm:$0xff]  }
 0x1d1   : > { %5462 = vmatprep.mubr.bf16.mxu0 %v1110_v54  ;;  %5995 = vmatprep.mubr.bf16.mxu1 %v1110_v54  ;;  %v8407_v54 = vld [vmem:[%s11635_s1 + $0x1004] ss:$16 sps:$4 sm:$0xff]  }
 0x1d3   : > { %5433 = vmatpush1.bf16.msra.mxu0 %v8315_v55  ;;  %5966 = vmatpush1.bf16.msra.mxu1 %v8318_v56  ;;  %v8410_v55 = vld [vmem:[%s11635_s1 + $0x100c] ss:$16 sps:$4 sm:$0xff]   ;;  %v1126_v56 = vcombine.high %v10614_v51, %v10614_v51 }
 0x1d4   : > { %5434 = vmatprep.subr.bf16.mxu0 %v8323_v47  ;;  %5967 = vmatprep.subr.bf16.mxu1 %v8326_v57  ;;  %v1108_v47 = vcombine.high %v10423_v48, %v10423_v48  ;;  %v8405_v57 = vld [vmem:[%s11635_s1 + $0x1000] ss:$16 sps:$4 sm:$0xff]   ;;  %v8416_v48 = vld [vmem:[%s11635_s1 + $0x102c] ss:$16 sps:$4 sm:$0xff]  }
 0x1d7   : > { %5435 = vmatpush1.bf16.msra.mxu0 %v8321_v58  ;;  %5968 = vmatpush1.bf16.msra.mxu1 %v8324_v59  ;;  %v8408_v58 = vld [vmem:[%s11635_s1 + $0x1008] ss:$16 sps:$4 sm:$0xff]   ;;  %v8413_v59 = vld [vmem:[%s11635_s1 + $0x1024] ss:$16 sps:$4 sm:$0xff]  }
 0x1d8   : > { %5436 = vmatprep.subr.bf16.mxu0 %v8329_v60  ;;  %5969 = vmatprep.subr.bf16.mxu1 %v8332_v61  ;;  %v10645_v60 = vrot.slane %v1126_v56, %v9135_v49  ;;  %v8411_v61 = vld [vmem:[%s11635_s1 + $0x1020] ss:$16 sps:$4 sm:$0xff]   ;;  %v8492_v56 = vld [vmem:[%s11635_s1 + $0x11c8] ss:$16 sps:$4 sm:$0xff]  }
 0x1db   : > { %5437 = vmatpush1.bf16.msra.mxu0 %v8327_v62  ;;  %5970 = vmatpush1.bf16.msra.mxu1 %v8330_v63  ;;  %v8414_v62 = vld [vmem:[%s11635_s1 + $0x1028] ss:$16 sps:$4 sm:$0xff]   ;;  %v8419_v63 = vld [vmem:[%s11635_s1 + $0x1044] ss:$16 sps:$4 sm:$0xff]  }
 0x1dc   : > { %5438 = vmatprep.subr.bf16.mxu0 %v8335_v0  ;;  %5971 = vmatprep.subr.bf16.mxu1 %v8338_v1  ;;  %v8422_v0 = vld [vmem:[%s11635_s1 + $0x104c] ss:$16 sps:$4 sm:$0xff]   ;;  %v8417_v1 = vld [vmem:[%s11635_s1 + $0x1040] ss:$16 sps:$4 sm:$0xff]  }
 0x1df   : > { %5439 = vmatpush1.bf16.msra.mxu0 %v8333_v2  ;;  %5972 = vmatpush1.bf16.msra.mxu1 %v8336_v3  ;;  %v8420_v2 = vld [vmem:[%s11635_s1 + $0x1048] ss:$16 sps:$4 sm:$0xff]   ;;  %v8425_v3 = vld [vmem:[%s11635_s1 + $0x1064] ss:$16 sps:$4 sm:$0xff]  }
 0x1e0   : > { %5440 = vmatprep.subr.bf16.mxu0 %v8341_v4  ;;  %5973 = vmatprep.subr.bf16.mxu1 %v8344_v5  ;;  %v8428_v4 = vld [vmem:[%s11635_s1 + $0x106c] ss:$16 sps:$4 sm:$0xff]   ;;  %v8423_v5 = vld [vmem:[%s11635_s1 + $0x1060] ss:$16 sps:$4 sm:$0xff]  }
 0x1e3   : > { %5441 = vmatpush1.bf16.msra.mxu0 %v8339_v6  ;;  %5974 = vmatpush1.bf16.msra.mxu1 %v8342_v7  ;;  %v8426_v6 = vld [vmem:[%s11635_s1 + $0x1068] ss:$16 sps:$4 sm:$0xff]   ;;  %v8431_v7 = vld [vmem:[%s11635_s1 + $0x1084] ss:$16 sps:$4 sm:$0xff]  }
 0x1e4   : > { %5442 = vmatprep.subr.bf16.mxu0 %v8347_v8  ;;  %5975 = vmatprep.subr.bf16.mxu1 %v8350_v9  ;;  %v8434_v8 = vld [vmem:[%s11635_s1 + $0x108c] ss:$16 sps:$4 sm:$0xff]   ;;  %v8429_v9 = vld [vmem:[%s11635_s1 + $0x1080] ss:$16 sps:$4 sm:$0xff]  }
 0x1e7   : > { %5443 = vmatpush1.bf16.msra.mxu0 %v8345_v10  ;;  %5976 = vmatpush1.bf16.msra.mxu1 %v8348_v11  ;;  %v8432_v10 = vld [vmem:[%s11635_s1 + $0x1088] ss:$16 sps:$4 sm:$0xff]   ;;  %v8437_v11 = vld [vmem:[%s11635_s1 + $0x10a4] ss:$16 sps:$4 sm:$0xff]  }
 0x1e8   : > { %5444 = vmatprep.subr.bf16.mxu0 %v8353_v12  ;;  %5977 = vmatprep.subr.bf16.mxu1 %v8356_v52  ;;  %v8440_v12 = vld [vmem:[%s11635_s1 + $0x10ac] ss:$16 sps:$4 sm:$0xff]   ;;  %v8435_v52 = vld [vmem:[%s11635_s1 + $0x10a0] ss:$16 sps:$4 sm:$0xff]  }
 0x1eb   : > { %5445 = vmatpush1.bf16.msra.mxu0 %v8351_v15  ;;  %5978 = vmatpush1.bf16.msra.mxu1 %v8354_v16  ;;  %v8438_v15 = vld [vmem:[%s11635_s1 + $0x10a8] ss:$16 sps:$4 sm:$0xff]   ;;  %v8443_v16 = vld [vmem:[%s11635_s1 + $0x10c4] ss:$16 sps:$4 sm:$0xff]  }
 0x1ec   : > { %5446 = vmatprep.subr.bf16.mxu0 %v8359_v17  ;;  %5979 = vmatprep.subr.bf16.mxu1 %v8362_v18  ;;  %v8446_v17 = vld [vmem:[%s11635_s1 + $0x10cc] ss:$16 sps:$4 sm:$0xff]   ;;  %v8441_v18 = vld [vmem:[%s11635_s1 + $0x10c0] ss:$16 sps:$4 sm:$0xff]  }
 0x1ef   : > { %5447 = vmatpush1.bf16.msra.mxu0 %v8357_v19  ;;  %5980 = vmatpush1.bf16.msra.mxu1 %v8360_v20  ;;  %v8444_v19 = vld [vmem:[%s11635_s1 + $0x10c8] ss:$16 sps:$4 sm:$0xff]   ;;  %v8449_v20 = vld [vmem:[%s11635_s1 + $0x10e4] ss:$16 sps:$4 sm:$0xff]  }
 0x1f0   : > { %5448 = vmatprep.subr.bf16.mxu0 %v8365_v22  ;;  %5981 = vmatprep.subr.bf16.mxu1 %v8368_v23  ;;  %v8452_v22 = vld [vmem:[%s11635_s1 + $0x10ec] ss:$16 sps:$4 sm:$0xff]   ;;  %v8447_v23 = vld [vmem:[%s11635_s1 + $0x10e0] ss:$16 sps:$4 sm:$0xff]  }
 0x1f3   : > { %5449 = vmatpush1.bf16.msra.mxu0 %v8363_v24  ;;  %5982 = vmatpush1.bf16.msra.mxu1 %v8366_v13  ;;  %v8450_v24 = vld [vmem:[%s11635_s1 + $0x10e8] ss:$16 sps:$4 sm:$0xff]   ;;  %v8455_v13 = vld [vmem:[%s11635_s1 + $0x1104] ss:$16 sps:$4 sm:$0xff]  }
 0x1f4   : > { %5450 = vmatprep.subr.bf16.mxu0 %v8371_v27  ;;  %5983 = vmatprep.subr.bf16.mxu1 %v8374_v28  ;;  %v8458_v27 = vld [vmem:[%s11635_s1 + $0x110c] ss:$16 sps:$4 sm:$0xff]   ;;  %v8453_v28 = vld [vmem:[%s11635_s1 + $0x1100] ss:$16 sps:$4 sm:$0xff]  }
 0x1f7   : > { %5451 = vmatpush1.bf16.msra.mxu0 %v8369_v29  ;;  %5984 = vmatpush1.bf16.msra.mxu1 %v8372_v14  ;;  %v8456_v29 = vld [vmem:[%s11635_s1 + $0x1108] ss:$16 sps:$4 sm:$0xff]   ;;  %v8461_v14 = vld [vmem:[%s11635_s1 + $0x1124] ss:$16 sps:$4 sm:$0xff]  }
 0x1f8   : > { %5452 = vmatprep.subr.bf16.mxu0 %v8377_v30  ;;  %5985 = vmatprep.subr.bf16.mxu1 %v8380_v31  ;;  %v8464_v30 = vld [vmem:[%s11635_s1 + $0x112c] ss:$16 sps:$4 sm:$0xff]   ;;  %v8459_v31 = vld [vmem:[%s11635_s1 + $0x1120] ss:$16 sps:$4 sm:$0xff]  }
 0x1fb   : > { %5453 = vmatpush1.bf16.msra.mxu0 %v8375_v25  ;;  %5986 = vmatpush1.bf16.msra.mxu1 %v8378_v32  ;;  %v8462_v25 = vld [vmem:[%s11635_s1 + $0x1128] ss:$16 sps:$4 sm:$0xff]   ;;  %v8467_v32 = vld [vmem:[%s11635_s1 + $0x1144] ss:$16 sps:$4 sm:$0xff]  }
 0x1fc   : > { %5454 = vmatprep.subr.bf16.mxu0 %v8383_v33  ;;  %5987 = vmatprep.subr.bf16.mxu1 %v8386_v26  ;;  %v8470_v33 = vld [vmem:[%s11635_s1 + $0x114c] ss:$16 sps:$4 sm:$0xff]   ;;  %v8465_v26 = vld [vmem:[%s11635_s1 + $0x1140] ss:$16 sps:$4 sm:$0xff]  }
 0x1ff   : > { %5455 = vmatpush1.bf16.msra.mxu0 %v8381_v36  ;;  %5988 = vmatpush1.bf16.msra.mxu1 %v8384_v37  ;;  %v8468_v36 = vld [vmem:[%s11635_s1 + $0x1148] ss:$16 sps:$4 sm:$0xff]   ;;  %v8473_v37 = vld [vmem:[%s11635_s1 + $0x1164] ss:$16 sps:$4 sm:$0xff]  }
 0x200   : > { %5456 = vmatprep.subr.bf16.mxu0 %v8389_v21  ;;  %5989 = vmatprep.subr.bf16.mxu1 %v8392_v39  ;;  %v8476_v21 = vld [vmem:[%s11635_s1 + $0x116c] ss:$16 sps:$4 sm:$0xff]   ;;  %v8471_v39 = vld [vmem:[%s11635_s1 + $0x1160] ss:$16 sps:$4 sm:$0xff]  }
 0x203   : > { %5457 = vmatpush1.bf16.msra.mxu0 %v8387_v40  ;;  %5990 = vmatpush1.bf16.msra.mxu1 %v8390_v41  ;;  %v8474_v40 = vld [vmem:[%s11635_s1 + $0x1168] ss:$16 sps:$4 sm:$0xff]   ;;  %v8479_v41 = vld [vmem:[%s11635_s1 + $0x1184] ss:$16 sps:$4 sm:$0xff]  }
 0x204   : > { %5458 = vmatprep.subr.bf16.mxu0 %v8395_v34  ;;  %5991 = vmatprep.subr.bf16.mxu1 %v8398_v42  ;;  %v8482_v34 = vld [vmem:[%s11635_s1 + $0x118c] ss:$16 sps:$4 sm:$0xff]   ;;  %v8477_v42 = vld [vmem:[%s11635_s1 + $0x1180] ss:$16 sps:$4 sm:$0xff]  }
 0x207   : > { %5459 = vmatpush1.bf16.msra.mxu0 %v8393_v45  ;;  %5992 = vmatpush1.bf16.msra.mxu1 %v8396_v46  ;;  %v8480_v45 = vld [vmem:[%s11635_s1 + $0x1188] ss:$16 sps:$4 sm:$0xff]   ;;  %v8485_v46 = vld [vmem:[%s11635_s1 + $0x11a4] ss:$16 sps:$4 sm:$0xff]  }
 0x208   : > { %5460 = vmatprep.subr.bf16.mxu0 %v8401_v35  ;;  %5993 = vmatprep.subr.bf16.mxu1 %v8404_v50  ;;  %v8488_v35 = vld [vmem:[%s11635_s1 + $0x11ac] ss:$16 sps:$4 sm:$0xff]   ;;  %v8483_v50 = vld [vmem:[%s11635_s1 + $0x11a0] ss:$16 sps:$4 sm:$0xff]  }
 0x20b   : > { %5461 = vmatpush1.bf16.msra.mxu0 %v8399_v53  ;;  %5994 = vmatpush1.bf16.msra.mxu1 %v8402_v38  ;;  %v8486_v53 = vld [vmem:[%s11635_s1 + $0x11a8] ss:$16 sps:$4 sm:$0xff]   ;;  %v8491_v38 = vld [vmem:[%s11635_s1 + $0x11c4] ss:$16 sps:$4 sm:$0xff]  }
 0x20c   : > { %5471 = vmatprep.subr.bf16.mxu0 %v8407_v54  ;;  %6004 = vmatprep.subr.bf16.mxu1 %v8410_v55  ;;  %v8494_v54 = vld [vmem:[%s11635_s1 + $0x11cc] ss:$16 sps:$4 sm:$0xff]   ;;  %v8489_v55 = vld [vmem:[%s11635_s1 + $0x11c0] ss:$16 sps:$4 sm:$0xff]  }
 0x20e   : > { %5463 = vmatmul.mubr.bf16.vlgmr.msra.gmra.mrb[0].mxu0 %v1108_v47  ;;  %5996 = vmatmul.mubr.bf16.vlgmr.msra.gmra.mrb[0].mxu1 %v1108_v47  ;;  %v8497_v47 = vld [vmem:[%s11635_s1 + $0x11e4] ss:$16 sps:$4 sm:$0xff]  }
 0x20f   : > { %5472 = vmatpush1.bf16.msra.mxu0 %v8405_v57  ;;  %6005 = vmatpush1.bf16.msra.mxu1 %v8408_v58  ;;  %v8500_v57 = vld [vmem:[%s11635_s1 + $0x11ec] ss:$16 sps:$4 sm:$0xff]   ;;  %v8495_v58 = vld [vmem:[%s11635_s1 + $0x11e0] ss:$16 sps:$4 sm:$0xff]  }
 0x210   : > { %5473 = vmatprep.subr.bf16.mxu0 %v8413_v59  ;;  %6006 = vmatprep.subr.bf16.mxu1 %v8416_v48  ;;  %v8498_v59 = vld [vmem:[%s11635_s1 + $0x11e8] ss:$16 sps:$4 sm:$0xff]   ;;  %v8503_v48 = vld [vmem:[%s11635_s1 + $0x1204] ss:$16 sps:$4 sm:$0xff]  }
 0x211   : > { %5503 = vmatprep.mubr.bf16.mxu0 %v10645_v60  ;;  %6036 = vmatprep.mubr.bf16.mxu1 %v10645_v60 }
 0x213   : > { %5474 = vmatpush1.bf16.msra.mxu0 %v8411_v61  ;;  %6007 = vmatpush1.bf16.msra.mxu1 %v8414_v62  ;;  %v8506_v61 = vld [vmem:[%s11635_s1 + $0x120c] ss:$16 sps:$4 sm:$0xff]   ;;  %v10831_v62 = vrot.slane %v10614_v51, %v9135_v49 }
 0x214   : > { %5475 = vmatprep.subr.bf16.mxu0 %v8419_v63  ;;  %6008 = vmatprep.subr.bf16.mxu1 %v8422_v0  ;;  %v8501_v63 = vld [vmem:[%s11635_s1 + $0x1200] ss:$16 sps:$4 sm:$0xff]   ;;  %v8504_v0 = vld [vmem:[%s11635_s1 + $0x1208] ss:$16 sps:$4 sm:$0xff]   ;;  %v8512_v51 = vld [vmem:[%s11635_s1 + $0x122c] ss:$16 sps:$4 sm:$0xff]  }
 0x217   : > { %5476 = vmatpush1.bf16.msra.mxu0 %v8417_v1  ;;  %6009 = vmatpush1.bf16.msra.mxu1 %v8420_v2  ;;  %v8509_v1 = vld [vmem:[%s11635_s1 + $0x1224] ss:$16 sps:$4 sm:$0xff]   ;;  %v1158_v2 = vcombine.high %v10645_v60, %v10645_v60 }
 0x218   : > { %5477 = vmatprep.subr.bf16.mxu0 %v8425_v3  ;;  %6010 = vmatprep.subr.bf16.mxu1 %v8428_v4  ;;  %v8507_v3 = vld [vmem:[%s11635_s1 + $0x1220] ss:$16 sps:$4 sm:$0xff]   ;;  %v8510_v4 = vld [vmem:[%s11635_s1 + $0x1228] ss:$16 sps:$4 sm:$0xff]   ;;  %v8515_v60 = vld [vmem:[%s11635_s1 + $0x1244] ss:$16 sps:$4 sm:$0xff]  }
 0x21b   : > { %5478 = vmatpush1.bf16.msra.mxu0 %v8423_v5  ;;  %6011 = vmatpush1.bf16.msra.mxu1 %v8426_v6  ;;  %v8518_v5 = vld [vmem:[%s11635_s1 + $0x124c] ss:$16 sps:$4 sm:$0xff]   ;;  %v8513_v6 = vld [vmem:[%s11635_s1 + $0x1240] ss:$16 sps:$4 sm:$0xff]  }
 0x21c   : > { %5479 = vmatprep.subr.bf16.mxu0 %v8431_v7  ;;  %6012 = vmatprep.subr.bf16.mxu1 %v8434_v8  ;;  %v8516_v7 = vld [vmem:[%s11635_s1 + $0x1248] ss:$16 sps:$4 sm:$0xff]   ;;  %v8521_v8 = vld [vmem:[%s11635_s1 + $0x1264] ss:$16 sps:$4 sm:$0xff]  }
 0x21f   : > { %5480 = vmatpush1.bf16.msra.mxu0 %v8429_v9  ;;  %6013 = vmatpush1.bf16.msra.mxu1 %v8432_v10  ;;  %v8524_v9 = vld [vmem:[%s11635_s1 + $0x126c] ss:$16 sps:$4 sm:$0xff]   ;;  %v8519_v10 = vld [vmem:[%s11635_s1 + $0x1260] ss:$16 sps:$4 sm:$0xff]  }
 0x220   : > { %5481 = vmatprep.subr.bf16.mxu0 %v8437_v11  ;;  %6014 = vmatprep.subr.bf16.mxu1 %v8440_v12  ;;  %v8522_v11 = vld [vmem:[%s11635_s1 + $0x1268] ss:$16 sps:$4 sm:$0xff]   ;;  %v8527_v12 = vld [vmem:[%s11635_s1 + $0x1284] ss:$16 sps:$4 sm:$0xff]  }
 0x223   : > { %5482 = vmatpush1.bf16.msra.mxu0 %v8435_v52  ;;  %6015 = vmatpush1.bf16.msra.mxu1 %v8438_v15  ;;  %v8530_v52 = vld [vmem:[%s11635_s1 + $0x128c] ss:$16 sps:$4 sm:$0xff]   ;;  %v8525_v15 = vld [vmem:[%s11635_s1 + $0x1280] ss:$16 sps:$4 sm:$0xff]  }
 0x224   : > { %5483 = vmatprep.subr.bf16.mxu0 %v8443_v16  ;;  %6016 = vmatprep.subr.bf16.mxu1 %v8446_v17  ;;  %v8528_v16 = vld [vmem:[%s11635_s1 + $0x1288] ss:$16 sps:$4 sm:$0xff]   ;;  %v8533_v17 = vld [vmem:[%s11635_s1 + $0x12a4] ss:$16 sps:$4 sm:$0xff]  }
 0x227   : > { %5484 = vmatpush1.bf16.msra.mxu0 %v8441_v18  ;;  %6017 = vmatpush1.bf16.msra.mxu1 %v8444_v19  ;;  %v8536_v18 = vld [vmem:[%s11635_s1 + $0x12ac] ss:$16 sps:$4 sm:$0xff]   ;;  %v8531_v19 = vld [vmem:[%s11635_s1 + $0x12a0] ss:$16 sps:$4 sm:$0xff]  }
 0x228   : > { %5485 = vmatprep.subr.bf16.mxu0 %v8449_v20  ;;  %6018 = vmatprep.subr.bf16.mxu1 %v8452_v22  ;;  %v8534_v20 = vld [vmem:[%s11635_s1 + $0x12a8] ss:$16 sps:$4 sm:$0xff]   ;;  %v8539_v22 = vld [vmem:[%s11635_s1 + $0x12c4] ss:$16 sps:$4 sm:$0xff]  }
 0x22b   : > { %5486 = vmatpush1.bf16.msra.mxu0 %v8447_v23  ;;  %6019 = vmatpush1.bf16.msra.mxu1 %v8450_v24  ;;  %v8542_v23 = vld [vmem:[%s11635_s1 + $0x12cc] ss:$16 sps:$4 sm:$0xff]   ;;  %v8537_v24 = vld [vmem:[%s11635_s1 + $0x12c0] ss:$16 sps:$4 sm:$0xff]  }
 0x22c   : > { %5487 = vmatprep.subr.bf16.mxu0 %v8455_v13  ;;  %6020 = vmatprep.subr.bf16.mxu1 %v8458_v27  ;;  %v8540_v13 = vld [vmem:[%s11635_s1 + $0x12c8] ss:$16 sps:$4 sm:$0xff]   ;;  %v8545_v27 = vld [vmem:[%s11635_s1 + $0x12e4] ss:$16 sps:$4 sm:$0xff]  }
 0x22f   : > { %5488 = vmatpush1.bf16.msra.mxu0 %v8453_v28  ;;  %6021 = vmatpush1.bf16.msra.mxu1 %v8456_v29  ;;  %v8548_v28 = vld [vmem:[%s11635_s1 + $0x12ec] ss:$16 sps:$4 sm:$0xff]   ;;  %v8543_v29 = vld [vmem:[%s11635_s1 + $0x12e0] ss:$16 sps:$4 sm:$0xff]  }
 0x230   : > { %5489 = vmatprep.subr.bf16.mxu0 %v8461_v14  ;;  %6022 = vmatprep.subr.bf16.mxu1 %v8464_v30  ;;  %v8546_v14 = vld [vmem:[%s11635_s1 + $0x12e8] ss:$16 sps:$4 sm:$0xff]   ;;  %v8551_v30 = vld [vmem:[%s11635_s1 + $0x1304] ss:$16 sps:$4 sm:$0xff]  }
 0x233   : > { %5490 = vmatpush1.bf16.msra.mxu0 %v8459_v31  ;;  %6023 = vmatpush1.bf16.msra.mxu1 %v8462_v25  ;;  %v8554_v31 = vld [vmem:[%s11635_s1 + $0x130c] ss:$16 sps:$4 sm:$0xff]   ;;  %v8549_v25 = vld [vmem:[%s11635_s1 + $0x1300] ss:$16 sps:$4 sm:$0xff]  }
 0x234   : > { %5491 = vmatprep.subr.bf16.mxu0 %v8467_v32  ;;  %6024 = vmatprep.subr.bf16.mxu1 %v8470_v33  ;;  %v8552_v32 = vld [vmem:[%s11635_s1 + $0x1308] ss:$16 sps:$4 sm:$0xff]   ;;  %v8557_v33 = vld [vmem:[%s11635_s1 + $0x1324] ss:$16 sps:$4 sm:$0xff]  }
 0x237   : > { %5492 = vmatpush1.bf16.msra.mxu0 %v8465_v26  ;;  %6025 = vmatpush1.bf16.msra.mxu1 %v8468_v36  ;;  %v8560_v26 = vld [vmem:[%s11635_s1 + $0x132c] ss:$16 sps:$4 sm:$0xff]   ;;  %v8555_v36 = vld [vmem:[%s11635_s1 + $0x1320] ss:$16 sps:$4 sm:$0xff]  }
 0x238   : > { %5493 = vmatprep.subr.bf16.mxu0 %v8473_v37  ;;  %6026 = vmatprep.subr.bf16.mxu1 %v8476_v21  ;;  %v8558_v37 = vld [vmem:[%s11635_s1 + $0x1328] ss:$16 sps:$4 sm:$0xff]   ;;  %v8563_v21 = vld [vmem:[%s11635_s1 + $0x1344] ss:$16 sps:$4 sm:$0xff]  }
 0x23b   : > { %5494 = vmatpush1.bf16.msra.mxu0 %v8471_v39  ;;  %6027 = vmatpush1.bf16.msra.mxu1 %v8474_v40  ;;  %v8566_v39 = vld [vmem:[%s11635_s1 + $0x134c] ss:$16 sps:$4 sm:$0xff]   ;;  %v8561_v40 = vld [vmem:[%s11635_s1 + $0x1340] ss:$16 sps:$4 sm:$0xff]  }
 0x23c   : > { %5495 = vmatprep.subr.bf16.mxu0 %v8479_v41  ;;  %6028 = vmatprep.subr.bf16.mxu1 %v8482_v34  ;;  %v8564_v41 = vld [vmem:[%s11635_s1 + $0x1348] ss:$16 sps:$4 sm:$0xff]   ;;  %v8569_v34 = vld [vmem:[%s11635_s1 + $0x1364] ss:$16 sps:$4 sm:$0xff]  }
 0x23f   : > { %5496 = vmatpush1.bf16.msra.mxu0 %v8477_v42  ;;  %6029 = vmatpush1.bf16.msra.mxu1 %v8480_v45  ;;  %v8572_v42 = vld [vmem:[%s11635_s1 + $0x136c] ss:$16 sps:$4 sm:$0xff]   ;;  %v8567_v45 = vld [vmem:[%s11635_s1 + $0x1360] ss:$16 sps:$4 sm:$0xff]  }
 0x240   : > { %5497 = vmatprep.subr.bf16.mxu0 %v8485_v46  ;;  %6030 = vmatprep.subr.bf16.mxu1 %v8488_v35  ;;  %v8570_v46 = vld [vmem:[%s11635_s1 + $0x1368] ss:$16 sps:$4 sm:$0xff]   ;;  %v8575_v35 = vld [vmem:[%s11635_s1 + $0x1384] ss:$16 sps:$4 sm:$0xff]  }
 0x243   : > { %5498 = vmatpush1.bf16.msra.mxu0 %v8483_v50  ;;  %6031 = vmatpush1.bf16.msra.mxu1 %v8486_v53  ;;  %v8578_v50 = vld [vmem:[%s11635_s1 + $0x138c] ss:$16 sps:$4 sm:$0xff]   ;;  %v8573_v53 = vld [vmem:[%s11635_s1 + $0x1380] ss:$16 sps:$4 sm:$0xff]  }
 0x244   : > { %5499 = vmatprep.subr.bf16.mxu0 %v8491_v38  ;;  %6032 = vmatprep.subr.bf16.mxu1 %v8494_v54  ;;  %v8576_v38 = vld [vmem:[%s11635_s1 + $0x1388] ss:$16 sps:$4 sm:$0xff]   ;;  %v8581_v54 = vld [vmem:[%s11635_s1 + $0x13a4] ss:$16 sps:$4 sm:$0xff]  }
 0x247   : > { %5500 = vmatpush1.bf16.msra.mxu0 %v8489_v55  ;;  %6033 = vmatpush1.bf16.msra.mxu1 %v8492_v56  ;;  %v8584_v55 = vld [vmem:[%s11635_s1 + $0x13ac] ss:$16 sps:$4 sm:$0xff]   ;;  %v8579_v56 = vld [vmem:[%s11635_s1 + $0x13a0] ss:$16 sps:$4 sm:$0xff]  }
 0x248   : > { %5501 = vmatprep.subr.bf16.mxu0 %v8497_v47  ;;  %6034 = vmatprep.subr.bf16.mxu1 %v8500_v57  ;;  %v8582_v47 = vld [vmem:[%s11635_s1 + $0x13a8] ss:$16 sps:$4 sm:$0xff]   ;;  %v8587_v57 = vld [vmem:[%s11635_s1 + $0x13c4] ss:$16 sps:$4 sm:$0xff]  }
 0x24b   : > { %5502 = vmatpush1.bf16.msra.mxu0 %v8495_v58  ;;  %6035 = vmatpush1.bf16.msra.mxu1 %v8498_v59  ;;  %v8590_v58 = vld [vmem:[%s11635_s1 + $0x13cc] ss:$16 sps:$4 sm:$0xff]   ;;  %v1111_v59 = vcombine.high %v10598_v44, %v10598_v44 }
 0x24c   : > { %5512 = vmatprep.subr.bf16.mxu0 %v8503_v48  ;;  %6045 = vmatprep.subr.bf16.mxu1 %v8506_v61  ;;  %v8585_v48 = vld [vmem:[%s11635_s1 + $0x13c0] ss:$16 sps:$4 sm:$0xff]   ;;  %v8588_v61 = vld [vmem:[%s11635_s1 + $0x13c8] ss:$16 sps:$4 sm:$0xff]   ;;  %v8596_v44 = vld [vmem:[%s11635_s1 + $0x13ec] ss:$16 sps:$4 sm:$0xff]  }
 0x24e   : > { %5504 = vmatmul.mubr.bf16.vlgmr.msra.gmra.mrb[0].mxu0 %v10831_v62  ;;  %6037 = vmatmul.mubr.bf16.vlgmr.msra.gmra.mrb[0].mxu1 %v10831_v62 }
 0x24f   : > { %5513 = vmatpush1.bf16.msra.mxu0 %v8501_v63  ;;  %6046 = vmatpush1.bf16.msra.mxu1 %v8504_v0  ;;  %v8593_v63 = vld [vmem:[%s11635_s1 + $0x13e4] ss:$16 sps:$4 sm:$0xff]   ;;  %v11020_v0 = vrot.slane %v1111_v59, %v9135_v49  ;;  %v8672_v59 = vld [vmem:[%s11635_s1 + $0x1588] ss:$16 sps:$4 sm:$0xff]  }
 0x250   : > { %5514 = vmatprep.subr.bf16.mxu0 %v8509_v1  ;;  %6047 = vmatprep.subr.bf16.mxu1 %v8512_v51  ;;  %v8591_v1 = vld [vmem:[%s11635_s1 + $0x13e0] ss:$16 sps:$4 sm:$0xff]   ;;  %v8594_v51 = vld [vmem:[%s11635_s1 + $0x13e8] ss:$16 sps:$4 sm:$0xff]  }
 0x251   : > { %5544 = vmatprep.mubr.bf16.mxu0 %v1158_v2  ;;  %6077 = vmatprep.mubr.bf16.mxu1 %v1158_v2  ;;  %v8599_v2 = vld [vmem:[%s11635_s1 + $0x1404] ss:$16 sps:$4 sm:$0xff]  }
 0x253   : > { %5515 = vmatpush1.bf16.msra.mxu0 %v8507_v3  ;;  %6048 = vmatpush1.bf16.msra.mxu1 %v8510_v4  ;;  %v8602_v3 = vld [vmem:[%s11635_s1 + $0x140c] ss:$16 sps:$4 sm:$0xff]   ;;  %v1127_v4 = vcombine.high %v11020_v0, %v11020_v0 }
 0x254   : > { %5516 = vmatprep.subr.bf16.mxu0 %v8515_v60  ;;  %6049 = vmatprep.subr.bf16.mxu1 %v8518_v5  ;;  %v1156_v60 = vcombine.high %v10831_v62, %v10831_v62  ;;  %v8597_v5 = vld [vmem:[%s11635_s1 + $0x1400] ss:$16 sps:$4 sm:$0xff]   ;;  %v8608_v62 = vld [vmem:[%s11635_s1 + $0x142c] ss:$16 sps:$4 sm:$0xff]  }
 0x257   : > { %5517 = vmatpush1.bf16.msra.mxu0 %v8513_v6  ;;  %6050 = vmatpush1.bf16.msra.mxu1 %v8516_v7  ;;  %v8600_v6 = vld [vmem:[%s11635_s1 + $0x1408] ss:$16 sps:$4 sm:$0xff]   ;;  %v8605_v7 = vld [vmem:[%s11635_s1 + $0x1424] ss:$16 sps:$4 sm:$0xff]  }
 0x258   : > { %5518 = vmatprep.subr.bf16.mxu0 %v8521_v8  ;;  %6051 = vmatprep.subr.bf16.mxu1 %v8524_v9  ;;  %v11051_v8 = vrot.slane %v1127_v4, %v9135_v49  ;;  %v8603_v9 = vld [vmem:[%s11635_s1 + $0x1420] ss:$16 sps:$4 sm:$0xff]   ;;  %v8689_v4 = vld [vmem:[%s11635_s1 + $0x15e4] ss:$16 sps:$4 sm:$0xff]  }
 0x25b   : > { %5519 = vmatpush1.bf16.msra.mxu0 %v8519_v10  ;;  %6052 = vmatpush1.bf16.msra.mxu1 %v8522_v11  ;;  %v8606_v10 = vld [vmem:[%s11635_s1 + $0x1428] ss:$16 sps:$4 sm:$0xff]   ;;  %v8611_v11 = vld [vmem:[%s11635_s1 + $0x1444] ss:$16 sps:$4 sm:$0xff]  }
 0x25c   : > { %5520 = vmatprep.subr.bf16.mxu0 %v8527_v12  ;;  %6053 = vmatprep.subr.bf16.mxu1 %v8530_v52  ;;  %v8614_v12 = vld [vmem:[%s11635_s1 + $0x144c] ss:$16 sps:$4 sm:$0xff]   ;;  %v8609_v52 = vld [vmem:[%s11635_s1 + $0x1440] ss:$16 sps:$4 sm:$0xff]  }
 0x25f   : > { %5521 = vmatpush1.bf16.msra.mxu0 %v8525_v15  ;;  %6054 = vmatpush1.bf16.msra.mxu1 %v8528_v16  ;;  %v8612_v15 = vld [vmem:[%s11635_s1 + $0x1448] ss:$16 sps:$4 sm:$0xff]   ;;  %v8617_v16 = vld [vmem:[%s11635_s1 + $0x1464] ss:$16 sps:$4 sm:$0xff]  }
 0x260   : > { %5522 = vmatprep.subr.bf16.mxu0 %v8533_v17  ;;  %6055 = vmatprep.subr.bf16.mxu1 %v8536_v18  ;;  %v8620_v17 = vld [vmem:[%s11635_s1 + $0x146c] ss:$16 sps:$4 sm:$0xff]   ;;  %v8615_v18 = vld [vmem:[%s11635_s1 + $0x1460] ss:$16 sps:$4 sm:$0xff]  }
 0x263   : > { %5523 = vmatpush1.bf16.msra.mxu0 %v8531_v19  ;;  %6056 = vmatpush1.bf16.msra.mxu1 %v8534_v20  ;;  %v8618_v19 = vld [vmem:[%s11635_s1 + $0x1468] ss:$16 sps:$4 sm:$0xff]   ;;  %v8623_v20 = vld [vmem:[%s11635_s1 + $0x1484] ss:$16 sps:$4 sm:$0xff]  }
 0x264   : > { %5524 = vmatprep.subr.bf16.mxu0 %v8539_v22  ;;  %6057 = vmatprep.subr.bf16.mxu1 %v8542_v23  ;;  %v8626_v22 = vld [vmem:[%s11635_s1 + $0x148c] ss:$16 sps:$4 sm:$0xff]   ;;  %v8621_v23 = vld [vmem:[%s11635_s1 + $0x1480] ss:$16 sps:$4 sm:$0xff]  }
 0x267   : > { %5525 = vmatpush1.bf16.msra.mxu0 %v8537_v24  ;;  %6058 = vmatpush1.bf16.msra.mxu1 %v8540_v13  ;;  %v8624_v24 = vld [vmem:[%s11635_s1 + $0x1488] ss:$16 sps:$4 sm:$0xff]   ;;  %v8629_v13 = vld [vmem:[%s11635_s1 + $0x14a4] ss:$16 sps:$4 sm:$0xff]  }
 0x268   : > { %5526 = vmatprep.subr.bf16.mxu0 %v8545_v27  ;;  %6059 = vmatprep.subr.bf16.mxu1 %v8548_v28  ;;  %v8632_v27 = vld [vmem:[%s11635_s1 + $0x14ac] ss:$16 sps:$4 sm:$0xff]   ;;  %v8627_v28 = vld [vmem:[%s11635_s1 + $0x14a0] ss:$16 sps:$4 sm:$0xff]  }
 0x26b   : > { %5527 = vmatpush1.bf16.msra.mxu0 %v8543_v29  ;;  %6060 = vmatpush1.bf16.msra.mxu1 %v8546_v14  ;;  %v8630_v29 = vld [vmem:[%s11635_s1 + $0x14a8] ss:$16 sps:$4 sm:$0xff]   ;;  %v8635_v14 = vld [vmem:[%s11635_s1 + $0x14c4] ss:$16 sps:$4 sm:$0xff]  }
 0x26c   : > { %5528 = vmatprep.subr.bf16.mxu0 %v8551_v30  ;;  %6061 = vmatprep.subr.bf16.mxu1 %v8554_v31  ;;  %v8638_v30 = vld [vmem:[%s11635_s1 + $0x14cc] ss:$16 sps:$4 sm:$0xff]   ;;  %v8633_v31 = vld [vmem:[%s11635_s1 + $0x14c0] ss:$16 sps:$4 sm:$0xff]  }
 0x26f   : > { %5529 = vmatpush1.bf16.msra.mxu0 %v8549_v25  ;;  %6062 = vmatpush1.bf16.msra.mxu1 %v8552_v32  ;;  %v8636_v25 = vld [vmem:[%s11635_s1 + $0x14c8] ss:$16 sps:$4 sm:$0xff]   ;;  %v8641_v32 = vld [vmem:[%s11635_s1 + $0x14e4] ss:$16 sps:$4 sm:$0xff]  }
 0x270   : > { %5530 = vmatprep.subr.bf16.mxu0 %v8557_v33  ;;  %6063 = vmatprep.subr.bf16.mxu1 %v8560_v26  ;;  %v8644_v33 = vld [vmem:[%s11635_s1 + $0x14ec] ss:$16 sps:$4 sm:$0xff]   ;;  %v8639_v26 = vld [vmem:[%s11635_s1 + $0x14e0] ss:$16 sps:$4 sm:$0xff]  }
 0x273   : > { %5531 = vmatpush1.bf16.msra.mxu0 %v8555_v36  ;;  %6064 = vmatpush1.bf16.msra.mxu1 %v8558_v37  ;;  %v8642_v36 = vld [vmem:[%s11635_s1 + $0x14e8] ss:$16 sps:$4 sm:$0xff]   ;;  %v8647_v37 = vld [vmem:[%s11635_s1 + $0x1504] ss:$16 sps:$4 sm:$0xff]  }
 0x274   : > { %5532 = vmatprep.subr.bf16.mxu0 %v8563_v21  ;;  %6065 = vmatprep.subr.bf16.mxu1 %v8566_v39  ;;  %v8650_v21 = vld [vmem:[%s11635_s1 + $0x150c] ss:$16 sps:$4 sm:$0xff]   ;;  %v8645_v39 = vld [vmem:[%s11635_s1 + $0x1500] ss:$16 sps:$4 sm:$0xff]  }
 0x277   : > { %5533 = vmatpush1.bf16.msra.mxu0 %v8561_v40  ;;  %6066 = vmatpush1.bf16.msra.mxu1 %v8564_v41  ;;  %v8648_v40 = vld [vmem:[%s11635_s1 + $0x1508] ss:$16 sps:$4 sm:$0xff]   ;;  %v8653_v41 = vld [vmem:[%s11635_s1 + $0x1524] ss:$16 sps:$4 sm:$0xff]  }
 0x278   : > { %5534 = vmatprep.subr.bf16.mxu0 %v8569_v34  ;;  %6067 = vmatprep.subr.bf16.mxu1 %v8572_v42  ;;  %v8656_v34 = vld [vmem:[%s11635_s1 + $0x152c] ss:$16 sps:$4 sm:$0xff]   ;;  %v8651_v42 = vld [vmem:[%s11635_s1 + $0x1520] ss:$16 sps:$4 sm:$0xff]  }
 0x27b   : > { %5535 = vmatpush1.bf16.msra.mxu0 %v8567_v45  ;;  %6068 = vmatpush1.bf16.msra.mxu1 %v8570_v46  ;;  %v8654_v45 = vld [vmem:[%s11635_s1 + $0x1528] ss:$16 sps:$4 sm:$0xff]   ;;  %v8659_v46 = vld [vmem:[%s11635_s1 + $0x1544] ss:$16 sps:$4 sm:$0xff]  }
 0x27c   : > { %5536 = vmatprep.subr.bf16.mxu0 %v8575_v35  ;;  %6069 = vmatprep.subr.bf16.mxu1 %v8578_v50  ;;  %v8662_v35 = vld [vmem:[%s11635_s1 + $0x154c] ss:$16 sps:$4 sm:$0xff]   ;;  %v8657_v50 = vld [vmem:[%s11635_s1 + $0x1540] ss:$16 sps:$4 sm:$0xff]  }
 0x27f   : > { %5537 = vmatpush1.bf16.msra.mxu0 %v8573_v53  ;;  %6070 = vmatpush1.bf16.msra.mxu1 %v8576_v38  ;;  %v8660_v53 = vld [vmem:[%s11635_s1 + $0x1548] ss:$16 sps:$4 sm:$0xff]   ;;  %v8665_v38 = vld [vmem:[%s11635_s1 + $0x1564] ss:$16 sps:$4 sm:$0xff]  }
 0x280   : > { %5538 = vmatprep.subr.bf16.mxu0 %v8581_v54  ;;  %6071 = vmatprep.subr.bf16.mxu1 %v8584_v55  ;;  %v8668_v54 = vld [vmem:[%s11635_s1 + $0x156c] ss:$16 sps:$4 sm:$0xff]   ;;  %v8663_v55 = vld [vmem:[%s11635_s1 + $0x1560] ss:$16 sps:$4 sm:$0xff]  }
 0x283   : > { %5539 = vmatpush1.bf16.msra.mxu0 %v8579_v56  ;;  %6072 = vmatpush1.bf16.msra.mxu1 %v8582_v47  ;;  %v8666_v56 = vld [vmem:[%s11635_s1 + $0x1568] ss:$16 sps:$4 sm:$0xff]   ;;  %v8671_v47 = vld [vmem:[%s11635_s1 + $0x1584] ss:$16 sps:$4 sm:$0xff]  }
 0x284   : > { %5540 = vmatprep.subr.bf16.mxu0 %v8587_v57  ;;  %6073 = vmatprep.subr.bf16.mxu1 %v8590_v58  ;;  %v8674_v57 = vld [vmem:[%s11635_s1 + $0x158c] ss:$16 sps:$4 sm:$0xff]   ;;  %v8669_v58 = vld [vmem:[%s11635_s1 + $0x1580] ss:$16 sps:$4 sm:$0xff]  }
 0x287   : > { %5541 = vmatpush1.bf16.msra.mxu0 %v8585_v48  ;;  %6074 = vmatpush1.bf16.msra.mxu1 %v8588_v61  ;;  %v8677_v48 = vld [vmem:[%s11635_s1 + $0x15a4] ss:$16 sps:$4 sm:$0xff]   ;;  %v8680_v61 = vld [vmem:[%s11635_s1 + $0x15ac] ss:$16 sps:$4 sm:$0xff]  }
 0x288   : > { %5542 = vmatprep.subr.bf16.mxu0 %v8593_v63  ;;  %6075 = vmatprep.subr.bf16.mxu1 %v8596_v44  ;;  %v8675_v63 = vld [vmem:[%s11635_s1 + $0x15a0] ss:$16 sps:$4 sm:$0xff]   ;;  %v8678_v44 = vld [vmem:[%s11635_s1 + $0x15a8] ss:$16 sps:$4 sm:$0xff]  }
 0x28b   : > { %5543 = vmatpush1.bf16.msra.mxu0 %v8591_v1  ;;  %6076 = vmatpush1.bf16.msra.mxu1 %v8594_v51  ;;  %v8683_v1 = vld [vmem:[%s11635_s1 + $0x15c4] ss:$16 sps:$4 sm:$0xff]   ;;  %v8686_v51 = vld [vmem:[%s11635_s1 + $0x15cc] ss:$16 sps:$4 sm:$0xff]  }
 0x28c   : > { %5553 = vmatprep.subr.bf16.mxu0 %v8599_v2  ;;  %6086 = vmatprep.subr.bf16.mxu1 %v8602_v3  ;;  %v8681_v2 = vld [vmem:[%s11635_s1 + $0x15c0] ss:$16 sps:$4 sm:$0xff]   ;;  %v8684_v3 = vld [vmem:[%s11635_s1 + $0x15c8] ss:$16 sps:$4 sm:$0xff]  }
 0x28e   : > { %5545 = vmatmul.mubr.bf16.vlgmr.msra.gmra.mrb[0].mxu0 %v1156_v60  ;;  %6078 = vmatmul.mubr.bf16.vlgmr.msra.gmra.mrb[0].mxu1 %v1156_v60  ;;  %v8692_v60 = vld [vmem:[%s11635_s1 + $0x15ec] ss:$16 sps:$4 sm:$0xff]  }
 0x28f   : > { %5554 = vmatpush1.bf16.msra.mxu0 %v8597_v5  ;;  %6087 = vmatpush1.bf16.msra.mxu1 %v8600_v6  ;;  %v8687_v5 = vld [vmem:[%s11635_s1 + $0x15e0] ss:$16 sps:$4 sm:$0xff]   ;;  %v8690_v6 = vld [vmem:[%s11635_s1 + $0x15e8] ss:$16 sps:$4 sm:$0xff]  }
 0x290   : > { %5555 = vmatprep.subr.bf16.mxu0 %v8605_v7  ;;  %6088 = vmatprep.subr.bf16.mxu1 %v8608_v62  ;;  %v8696_v7 = vld [vmem:[%s11635_s1 + $0x1604] ss:$16 sps:$4 sm:$0xff]   ;;  %v8699_v62 = vld [vmem:[%s11635_s1 + $0x160c] ss:$16 sps:$4 sm:$0xff]  }
 0x291   : > { %5585 = vmatprep.mubr.bf16.mxu0 %v11051_v8  ;;  %6118 = vmatprep.mubr.bf16.mxu1 %v11051_v8 }
 0x293   : > { %5556 = vmatpush1.bf16.msra.mxu0 %v8603_v9  ;;  %6089 = vmatpush1.bf16.msra.mxu1 %v8606_v10  ;;  %v11237_v9 = vrot.slane %v11020_v0, %v9135_v49  ;;  %v8694_v10 = vld [vmem:[%s11635_s1 + $0x1600] ss:$16 sps:$4 sm:$0xff]   ;;  %v8705_v0 = vld [vmem:[%s11635_s1 + $0x162c] ss:$16 sps:$4 sm:$0xff]  }
 0x294   : > { %5557 = vmatprep.subr.bf16.mxu0 %v8611_v11  ;;  %6090 = vmatprep.subr.bf16.mxu1 %v8614_v12  ;;  %v8697_v11 = vld [vmem:[%s11635_s1 + $0x1608] ss:$16 sps:$4 sm:$0xff]   ;;  %v8702_v12 = vld [vmem:[%s11635_s1 + $0x1624] ss:$16 sps:$4 sm:$0xff]  }
 0x297   : > { %5558 = vmatpush1.bf16.msra.mxu0 %v8609_v52  ;;  %6091 = vmatpush1.bf16.msra.mxu1 %v8612_v15  ;;  %v1159_v52 = vcombine.high %v11051_v8, %v11051_v8  ;;  %v8700_v15 = vld [vmem:[%s11635_s1 + $0x1620] ss:$16 sps:$4 sm:$0xff]   ;;  %v8708_v8 = vld [vmem:[%s11635_s1 + $0x1644] ss:$16 sps:$4 sm:$0xff]  }
 0x298   : > { %5559 = vmatprep.subr.bf16.mxu0 %v8617_v16  ;;  %6092 = vmatprep.subr.bf16.mxu1 %v8620_v17  ;;  %v8703_v16 = vld [vmem:[%s11635_s1 + $0x1628] ss:$16 sps:$4 sm:$0xff]   ;;  %v8711_v17 = vld [vmem:[%s11635_s1 + $0x164c] ss:$16 sps:$4 sm:$0xff]  }
 0x29b   : > { %5560 = vmatpush1.bf16.msra.mxu0 %v8615_v18  ;;  %6093 = vmatpush1.bf16.msra.mxu1 %v8618_v19  ;;  %v8706_v18 = vld [vmem:[%s11635_s1 + $0x1640] ss:$16 sps:$4 sm:$0xff]   ;;  %v8709_v19 = vld [vmem:[%s11635_s1 + $0x1648] ss:$16 sps:$4 sm:$0xff]  }
 0x29c   : > { %5561 = vmatprep.subr.bf16.mxu0 %v8623_v20  ;;  %6094 = vmatprep.subr.bf16.mxu1 %v8626_v22  ;;  %v8714_v20 = vld [vmem:[%s11635_s1 + $0x1664] ss:$16 sps:$4 sm:$0xff]   ;;  %v8717_v22 = vld [vmem:[%s11635_s1 + $0x166c] ss:$16 sps:$4 sm:$0xff]  }
 0x29f   : > { %5562 = vmatpush1.bf16.msra.mxu0 %v8621_v23  ;;  %6095 = vmatpush1.bf16.msra.mxu1 %v8624_v24  ;;  %v8712_v23 = vld [vmem:[%s11635_s1 + $0x1660] ss:$16 sps:$4 sm:$0xff]   ;;  %v8715_v24 = vld [vmem:[%s11635_s1 + $0x1668] ss:$16 sps:$4 sm:$0xff]  }
 0x2a0   : > { %5563 = vmatprep.subr.bf16.mxu0 %v8629_v13  ;;  %6096 = vmatprep.subr.bf16.mxu1 %v8632_v27  ;;  %v8720_v13 = vld [vmem:[%s11635_s1 + $0x1684] ss:$16 sps:$4 sm:$0xff]   ;;  %v8723_v27 = vld [vmem:[%s11635_s1 + $0x168c] ss:$16 sps:$4 sm:$0xff]  }
 0x2a3   : > { %5564 = vmatpush1.bf16.msra.mxu0 %v8627_v28  ;;  %6097 = vmatpush1.bf16.msra.mxu1 %v8630_v29  ;;  %v8718_v28 = vld [vmem:[%s11635_s1 + $0x1680] ss:$16 sps:$4 sm:$0xff]   ;;  %v8721_v29 = vld [vmem:[%s11635_s1 + $0x1688] ss:$16 sps:$4 sm:$0xff]  }
 0x2a4   : > { %5565 = vmatprep.subr.bf16.mxu0 %v8635_v14  ;;  %6098 = vmatprep.subr.bf16.mxu1 %v8638_v30  ;;  %v8726_v14 = vld [vmem:[%s11635_s1 + $0x16a4] ss:$16 sps:$4 sm:$0xff]   ;;  %v8729_v30 = vld [vmem:[%s11635_s1 + $0x16ac] ss:$16 sps:$4 sm:$0xff]  }
 0x2a7   : > { %5566 = vmatpush1.bf16.msra.mxu0 %v8633_v31  ;;  %6099 = vmatpush1.bf16.msra.mxu1 %v8636_v25  ;;  %v8724_v31 = vld [vmem:[%s11635_s1 + $0x16a0] ss:$16 sps:$4 sm:$0xff]   ;;  %v8727_v25 = vld [vmem:[%s11635_s1 + $0x16a8] ss:$16 sps:$4 sm:$0xff]  }
 0x2a8   : > { %5567 = vmatprep.subr.bf16.mxu0 %v8641_v32  ;;  %6100 = vmatprep.subr.bf16.mxu1 %v8644_v33  ;;  %v8732_v32 = vld [vmem:[%s11635_s1 + $0x16c4] ss:$16 sps:$4 sm:$0xff]   ;;  %v8735_v33 = vld [vmem:[%s11635_s1 + $0x16cc] ss:$16 sps:$4 sm:$0xff]  }
 0x2ab   : > { %5568 = vmatpush1.bf16.msra.mxu0 %v8639_v26  ;;  %6101 = vmatpush1.bf16.msra.mxu1 %v8642_v36  ;;  %v8730_v26 = vld [vmem:[%s11635_s1 + $0x16c0] ss:$16 sps:$4 sm:$0xff]   ;;  %v8733_v36 = vld [vmem:[%s11635_s1 + $0x16c8] ss:$16 sps:$4 sm:$0xff]  }
 0x2ac   : > { %5569 = vmatprep.subr.bf16.mxu0 %v8647_v37  ;;  %6102 = vmatprep.subr.bf16.mxu1 %v8650_v21  ;;  %v8738_v37 = vld [vmem:[%s11635_s1 + $0x16e4] ss:$16 sps:$4 sm:$0xff]   ;;  %v8741_v21 = vld [vmem:[%s11635_s1 + $0x16ec] ss:$16 sps:$4 sm:$0xff]  }
 0x2af   : > { %5570 = vmatpush1.bf16.msra.mxu0 %v8645_v39  ;;  %6103 = vmatpush1.bf16.msra.mxu1 %v8648_v40  ;;  %v8736_v39 = vld [vmem:[%s11635_s1 + $0x16e0] ss:$16 sps:$4 sm:$0xff]   ;;  %v8739_v40 = vld [vmem:[%s11635_s1 + $0x16e8] ss:$16 sps:$4 sm:$0xff]  }
 0x2b0   : > { %5571 = vmatprep.subr.bf16.mxu0 %v8653_v41  ;;  %6104 = vmatprep.subr.bf16.mxu1 %v8656_v34  ;;  %v8744_v41 = vld [vmem:[%s11635_s1 + $0x1704] ss:$16 sps:$4 sm:$0xff]   ;;  %v8747_v34 = vld [vmem:[%s11635_s1 + $0x170c] ss:$16 sps:$4 sm:$0xff]  }
 0x2b3   : > { %5572 = vmatpush1.bf16.msra.mxu0 %v8651_v42  ;;  %6105 = vmatpush1.bf16.msra.mxu1 %v8654_v45  ;;  %v8742_v42 = vld [vmem:[%s11635_s1 + $0x1700] ss:$16 sps:$4 sm:$0xff]   ;;  %v8745_v45 = vld [vmem:[%s11635_s1 + $0x1708] ss:$16 sps:$4 sm:$0xff]  }
 0x2b4   : > { %5573 = vmatprep.subr.bf16.mxu0 %v8659_v46  ;;  %6106 = vmatprep.subr.bf16.mxu1 %v8662_v35  ;;  %v8750_v46 = vld [vmem:[%s11635_s1 + $0x1724] ss:$16 sps:$4 sm:$0xff]   ;;  %v8753_v35 = vld [vmem:[%s11635_s1 + $0x172c] ss:$16 sps:$4 sm:$0xff]  }
 0x2b7   : > { %5574 = vmatpush1.bf16.msra.mxu0 %v8657_v50  ;;  %6107 = vmatpush1.bf16.msra.mxu1 %v8660_v53  ;;  %v8748_v50 = vld [vmem:[%s11635_s1 + $0x1720] ss:$16 sps:$4 sm:$0xff]   ;;  %v8751_v53 = vld [vmem:[%s11635_s1 + $0x1728] ss:$16 sps:$4 sm:$0xff]  }
 0x2b8   : > { %5575 = vmatprep.subr.bf16.mxu0 %v8665_v38  ;;  %6108 = vmatprep.subr.bf16.mxu1 %v8668_v54  ;;  %v8756_v38 = vld [vmem:[%s11635_s1 + $0x1744] ss:$16 sps:$4 sm:$0xff]   ;;  %v8759_v54 = vld [vmem:[%s11635_s1 + $0x174c] ss:$16 sps:$4 sm:$0xff]  }
 0x2bb   : > { %5576 = vmatpush1.bf16.msra.mxu0 %v8663_v55  ;;  %6109 = vmatpush1.bf16.msra.mxu1 %v8666_v56  ;;  %v8754_v55 = vld [vmem:[%s11635_s1 + $0x1740] ss:$16 sps:$4 sm:$0xff]   ;;  %v8757_v56 = vld [vmem:[%s11635_s1 + $0x1748] ss:$16 sps:$4 sm:$0xff]  }
 0x2bc   : > { %5577 = vmatprep.subr.bf16.mxu0 %v8671_v47  ;;  %6110 = vmatprep.subr.bf16.mxu1 %v8674_v57  ;;  %v8762_v47 = vld [vmem:[%s11635_s1 + $0x1764] ss:$16 sps:$4 sm:$0xff]   ;;  %v8765_v57 = vld [vmem:[%s11635_s1 + $0x176c] ss:$16 sps:$4 sm:$0xff]  }
 0x2bf   : > { %5578 = vmatpush1.bf16.msra.mxu0 %v8669_v58  ;;  %6111 = vmatpush1.bf16.msra.mxu1 %v8672_v59  ;;  %v8760_v58 = vld [vmem:[%s11635_s1 + $0x1760] ss:$16 sps:$4 sm:$0xff]   ;;  %v8763_v59 = vld [vmem:[%s11635_s1 + $0x1768] ss:$16 sps:$4 sm:$0xff]  }
 0x2c0   : > { %5579 = vmatprep.subr.bf16.mxu0 %v8677_v48  ;;  %6112 = vmatprep.subr.bf16.mxu1 %v8680_v61  ;;  %v8768_v48 = vld [vmem:[%s11635_s1 + $0x1784] ss:$16 sps:$4 sm:$0xff]   ;;  %v8771_v61 = vld [vmem:[%s11635_s1 + $0x178c] ss:$16 sps:$4 sm:$0xff]  }
 0x2c3   : > { %5580 = vmatpush1.bf16.msra.mxu0 %v8675_v63  ;;  %6113 = vmatpush1.bf16.msra.mxu1 %v8678_v44  ;;  %v8766_v63 = vld [vmem:[%s11635_s1 + $0x1780] ss:$16 sps:$4 sm:$0xff]   ;;  %v8769_v44 = vld [vmem:[%s11635_s1 + $0x1788] ss:$16 sps:$4 sm:$0xff]  }
 0x2c4   : > { %5581 = vmatprep.subr.bf16.mxu0 %v8683_v1  ;;  %6114 = vmatprep.subr.bf16.mxu1 %v8686_v51  ;;  %v8774_v1 = vld [vmem:[%s11635_s1 + $0x17a4] ss:$16 sps:$4 sm:$0xff]   ;;  %v8777_v51 = vld [vmem:[%s11635_s1 + $0x17ac] ss:$16 sps:$4 sm:$0xff]  }
 0x2c7   : > { %5582 = vmatpush1.bf16.msra.mxu0 %v8681_v2  ;;  %6115 = vmatpush1.bf16.msra.mxu1 %v8684_v3  ;;  %v8772_v2 = vld [vmem:[%s11635_s1 + $0x17a0] ss:$16 sps:$4 sm:$0xff]   ;;  %v8775_v3 = vld [vmem:[%s11635_s1 + $0x17a8] ss:$16 sps:$4 sm:$0xff]  }
 0x2c8   : > { %5583 = vmatprep.subr.bf16.mxu0 %v8689_v4  ;;  %6116 = vmatprep.subr.bf16.mxu1 %v8692_v60  ;;  %v8780_v4 = vld [vmem:[%s11635_s1 + $0x17c4] ss:$16 sps:$4 sm:$0xff]   ;;  %v8783_v60 = vld [vmem:[%s11635_s1 + $0x17cc] ss:$16 sps:$4 sm:$0xff]  }
 0x2cb   : > { %5584 = vmatpush1.bf16.msra.mxu0 %v8687_v5  ;;  %6117 = vmatpush1.bf16.msra.mxu1 %v8690_v6  ;;  %v8778_v5 = vld [vmem:[%s11635_s1 + $0x17c0] ss:$16 sps:$4 sm:$0xff]   ;;  %v8781_v6 = vld [vmem:[%s11635_s1 + $0x17c8] ss:$16 sps:$4 sm:$0xff]  }
 0x2cc   : > { %5594 = vmatprep.subr.bf16.mxu0 %v8696_v7  ;;  %6127 = vmatprep.subr.bf16.mxu1 %v8699_v62  ;;  %v8786_v7 = vld [vmem:[%s11635_s1 + $0x17e4] ss:$16 sps:$4 sm:$0xff]   ;;  %v8789_v62 = vld [vmem:[%s11635_s1 + $0x17ec] ss:$16 sps:$4 sm:$0xff]  }
 0x2ce   : > { %5586 = vmatmul.mubr.bf16.vlgmr.msra.gmra.mrb[0].mxu0 %v11237_v9  ;;  %6119 = vmatmul.mubr.bf16.vlgmr.msra.gmra.mrb[0].mxu1 %v11237_v9 }
 0x2cf   : > { %5595 = vmatpush1.bf16.msra.mxu0 %v8694_v10  ;;  %6128 = vmatpush1.bf16.msra.mxu1 %v8697_v11  ;;  %v8784_v10 = vld [vmem:[%s11635_s1 + $0x17e0] ss:$16 sps:$4 sm:$0xff]   ;;  %v8787_v11 = vld [vmem:[%s11635_s1 + $0x17e8] ss:$16 sps:$4 sm:$0xff]  }
 0x2d0   : > { %5596 = vmatprep.subr.bf16.mxu0 %v8702_v12  ;;  %6129 = vmatprep.subr.bf16.mxu1 %v8705_v0  ;;  %v8792_v12 = vld [vmem:[%s11635_s1 + $0x1804] ss:$16 sps:$4 sm:$0xff]   ;;  %v8795_v0 = vld [vmem:[%s11635_s1 + $0x180c] ss:$16 sps:$4 sm:$0xff]  }
 0x2d1   : > { %5626 = vmatprep.mubr.bf16.mxu0 %v1159_v52  ;;  %6159 = vmatprep.mubr.bf16.mxu1 %v1159_v52  ;;  %v1157_v52 = vcombine.high %v11237_v9, %v11237_v9  ;;  %v8801_v9 = vld [vmem:[%s11635_s1 + $0x182c] ss:$16 sps:$4 sm:$0xff]  }
 0x2d3   : > { %5597 = vmatpush1.bf16.msra.mxu0 %v8700_v15  ;;  %6130 = vmatpush1.bf16.msra.mxu1 %v8703_v16  ;;  %v8790_v15 = vld [vmem:[%s11635_s1 + $0x1800] ss:$16 sps:$4 sm:$0xff]   ;;  %v8793_v16 = vld [vmem:[%s11635_s1 + $0x1808] ss:$16 sps:$4 sm:$0xff]  }
 0x2d4   : > { %5598 = vmatprep.subr.bf16.mxu0 %v8708_v8  ;;  %6131 = vmatprep.subr.bf16.mxu1 %v8711_v17  ;;  %v8798_v8 = vld [vmem:[%s11635_s1 + $0x1824] ss:$16 sps:$4 sm:$0xff]   ;;  %v8796_v17 = vld [vmem:[%s11635_s1 + $0x1820] ss:$16 sps:$4 sm:$0xff]  }
 0x2d7   : > { %5599 = vmatpush1.bf16.msra.mxu0 %v8706_v18  ;;  %6132 = vmatpush1.bf16.msra.mxu1 %v8709_v19  ;;  %v8799_v18 = vld [vmem:[%s11635_s1 + $0x1828] ss:$16 sps:$4 sm:$0xff]   ;;  %v8804_v19 = vld [vmem:[%s11635_s1 + $0x1844] ss:$16 sps:$4 sm:$0xff]  }
 0x2d8   : > { %5600 = vmatprep.subr.bf16.mxu0 %v8714_v20  ;;  %6133 = vmatprep.subr.bf16.mxu1 %v8717_v22  ;;  %v8807_v20 = vld [vmem:[%s11635_s1 + $0x184c] ss:$16 sps:$4 sm:$0xff]   ;;  %v8913_v22 = vmov 0  }
 0x2db   : > { %5601 = vmatpush1.bf16.msra.mxu0 %v8712_v23  ;;  %6134 = vmatpush1.bf16.msra.mxu1 %v8715_v24  ;;  %v8802_v23 = vld [vmem:[%s11635_s1 + $0x1840] ss:$16 sps:$4 sm:$0xff]   ;;  %v8805_v24 = vld [vmem:[%s11635_s1 + $0x1848] ss:$16 sps:$4 sm:$0xff]  }
 0x2dc   : > { %5602 = vmatprep.subr.bf16.mxu0 %v8720_v13  ;;  %6135 = vmatprep.subr.bf16.mxu1 %v8723_v27  ;;  %v8810_v13 = vld [vmem:[%s11635_s1 + $0x1864] ss:$16 sps:$4 sm:$0xff]   ;;  %v8813_v27 = vld [vmem:[%s11635_s1 + $0x186c] ss:$16 sps:$4 sm:$0xff]  }
 0x2df   : > { %5603 = vmatpush1.bf16.msra.mxu0 %v8718_v28  ;;  %6136 = vmatpush1.bf16.msra.mxu1 %v8721_v29  ;;  %v8808_v28 = vld [vmem:[%s11635_s1 + $0x1860] ss:$16 sps:$4 sm:$0xff]   ;;  %v8811_v29 = vld [vmem:[%s11635_s1 + $0x1868] ss:$16 sps:$4 sm:$0xff]  }
 0x2e0   : > { %5604 = vmatprep.subr.bf16.mxu0 %v8726_v14  ;;  %6137 = vmatprep.subr.bf16.mxu1 %v8729_v30  ;;  %v6627_v14 = vld.sshfl [vmem:[%s9132_s17 + $0x18] sm:$0x1 pattern:$0x75316420]  ;;  %v8814_v30 = vld [vmem:[%s11637_s3 + $0x40] sm:$0xff]   ;;  %s214_s17 = scalar_lea.vmem [#allocation2], %s213_s14 }
 0x2e1   : > { %s6568_s25 = sshll.u32 %s214_s17, 4  ;;  %s11594_s25 = int_to_ptr.vmem [resolvable:$true] %s6568_s25 }
 0x2e2   : > { %s8848_s8 = scalar_lea.vmem %s11594_s25, 16  ;;  %p8855_p0 = scmp.lt.s32.totalorder %s11594_s25, %s8853_s9 }
 0x2e3   : > { %5605 = vmatpush1.bf16.msra.mxu0 %v8724_v31  ;;  %6138 = vmatpush1.bf16.msra.mxu1 %v8727_v25  ;;  %v8815_v31 = vld [vmem:[%s11637_s3 + $0xc0] sm:$0xff]   ;;  %v1173_v25 = vrot.slane %v6627_v14, %v9135_v49  ;;  %v8819_v49 = vld [vmem:[%s11637_s3 + $0xc8] sm:$0xff]   ;;  %p8849_p11 = scmp.ne.s32.totalorder %s11594_s25, %s8848_s8  ;;  %p8856_p1 = scmp.lt.s32.totalorder %s8854_s10, %s8848_s8 }
 0x2e4   : > { %5606 = vmatprep.subr.bf16.mxu0 %v8732_v32  ;;  %6139 = vmatprep.subr.bf16.mxu1 %v8735_v33  ;;  %v8816_v32 = vld [vmem:[%s11637_s3] sm:$0xff]  }
 0x2e5   : > { %v8817_v33 = vld [vmem:[%s11637_s3 + $0x80] sm:$0xff]   ;;  %p8850_p12 = pnand %p8849_p11, %p8983_p5  ;;  %p8857_p2 = por %p8856_p1, %p8855_p0 }
 0x2e7   : > { %5607 = vmatpush1.bf16.msra.mxu0 %v8730_v26  ;;  %6140 = vmatpush1.bf16.msra.mxu1 %v8733_v36  ;;  %v8818_v26 = vld [vmem:[%s11637_s3 + $0x48] sm:$0xff]   ;;  %p8851_p13 = pneg %p8850_p12 }
 0x2e8   : > { %5608 = vmatprep.subr.bf16.mxu0 %v8738_v37  ;;  %6141 = vmatprep.subr.bf16.mxu1 %v8741_v21  ;;  %v8820_v36 = vld [vmem:[%s11637_s3 + $0x8] sm:$0xff]   ;;  %v8822_v21 = vld [vmem:[%s11637_s3 + $0x50] sm:$0xff]  }
 0x2e9   : > { %v8821_v37 = vld [vmem:[%s11637_s3 + $0x88] sm:$0xff]   ;;  %p8858_p3 = pnand %p8857_p2, %p8851_p13 }
 0x2eb   : > { %5609 = vmatpush1.bf16.msra.mxu0 %v8736_v39  ;;  %6142 = vmatpush1.bf16.msra.mxu1 %v8739_v40  ;;  %v8823_v39 = vld [vmem:[%s11637_s3 + $0xd0] sm:$0xff]  }
 0x2ec   : > { %5610 = vmatprep.subr.bf16.mxu0 %v8744_v41  ;;  %6143 = vmatprep.subr.bf16.mxu1 %v8747_v34  ;;  %v8824_v40 = vld [vmem:[%s11637_s3 + $0x10] sm:$0xff]   ;;  %v8826_v34 = vld [vmem:[%s11637_s3 + $0x58] sm:$0xff]  }
 0x2ed   : > { %v8825_v41 = vld [vmem:[%s11637_s3 + $0x90] sm:$0xff]  }
 0x2ef   : > { %5611 = vmatpush1.bf16.msra.mxu0 %v8742_v42  ;;  %6144 = vmatpush1.bf16.msra.mxu1 %v8745_v45  ;;  %v8827_v42 = vld [vmem:[%s11637_s3 + $0xd8] sm:$0xff]  }
 0x2f0   : > { %5612 = vmatprep.subr.bf16.mxu0 %v8750_v46  ;;  %6145 = vmatprep.subr.bf16.mxu1 %v8753_v35  ;;  %v8828_v45 = vld [vmem:[%s11637_s3 + $0x18] sm:$0xff]   ;;  %v8830_v35 = vld [vmem:[%s11637_s3 + $0x60] sm:$0xff]  }
 0x2f1   : > { %v8829_v46 = vld [vmem:[%s11637_s3 + $0x98] sm:$0xff]  }
 0x2f3   : > { %5613 = vmatpush1.bf16.msra.mxu0 %v8748_v50  ;;  %6146 = vmatpush1.bf16.msra.mxu1 %v8751_v53  ;;  %v8831_v50 = vld [vmem:[%s11637_s3 + $0xe0] sm:$0xff]  }
 0x2f4   : > { %5614 = vmatprep.subr.bf16.mxu0 %v8756_v38  ;;  %6147 = vmatprep.subr.bf16.mxu1 %v8759_v54  ;;  %v8832_v53 = vld [vmem:[%s11637_s3 + $0x20] sm:$0xff]   ;;  %v8834_v54 = vld [vmem:[%s11637_s3 + $0x68] sm:$0xff]  }
 0x2f5   : > { %v8833_v38 = vld [vmem:[%s11637_s3 + $0xa0] sm:$0xff]  }
 0x2f7   : > { %5615 = vmatpush1.bf16.msra.mxu0 %v8754_v55  ;;  %6148 = vmatpush1.bf16.msra.mxu1 %v8757_v56  ;;  %v8835_v55 = vld [vmem:[%s11637_s3 + $0xe8] sm:$0xff]  }
 0x2f8   : > { %5616 = vmatprep.subr.bf16.mxu0 %v8762_v47  ;;  %6149 = vmatprep.subr.bf16.mxu1 %v8765_v57  ;;  %v8836_v56 = vld [vmem:[%s11637_s3 + $0x28] sm:$0xff]   ;;  %v8838_v57 = vld [vmem:[%s11637_s3 + $0x70] sm:$0xff]  }
 0x2f9   : > { %v8837_v47 = vld [vmem:[%s11637_s3 + $0xa8] sm:$0xff]  }
 0x2fb   : > { %5617 = vmatpush1.bf16.msra.mxu0 %v8760_v58  ;;  %6150 = vmatpush1.bf16.msra.mxu1 %v8763_v59  ;;  %v8839_v58 = vld [vmem:[%s11637_s3 + $0xf0] sm:$0xff]  }
 0x2fc   : > { %5618 = vmatprep.subr.bf16.mxu0 %v8768_v48  ;;  %6151 = vmatprep.subr.bf16.mxu1 %v8771_v61  ;;  %v8840_v59 = vld [vmem:[%s11637_s3 + $0x30] sm:$0xff]   ;;  %v8842_v61 = vld [vmem:[%s11637_s3 + $0x78] sm:$0xff]  }
 0x2fd   : > { %v8841_v48 = vld [vmem:[%s11637_s3 + $0xb0] sm:$0xff]  }
 0x2ff   : > { %5619 = vmatpush1.bf16.msra.mxu0 %v8766_v63  ;;  %6152 = vmatpush1.bf16.msra.mxu1 %v8769_v44  ;;  %v8843_v63 = vld [vmem:[%s11637_s3 + $0xf8] sm:$0xff]  }
 0x300   : > { %5620 = vmatprep.subr.bf16.mxu0 %v8774_v1  ;;  %6153 = vmatprep.subr.bf16.mxu1 %v8777_v51  ;;  %v8844_v44 = vld [vmem:[%s11637_s3 + $0x38] sm:$0xff]   ;;  %v5121_v51 = vsub.s32 0, %v9112_v43 }
 0x301   : > { %v8845_v1 = vld [vmem:[%s11637_s3 + $0xb8] sm:$0xff]  }
 0x303   : > { %5621 = vmatpush1.bf16.msra.mxu0 %v8772_v2  ;;  %6154 = vmatpush1.bf16.msra.mxu1 %v8775_v3  ;;  %v5129_v2 = vsub.s32 2, %v9112_v43  ;;  %v1008_v3 = vld [vmem:[%s11636_s2] sm:$0xf] }
 0x304   : > { %5622 = vmatprep.subr.bf16.mxu0 %v8780_v4  ;;  %6155 = vmatprep.subr.bf16.mxu1 %v8783_v60  ;;  %v5125_v4 = vsub.s32 1, %v9112_v43  ;;  %v5133_v60 = vsub.s32 3, %v9112_v43 }
 0x307   : > { %5623 = vmatpush1.bf16.msra.mxu0 %v8778_v5  ;;  %6156 = vmatpush1.bf16.msra.mxu1 %v8781_v6  ;;  %v5122_v5 = vrot.slane %v1008_v3, %v5121_v51  ;;  %v5130_v6 = vrot.slane %v1008_v3, %v5129_v2 }
 0x308   : > { %5624 = vmatprep.subr.bf16.mxu0 %v8786_v7  ;;  %6157 = vmatprep.subr.bf16.mxu1 %v8789_v62  ;;  %v5126_v7 = vrot.slane %v1008_v3, %v5125_v4  ;;  %v5134_v62 = vrot.slane %v1008_v3, %v5133_v60 }
 0x30b   : > { %5625 = vmatpush1.bf16.msra.mxu0 %v8784_v10  ;;  %6158 = vmatpush1.bf16.msra.mxu1 %v8787_v11 }
 0x30c   : > { %5635 = vmatprep.subr.bf16.mxu0 %v8792_v12  ;;  %6168 = vmatprep.subr.bf16.mxu1 %v8795_v0 }
 0x30e   : > { %5627 = vmatmul.mubr.bf16.vlgmr.msra.gmra.mrb[0].mxu0 %v1157_v52  ;;  %6160 = vmatmul.mubr.bf16.vlgmr.msra.gmra.mrb[0].mxu1 %v1157_v52 }
 0x30f   : > { %5636 = vmatpush1.bf16.msra.mxu0 %v8790_v15  ;;  %6169 = vmatpush1.bf16.msra.mxu1 %v8793_v16 }
 0x310   : > { %5637 = vmatprep.subr.bf16.mxu0 %v8798_v8  ;;  %6170 = vmatprep.subr.bf16.mxu1 %v8801_v9 }
 0x311   : > { %5667 = vmatprep.mubr.bf16.mxu0 %v8913_v22  ;;  %6200 = vmatprep.mubr.bf16.mxu1 %v8913_v22 }
 0x313   : > { %5638 = vmatpush1.bf16.msra.mxu0 %v8796_v17  ;;  %6171 = vmatpush1.bf16.msra.mxu1 %v8799_v18 }
 0x314   : > { %5639 = vmatprep.subr.bf16.mxu0 %v8804_v19  ;;  %6172 = vmatprep.subr.bf16.mxu1 %v8807_v20 }
 0x317   : > { %5640 = vmatpush1.bf16.msra.mxu0 %v8802_v23  ;;  %6173 = vmatpush1.bf16.msra.mxu1 %v8805_v24 }
 0x318   : > { %5641 = vmatprep.subr.bf16.mxu0 %v8810_v13  ;;  %6174 = vmatprep.subr.bf16.mxu1 %v8813_v27 }
 0x31b   : > { %5642 = vmatpush1.bf16.msra.mxu0 %v8808_v28  ;;  %6175 = vmatpush1.bf16.msra.mxu1 %v8811_v29 }
 0x31c   : > { %7449 = vmatprep.subr.bf16.mxu0 %v8814_v30  ;;  %7471 = vmatprep.subr.bf16.mxu1 %v8815_v31  ;;  %v6281_v30 = vld [vmem:[%s11638_s4] sm:$0x1] }
 0x31e   : > { %7412 = vmatmul.mubr.msk.bf16.vlgmr.msra.gmra.mrb[0].mxu0 %vm5139_vm0, %v1173_v25  ;;  %7413 = vmatmul.mubr.msk.bf16.vlgmr.msra.gmra.mrb[0].mxu1 %vm5139_vm0, %v1173_v25 }
 0x31f   : > { %7450 = vmatpush3.bf16.msra.mxu0 %v8816_v32  ;;  %7472 = vmatpush3.bf16.msra.mxu1 %v8817_v33 }
 0x320   : > { %7451 = vmatprep.subr.bf16.mxu0 %v8818_v26  ;;  %7473 = vmatprep.subr.bf16.mxu1 %v8819_v49 }
 0x323   : > { %7452 = vmatpush3.bf16.msra.mxu0 %v8820_v36  ;;  %7474 = vmatpush3.bf16.msra.mxu1 %v8821_v37 }
 0x324   : > { %7453 = vmatprep.subr.bf16.mxu0 %v8822_v21  ;;  %7475 = vmatprep.subr.bf16.mxu1 %v8823_v39 }
 0x327   : > { %7454 = vmatpush3.bf16.msra.mxu0 %v8824_v40  ;;  %7476 = vmatpush3.bf16.msra.mxu1 %v8825_v41 }
 0x328   : > { %7455 = vmatprep.subr.bf16.mxu0 %v8826_v34  ;;  %7477 = vmatprep.subr.bf16.mxu1 %v8827_v42 }
 0x32b   : > { %7456 = vmatpush3.bf16.msra.mxu0 %v8828_v45  ;;  %7478 = vmatpush3.bf16.msra.mxu1 %v8829_v46 }
 0x32c   : > { %7457 = vmatprep.subr.bf16.mxu0 %v8830_v35  ;;  %7479 = vmatprep.subr.bf16.mxu1 %v8831_v50 }
 0x32f   : > { %7458 = vmatpush3.bf16.msra.mxu0 %v8832_v53  ;;  %7480 = vmatpush3.bf16.msra.mxu1 %v8833_v38 }
 0x330   : > { %7459 = vmatprep.subr.bf16.mxu0 %v8834_v54  ;;  %7481 = vmatprep.subr.bf16.mxu1 %v8835_v55 }
 0x333   : > { %7460 = vmatpush3.bf16.msra.mxu0 %v8836_v56  ;;  %7482 = vmatpush3.bf16.msra.mxu1 %v8837_v47 }
 0x334   : > { %7461 = vmatprep.subr.bf16.mxu0 %v8838_v57  ;;  %7483 = vmatprep.subr.bf16.mxu1 %v8839_v58 }
 0x337   : > { %7462 = vmatpush3.bf16.msra.mxu0 %v8840_v59  ;;  %7484 = vmatpush3.bf16.msra.mxu1 %v8841_v48 }
 0x338   : > { %7463 = vmatprep.subr.bf16.mxu0 %v8842_v61  ;;  %7485 = vmatprep.subr.bf16.mxu1 %v8843_v63 }
 0x33b   : > { %7464 = vmatpush3.bf16.msra.mxu0 %v8844_v44  ;;  %7486 = vmatpush3.bf16.msra.mxu1 %v8845_v1 }
 0x3f1   : > { %v5669_v10 = vpop.f32.mrb[0].mxu0  ;;  %v6202_v11 = vpop.f32.mrb[0].mxu1 }
 0x3f2   : > { %v7493_v12 = vadd.f32 %v5669_v10, %v5122_v5  ;;  %v7495_v0 = vadd.f32 %v6202_v11, %v5130_v6  ;;  %v5671_v52 = vpop.f32.mrb[1].mxu0  ;;  %v6204_v15 = vpop.f32.mrb[1].mxu1 }
 0x3f3   : > { %v7494_v16 = vadd.f32 %v5671_v52, %v5126_v7  ;;  %v7496_v8 = vadd.f32 %v6204_v15, %v5134_v62  ;;  %v5673_v9 = vpop.f32.mrb[2].mxu0  ;;  %v6206_v17 = vpop.f32.mrb[2].mxu1 }
 0x3f4   : > { %v6209_v18 = vmax.f32 %v7493_v12, 0.0  ;;  %v6211_v19 = vmax.f32 %v7495_v0, 0.0  ;;  %v5674_v20 = vpop.f32.mrb[3].mxu0  ;;  %v6207_v22 = vpop.f32.mrb[3].mxu1 }
 0x3f5   : > { %v6210_v43 = vmax.f32 %v7494_v16, 0.0  ;;  %v6212_v23 = vmax.f32 %v7496_v8, 0.0 }
 0x3f6   : > { %v6213_v27 = vpack.c.bf16 %v6209_v18, %v6209_v18  ;;  %v6215_v28 = vpack.c.bf16 %v6211_v19, %v6211_v19 }
 0x3f7   : > { %v6214_v24 = vpack.c.bf16 %v6210_v43, %v6210_v43  ;;  %v6216_v13 = vpack.c.bf16 %v6212_v23, %v6212_v23 }
 0x3f9   : > { %6506 = vmatprep.mubr.bf16.mxu0 %v6214_v24  ;;  %6546 = vmatprep.mubr.bf16.mxu1 %v6216_v13 }
 0x3fa   : > { %6507 = vmatmul.mubr.bf16.vlgmr.msra.gmra.mrb[4].mxu0 %v6213_v27  ;;  %6547 = vmatmul.mubr.bf16.vlgmr.msra.gmra.mrb[4].mxu1 %v6215_v28 }
 0x4cd   : > { %v7465_v29 = vpop.f32.mrb[4].mxu0  ;;  %v7487_v14 = vpop.f32.mrb[4].mxu1 }
 0x4ce   : > { %v7466_v31 = vpop.f32.mrb[5].mxu0  ;;  %v7488_v25 = vpop.f32.mrb[5].mxu1 }
 0x4cf   : > { %v7467_v32 = vadd.f32 %v7466_v31, %v7465_v29  ;;  %v7489_v33 = vadd.f32 %v7488_v25, %v7487_v14  ;;  %v7468_v26 = vpop.f32.mrb[6].mxu0  ;;  %v7490_v49 = vpop.f32.mrb[6].mxu1 }
 0x4d0   : > { %v7469_v36 = vpop.f32.mrb[7].mxu0  ;;  %v7491_v37 = vpop.f32.mrb[7].mxu1 }
 0x4d1   : > { %v6509_v21 = vadd.f32 %v7467_v32, %v6281_v30 }
 0x4d3   : > { %v6549_v39 = vadd.f32 %v7489_v33, %v6509_v21 }
 0x4d5   : > { %6554 = vst [vmem:[%s214_s17] sm:$0x1] %v6549_v39 }
 0x4d6   : > { %8861 = shalt.err (!%p8858_p3)
}
 0x4d7   : > { %s8862_s11 = scalar_lea.hbm %s11592_s26, 16  ;;  %s8866_s14 = scalar_lea.hbm %s11639_s5, 32 }
 0x4d8   : > { %p8863_p4 = scmp.ne.s32.totalorder %s11592_s26, %s8862_s11  ;;  %p8867_p9 = scmp.lt.u32.totalorder %s11592_s26, %s11639_s5 }
 0x4d9   : > { %p8868_p10 = scmp.lt.u32.totalorder %s8866_s14, %s8862_s11  ;;  %p8870_p12 = scmp.lt.u32.totalorder %s8862_s11, %s11592_s26 }
 0x4da   : > { %p8864_p7 = pnand %p8863_p4, %p8983_p5 }
 0x4db   : > { %p8869_p11 = por %p8868_p10, %p8867_p9 }
 0x4dc   : > { %p8865_p8 = pneg %p8864_p7 }
 0x4dd   : > { %p8871_p13 = por %p8870_p12, %p8869_p11 }
 0x4df   : > { %p8872_p0 = pnand %p8871_p13, %p8865_p8 }
 0x4e1   : > { %8875 = shalt.err (!%p8872_p0)
}
 0x4e2   : > { %7594 = dma.vmem_to_hbm [thread:$0]  (%p8983_p5), %s11594_s25, 16, %s11592_s26, %s6556_s7  }
 0x4e3 PF: > { %p7600_p1 = scmp.ge.s32.totalorder %s8910_s21, 2  ;;  %s6580_s23 = sand.u32 1, %s8898_s18  }
 0x4e4   : > { %s6581_s17 = scalar_lea.sflag [#allocation3], %s6580_s23 }
 0x4e5   : > { %p7597_p2 = pnand %p7600_p1, %p8987_p6 }
 0x4e7   : > { %8893 = dma.done.wait (!%p7597_p2), %s6581_s17, 16  }
 0x4e8   : > { %8895 = vsyncadd (!%p7597_p2), %s6581_s17, 4294967280  ;;  %p15_p3 = scmp.ge.s32.totalorder %s8970_s24, 4   ;;  %s11642_s18 = smov %s8902_s19 }
 0x4e9   : > { %s11643_s19 = smov %s8906_s20  ;;  %s11644_s20 = smov %s8981_s27 }
 0x4ea   : > { %s11645_s21 = smov %s8970_s24  ;;  %17 = sbr.rel (!%p15_p3) target bundleno = 3 (0x3), region = 75 }
 0x4f1   :  { %6585 = vsyncpa [#allocation3], 1 }
 0x4f2   :  { %6587 = vsyncpa [#allocation3 + $0x1], 1 }

// kernel: mnist_classifier_forward.2
= control target key start
LH: loop header
LB: loop body
LE: loop exit
PB: predicated region body
PF: predicated region fallthrough
CT: control target
= control target key end

     0   :  { %12 = vsyncpa [#allocation12], 0  ;;  %s9415_s0 = inlined_call_operand.vmem [shape: f32[1792,9], index: 0, kind: input, shape index: {}]   ;;  %s9416_s1 = inlined_call_operand.hbm [shape: f32[9,32], index: 1, kind: input, shape index: {}]   ;;  %s9417_s2 = inlined_call_operand.hbm [shape: f32[1,32], index: 2, kind: input, shape index: {}]   ;;  %s9418_s3 = inlined_call_operand.vmem [shape: bf16[288,64], index: 3, kind: input, shape index: {}]   ;;  %s9419_s4 = inlined_call_operand.hbm [shape: f32[1,64], index: 4, kind: input, shape index: {}]   ;;  %s9420_s5 = inlined_call_operand.vmem [shape: bf16[576,64], index: 5, kind: input, shape index: {}]   ;;  %s9421_s6 = inlined_call_operand.hbm [shape: f32[1,64], index: 6, kind: input, shape index: {}]   ;;  %s9422_s7 = inlined_call_operand.vmem [shape: bf16[2,1,3136], index: 7, kind: output, shape index: {}]  }
   0x1   :  { %13 = vsyncpa [#allocation14], 0 }
   0x2   :  { %14 = vsyncpa [#allocation17], 0  ;;  %s7513_s24 = smov 0  }
   0x3 LB: > { %s7461_s25 = smov [#allocation13]   ;;  %s7519_s27 = sadd.s32 4294967295, %s7459_s24   ;;  %s7459_s24 = sphi %s7513_s24, %s20_s24  }
   0x4   : > { %s229_s26 = sshll.u32 %s7461_s25, 4  ;;  %p6148_p0 = scmp.ge.s32.totalorder %s7459_s24, 1  ;;  %s7524_s26 = int_to_ptr.vmem [resolvable:$true] %s229_s26 }
   0x5   : > { %p203_p1 = scmp.lt.s32.totalorder %s7459_s24, 3  ;;  %p9423_p2 = scmp.eq.s32.totalorder %s7519_s27, 0 }
   0x6   : > { %s7462_s29 = smov [#allocation11]   ;;  %s7463_s9 = smov [#allocation15]  }
   0x7   : > { %p7526_p3 = pnand %p6148_p0, %p203_p1  ;;  %s215_s30 = sshll.u32 %s7462_s29, 4  ;;  %s7532_s30 = int_to_ptr.vmem [resolvable:$true] %s215_s30 }
   0x8   : > { %s243_s10 = sshll.u32 %s7463_s9, 4  ;;  %s7464_s11 = smov [#allocation16]   ;;  %s7540_s10 = int_to_ptr.vmem [resolvable:$true] %s243_s10 }
   0x9   : > { %s9425_s28 = scalar_select %p7526_p3, 1, 0 }
   0xa   : > { %p7199_p4 = pneg %p7526_p3  ;;  %s7542_s12 = sshll.u32 %s7464_s11, 4  ;;  %s258_s12 = int_to_ptr.vmem [resolvable:$true] %s7542_s12 }
   0xb   : > { %s7329_s15 = scalar_lea.hbm %s9417_s2, 16 }
   0xc   : > { %p7536_p5 = pnand %p9423_p2, %p7199_p4  ;;  %p7330_p6 = scmp.ne.s32.totalorder %s9417_s2, %s7329_s15 }
   0xd   : > { %p7336_p10 = scmp.lt.u32.totalorder %s7329_s15, %s9417_s2 }
   0xe   : > { %p7552_p7 = pneg %p7536_p5 }
  0x10   : > { %p7332_p8 = pnand %p7552_p7, %p7330_p6 }
  0x12   : > { %p7333_p9 = pneg %p7332_p8 }
  0x14   : > { %p7338_p11 = pnand %p7336_p10, %p7333_p9 }
  0x16   : > { %7341 = shalt.err (!%p7338_p11)
}
  0x17   : > { %s7342_s21 = scalar_lea.vmem %s7524_s26, 16  ;;  %s7349_s22 = scalar_lea.vmem %s7524_s26, 32 }
  0x18   : > { %p7343_p12 = scmp.ne.s32.totalorder %s7524_s26, %s7342_s21  ;;  %p7350_p1 = scmp.lt.s32.totalorder %s7524_s26, %s7524_s26 }
  0x19   : > { %p7351_p4 = scmp.lt.s32.totalorder %s7349_s22, %s7342_s21 }
  0x1a   : > { %p7345_p13 = pnand %p7343_p12, %p7552_p7 }
  0x1b   : > { %p7352_p6 = por %p7351_p4, %p7350_p1 }
  0x1c   : > { %p7346_p0 = pneg %p7345_p13 }
  0x1e   : > { %p7353_p8 = pnand %p7352_p6, %p7346_p0 }
  0x20   : > { %7356 = shalt.err (!%p7353_p8)
}
  0x21   : > { %7205 = dma.hbm_to_vmem [thread:$0]  (!%p7536_p5), %s9417_s2, 16, %s7524_s26, [#allocation14]  }
  0x22   : > { %s7357_s11 = scalar_lea.hbm %s9416_s1, 256 }
  0x23   : > { %p7358_p9 = scmp.ne.s32.totalorder %s9416_s1, %s7357_s11  ;;  %p7364_p12 = scmp.lt.u32.totalorder %s7357_s11, %s9416_s1 }
  0x25   : > { %p7360_p10 = pnand %p7358_p9, %p7552_p7 }
  0x27   : > { %p7361_p11 = pneg %p7360_p10 }
  0x29   : > { %p7366_p13 = pnand %p7364_p12, %p7361_p11 }
  0x2b   : > { %7369 = shalt.err (!%p7366_p13)
}
  0x2c   : > { %s7370_s26 = scalar_lea.vmem %s7532_s30, 256  ;;  %p7378_p6 = scmp.lt.s32.totalorder %s7532_s30, %s7532_s30 }
  0x2d   : > { %p7371_p0 = scmp.ne.s32.totalorder %s7532_s30, %s7370_s26  ;;  %p7379_p8 = scmp.lt.s32.totalorder %s7370_s26, %s7370_s26 }
  0x2f   : > { %p7373_p1 = pnand %p7371_p0, %p7552_p7  ;;  %p7380_p9 = por %p7379_p8, %p7378_p6 }
  0x31   : > { %p7374_p4 = pneg %p7373_p1 }
  0x33   : > { %p7381_p10 = pnand %p7380_p9, %p7374_p4 }
  0x35   : > { %7384 = shalt.err (!%p7381_p10)
}
  0x36   : > { %s7465_s17 = smov 128   ;;  %s7466_s19 = smov 8  }
  0x37   : > { %7202 = dma.hbm_to_vmem [thread:$0]  (!%p7536_p5), %s9416_s1, 256, %s7532_s30, [#allocation12], %s7465_s17, %s7465_s17, %s7466_s19  }
  0x38   : > { %s7385_s25 = scalar_lea.hbm %s9419_s4, 16 }
  0x39   : > { %p7386_p11 = scmp.ne.s32.totalorder %s9419_s4, %s7385_s25  ;;  %p7392_p0 = scmp.lt.u32.totalorder %s7385_s25, %s9419_s4 }
  0x3b   : > { %p7388_p12 = pnand %p7386_p11, %p7552_p7 }
  0x3d   : > { %p7389_p13 = pneg %p7388_p12 }
  0x3f   : > { %p7394_p1 = pnand %p7392_p0, %p7389_p13 }
  0x41   : > { %7397 = shalt.err (!%p7394_p1)
}
  0x42   : > { %s7398_s30 = scalar_lea.vmem %s7540_s10, 16  ;;  %s7405_s14 = scalar_lea.vmem %s7540_s10, 32 }
  0x43   : > { %p7399_p4 = scmp.ne.s32.totalorder %s7540_s10, %s7398_s30  ;;  %p7406_p9 = scmp.lt.s32.totalorder %s7540_s10, %s7540_s10 }
  0x44   : > { %p7407_p10 = scmp.lt.s32.totalorder %s7405_s14, %s7398_s30 }
  0x45   : > { %p7401_p6 = pnand %p7399_p4, %p7552_p7 }
  0x46   : > { %p7408_p11 = por %p7407_p10, %p7406_p9 }
  0x47   : > { %p7402_p8 = pneg %p7401_p6 }
  0x49   : > { %p7409_p12 = pnand %p7408_p11, %p7402_p8 }
  0x4b   : > { %7412 = shalt.err (!%p7409_p12)
}
  0x4c   : > { %7208 = dma.hbm_to_vmem [thread:$0]  (!%p7536_p5), %s9419_s4, 16, %s7540_s10, [#allocation14]  }
  0x4d   : > { %s7413_s19 = scalar_lea.hbm %s9421_s6, 16 }
  0x4e   : > { %p7414_p13 = scmp.ne.s32.totalorder %s9421_s6, %s7413_s19  ;;  %p7420_p4 = scmp.lt.u32.totalorder %s7413_s19, %s9421_s6 }
  0x50   : > { %p7416_p0 = pnand %p7414_p13, %p7552_p7 }
  0x52   : > { %p7417_p1 = pneg %p7416_p0 }
  0x54   : > { %p7422_p6 = pnand %p7420_p4, %p7417_p1 }
  0x56   : > { %7425 = shalt.err (!%p7422_p6)
}
  0x57   : > { %s7426_s25 = scalar_lea.vmem %s258_s12, 16  ;;  %s7433_s10 = scalar_lea.vmem %s258_s12, 32 }
  0x58   : > { %p7427_p8 = scmp.ne.s32.totalorder %s258_s12, %s7426_s25  ;;  %p7434_p11 = scmp.lt.s32.totalorder %s258_s12, %s258_s12 }
  0x59   : > { %p7435_p12 = scmp.lt.s32.totalorder %s7433_s10, %s7426_s25 }
  0x5a   : > { %p7429_p9 = pnand %p7427_p8, %p7552_p7 }
  0x5b   : > { %p7436_p2 = por %p7435_p12, %p7434_p11 }
  0x5c   : > { %p7430_p10 = pneg %p7429_p9 }
  0x5e   : > { %p7437_p3 = pnand %p7436_p2, %p7430_p10 }
  0x60   : > { %7440 = shalt.err (!%p7437_p3)
}
  0x61   : > { %7211 = dma.hbm_to_vmem [thread:$0]  (!%p7536_p5), %s9421_s6, 16, %s258_s12, [#allocation17]  }
  0x62   : > { %p9428_p13 = scmp.ne.s32.totalorder %s9425_s28, 0 }
  0x63   : > { %p9429_p0 = scmp.eq.s32.totalorder (!%p9428_p13), %s7519_s27, 0 }
  0x64   : > { %279 = sbr.rel (%p9428_p13) target bundleno = 1619 (0x653), region = 48 }
  0x6b   : > { %7446 = dma.done.wait (%p9429_p0), [#allocation12], 256   ;;  %p9430_p7 = pmov %p9429_p0 }
  0x6c   : > { %p9431_p1 = pmov %p9429_p0 }
  0x6d   : > { %7448 = vsyncadd (%p9430_p7), [#allocation12], 4294967040 }
  0x6e   : > { %7450 = dma.done.wait (%p9431_p1), [#allocation14], 32   ;;  %p9432_p2 = pmov %p9429_p0 }
  0x6f   : > { %p9433_p3 = pmov %p9429_p0 }
  0x70   : > { %7452 = vsyncadd (%p9432_p2), [#allocation14], 4294967264 }
  0x71   : > { %7454 = dma.done.wait (%p9433_p3), [#allocation17], 16   ;;  %p9434_p5 = pmov %p9429_p0 }
  0x72   : > { %s322_s28 = smul.u32 112, %s7519_s27  ;;  %vm791_vm0 = vcmask 1040384   ;;  %vm7467_vm1 = vmmov 1   ;;  %vm454_vm3 = vcmask 72704   ;;  %v445_v0 = vld [vmem:[#allocation11] sm:$0xff]  ;;  %vm1532_vm4 = vcmask 261120  }
  0x73   : > { %7456 = vsyncadd (%p9434_p5), [#allocation17], 4294967280  ;;  %v446_v1 = vld [vmem:[#allocation11 + $0x8] sm:$0x1]  ;;  %s7469_s13 = smov 32   ;;  %s7470_s30 = smov 64  }
  0x74   : > { %p323_p4 = scmp.lt.s32.totalorder %s322_s28, 223  ;;  %vm7169_vm2 = vmpackc.low %vm791_vm0, %vm7467_vm1  ;;  %v7168_v2 = vpack.c.bf16 %v446_v1, %v445_v0  ;;  %s7471_s14 = smov 96   ;;  %vm2292_vm5 = vcmask 523520   ;;  %vm2023_vm6 = vcmask 259072   ;;  %vm2421_vm7 = vcmask 785920  }
  0x75   : > { %vm2550_vm8 = vcmask 1048320   ;;  %vm3680_vm9 = vcmask 523264   ;;  %vm3935_vm10 = vcmask 519168   ;;  %vm4025_vm11 = vcmask 1043968   ;;  %p328_p6 = scmp.lt.s32.totalorder %s7519_s27, 1 }
  0x76   : > { %s9440_s28 = smov (!%p323_p4, %s322_s28), 223  ;;  %7170 = vmatprep.subr.msk.bf16.mxu0 %vm7169_vm2, %v7168_v2  ;;  %vm3829_vm12 = vcmask 522240   ;;  %vm5324_vm13 = vcmask 516096   ;;  %vm5325_vm14 = vsmask.f32 256  ;;  %vm5351_vm0 = vcmask 1040896  }
  0x77   : > { %s6159_s8 = sshll.u32 %s9440_s28, 3  ;;  %7173 = vmatpush3.bf16.msk.msra.mxu0 %vm7169_vm2, %v7168_v2  ;;  %s9442_s27 = smov (!%p328_p6, %s7519_s27), 1  ;;  %vm9090_vm15 = vmand %vm5324_vm13, %vm5325_vm14 }
  0x78   : > { %s7658_s11 = scalar_lea.vmem %s9415_s0, %s6159_s8  ;;  %s7182_s10 = smul.u32 25, %s9442_s27  ;;  %vm9312_vm1 = vmand %vm5351_vm0, %vm5325_vm14 }
  0x79   : > { %v333_v3 = vld [vmem:[%s7658_s11] sm:$0xff]  ;;  %v334_v4 = vld [vmem:[%s7658_s11 + $0x8] sm:$0xff]  ;;  %v335_v5 = vld [vmem:[%s7658_s11 + $0x10] sm:$0xff] }
  0x7a   : > { %6944 = vmatprep.mubr.msk.f32.mxu0 %vm454_vm3, %v333_v3  ;;  %v336_v6 = vld [vmem:[%s7658_s11 + $0x18] sm:$0xff]  ;;  %v337_v7 = vld [vmem:[%s7658_s11 + $0x20] sm:$0xff]  ;;  %v338_v8 = vld [vmem:[%s7658_s11 + $0x28] sm:$0xff]  ;;  %s9084_s9 = scalar_lea.vmem %s9422_s7, %s7182_s10 }
  0x7b   : > { %6945 = vmatmul.mubr.msk.f32.vlgmr.msra.gmra.mrb[0].mxu0 %vm454_vm3, %v334_v4  ;;  %v339_v9 = vld [vmem:[%s7658_s11 + $0x30] sm:$0xff]  ;;  %v340_v10 = vld [vmem:[%s7658_s11 + $0x38] sm:$0xff]  ;;  %v341_v11 = vld [vmem:[%s7658_s11 + $0x40] sm:$0xff]  ;;  %v7468_v4 = vmov 0.0  }
  0x7c   : > { %6947 = vmatprep.mubr.msk.f32.mxu0 %vm454_vm3, %v335_v5  ;;  %v342_v12 = vld [vmem:[%s7658_s11 + $0x48] sm:$0xff]  ;;  %v343_v13 = vld [vmem:[%s7658_s11 + $0x50] sm:$0xff]  ;;  %v344_v14 = vld [vmem:[%s7658_s11 + $0x58] sm:$0xff]  ;;  %1980 = vst.msk [vmem:[#allocation4] sm:$0xff] %vm1532_vm4, %v7468_v4 }
  0x7d   : > { %v345_v15 = vld [vmem:[%s7658_s11 + $0x60] sm:$0xff]  ;;  %v346_v16 = vld [vmem:[%s7658_s11 + $0x68] sm:$0xff]  ;;  %v347_v17 = vld [vmem:[%s7658_s11 + $0x70] sm:$0xff]  ;;  %1981 = vst.msk [vmem:[#allocation4 + $0x8] sm:$0xff] %vm1532_vm4, %v7468_v4 }
  0x7e   : > { %v348_v18 = vld [vmem:[%s7658_s11 + $0x78] sm:$0xff]  ;;  %v349_v19 = vld [vmem:[%s7658_s11 + $0x80] sm:$0xff]  ;;  %v350_v20 = vld [vmem:[%s7658_s11 + $0x88] sm:$0xff]  ;;  %1982 = vst.msk [vmem:[#allocation4 + $0x10] sm:$0xff] %vm1532_vm4, %v7468_v4 }
  0x7f   : > { %6948 = vmatmul.mubr.msk.f32.gmra.mrb[2].mxu0 %vm454_vm3, %v336_v6  ;;  %v351_v21 = vld [vmem:[%s7658_s11 + $0x90] sm:$0xff]  ;;  %v352_v22 = vld [vmem:[%s7658_s11 + $0x98] sm:$0xff]  ;;  %v353_v23 = vld [vmem:[%s7658_s11 + $0xa0] sm:$0xff]  ;;  %1983 = vst.msk [vmem:[#allocation4 + $0x18] sm:$0xff] %vm1532_vm4, %v7468_v4 }
  0x80   : > { %6950 = vmatprep.mubr.msk.f32.mxu0 %vm454_vm3, %v337_v7  ;;  %v354_v24 = vld [vmem:[%s7658_s11 + $0xa8] sm:$0xff]  ;;  %v355_v25 = vld [vmem:[%s7658_s11 + $0xb0] sm:$0xff]  ;;  %v356_v26 = vld [vmem:[%s7658_s11 + $0xb8] sm:$0xff]  ;;  %1984 = vst.msk [vmem:[#allocation4 + $0x20] sm:$0xff] %vm1532_vm4, %v7468_v4 }
  0x81   : > { %v357_v27 = vld [vmem:[%s7658_s11 + $0xc0] sm:$0xff]  ;;  %v358_v28 = vld [vmem:[%s7658_s11 + $0xc8] sm:$0xff]  ;;  %v359_v29 = vld [vmem:[%s7658_s11 + $0xd0] sm:$0xff]  ;;  %1985 = vst.msk [vmem:[#allocation4 + $0x28] sm:$0xff] %vm1532_vm4, %v7468_v4 }
  0x82   : > { %v360_v30 = vld [vmem:[%s7658_s11 + $0xd8] sm:$0xff]  ;;  %v361_v31 = vld [vmem:[%s7658_s11 + $0xe0] sm:$0xff]  ;;  %v362_v32 = vld [vmem:[%s7658_s11 + $0xe8] sm:$0xff]  ;;  %1986 = vst.msk [vmem:[#allocation4 + $0x30] sm:$0xff] %vm1532_vm4, %v7468_v4 }
  0x83   : > { %6951 = vmatmul.mubr.msk.f32.gmra.mrb[4].mxu0 %vm454_vm3, %v338_v8  ;;  %v363_v33 = vld [vmem:[%s7658_s11 + $0xf0] sm:$0xff]  ;;  %v364_v34 = vld [vmem:[%s7658_s11 + $0xf8] sm:$0xff]  ;;  %v365_v35 = vld [vmem:[%s7658_s11 + $0x100] sm:$0xff]  ;;  %1987 = vst.msk [vmem:[#allocation4 + $0x38] sm:$0xff] %vm1532_vm4, %v7468_v4 }
  0x84   : > { %6953 = vmatprep.mubr.msk.f32.mxu0 %vm454_vm3, %v339_v9  ;;  %v366_v36 = vld [vmem:[%s7658_s11 + $0x108] sm:$0xff]  ;;  %v367_v37 = vld [vmem:[%s7658_s11 + $0x110] sm:$0xff]  ;;  %v368_v38 = vld [vmem:[%s7658_s11 + $0x118] sm:$0xff]  ;;  %1988 = vst.msk [vmem:[#allocation4 + $0x40] sm:$0xff] %vm1532_vm4, %v7468_v4 }
  0x85   : > { %v369_v39 = vld [vmem:[%s7658_s11 + $0x120] sm:$0xff]  ;;  %v370_v40 = vld [vmem:[%s7658_s11 + $0x128] sm:$0xff]  ;;  %v371_v41 = vld [vmem:[%s7658_s11 + $0x130] sm:$0xff]  ;;  %1989 = vst.msk [vmem:[#allocation4 + $0x48] sm:$0xff] %vm1532_vm4, %v7468_v4 }
  0x86   : > { %v372_v42 = vld [vmem:[%s7658_s11 + $0x138] sm:$0xff]  ;;  %v373_v43 = vld [vmem:[%s7658_s11 + $0x140] sm:$0xff]  ;;  %v374_v44 = vld [vmem:[%s7658_s11 + $0x148] sm:$0xff]  ;;  %1990 = vst.msk [vmem:[#allocation4 + $0x50] sm:$0xff] %vm1532_vm4, %v7468_v4 }
  0x87   : > { %6954 = vmatmul.mubr.msk.f32.gmra.mrb[6].mxu0 %vm454_vm3, %v340_v10  ;;  %v375_v45 = vld [vmem:[%s7658_s11 + $0x150] sm:$0xff]  ;;  %v376_v46 = vld [vmem:[%s7658_s11 + $0x158] sm:$0xff]  ;;  %v377_v47 = vld [vmem:[%s7658_s11 + $0x160] sm:$0xff]  ;;  %1991 = vst.msk [vmem:[#allocation4 + $0x58] sm:$0xff] %vm1532_vm4, %v7468_v4 }
  0x88   : > { %6956 = vmatprep.mubr.msk.f32.mxu0 %vm454_vm3, %v341_v11  ;;  %v378_v48 = vld [vmem:[%s7658_s11 + $0x168] sm:$0xff]  ;;  %v379_v49 = vld [vmem:[%s7658_s11 + $0x170] sm:$0xff]  ;;  %v380_v50 = vld [vmem:[%s7658_s11 + $0x178] sm:$0xff]  ;;  %1992 = vst.msk [vmem:[#allocation4 + $0x60] sm:$0xff] %vm1532_vm4, %v7468_v4 }
  0x89   : > { %v381_v51 = vld [vmem:[%s7658_s11 + $0x180] sm:$0xff]  ;;  %v382_v52 = vld [vmem:[%s7658_s11 + $0x188] sm:$0xff]  ;;  %v383_v53 = vld [vmem:[%s7658_s11 + $0x190] sm:$0xff]  ;;  %1993 = vst.msk [vmem:[#allocation4 + $0x68] sm:$0xff] %vm1532_vm4, %v7468_v4 }
  0x8a   : > { %v384_v54 = vld [vmem:[%s7658_s11 + $0x198] sm:$0xff]  ;;  %v385_v55 = vld [vmem:[%s7658_s11 + $0x1a0] sm:$0xff]  ;;  %v386_v56 = vld [vmem:[%s7658_s11 + $0x1a8] sm:$0xff]  ;;  %1994 = vst.msk [vmem:[#allocation4 + $0x70] sm:$0xff] %vm1532_vm4, %v7468_v4 }
  0x8b   : > { %6957 = vmatmul.mubr.msk.f32.gmra.mrb[8].mxu0 %vm454_vm3, %v342_v12  ;;  %v387_v57 = vld [vmem:[%s7658_s11 + $0x1b0] sm:$0xff]  ;;  %v388_v58 = vld [vmem:[%s7658_s11 + $0x1b8] sm:$0xff]  ;;  %v389_v59 = vld [vmem:[%s7658_s11 + $0x1c0] sm:$0xff]  ;;  %1995 = vst.msk [vmem:[#allocation4 + $0x78] sm:$0xff] %vm1532_vm4, %v7468_v4 }
  0x8c   : > { %6959 = vmatprep.mubr.msk.f32.mxu0 %vm454_vm3, %v343_v13  ;;  %v390_v60 = vld [vmem:[%s7658_s11 + $0x1c8] sm:$0xff]  ;;  %v391_v61 = vld [vmem:[%s7658_s11 + $0x1d0] sm:$0xff]  ;;  %v392_v62 = vld [vmem:[%s7658_s11 + $0x1d8] sm:$0xff]  ;;  %1996 = vst.msk [vmem:[#allocation4 + $0x80] sm:$0xff] %vm1532_vm4, %v7468_v4 }
  0x8d   : > { %v393_v63 = vld [vmem:[%s7658_s11 + $0x1e0] sm:$0xff]  ;;  %v394_v0 = vld [vmem:[%s7658_s11 + $0x1e8] sm:$0xff]  ;;  %v395_v1 = vld [vmem:[%s7658_s11 + $0x1f0] sm:$0xff]  ;;  %1997 = vst.msk [vmem:[#allocation4 + $0x88] sm:$0xff] %vm1532_vm4, %v7468_v4 }
  0x8e   : > { %v396_v2 = vld [vmem:[%s7658_s11 + $0x1f8] sm:$0xff]  ;;  %v397_v3 = vld [vmem:[%s7658_s11 + $0x200] sm:$0xff]  ;;  %1998 = vst.msk [vmem:[#allocation4 + $0x90] sm:$0xff] %vm1532_vm4, %v7468_v4  ;;  %1999 = vst.msk [vmem:[#allocation4 + $0x98] sm:$0xff] %vm1532_vm4, %v7468_v4 }
  0x8f   : > { %6960 = vmatmul.mubr.msk.f32.gmra.mrb[10].mxu0 %vm454_vm3, %v344_v14  ;;  %2000 = vst.msk [vmem:[#allocation4 + $0xa0] sm:$0xff] %vm1532_vm4, %v7468_v4  ;;  %2001 = vst.msk [vmem:[#allocation4 + $0xa8] sm:$0xff] %vm1532_vm4, %v7468_v4  ;;  %v398_v5 = vld [vmem:[%s7658_s11 + $0x208] sm:$0xff]  ;;  %v399_v6 = vld [vmem:[%s7658_s11 + $0x210] sm:$0xff] }
  0x90   : > { %6962 = vmatprep.mubr.msk.f32.mxu0 %vm454_vm3, %v345_v15  ;;  %2002 = vst.msk [vmem:[#allocation4 + $0xb0] sm:$0xff] %vm1532_vm4, %v7468_v4  ;;  %2003 = vst.msk [vmem:[#allocation4 + $0xb8] sm:$0xff] %vm1532_vm4, %v7468_v4  ;;  %v400_v7 = vld [vmem:[%s7658_s11 + $0x218] sm:$0xff]  ;;  %v401_v8 = vld [vmem:[%s7658_s11 + $0x220] sm:$0xff] }
  0x91   : > { %2004 = vst.msk [vmem:[#allocation4 + $0xc0] sm:$0xff] %vm1532_vm4, %v7468_v4  ;;  %2005 = vst.msk [vmem:[#allocation4 + $0xc8] sm:$0xff] %vm1532_vm4, %v7468_v4  ;;  %v2180_v9 = vld [vmem:[#allocation4 + $0x1] sm:$0xff]  ;;  %v2181_v10 = vld [vmem:[#allocation4 + $0x9] sm:$0xff] }
  0x92   : > { %2006 = vst.msk [vmem:[#allocation4 + $0xd0] sm:$0xff] %vm1532_vm4, %v7468_v4  ;;  %2007 = vst.msk [vmem:[#allocation4 + $0xd8] sm:$0xff] %vm1532_vm4, %v7468_v4  ;;  %v2212_v11 = vpack.c.bf16 %v2181_v10, %v2180_v9  ;;  %v402_v12 = vld [vmem:[%s7658_s11 + $0x228] sm:$0xff]  ;;  %v403_v13 = vld [vmem:[%s7658_s11 + $0x230] sm:$0xff] }
  0x93   : > { %6963 = vmatmul.mubr.msk.f32.gmra.mrb[12].mxu0 %vm454_vm3, %v346_v16  ;;  %2008 = vst.msk [vmem:[#allocation4 + $0xe0] sm:$0xff] %vm1532_vm4, %v7468_v4  ;;  %2009 = vst.msk [vmem:[#allocation4 + $0xe8] sm:$0xff] %vm1532_vm4, %v7468_v4  ;;  %v404_v14 = vld [vmem:[%s7658_s11 + $0x238] sm:$0xff] }
  0x94   : > { %6965 = vmatprep.mubr.msk.f32.mxu0 %vm454_vm3, %v347_v17  ;;  %2010 = vst.msk [vmem:[#allocation4 + $0xf0] sm:$0xff] %vm1532_vm4, %v7468_v4  ;;  %2011 = vst.msk [vmem:[#allocation4 + $0xf8] sm:$0xff] %vm1532_vm4, %v7468_v4  ;;  %2244 = vrot.lane.b32.xlu0 %v2212_v11, %s7469_s13  ;;  %v405_v17 = vld [vmem:[%s7658_s11 + $0x240] sm:$0xff]  ;;  %v444_v11 = vld [vmem:[%s7658_s11 + $0x378] sm:$0xff] }
  0x95   : > { %2012 = vst.msk [vmem:[#allocation4 + $0x100] sm:$0xff] %vm1532_vm4, %v7468_v4  ;;  %2013 = vst.msk [vmem:[#allocation4 + $0x108] sm:$0xff] %vm1532_vm4, %v7468_v4 }
  0x96   : > { %2014 = vst.msk [vmem:[#allocation4 + $0x110] sm:$0xff] %vm1532_vm4, %v7468_v4  ;;  %2015 = vst.msk [vmem:[#allocation4 + $0x118] sm:$0xff] %vm1532_vm4, %v7468_v4 }
  0x97   : > { %6966 = vmatmul.mubr.msk.f32.gmra.mrb[14].mxu0 %vm454_vm3, %v348_v18  ;;  %2016 = vst.msk [vmem:[#allocation4 + $0x120] sm:$0xff] %vm1532_vm4, %v7468_v4 }
  0x98   : > { %6968 = vmatprep.mubr.msk.f32.mxu0 %vm454_vm3, %v349_v19  ;;  %v406_v19 = vld [vmem:[%s7658_s11 + $0x248] sm:$0xff]  ;;  %3808 = vst.msk [vmem:[#allocation8] sm:$0xff] %vm3680_vm9, %v7468_v4  ;;  %3809 = vst.msk [vmem:[#allocation8 + $0x8] sm:$0xff] %vm3680_vm9, %v7468_v4 }
  0x99   : > { %3810 = vst.msk [vmem:[#allocation8 + $0x10] sm:$0xff] %vm3680_vm9, %v7468_v4  ;;  %3811 = vst.msk [vmem:[#allocation8 + $0x18] sm:$0xff] %vm3680_vm9, %v7468_v4 }
  0x9a   : > { %3812 = vst.msk [vmem:[#allocation8 + $0x20] sm:$0xff] %vm3680_vm9, %v7468_v4  ;;  %3813 = vst.msk [vmem:[#allocation8 + $0x28] sm:$0xff] %vm3680_vm9, %v7468_v4 }
  0x9b   : > { %6969 = vmatmul.mubr.msk.f32.gmra.mrb[16].mxu0 %vm454_vm3, %v350_v20  ;;  %v2785_v15 = vld [vmem:[#allocation4 + $0xf0] sm:$0xff]  ;;  %v2786_v16 = vld [vmem:[#allocation4 + $0xf8] sm:$0xff]  ;;  %3814 = vst.msk [vmem:[#allocation8 + $0x30] sm:$0xff] %vm3680_vm9, %v7468_v4  ;;  %3815 = vst.msk [vmem:[#allocation8 + $0x38] sm:$0xff] %vm3680_vm9, %v7468_v4 }
  0x9c   : > { %6971 = vmatprep.mubr.msk.f32.mxu0 %vm454_vm3, %v351_v21  ;;  %v2804_v18 = vpack.c.bf16 %v2786_v16, %v2785_v15  ;;  %v2913_v20 = vld [vmem:[#allocation4 + $0xf1] sm:$0xff]  ;;  %v2914_v21 = vld [vmem:[#allocation4 + $0xf9] sm:$0xff]  ;;  %3816 = vst.msk [vmem:[#allocation8 + $0x40] sm:$0xff] %vm3680_vm9, %v7468_v4  ;;  %3817 = vst.msk [vmem:[#allocation8 + $0x48] sm:$0xff] %vm3680_vm9, %v7468_v4 }
  0x9d   : > { %3818 = vst.msk [vmem:[#allocation8 + $0x50] sm:$0xff] %vm3680_vm9, %v7468_v4  ;;  %3819 = vst.msk [vmem:[#allocation8 + $0x58] sm:$0xff] %vm3680_vm9, %v7468_v4 }
  0x9e   : > { %2849 = vrot.lane.b32.xlu0 %v2804_v18, %s7470_s30  ;;  %3820 = vst.msk [vmem:[#allocation8 + $0x60] sm:$0xff] %vm3680_vm9, %v7468_v4  ;;  %3821 = vst.msk [vmem:[#allocation8 + $0x68] sm:$0xff] %vm3680_vm9, %v7468_v4  ;;  %v7260_v4 = vld [vmem:[%s9420_s5 + $0xc8] sm:$0xff]  }
  0x9f   : > { %6972 = vmatmul.mubr.msk.f32.gmra.mrb[18].mxu0 %vm454_vm3, %v352_v22  ;;  %v407_v22 = vld [vmem:[%s7658_s11 + $0x250] sm:$0xff] }
  0xa0   : > { %6974 = vmatprep.mubr.msk.f32.mxu0 %vm454_vm3, %v353_v23  ;;  %v2932_v23 = vpack.c.bf16 %v2914_v21, %v2913_v20 }
  0xa2   : > { %2977 = vrot.lane.b32.xlu0 %v2932_v23, %s7471_s14 }
  0xa3   : > { %6975 = vmatmul.mubr.msk.f32.gmra.mrb[20].mxu0 %vm454_vm3, %v354_v24  ;;  %v408_v24 = vld [vmem:[%s7658_s11 + $0x258] sm:$0xff] }
  0xa4   : > { %6977 = vmatprep.mubr.msk.f32.mxu0 %vm454_vm3, %v355_v25  ;;  %v409_v25 = vld [vmem:[%s7658_s11 + $0x260] sm:$0xff] }
  0xa7   : > { %6978 = vmatmul.mubr.msk.f32.gmra.mrb[22].mxu0 %vm454_vm3, %v356_v26  ;;  %v2659_v26 = vld [vmem:[#allocation4 + $0xf2] sm:$0xff] }
  0xa8   : > { %6980 = vmatprep.mubr.msk.f32.mxu0 %vm454_vm3, %v357_v27  ;;  %v2660_v27 = vld [vmem:[#allocation4 + $0xfa] sm:$0xff] }
  0xab   : > { %6981 = vmatmul.mubr.msk.f32.gmra.mrb[24].mxu0 %vm454_vm3, %v358_v28  ;;  %v2677_v28 = vpack.c.bf16 %v2660_v27, %v2659_v26 }
  0xac   : > { %6983 = vmatprep.mubr.msk.f32.mxu0 %vm454_vm3, %v359_v29  ;;  %v410_v29 = vld [vmem:[%s7658_s11 + $0x268] sm:$0xff] }
  0xad   : > { %2723 = vrot.lane.b32.xlu0 %v2677_v28, %s7469_s13 }
  0xaf   : > { %6984 = vmatmul.mubr.msk.f32.gmra.mrb[26].mxu0 %vm454_vm3, %v360_v30  ;;  %v411_v30 = vld [vmem:[%s7658_s11 + $0x270] sm:$0xff] }
  0xb0   : > { %6986 = vmatprep.mubr.msk.f32.mxu0 %vm454_vm3, %v361_v31  ;;  %v412_v31 = vld [vmem:[%s7658_s11 + $0x278] sm:$0xff] }
  0xb3   : > { %6987 = vmatmul.mubr.msk.f32.gmra.mrb[28].mxu0 %vm454_vm3, %v362_v32  ;;  %v413_v32 = vld [vmem:[%s7658_s11 + $0x280] sm:$0xff] }
  0xb4   : > { %6989 = vmatprep.mubr.msk.f32.mxu0 %vm454_vm3, %v363_v33  ;;  %v414_v33 = vld [vmem:[%s7658_s11 + $0x288] sm:$0xff] }
  0xb7   : > { %6990 = vmatmul.mubr.msk.f32.gmra.mrb[30].mxu0 %vm454_vm3, %v364_v34  ;;  %v415_v34 = vld [vmem:[%s7658_s11 + $0x290] sm:$0xff] }
  0xb8   : > { %6992 = vmatprep.mubr.msk.f32.mxu0 %vm454_vm3, %v365_v35  ;;  %v416_v35 = vld [vmem:[%s7658_s11 + $0x298] sm:$0xff] }
  0xbb   : > { %6993 = vmatmul.mubr.msk.f32.gmra.mrb[32].mxu0 %vm454_vm3, %v366_v36  ;;  %v417_v36 = vld [vmem:[%s7658_s11 + $0x2a0] sm:$0xff] }
  0xbc   : > { %6995 = vmatprep.mubr.msk.f32.mxu0 %vm454_vm3, %v367_v37  ;;  %v418_v37 = vld [vmem:[%s7658_s11 + $0x2a8] sm:$0xff] }
  0xbf   : > { %6996 = vmatmul.mubr.msk.f32.gmra.mrb[34].mxu0 %vm454_vm3, %v368_v38  ;;  %v419_v38 = vld [vmem:[%s7658_s11 + $0x2b0] sm:$0xff] }
  0xc0   : > { %6998 = vmatprep.mubr.msk.f32.mxu0 %vm454_vm3, %v369_v39  ;;  %v420_v39 = vld [vmem:[%s7658_s11 + $0x2b8] sm:$0xff] }
  0xc3   : > { %6999 = vmatmul.mubr.msk.f32.gmra.mrb[36].mxu0 %vm454_vm3, %v370_v40  ;;  %v421_v40 = vld [vmem:[%s7658_s11 + $0x2c0] sm:$0xff] }
  0xc4   : > { %7001 = vmatprep.mubr.msk.f32.mxu0 %vm454_vm3, %v371_v41  ;;  %v422_v41 = vld [vmem:[%s7658_s11 + $0x2c8] sm:$0xff] }
  0xc7   : > { %7002 = vmatmul.mubr.msk.f32.gmra.mrb[38].mxu0 %vm454_vm3, %v372_v42  ;;  %v423_v42 = vld [vmem:[%s7658_s11 + $0x2d0] sm:$0xff] }
  0xc8   : > { %7004 = vmatprep.mubr.msk.f32.mxu0 %vm454_vm3, %v373_v43  ;;  %v424_v43 = vld [vmem:[%s7658_s11 + $0x2d8] sm:$0xff] }
  0xcb   : > { %7005 = vmatmul.mubr.msk.f32.gmra.mrb[40].mxu0 %vm454_vm3, %v374_v44  ;;  %v425_v44 = vld [vmem:[%s7658_s11 + $0x2e0] sm:$0xff] }
  0xcc   : > { %7007 = vmatprep.mubr.msk.f32.mxu0 %vm454_vm3, %v375_v45  ;;  %v426_v45 = vld [vmem:[%s7658_s11 + $0x2e8] sm:$0xff] }
  0xcf   : > { %7008 = vmatmul.mubr.msk.f32.gmra.mrb[42].mxu0 %vm454_vm3, %v376_v46  ;;  %v427_v46 = vld [vmem:[%s7658_s11 + $0x2f0] sm:$0xff] }
  0xd0   : > { %7010 = vmatprep.mubr.msk.f32.mxu0 %vm454_vm3, %v377_v47  ;;  %v428_v47 = vld [vmem:[%s7658_s11 + $0x2f8] sm:$0xff] }
  0xd3   : > { %7011 = vmatmul.mubr.msk.f32.gmra.mrb[44].mxu0 %vm454_vm3, %v378_v48  ;;  %v429_v48 = vld [vmem:[%s7658_s11 + $0x300] sm:$0xff] }
  0xd4   : > { %7013 = vmatprep.mubr.msk.f32.mxu0 %vm454_vm3, %v379_v49  ;;  %v430_v49 = vld [vmem:[%s7658_s11 + $0x308] sm:$0xff] }
  0xd7   : > { %7014 = vmatmul.mubr.msk.f32.gmra.mrb[46].mxu0 %vm454_vm3, %v380_v50  ;;  %v431_v50 = vld [vmem:[%s7658_s11 + $0x310] sm:$0xff] }
  0xd8   : > { %7016 = vmatprep.mubr.msk.f32.mxu0 %vm454_vm3, %v381_v51  ;;  %v432_v51 = vld [vmem:[%s7658_s11 + $0x318] sm:$0xff] }
  0xdb   : > { %7017 = vmatmul.mubr.msk.f32.gmra.mrb[48].mxu0 %vm454_vm3, %v382_v52  ;;  %v433_v52 = vld [vmem:[%s7658_s11 + $0x320] sm:$0xff] }
  0xdc   : > { %7019 = vmatprep.mubr.msk.f32.mxu0 %vm454_vm3, %v383_v53  ;;  %v434_v53 = vld [vmem:[%s7658_s11 + $0x328] sm:$0xff] }
  0xdf   : > { %7020 = vmatmul.mubr.msk.f32.gmra.mrb[50].mxu0 %vm454_vm3, %v384_v54  ;;  %v435_v54 = vld [vmem:[%s7658_s11 + $0x330] sm:$0xff] }
  0xe0   : > { %7022 = vmatprep.mubr.msk.f32.mxu0 %vm454_vm3, %v385_v55  ;;  %v436_v55 = vld [vmem:[%s7658_s11 + $0x338] sm:$0xff] }
  0xe3   : > { %7023 = vmatmul.mubr.msk.f32.gmra.mrb[52].mxu0 %vm454_vm3, %v386_v56  ;;  %v437_v56 = vld [vmem:[%s7658_s11 + $0x340] sm:$0xff] }
  0xe4   : > { %7025 = vmatprep.mubr.msk.f32.mxu0 %vm454_vm3, %v387_v57  ;;  %v438_v57 = vld [vmem:[%s7658_s11 + $0x348] sm:$0xff] }
  0xe7   : > { %7026 = vmatmul.mubr.msk.f32.gmra.mrb[54].mxu0 %vm454_vm3, %v388_v58  ;;  %v439_v58 = vld [vmem:[%s7658_s11 + $0x350] sm:$0xff] }
  0xe8   : > { %7028 = vmatprep.mubr.msk.f32.mxu0 %vm454_vm3, %v389_v59  ;;  %v7951_v59 = vld [vmem:[#allocation13] ss:$0 sm:$0xff] }
  0xeb   : > { %7029 = vmatmul.mubr.msk.f32.gmra.mrb[56].mxu0 %vm454_vm3, %v390_v60  ;;  %v440_v60 = vld [vmem:[%s7658_s11 + $0x358] sm:$0xff] }
  0xec   : > { %7031 = vmatprep.mubr.msk.f32.mxu0 %vm454_vm3, %v391_v61  ;;  %v441_v61 = vld [vmem:[%s7658_s11 + $0x360] sm:$0xff] }
  0xef   : > { %7032 = vmatmul.mubr.msk.f32.gmra.mrb[58].mxu0 %vm454_vm3, %v392_v62 }
  0xf0   : > { %7034 = vmatprep.mubr.msk.f32.mxu0 %vm454_vm3, %v393_v63 }
  0xf3   : > { %7035 = vmatmul.mubr.msk.f32.gmra.mrb[60].mxu0 %vm454_vm3, %v394_v0 }
  0xf4   : > { %7037 = vmatprep.mubr.msk.f32.mxu0 %vm454_vm3, %v395_v1 }
  0xf7   : > { %7038 = vmatmul.mubr.msk.f32.gmra.mrb[62].mxu0 %vm454_vm3, %v396_v2  ;;  %v442_v2 = vld [vmem:[%s7658_s11 + $0x368] sm:$0xff] }
  0xf8   : > { %7040 = vmatprep.mubr.msk.f32.mxu0 %vm454_vm3, %v397_v3 }
  0xfb   : > { %7041 = vmatmul.mubr.msk.f32.gmra.mrb[64].mxu0 %vm454_vm3, %v398_v5  ;;  %v443_v5 = vld [vmem:[%s7658_s11 + $0x370] sm:$0xff] }
  0xfc   : > { %7043 = vmatprep.mubr.msk.f32.mxu0 %vm454_vm3, %v399_v6 }
  0xff   : > { %7044 = vmatmul.mubr.msk.f32.gmra.mrb[66].mxu0 %vm454_vm3, %v400_v7 }
 0x100   : > { %7046 = vmatprep.mubr.msk.f32.mxu0 %vm454_vm3, %v401_v8 }
 0x103   : > { %7047 = vmatmul.mubr.msk.f32.gmra.mrb[68].mxu0 %vm454_vm3, %v402_v12 }
 0x104   : > { %7049 = vmatprep.mubr.msk.f32.mxu0 %vm454_vm3, %v403_v13 }
 0x107   : > { %7050 = vmatmul.mubr.msk.f32.gmra.mrb[70].mxu0 %vm454_vm3, %v404_v14 }
 0x108   : > { %7052 = vmatprep.mubr.msk.f32.mxu0 %vm454_vm3, %v405_v17 }
 0x10b   : > { %7053 = vmatmul.mubr.msk.f32.gmra.mrb[72].mxu0 %vm454_vm3, %v406_v19 }
 0x10c   : > { %7055 = vmatprep.mubr.msk.f32.mxu0 %vm454_vm3, %v407_v22 }
 0x10f   : > { %7056 = vmatmul.mubr.msk.f32.gmra.mrb[74].mxu0 %vm454_vm3, %v408_v24 }
 0x110   : > { %7058 = vmatprep.mubr.msk.f32.mxu0 %vm454_vm3, %v409_v25 }
 0x113   : > { %7059 = vmatmul.mubr.msk.f32.gmra.mrb[76].mxu0 %vm454_vm3, %v410_v29 }
 0x114   : > { %7061 = vmatprep.mubr.msk.f32.mxu0 %vm454_vm3, %v411_v30 }
 0x117   : > { %7062 = vmatmul.mubr.msk.f32.gmra.mrb[78].mxu0 %vm454_vm3, %v412_v31 }
 0x118   : > { %7064 = vmatprep.mubr.msk.f32.mxu0 %vm454_vm3, %v413_v32 }
 0x11b   : > { %7065 = vmatmul.mubr.msk.f32.gmra.mrb[80].mxu0 %vm454_vm3, %v414_v33 }
 0x11c   : > { %7067 = vmatprep.mubr.msk.f32.mxu0 %vm454_vm3, %v415_v34 }
 0x11f   : > { %7068 = vmatmul.mubr.msk.f32.gmra.mrb[82].mxu0 %vm454_vm3, %v416_v35 }
 0x120   : > { %7070 = vmatprep.mubr.msk.f32.mxu0 %vm454_vm3, %v417_v36 }
 0x123   : > { %7071 = vmatmul.mubr.msk.f32.gmra.mrb[84].mxu0 %vm454_vm3, %v418_v37 }
 0x124   : > { %7073 = vmatprep.mubr.msk.f32.mxu0 %vm454_vm3, %v419_v38 }
 0x127   : > { %7074 = vmatmul.mubr.msk.f32.gmra.mrb[86].mxu0 %vm454_vm3, %v420_v39 }
 0x128   : > { %7076 = vmatprep.mubr.msk.f32.mxu0 %vm454_vm3, %v421_v40 }
 0x12b   : > { %7077 = vmatmul.mubr.msk.f32.gmra.mrb[88].mxu0 %vm454_vm3, %v422_v41 }
 0x12c   : > { %7079 = vmatprep.mubr.msk.f32.mxu0 %vm454_vm3, %v423_v42 }
 0x12f   : > { %7080 = vmatmul.mubr.msk.f32.gmra.mrb[90].mxu0 %vm454_vm3, %v424_v43 }
 0x130   : > { %7082 = vmatprep.mubr.msk.f32.mxu0 %vm454_vm3, %v425_v44 }
 0x133   : > { %7083 = vmatmul.mubr.msk.f32.gmra.mrb[92].mxu0 %vm454_vm3, %v426_v45 }
 0x134   : > { %7085 = vmatprep.mubr.msk.f32.mxu0 %vm454_vm3, %v427_v46 }
 0x137   : > { %7086 = vmatmul.mubr.msk.f32.gmra.mrb[94].mxu0 %vm454_vm3, %v428_v47 }
 0x138   : > { %7088 = vmatprep.mubr.msk.f32.mxu0 %vm454_vm3, %v429_v48 }
 0x13b   : > { %7089 = vmatmul.mubr.msk.f32.gmra.mrb[96].mxu0 %vm454_vm3, %v430_v49 }
 0x13c   : > { %7091 = vmatprep.mubr.msk.f32.mxu0 %vm454_vm3, %v431_v50 }
 0x13f   : > { %7092 = vmatmul.mubr.msk.f32.gmra.mrb[98].mxu0 %vm454_vm3, %v432_v51 }
 0x140   : > { %7094 = vmatprep.mubr.msk.f32.mxu0 %vm454_vm3, %v433_v52 }
 0x143   : > { %7095 = vmatmul.mubr.msk.f32.gmra.mrb[100].mxu0 %vm454_vm3, %v434_v53 }
 0x144   : > { %7097 = vmatprep.mubr.msk.f32.mxu0 %vm454_vm3, %v435_v54 }
 0x147   : > { %7098 = vmatmul.mubr.msk.f32.gmra.mrb[102].mxu0 %vm454_vm3, %v436_v55 }
 0x148   : > { %7100 = vmatprep.mubr.msk.f32.mxu0 %vm454_vm3, %v437_v56 }
 0x14b   : > { %7101 = vmatmul.mubr.msk.f32.gmra.mrb[104].mxu0 %vm454_vm3, %v438_v57 }
 0x14c   : > { %7103 = vmatprep.mubr.msk.f32.mxu0 %vm454_vm3, %v439_v58 }
 0x14e   : > { %v6946_v62 = vpop.f32.mrb[0].mxu0 }
 0x14f   : > { %v867_v63 = vadd.f32 %v6946_v62, %v7951_v59  ;;  %v861_v0 = vpop.f32.mrb[1].mxu0  ;;  %7104 = vmatmul.mubr.msk.f32.gmra.mrb[106].mxu0 %vm454_vm3, %v440_v60 }
 0x150   : > { %v862_v1 = vadd.f32 %v7951_v59, %v861_v0  ;;  %7106 = vmatprep.mubr.msk.f32.mxu0 %vm454_vm3, %v441_v61 }
 0x151   : > { %v1421_v3 = vmax.f32 %v867_v63, 0.0 }
 0x152   : > { %v1420_v6 = vmax.f32 %v862_v1, 0.0  ;;  %v6949_v7 = vpop.f32.mrb[2].mxu0 }
 0x153   : > { %1534 = vst.msk [vmem:[#allocation2 + $0x8] sm:$0xff] %vm1532_vm4, %v1421_v3  ;;  %v877_v8 = vadd.f32 %v6949_v7, %v7951_v59  ;;  %v871_v9 = vpop.f32.mrb[3].mxu0  ;;  %7107 = vmatmul.mubr.msk.f32.gmra.mrb[108].mxu0 %vm454_vm3, %v442_v2 }
 0x154   : > { %1533 = vst.msk [vmem:[#allocation2] sm:$0xff] %vm1532_vm4, %v1420_v6  ;;  %v872_v10 = vadd.f32 %v7951_v59, %v871_v9  ;;  %7109 = vmatprep.mubr.msk.f32.mxu0 %vm454_vm3, %v443_v5 }
 0x155   : > { %v1423_v12 = vmax.f32 %v877_v8, 0.0 }
 0x156   : > { %v1422_v13 = vmax.f32 %v872_v10, 0.0  ;;  %v6952_v14 = vpop.f32.mrb[4].mxu0 }
 0x157   : > { %1536 = vst.msk [vmem:[#allocation2 + $0x18] sm:$0xff] %vm1532_vm4, %v1423_v12  ;;  %v887_v15 = vadd.f32 %v6952_v14, %v7951_v59  ;;  %v881_v16 = vpop.f32.mrb[5].mxu0  ;;  %7110 = vmatmul.mubr.msk.f32.gmra.mrb[110].mxu0 %vm454_vm3, %v444_v11 }
 0x158   : > { %1535 = vst.msk [vmem:[#allocation2 + $0x10] sm:$0xff] %vm1532_vm4, %v1422_v13  ;;  %v882_v17 = vadd.f32 %v7951_v59, %v881_v16  ;;  %v7240_v16 = vld [vmem:[%s9418_s3 + $0x40] sm:$0xff]  }
 0x159   : > { %v1425_v18 = vmax.f32 %v887_v15, 0.0  ;;  %6696 = vmatprep.subr.bf16.mxu1 %v7240_v16 }
 0x15a   : > { %v1424_v19 = vmax.f32 %v882_v17, 0.0  ;;  %v6955_v20 = vpop.f32.mrb[6].mxu0  ;;  %v2117_v17 = vld [vmem:[#allocation4 + $0x8] sm:$0xff] }
 0x15b   : > { %1538 = vst.msk [vmem:[#allocation2 + $0x28] sm:$0xff] %vm1532_vm4, %v1425_v18  ;;  %v897_v21 = vadd.f32 %v6955_v20, %v7951_v59  ;;  %v891_v22 = vpop.f32.mrb[7].mxu0  ;;  %v1645_v24 = vld [vmem:[#allocation2] ss:$2 sm:$0xff]  ;;  %v1757_v25 = vld [vmem:[#allocation2 + $0x1] ss:$2 sm:$0xff] }
 0x15c   : > { %1537 = vst.msk [vmem:[#allocation2 + $0x20] sm:$0xff] %vm1532_vm4, %v1424_v19  ;;  %v892_v23 = vadd.f32 %v7951_v59, %v891_v22  ;;  %v1868_v33 = vmax.f32 %v1645_v24, %v1757_v25  ;;  %v2116_v18 = vld [vmem:[#allocation4] sm:$0xff] }
 0x15d   : > { %v1427_v26 = vmax.f32 %v897_v21, 0.0  ;;  %v7241_v21 = vld [vmem:[%s9418_s3] sm:$0xff]   ;;  %v2148_v22 = vpack.c.bf16 %v2117_v17, %v2116_v18 }
 0x15e   : > { %v1426_v27 = vmax.f32 %v892_v23, 0.0  ;;  %v6958_v28 = vpop.f32.mrb[8].mxu0  ;;  %6697 = vmatpush3.bf16.msra.mxu1 %v7241_v21  ;;  %v7248_v21 = vld [vmem:[%s9418_s3 + $0x60] sm:$0xff]  }
 0x15f   : > { %v1647_v29 = vld [vmem:[#allocation2 + $0x10] ss:$2 sm:$0xff]  ;;  %v1759_v30 = vld [vmem:[#allocation2 + $0x11] ss:$2 sm:$0xff]  ;;  %1540 = vst.msk [vmem:[#allocation2 + $0x38] sm:$0xff] %vm1532_vm4, %v1427_v26  ;;  %v907_v31 = vadd.f32 %v6958_v28, %v7951_v59  ;;  %v901_v32 = vpop.f32.mrb[9].mxu0 }
 0x160   : > { %v1869_v34 = vmax.f32 %v1647_v29, %v1759_v30  ;;  %1539 = vst.msk [vmem:[#allocation2 + $0x30] sm:$0xff] %vm1532_vm4, %v1426_v27  ;;  %v902_v35 = vadd.f32 %v7951_v59, %v901_v32  ;;  %v2245_v30 = vpop.permute.xlu0 %2244  ;;  %2164 = vst.msk [vmem:[#allocation5] sm:$0xff] %vm1532_vm4, %v2148_v22 }
 0x161   : > { %v1429_v36 = vmax.f32 %v907_v31, 0.0  ;;  %2293 = vst.msk [vmem:[#allocation5] sm:$0xff] %vm2292_vm5, %v2245_v30 }
 0x162   : > { %v1924_v37 = vpack.c.bf16 %v1869_v34, %v1868_v33  ;;  %v1428_v38 = vmax.f32 %v902_v35, 0.0  ;;  %v6961_v39 = vpop.f32.mrb[10].mxu0  ;;  %v7242_v33 = vld [vmem:[%s9418_s3 + $0x48] sm:$0xff]  }
 0x163   : > { %1542 = vst.msk [vmem:[#allocation2 + $0x48] sm:$0xff] %vm1532_vm4, %v1429_v36  ;;  %v917_v40 = vadd.f32 %v6961_v39, %v7951_v59  ;;  %v911_v41 = vpop.f32.mrb[11].mxu0  ;;  %v1649_v43 = vld [vmem:[#allocation2 + $0x20] ss:$2 sm:$0xff]  ;;  %v1761_v44 = vld [vmem:[#allocation2 + $0x21] ss:$2 sm:$0xff]  ;;  %6698 = vmatprep.subr.bf16.mxu1 %v7242_v33 }
 0x164   : > { %1952 = vst.msk [vmem:[#allocation3] sm:$0xff] %vm1532_vm4, %v1924_v37  ;;  %1541 = vst.msk [vmem:[#allocation2 + $0x40] sm:$0xff] %vm1532_vm4, %v1428_v38  ;;  %v912_v42 = vadd.f32 %v7951_v59, %v911_v41  ;;  %v1870_v52 = vmax.f32 %v1649_v43, %v1761_v44 }
 0x165   : > { %v1431_v45 = vmax.f32 %v917_v40, 0.0  ;;  %v7243_v40 = vld [vmem:[%s9418_s3 + $0x8] sm:$0xff]  }
 0x166   : > { %v1430_v46 = vmax.f32 %v912_v42, 0.0  ;;  %v6964_v47 = vpop.f32.mrb[12].mxu0  ;;  %6699 = vmatpush3.bf16.msra.mxu1 %v7243_v40 }
 0x167   : > { %v1651_v48 = vld [vmem:[#allocation2 + $0x30] ss:$2 sm:$0xff]  ;;  %v1763_v49 = vld [vmem:[#allocation2 + $0x31] ss:$2 sm:$0xff]  ;;  %1544 = vst.msk [vmem:[#allocation2 + $0x58] sm:$0xff] %vm1532_vm4, %v1431_v45  ;;  %v927_v50 = vadd.f32 %v6964_v47, %v7951_v59  ;;  %v921_v51 = vpop.f32.mrb[13].mxu0 }
 0x168   : > { %v1871_v53 = vmax.f32 %v1651_v48, %v1763_v49  ;;  %1543 = vst.msk [vmem:[#allocation2 + $0x50] sm:$0xff] %vm1532_vm4, %v1430_v46  ;;  %v922_v54 = vadd.f32 %v7951_v59, %v921_v51  ;;  %v7244_v48 = vld [vmem:[%s9418_s3 + $0x50] sm:$0xff]  }
 0x169   : > { %v1433_v55 = vmax.f32 %v927_v50, 0.0  ;;  %v7245_v51 = vld [vmem:[%s9418_s3 + $0x10] sm:$0xff]   ;;  %6700 = vmatprep.subr.bf16.mxu1 %v7244_v48 }
 0x16a   : > { %v1925_v56 = vpack.c.bf16 %v1871_v53, %v1870_v52  ;;  %v1432_v57 = vmax.f32 %v922_v54, 0.0  ;;  %v6967_v58 = vpop.f32.mrb[14].mxu0  ;;  %6701 = vmatpush3.bf16.msra.mxu1 %v7245_v51 }
 0x16b   : > { %1546 = vst.msk [vmem:[#allocation2 + $0x68] sm:$0xff] %vm1532_vm4, %v1433_v55  ;;  %v937_v60 = vadd.f32 %v6967_v58, %v7951_v59  ;;  %v931_v61 = vpop.f32.mrb[15].mxu0  ;;  %v1653_v63 = vld [vmem:[#allocation2 + $0x40] ss:$2 sm:$0xff]  ;;  %v1765_v0 = vld [vmem:[#allocation2 + $0x41] ss:$2 sm:$0xff] }
 0x16c   : > { %1953 = vst.msk [vmem:[#allocation3 + $0x8] sm:$0xff] %vm1532_vm4, %v1925_v56  ;;  %1545 = vst.msk [vmem:[#allocation2 + $0x60] sm:$0xff] %vm1532_vm4, %v1432_v57  ;;  %v932_v62 = vadd.f32 %v7951_v59, %v931_v61  ;;  %v1872_v9 = vmax.f32 %v1653_v63, %v1765_v0  ;;  %v2017_v24 = vld [vmem:[#allocation3] sm:$0x7f]  ;;  %v7246_v0 = vld [vmem:[%s9418_s3 + $0x58] sm:$0xff]  }
 0x16d   : > { %v1435_v1 = vmax.f32 %v937_v60, 0.0  ;;  %v2309_v58 = vld [vmem:[#allocation4 + $0x2] sm:$0xff]  ;;  %6702 = vmatprep.subr.bf16.mxu1 %v7246_v0 }
 0x16e   : > { %v1434_v2 = vmax.f32 %v932_v62, 0.0  ;;  %v6970_v3 = vpop.f32.mrb[16].mxu0 }
 0x16f   : > { %v1655_v5 = vld [vmem:[#allocation2 + $0x50] ss:$2 sm:$0xff]  ;;  %v1767_v6 = vld [vmem:[#allocation2 + $0x51] ss:$2 sm:$0xff]  ;;  %1548 = vst.msk [vmem:[#allocation2 + $0x78] sm:$0xff] %vm1532_vm4, %v1435_v1  ;;  %v947_v7 = vadd.f32 %v6970_v3, %v7951_v59  ;;  %v941_v8 = vpop.f32.mrb[17].mxu0 }
 0x170   : > { %v1873_v10 = vmax.f32 %v1655_v5, %v1767_v6  ;;  %1547 = vst.msk [vmem:[#allocation2 + $0x70] sm:$0xff] %vm1532_vm4, %v1434_v2  ;;  %v942_v11 = vadd.f32 %v7951_v59, %v941_v8 }
 0x171   : > { %v1437_v12 = vmax.f32 %v947_v7, 0.0 }
 0x172   : > { %v1926_v13 = vpack.c.bf16 %v1873_v10, %v1872_v9  ;;  %v1436_v14 = vmax.f32 %v942_v11, 0.0  ;;  %v6973_v15 = vpop.f32.mrb[18].mxu0 }
 0x173   : > { %1550 = vst.msk [vmem:[#allocation2 + $0x88] sm:$0xff] %vm1532_vm4, %v1437_v12  ;;  %v957_v19 = vadd.f32 %v6973_v15, %v7951_v59  ;;  %v951_v20 = vpop.f32.mrb[19].mxu0  ;;  %v2018_v25 = vld [vmem:[#allocation3 + $0x8] sm:$0x7f]  ;;  %v7247_v15 = vld [vmem:[%s9418_s3 + $0x18] sm:$0xff]  }
 0x174   : > { %1954 = vst.msk [vmem:[#allocation3 + $0x10] sm:$0xff] %vm1532_vm4, %v1926_v13  ;;  %1549 = vst.msk [vmem:[#allocation2 + $0x80] sm:$0xff] %vm1532_vm4, %v1436_v14  ;;  %v952_v23 = vadd.f32 %v7951_v59, %v951_v20  ;;  %v1657_v26 = vld [vmem:[#allocation2 + $0x60] ss:$2 sm:$0xff]  ;;  %v1769_v27 = vld [vmem:[#allocation2 + $0x61] ss:$2 sm:$0xff]  ;;  %v2019_v29 = vmax.bf16 %v2018_v25, %v2017_v24  ;;  %6703 = vmatpush3.bf16.msra.mxu1 %v7247_v15 }
 0x175   : > { %v1439_v28 = vmax.f32 %v957_v19, 0.0  ;;  %v1874_v41 = vmax.f32 %v1657_v26, %v1769_v27  ;;  %v8049_v19 = vpop.permute.xlu0 %2849  ;;  %v7249_v24 = vld [vmem:[%s9418_s3 + $0x20] sm:$0xff]   ;;  %6704 = vmatprep.subr.bf16.mxu1 %v7248_v21 }
 0x176   : > { %v1438_v31 = vmax.f32 %v952_v23, 0.0  ;;  %v6976_v32 = vpop.f32.mrb[20].mxu0  ;;  %v2020_v38 = vunpack.c.l.bf16 %v2019_v29  ;;  %v2021_v39 = vunpack.c.h.bf16 %v2019_v29 }
 0x177   : > { %v1659_v34 = vld [vmem:[#allocation2 + $0x70] ss:$2 sm:$0xff]  ;;  %v1771_v35 = vld [vmem:[#allocation2 + $0x71] ss:$2 sm:$0xff]  ;;  %1552 = vst.msk [vmem:[#allocation2 + $0x98] sm:$0xff] %vm1532_vm4, %v1439_v28  ;;  %v967_v36 = vadd.f32 %v6976_v32, %v7951_v59  ;;  %v961_v37 = vpop.f32.mrb[21].mxu0 }
 0x178   : > { %v1875_v42 = vmax.f32 %v1659_v34, %v1771_v35  ;;  %1551 = vst.msk [vmem:[#allocation2 + $0x90] sm:$0xff] %vm1532_vm4, %v1438_v31  ;;  %v962_v43 = vadd.f32 %v7951_v59, %v961_v37  ;;  %2022 = vst.msk [vmem:[#allocation4 + $0x11] sm:$0xff] %vm1532_vm4, %v2020_v38  ;;  %6705 = vmatpush3.bf16.msra.mxu1 %v7249_v24 }
 0x179   : > { %v1441_v44 = vmax.f32 %v967_v36, 0.0  ;;  %2024 = vst.msk [vmem:[#allocation4 + $0x19] sm:$0x3f] %vm2023_vm6, %v2021_v39  ;;  %v8069_v48 = vpop.permute.xlu0 %2977 }
 0x17a   : > { %v1927_v45 = vpack.c.bf16 %v1875_v42, %v1874_v41  ;;  %v1440_v46 = vmax.f32 %v962_v43, 0.0  ;;  %v6979_v47 = vpop.f32.mrb[22].mxu0 }
 0x17b   : > { %1554 = vst.msk [vmem:[#allocation2 + $0xa8] sm:$0xff] %vm1532_vm4, %v1441_v44  ;;  %v977_v49 = vadd.f32 %v6979_v47, %v7951_v59  ;;  %v971_v50 = vpop.f32.mrb[23].mxu0  ;;  %v1661_v53 = vld [vmem:[#allocation2 + $0x80] ss:$2 sm:$0xff]  ;;  %v1773_v54 = vld [vmem:[#allocation2 + $0x81] ss:$2 sm:$0xff] }
 0x17c   : > { %1955 = vst.msk [vmem:[#allocation3 + $0x18] sm:$0xff] %vm1532_vm4, %v1927_v45  ;;  %1553 = vst.msk [vmem:[#allocation2 + $0xa0] sm:$0xff] %vm1532_vm4, %v1440_v46  ;;  %v972_v52 = vadd.f32 %v7951_v59, %v971_v50  ;;  %v1876_v1 = vmax.f32 %v1661_v53, %v1773_v54  ;;  %v2025_v18 = vld [vmem:[#allocation3 + $0x10] sm:$0x7f] }
 0x17d   : > { %v1443_v55 = vmax.f32 %v977_v49, 0.0 }
 0x17e   : > { %v1442_v56 = vmax.f32 %v972_v52, 0.0  ;;  %v6982_v57 = vpop.f32.mrb[24].mxu0  ;;  %v7250_v52 = vld [vmem:[%s9418_s3 + $0x68] sm:$0xff]  }
 0x17f   : > { %v1663_v60 = vld [vmem:[#allocation2 + $0x90] ss:$2 sm:$0xff]  ;;  %v1775_v61 = vld [vmem:[#allocation2 + $0x91] ss:$2 sm:$0xff]  ;;  %1556 = vst.msk [vmem:[#allocation2 + $0xb8] sm:$0xff] %vm1532_vm4, %v1443_v55  ;;  %v987_v62 = vadd.f32 %v6982_v57, %v7951_v59  ;;  %v981_v63 = vpop.f32.mrb[25].mxu0  ;;  %6706 = vmatprep.subr.bf16.mxu1 %v7250_v52 }
 0x180   : > { %v1877_v2 = vmax.f32 %v1663_v60, %v1775_v61  ;;  %1555 = vst.msk [vmem:[#allocation2 + $0xb0] sm:$0xff] %vm1532_vm4, %v1442_v56  ;;  %v982_v3 = vadd.f32 %v7951_v59, %v981_v63  ;;  %v2310_v5 = vld [vmem:[#allocation4 + $0xa] sm:$0xff]  ;;  %v2439_v9 = vld [vmem:[#allocation4 + $0x18] sm:$0xff] }
 0x181   : > { %v1445_v6 = vmax.f32 %v987_v62, 0.0  ;;  %v2341_v7 = vpack.c.bf16 %v2310_v5, %v2309_v58  ;;  %v2438_v8 = vld [vmem:[#allocation4 + $0x10] sm:$0xff]  ;;  %v2119_v14 = vld [vmem:[#allocation4 + $0x18] sm:$0xff]  ;;  %v7251_v55 = vld [vmem:[%s9418_s3 + $0x28] sm:$0xff]  }
 0x182   : > { %v1928_v10 = vpack.c.bf16 %v1877_v2, %v1876_v1  ;;  %v1444_v11 = vmax.f32 %v982_v3, 0.0  ;;  %v6985_v12 = vpop.f32.mrb[26].mxu0  ;;  %v2118_v13 = vld [vmem:[#allocation4 + $0x10] sm:$0xff]  ;;  %v2568_v25 = vld [vmem:[#allocation4 + $0x19] sm:$0xff]  ;;  %v2470_v29 = vpack.c.bf16 %v2439_v9, %v2438_v8  ;;  %6707 = vmatpush3.bf16.msra.mxu1 %v7251_v55  ;;  %v2724_v9 = vpop.permute.xlu0 %2723 }
 0x183   : > { %1558 = vst.msk [vmem:[#allocation2 + $0xc8] sm:$0xff] %vm1532_vm4, %v1445_v6  ;;  %v997_v16 = vadd.f32 %v6985_v12, %v7951_v59  ;;  %2373 = vrot.lane.b32.xlu1 %v2341_v7, %s7470_s30  ;;  %v991_v17 = vpop.f32.mrb[27].mxu0  ;;  %v2149_v20 = vpack.c.bf16 %v2119_v14, %v2118_v13  ;;  %v2026_v23 = vld [vmem:[#allocation3 + $0x18] sm:$0x7f]  ;;  %v1665_v26 = vld [vmem:[#allocation2 + $0xa0] ss:$2 sm:$0xff] }
 0x184   : > { %1956 = vst.msk [vmem:[#allocation3 + $0x20] sm:$0xff] %vm1532_vm4, %v1928_v10  ;;  %1557 = vst.msk [vmem:[#allocation2 + $0xc0] sm:$0xff] %vm1532_vm4, %v1444_v11  ;;  %v992_v22 = vadd.f32 %v7951_v59, %v991_v17  ;;  %v1777_v27 = vld [vmem:[#allocation2 + $0xa1] ss:$2 sm:$0xff]  ;;  %v2027_v30 = vmax.bf16 %v2026_v23, %v2025_v18  ;;  %v2567_v31 = vld [vmem:[#allocation4 + $0x11] sm:$0xff] }
 0x185   : > { %v1447_v28 = vmax.f32 %v997_v16, 0.0  ;;  %2165 = vst.msk [vmem:[#allocation5 + $0x18] sm:$0xff] %vm1532_vm4, %v2149_v20  ;;  %v2182_v34 = vld [vmem:[#allocation4 + $0x11] sm:$0xff]  ;;  %v2183_v35 = vld [vmem:[#allocation4 + $0x19] sm:$0xff]  ;;  %v2599_v36 = vpack.c.bf16 %v2568_v25, %v2567_v31  ;;  %v1878_v43 = vmax.f32 %v1665_v26, %v1777_v27 }
 0x186   : > { %v1446_v32 = vmax.f32 %v992_v22, 0.0  ;;  %v6988_v33 = vpop.f32.mrb[28].mxu0  ;;  %v2028_v41 = vunpack.c.l.bf16 %v2027_v30  ;;  %v2029_v42 = vunpack.c.h.bf16 %v2027_v30  ;;  %v2213_v47 = vpack.c.bf16 %v2183_v35, %v2182_v34  ;;  %v2595_v57 = vld [vmem:[#allocation4 + $0xf1] sm:$0xff]  ;;  %v2596_v58 = vld [vmem:[#allocation4 + $0xf9] sm:$0xff] }
 0x187   : > { %v1667_v37 = vld [vmem:[#allocation2 + $0xb0] ss:$2 sm:$0xff]  ;;  %v1779_v38 = vld [vmem:[#allocation2 + $0xb1] ss:$2 sm:$0xff]  ;;  %1560 = vst.msk [vmem:[#allocation2 + $0xd8] sm:$0xff] %vm1532_vm4, %v1447_v28  ;;  %v1007_v39 = vadd.f32 %v6988_v33, %v7951_v59  ;;  %2502 = vrot.lane.b32.xlu1 %v2470_v29, %s7471_s14  ;;  %v1001_v40 = vpop.f32.mrb[29].mxu0  ;;  %v2613_v63 = vpack.c.bf16 %v2596_v58, %v2595_v57 }
 0x188   : > { %v1879_v44 = vmax.f32 %v1667_v37, %v1779_v38  ;;  %1559 = vst.msk [vmem:[#allocation2 + $0xd0] sm:$0xff] %vm1532_vm4, %v1446_v32  ;;  %v1002_v45 = vadd.f32 %v7951_v59, %v1001_v40  ;;  %2615 = vst.msk [vmem:[#allocation5 + $0x8] sm:$0xff] %vm1532_vm4, %v2599_v36  ;;  %v2631_v2 = vld [vmem:[#allocation4 + $0x12] sm:$0xff] }
 0x189   : > { %v1449_v46 = vmax.f32 %v1007_v39, 0.0  ;;  %2030 = vst.msk [vmem:[#allocation4 + $0x21] sm:$0xff] %vm1532_vm4, %v2028_v41  ;;  %v7252_v3 = vld [vmem:[%s9418_s3 + $0x70] sm:$0xff]   ;;  %2629 = vst.msk [vmem:[#allocation5 + $0x158] sm:$0xff] %vm1532_vm4, %v2613_v63  ;;  %v7254_v26 = vld [vmem:[%s9418_s3 + $0x78] sm:$0xff]  }
 0x18a   : > { %2031 = vst.msk [vmem:[#allocation4 + $0x29] sm:$0x3f] %vm2023_vm6, %v2029_v42  ;;  %v1929_v49 = vpack.c.bf16 %v1879_v44, %v1878_v43  ;;  %v1448_v50 = vmax.f32 %v1002_v45, 0.0  ;;  %v6991_v51 = vpop.f32.mrb[30].mxu0  ;;  %v7253_v10 = vld [vmem:[%s9418_s3 + $0x30] sm:$0xff]   ;;  %6708 = vmatprep.subr.bf16.mxu1 %v7252_v3  ;;  %v7255_v32 = vld [vmem:[%s9418_s3 + $0x38] sm:$0xff]  }
 0x18b   : > { %1562 = vst.msk [vmem:[#allocation2 + $0xe8] sm:$0xff] %vm1532_vm4, %v1449_v46  ;;  %v1017_v53 = vadd.f32 %v6991_v51, %v7951_v59  ;;  %2246 = vrot.lane.b32.xlu1 %v2213_v47, %s7469_s13  ;;  %v1011_v54 = vpop.f32.mrb[31].mxu0  ;;  %v1669_v60 = vld [vmem:[#allocation2 + $0xc0] ss:$2 sm:$0xff]  ;;  %v1781_v61 = vld [vmem:[#allocation2 + $0xc1] ss:$2 sm:$0xff]  ;;  %6709 = vmatpush3.bf16.msra.mxu1 %v7253_v10 }
 0x18c   : > { %1957 = vst.msk [vmem:[#allocation3 + $0x28] sm:$0xff] %vm1532_vm4, %v1929_v49  ;;  %1561 = vst.msk [vmem:[#allocation2 + $0xe0] sm:$0xff] %vm1532_vm4, %v1448_v50  ;;  %v1012_v56 = vadd.f32 %v7951_v59, %v1011_v54  ;;  %v1880_v11 = vmax.f32 %v1669_v60, %v1781_v61  ;;  %v2032_v31 = vld [vmem:[#allocation3 + $0x20] sm:$0x7f]  ;;  %6710 = vmatprep.subr.bf16.mxu1 %v7254_v26 }
 0x18d   : > { %v1451_v62 = vmax.f32 %v1017_v53, 0.0  ;;  %2757 = vst.msk [vmem:[#allocation5 + $0x158] sm:$0xff] %vm2292_vm5, %v2724_v9 }
 0x18e   : > { %v1450_v0 = vmax.f32 %v1012_v56, 0.0  ;;  %v6994_v1 = vpop.f32.mrb[32].mxu0 }
 0x18f   : > { %v1671_v5 = vld [vmem:[#allocation2 + $0xd0] ss:$2 sm:$0xff]  ;;  %v1783_v6 = vld [vmem:[#allocation2 + $0xd1] ss:$2 sm:$0xff]  ;;  %1564 = vst.msk [vmem:[#allocation2 + $0xf8] sm:$0xff] %vm1532_vm4, %v1451_v62  ;;  %v1027_v7 = vadd.f32 %v6994_v1, %v7951_v59  ;;  %v1021_v8 = vpop.f32.mrb[33].mxu0  ;;  %6711 = vmatpush3.bf16.msra.mxu1 %v7255_v32 }
 0x190   : > { %v1881_v12 = vmax.f32 %v1671_v5, %v1783_v6  ;;  %1563 = vst.msk [vmem:[#allocation2 + $0xf0] sm:$0xff] %vm1532_vm4, %v1450_v0  ;;  %v1022_v13 = vadd.f32 %v7951_v59, %v1021_v8  ;;  %v2632_v14 = vld [vmem:[#allocation4 + $0x1a] sm:$0xff] }
 0x191   : > { %v2759_v15 = vld [vmem:[#allocation4 + $0x20] sm:$0xff]  ;;  %v2760_v16 = vld [vmem:[#allocation4 + $0x28] sm:$0xff]  ;;  %v1453_v17 = vmax.f32 %v1027_v7, 0.0  ;;  %v2663_v18 = vpack.c.bf16 %v2632_v14, %v2631_v2 }
 0x192   : > { %v2791_v20 = vpack.c.bf16 %v2760_v16, %v2759_v15  ;;  %v2887_v21 = vld [vmem:[#allocation4 + $0x21] sm:$0xff]  ;;  %v2888_v22 = vld [vmem:[#allocation4 + $0x29] sm:$0xff]  ;;  %v1930_v23 = vpack.c.bf16 %v1881_v12, %v1880_v11  ;;  %v1452_v24 = vmax.f32 %v1022_v13, 0.0  ;;  %v6997_v25 = vpop.f32.mrb[34].mxu0 }
 0x193   : > { %v2120_v27 = vld [vmem:[#allocation4 + $0x20] sm:$0xff]  ;;  %v2121_v28 = vld [vmem:[#allocation4 + $0x28] sm:$0xff]  ;;  %1566 = vst.msk [vmem:[#allocation2 + $0x108] sm:$0xff] %vm1532_vm4, %v1453_v17  ;;  %v1037_v29 = vadd.f32 %v6997_v25, %v7951_v59  ;;  %2695 = vrot.lane.b32.xlu0 %v2663_v18, %s7469_s13  ;;  %v1031_v30 = vpop.f32.mrb[35].mxu0  ;;  %v2919_v41 = vpack.c.bf16 %v2888_v22, %v2887_v21 }
 0x194   : > { %2823 = vrot.lane.b32.xlu1 %v2791_v20, %s7470_s30  ;;  %v2150_v33 = vpack.c.bf16 %v2121_v28, %v2120_v27  ;;  %1958 = vst.msk [vmem:[#allocation3 + $0x30] sm:$0xff] %vm1532_vm4, %v1930_v23  ;;  %1565 = vst.msk [vmem:[#allocation2 + $0x100] sm:$0xff] %vm1532_vm4, %v1452_v24  ;;  %v1032_v34 = vadd.f32 %v7951_v59, %v1031_v30  ;;  %v2033_v35 = vld [vmem:[#allocation3 + $0x28] sm:$0x7f] }
 0x195   : > { %v2569_v36 = vld [vmem:[#allocation4 + $0x21] sm:$0xff]  ;;  %v2570_v37 = vld [vmem:[#allocation4 + $0x29] sm:$0xff]  ;;  %v1455_v40 = vmax.f32 %v1037_v29, 0.0  ;;  %v2034_v42 = vmax.bf16 %v2033_v35, %v2032_v31 }
 0x196   : > { %v1673_v38 = vld [vmem:[#allocation2 + $0xe0] ss:$2 sm:$0xff]  ;;  %v1785_v39 = vld [vmem:[#allocation2 + $0xe1] ss:$2 sm:$0xff]  ;;  %2166 = vst.msk [vmem:[#allocation5 + $0x30] sm:$0xff] %vm1532_vm4, %v2150_v33  ;;  %v2600_v43 = vpack.c.bf16 %v2570_v37, %v2569_v36  ;;  %v1454_v44 = vmax.f32 %v1032_v34, 0.0 }
 0x197   : > { %v7000_v45 = vpop.f32.mrb[36].mxu0  ;;  %v1675_v46 = vld [vmem:[#allocation2 + $0xf0] ss:$2 sm:$0xff]  ;;  %v1787_v47 = vld [vmem:[#allocation2 + $0xf1] ss:$2 sm:$0xff]  ;;  %1568 = vst.msk [vmem:[#allocation2 + $0x118] sm:$0xff] %vm1532_vm4, %v1455_v40  ;;  %2951 = vrot.lane.b32.xlu0 %v2919_v41, %s7471_s14  ;;  %v2035_v51 = vunpack.c.l.bf16 %v2034_v42  ;;  %v2036_v52 = vunpack.c.h.bf16 %v2034_v42  ;;  %v1882_v53 = vmax.f32 %v1673_v38, %v1785_v39 }
 0x198   : > { %v1047_v49 = vadd.f32 %v7000_v45, %v7951_v59  ;;  %2375 = vrot.lane.b32.xlu1 %v2663_v18, %s7470_s30  ;;  %v1041_v50 = vpop.f32.mrb[37].mxu0  ;;  %2616 = vst.msk [vmem:[#allocation5 + $0x20] sm:$0xff] %vm1532_vm4, %v2600_v43  ;;  %v1883_v54 = vmax.f32 %v1675_v46, %v1787_v47  ;;  %1567 = vst.msk [vmem:[#allocation2 + $0x110] sm:$0xff] %vm1532_vm4, %v1454_v44  ;;  %v2633_v13 = vld [vmem:[#allocation4 + $0x22] sm:$0xff] }
 0x199   : > { %v1042_v55 = vadd.f32 %v7951_v59, %v1041_v50  ;;  %2037 = vst.msk [vmem:[#allocation4 + $0x31] sm:$0xff] %vm1532_vm4, %v2035_v51  ;;  %v3015_v30 = vld [vmem:[#allocation4 + $0x22] sm:$0xff] }
 0x19a   : > { %v1457_v56 = vmax.f32 %v1047_v49, 0.0  ;;  %2038 = vst.msk [vmem:[#allocation4 + $0x39] sm:$0x3f] %vm2023_vm6, %v2036_v52  ;;  %v1931_v57 = vpack.c.bf16 %v1883_v54, %v1882_v53  ;;  %v7003_v60 = vpop.f32.mrb[38].mxu0 }
 0x19b   : > { %v1456_v58 = vmax.f32 %v1042_v55, 0.0  ;;  %v1057_v61 = vadd.f32 %v7003_v60, %v7951_v59  ;;  %v1051_v62 = vpop.f32.mrb[39].mxu0  ;;  %v1677_v0 = vld [vmem:[#allocation2 + $0x100] ss:$2 sm:$0xff]  ;;  %v1789_v1 = vld [vmem:[#allocation2 + $0x101] ss:$2 sm:$0xff] }
 0x19c   : > { %1570 = vst.msk [vmem:[#allocation2 + $0x128] sm:$0xff] %vm1532_vm4, %v1457_v56  ;;  %2504 = vrot.lane.b32.xlu1 %v2791_v20, %s7471_s14  ;;  %1959 = vst.msk [vmem:[#allocation3 + $0x38] sm:$0xff] %vm1532_vm4, %v1931_v57  ;;  %v1052_v63 = vadd.f32 %v7951_v59, %v1051_v62  ;;  %v1884_v10 = vmax.f32 %v1677_v0, %v1789_v1  ;;  %v2039_v32 = vld [vmem:[#allocation3 + $0x30] sm:$0x7f] }
 0x19d   : > { %1569 = vst.msk [vmem:[#allocation2 + $0x120] sm:$0xff] %vm1532_vm4, %v1456_v58  ;;  %v1459_v2 = vmax.f32 %v1057_v61, 0.0 }
 0x19e   : > { %v1458_v3 = vmax.f32 %v1052_v63, 0.0  ;;  %v7006_v5 = vpop.f32.mrb[40].mxu0 }
 0x19f   : > { %v1679_v6 = vld [vmem:[#allocation2 + $0x110] ss:$2 sm:$0xff]  ;;  %v1791_v7 = vld [vmem:[#allocation2 + $0x111] ss:$2 sm:$0xff]  ;;  %1572 = vst.msk [vmem:[#allocation2 + $0x138] sm:$0xff] %vm1532_vm4, %v1459_v2  ;;  %v1067_v8 = vadd.f32 %v7006_v5, %v7951_v59  ;;  %v1061_v9 = vpop.f32.mrb[41].mxu0 }
 0x1a0   : > { %2248 = vrot.lane.b32.xlu1 %v2919_v41, %s7469_s13  ;;  %v1885_v11 = vmax.f32 %v1679_v6, %v1791_v7  ;;  %1571 = vst.msk [vmem:[#allocation2 + $0x130] sm:$0xff] %vm1532_vm4, %v1458_v3  ;;  %v1062_v12 = vadd.f32 %v7951_v59, %v1061_v9  ;;  %v2634_v14 = vld [vmem:[#allocation4 + $0x2a] sm:$0xff] }
 0x1a1   : > { %v1461_v15 = vmax.f32 %v1067_v8, 0.0  ;;  %v2664_v16 = vpack.c.bf16 %v2634_v14, %v2633_v13  ;;  %v2761_v17 = vld [vmem:[#allocation4 + $0x30] sm:$0xff]  ;;  %v2762_v18 = vld [vmem:[#allocation4 + $0x38] sm:$0xff] }
 0x1a2   : > { %v1932_v20 = vpack.c.bf16 %v1885_v11, %v1884_v10  ;;  %v1460_v21 = vmax.f32 %v1062_v12, 0.0  ;;  %v7009_v22 = vpop.f32.mrb[42].mxu0  ;;  %v2122_v23 = vld [vmem:[#allocation4 + $0x30] sm:$0xff]  ;;  %v2123_v24 = vld [vmem:[#allocation4 + $0x38] sm:$0xff]  ;;  %v2792_v39 = vpack.c.bf16 %v2762_v18, %v2761_v17 }
 0x1a3   : > { %v2571_v25 = vld [vmem:[#allocation4 + $0x31] sm:$0xff]  ;;  %1574 = vst.msk [vmem:[#allocation2 + $0x148] sm:$0xff] %vm1532_vm4, %v1461_v15  ;;  %v1077_v26 = vadd.f32 %v7009_v22, %v7951_v59  ;;  %2697 = vrot.lane.b32.xlu0 %v2664_v16, %s7469_s13  ;;  %v1071_v27 = vpop.f32.mrb[43].mxu0  ;;  %v2151_v28 = vpack.c.bf16 %v2123_v24, %v2122_v23  ;;  %v2572_v29 = vld [vmem:[#allocation4 + $0x39] sm:$0xff] }
 0x1a4   : > { %2377 = vrot.lane.b32.xlu1 %v2664_v16, %s7470_s30  ;;  %1960 = vst.msk [vmem:[#allocation3 + $0x40] sm:$0xff] %vm1532_vm4, %v1932_v20  ;;  %1573 = vst.msk [vmem:[#allocation2 + $0x140] sm:$0xff] %vm1532_vm4, %v1460_v21  ;;  %v1072_v31 = vadd.f32 %v7951_v59, %v1071_v27  ;;  %v2040_v33 = vld [vmem:[#allocation3 + $0x38] sm:$0x7f]  ;;  %v2601_v34 = vpack.c.bf16 %v2572_v29, %v2571_v25  ;;  %v3016_v35 = vld [vmem:[#allocation4 + $0x2a] sm:$0xff] }
 0x1a5   : > { %v1681_v36 = vld [vmem:[#allocation2 + $0x120] ss:$2 sm:$0xff]  ;;  %v1793_v37 = vld [vmem:[#allocation2 + $0x121] ss:$2 sm:$0xff]  ;;  %v1463_v38 = vmax.f32 %v1077_v26, 0.0  ;;  %v2041_v40 = vmax.bf16 %v2040_v33, %v2039_v32  ;;  %2167 = vst.msk [vmem:[#allocation5 + $0x48] sm:$0xff] %vm1532_vm4, %v2151_v28  ;;  %v3047_v41 = vpack.c.bf16 %v3016_v35, %v3015_v30 }
 0x1a6   : > { %v1462_v42 = vmax.f32 %v1072_v31, 0.0  ;;  %v7012_v43 = vpop.f32.mrb[44].mxu0  ;;  %v2889_v44 = vld [vmem:[#allocation4 + $0x31] sm:$0xff]  ;;  %v2890_v45 = vld [vmem:[#allocation4 + $0x39] sm:$0xff]  ;;  %2617 = vst.msk [vmem:[#allocation5 + $0x38] sm:$0xff] %vm1532_vm4, %v2601_v34  ;;  %v1886_v53 = vmax.f32 %v1681_v36, %v1793_v37 }
 0x1a7   : > { %v1683_v46 = vld [vmem:[#allocation2 + $0x130] ss:$2 sm:$0xff]  ;;  %v1795_v47 = vld [vmem:[#allocation2 + $0x131] ss:$2 sm:$0xff]  ;;  %1576 = vst.msk [vmem:[#allocation2 + $0x158] sm:$0xff] %vm1532_vm4, %v1463_v38  ;;  %v1087_v49 = vadd.f32 %v7012_v43, %v7951_v59  ;;  %2825 = vrot.lane.b32.xlu0 %v2792_v39, %s7470_s30  ;;  %v1081_v50 = vpop.f32.mrb[45].mxu0  ;;  %v2042_v51 = vunpack.c.l.bf16 %v2041_v40  ;;  %v2043_v52 = vunpack.c.h.bf16 %v2041_v40  ;;  %v2920_v57 = vpack.c.bf16 %v2890_v45, %v2889_v44 }
 0x1a8   : > { %2506 = vrot.lane.b32.xlu1 %v2792_v39, %s7471_s14  ;;  %3063 = vst.msk [vmem:[#allocation5 + $0x10] sm:$0xff] %vm1532_vm4, %v3047_v41  ;;  %v1887_v54 = vmax.f32 %v1683_v46, %v1795_v47  ;;  %1575 = vst.msk [vmem:[#allocation2 + $0x150] sm:$0xff] %vm1532_vm4, %v1462_v42  ;;  %v1082_v55 = vadd.f32 %v7951_v59, %v1081_v50  ;;  %v2635_v14 = vld [vmem:[#allocation4 + $0x32] sm:$0xff] }
 0x1a9   : > { %v1465_v56 = vmax.f32 %v1087_v49, 0.0  ;;  %2044 = vst.msk [vmem:[#allocation4 + $0x41] sm:$0xff] %vm1532_vm4, %v2042_v51  ;;  %v3017_v31 = vld [vmem:[#allocation4 + $0x32] sm:$0xff] }
 0x1aa   : > { %2045 = vst.msk [vmem:[#allocation4 + $0x49] sm:$0x3f] %vm2023_vm6, %v2043_v52  ;;  %v1933_v58 = vpack.c.bf16 %v1887_v54, %v1886_v53  ;;  %v1464_v60 = vmax.f32 %v1082_v55, 0.0  ;;  %v7015_v61 = vpop.f32.mrb[46].mxu0 }
 0x1ab   : > { %1578 = vst.msk [vmem:[#allocation2 + $0x168] sm:$0xff] %vm1532_vm4, %v1465_v56  ;;  %v1097_v62 = vadd.f32 %v7015_v61, %v7951_v59  ;;  %2953 = vrot.lane.b32.xlu0 %v2920_v57, %s7471_s14  ;;  %v1091_v63 = vpop.f32.mrb[47].mxu0  ;;  %v1685_v1 = vld [vmem:[#allocation2 + $0x140] ss:$2 sm:$0xff]  ;;  %v1797_v2 = vld [vmem:[#allocation2 + $0x141] ss:$2 sm:$0xff] }
 0x1ac   : > { %2250 = vrot.lane.b32.xlu1 %v2920_v57, %s7469_s13  ;;  %1961 = vst.msk [vmem:[#allocation3 + $0x48] sm:$0xff] %vm1532_vm4, %v1933_v58  ;;  %1577 = vst.msk [vmem:[#allocation2 + $0x160] sm:$0xff] %vm1532_vm4, %v1464_v60  ;;  %v1092_v0 = vadd.f32 %v7951_v59, %v1091_v63  ;;  %v1888_v11 = vmax.f32 %v1685_v1, %v1797_v2  ;;  %v2046_v33 = vld [vmem:[#allocation3 + $0x40] sm:$0x7f] }
 0x1ad   : > { %v1467_v3 = vmax.f32 %v1097_v62, 0.0 }
 0x1ae   : > { %v1466_v5 = vmax.f32 %v1092_v0, 0.0  ;;  %v7018_v6 = vpop.f32.mrb[48].mxu0 }
 0x1af   : > { %v1687_v7 = vld [vmem:[#allocation2 + $0x150] ss:$2 sm:$0xff]  ;;  %v1799_v8 = vld [vmem:[#allocation2 + $0x151] ss:$2 sm:$0xff]  ;;  %1580 = vst.msk [vmem:[#allocation2 + $0x178] sm:$0xff] %vm1532_vm4, %v1467_v3  ;;  %v1107_v9 = vadd.f32 %v7018_v6, %v7951_v59  ;;  %v1101_v10 = vpop.f32.mrb[49].mxu0 }
 0x1b0   : > { %v1889_v12 = vmax.f32 %v1687_v7, %v1799_v8  ;;  %1579 = vst.msk [vmem:[#allocation2 + $0x170] sm:$0xff] %vm1532_vm4, %v1466_v5  ;;  %v1102_v13 = vadd.f32 %v7951_v59, %v1101_v10  ;;  %v2636_v15 = vld [vmem:[#allocation4 + $0x3a] sm:$0xff] }
 0x1b1   : > { %v1469_v16 = vmax.f32 %v1107_v9, 0.0  ;;  %v2665_v17 = vpack.c.bf16 %v2636_v15, %v2635_v14  ;;  %v2763_v18 = vld [vmem:[#allocation4 + $0x40] sm:$0xff]  ;;  %v2764_v20 = vld [vmem:[#allocation4 + $0x48] sm:$0xff]  ;;  %v8184_v10 = vld [vmem:[#allocation13] ss:$0 sm:$0xff] }
 0x1b2   : > { %v1934_v21 = vpack.c.bf16 %v1889_v12, %v1888_v11  ;;  %v1468_v22 = vmax.f32 %v1102_v13, 0.0  ;;  %v7021_v23 = vpop.f32.mrb[50].mxu0  ;;  %v2124_v24 = vld [vmem:[#allocation4 + $0x40] sm:$0xff]  ;;  %v2125_v25 = vld [vmem:[#allocation4 + $0x48] sm:$0xff]  ;;  %v2793_v40 = vpack.c.bf16 %v2764_v20, %v2763_v18 }
 0x1b3   : > { %v2573_v26 = vld [vmem:[#allocation4 + $0x41] sm:$0xff]  ;;  %1582 = vst.msk [vmem:[#allocation2 + $0x188] sm:$0xff] %vm1532_vm4, %v1469_v16  ;;  %v1117_v27 = vadd.f32 %v7021_v23, %v7951_v59  ;;  %2699 = vrot.lane.b32.xlu0 %v2665_v17, %s7469_s13  ;;  %2379 = vrot.lane.b32.xlu1 %v2665_v17, %s7470_s30  ;;  %v1111_v28 = vpop.f32.mrb[51].mxu0  ;;  %v2152_v29 = vpack.c.bf16 %v2125_v25, %v2124_v24  ;;  %v2574_v30 = vld [vmem:[#allocation4 + $0x49] sm:$0xff] }
 0x1b4   : > { %1962 = vst.msk [vmem:[#allocation3 + $0x50] sm:$0xff] %vm1532_vm4, %v1934_v21  ;;  %1581 = vst.msk [vmem:[#allocation2 + $0x180] sm:$0xff] %vm1532_vm4, %v1468_v22  ;;  %v1112_v32 = vadd.f32 %v7951_v59, %v1111_v28  ;;  %v2047_v34 = vld [vmem:[#allocation3 + $0x48] sm:$0x7f]  ;;  %v2602_v35 = vpack.c.bf16 %v2574_v30, %v2573_v26  ;;  %v3018_v36 = vld [vmem:[#allocation4 + $0x3a] sm:$0xff] }
 0x1b5   : > { %v1689_v37 = vld [vmem:[#allocation2 + $0x160] ss:$2 sm:$0xff]  ;;  %v1801_v38 = vld [vmem:[#allocation2 + $0x161] ss:$2 sm:$0xff]  ;;  %v1471_v39 = vmax.f32 %v1117_v27, 0.0  ;;  %v2048_v41 = vmax.bf16 %v2047_v34, %v2046_v33  ;;  %2168 = vst.msk [vmem:[#allocation5 + $0x60] sm:$0xff] %vm1532_vm4, %v2152_v29  ;;  %v3048_v42 = vpack.c.bf16 %v3018_v36, %v3017_v31 }
 0x1b6   : > { %v1470_v43 = vmax.f32 %v1112_v32, 0.0  ;;  %v7024_v44 = vpop.f32.mrb[52].mxu0  ;;  %v2891_v45 = vld [vmem:[#allocation4 + $0x41] sm:$0xff]  ;;  %v2892_v46 = vld [vmem:[#allocation4 + $0x49] sm:$0xff]  ;;  %2618 = vst.msk [vmem:[#allocation5 + $0x50] sm:$0xff] %vm1532_vm4, %v2602_v35  ;;  %v1890_v54 = vmax.f32 %v1689_v37, %v1801_v38 }
 0x1b7   : > { %v1691_v47 = vld [vmem:[#allocation2 + $0x170] ss:$2 sm:$0xff]  ;;  %v1803_v49 = vld [vmem:[#allocation2 + $0x171] ss:$2 sm:$0xff]  ;;  %1584 = vst.msk [vmem:[#allocation2 + $0x198] sm:$0xff] %vm1532_vm4, %v1471_v39  ;;  %v1127_v50 = vadd.f32 %v7024_v44, %v7951_v59  ;;  %2827 = vrot.lane.b32.xlu0 %v2793_v40, %s7470_s30  ;;  %2508 = vrot.lane.b32.xlu1 %v2793_v40, %s7471_s14  ;;  %v1121_v51 = vpop.f32.mrb[53].mxu0  ;;  %v2049_v52 = vunpack.c.l.bf16 %v2048_v41  ;;  %v2050_v53 = vunpack.c.h.bf16 %v2048_v41  ;;  %v2921_v58 = vpack.c.bf16 %v2892_v46, %v2891_v45 }
 0x1b8   : > { %3064 = vst.msk [vmem:[#allocation5 + $0x28] sm:$0xff] %vm1532_vm4, %v3048_v42  ;;  %v1891_v55 = vmax.f32 %v1691_v47, %v1803_v49  ;;  %1583 = vst.msk [vmem:[#allocation2 + $0x190] sm:$0xff] %vm1532_vm4, %v1470_v43  ;;  %v1122_v56 = vadd.f32 %v7951_v59, %v1121_v51  ;;  %v2637_v15 = vld [vmem:[#allocation4 + $0x42] sm:$0xff] }
 0x1b9   : > { %v1473_v57 = vmax.f32 %v1127_v50, 0.0  ;;  %2051 = vst.msk [vmem:[#allocation4 + $0x51] sm:$0xff] %vm1532_vm4, %v2049_v52  ;;  %v3019_v32 = vld [vmem:[#allocation4 + $0x42] sm:$0xff] }
 0x1ba   : > { %2052 = vst.msk [vmem:[#allocation4 + $0x59] sm:$0x3f] %vm2023_vm6, %v2050_v53  ;;  %v1935_v60 = vpack.c.bf16 %v1891_v55, %v1890_v54  ;;  %v1472_v61 = vmax.f32 %v1122_v56, 0.0  ;;  %v7027_v62 = vpop.f32.mrb[54].mxu0 }
 0x1bb   : > { %1586 = vst.msk [vmem:[#allocation2 + $0x1a8] sm:$0xff] %vm1532_vm4, %v1473_v57  ;;  %v1137_v63 = vadd.f32 %v7027_v62, %v7951_v59  ;;  %2955 = vrot.lane.b32.xlu0 %v2921_v58, %s7471_s14  ;;  %2252 = vrot.lane.b32.xlu1 %v2921_v58, %s7469_s13  ;;  %v1131_v0 = vpop.f32.mrb[55].mxu0  ;;  %v1693_v2 = vld [vmem:[#allocation2 + $0x180] ss:$2 sm:$0xff]  ;;  %v1805_v3 = vld [vmem:[#allocation2 + $0x181] ss:$2 sm:$0xff] }
 0x1bc   : > { %1963 = vst.msk [vmem:[#allocation3 + $0x58] sm:$0xff] %vm1532_vm4, %v1935_v60  ;;  %1585 = vst.msk [vmem:[#allocation2 + $0x1a0] sm:$0xff] %vm1532_vm4, %v1472_v61  ;;  %v1132_v1 = vadd.f32 %v7951_v59, %v1131_v0  ;;  %v1892_v13 = vmax.f32 %v1693_v2, %v1805_v3  ;;  %v2053_v34 = vld [vmem:[#allocation3 + $0x50] sm:$0x7f] }
 0x1bd   : > { %v1475_v5 = vmax.f32 %v1137_v63, 0.0 }
 0x1be   : > { %v1474_v6 = vmax.f32 %v1132_v1, 0.0  ;;  %v7030_v7 = vpop.f32.mrb[56].mxu0 }
 0x1bf   : > { %v1695_v8 = vld [vmem:[#allocation2 + $0x190] ss:$2 sm:$0xff]  ;;  %v1807_v9 = vld [vmem:[#allocation2 + $0x191] ss:$2 sm:$0xff]  ;;  %1588 = vst.msk [vmem:[#allocation2 + $0x1b8] sm:$0xff] %vm1532_vm4, %v1475_v5  ;;  %v1147_v11 = vadd.f32 %v8184_v10, %v7030_v7  ;;  %v1141_v12 = vpop.f32.mrb[57].mxu0 }
 0x1c0   : > { %v1893_v14 = vmax.f32 %v1695_v8, %v1807_v9  ;;  %1587 = vst.msk [vmem:[#allocation2 + $0x1b0] sm:$0xff] %vm1532_vm4, %v1474_v6  ;;  %v1142_v59 = vadd.f32 %v8184_v10, %v1141_v12  ;;  %v2638_v16 = vld [vmem:[#allocation4 + $0x4a] sm:$0xff] }
 0x1c1   : > { %v1477_v17 = vmax.f32 %v1147_v11, 0.0  ;;  %v2666_v18 = vpack.c.bf16 %v2638_v16, %v2637_v15  ;;  %v2765_v20 = vld [vmem:[#allocation4 + $0x50] sm:$0xff]  ;;  %v2766_v21 = vld [vmem:[#allocation4 + $0x58] sm:$0xff] }
 0x1c2   : > { %v1936_v22 = vpack.c.bf16 %v1893_v14, %v1892_v13  ;;  %v1476_v23 = vmax.f32 %v1142_v59, 0.0  ;;  %v7033_v24 = vpop.f32.mrb[58].mxu0  ;;  %v2126_v25 = vld [vmem:[#allocation4 + $0x50] sm:$0xff]  ;;  %v2127_v26 = vld [vmem:[#allocation4 + $0x58] sm:$0xff]  ;;  %v2794_v41 = vpack.c.bf16 %v2766_v21, %v2765_v20 }
 0x1c3   : > { %v2575_v27 = vld [vmem:[#allocation4 + $0x51] sm:$0xff]  ;;  %1590 = vst.msk [vmem:[#allocation2 + $0x1c8] sm:$0xff] %vm1532_vm4, %v1477_v17  ;;  %v1157_v28 = vadd.f32 %v8184_v10, %v7033_v24  ;;  %2701 = vrot.lane.b32.xlu0 %v2666_v18, %s7469_s13  ;;  %2381 = vrot.lane.b32.xlu1 %v2666_v18, %s7470_s30  ;;  %v1151_v29 = vpop.f32.mrb[59].mxu0  ;;  %v2153_v30 = vpack.c.bf16 %v2127_v26, %v2126_v25  ;;  %v2576_v31 = vld [vmem:[#allocation4 + $0x59] sm:$0xff]  ;;  %v1809_v39 = vld [vmem:[#allocation2 + $0x1a1] ss:$2 sm:$0xff] }
 0x1c4   : > { %1964 = vst.msk [vmem:[#allocation3 + $0x60] sm:$0xff] %vm1532_vm4, %v1936_v22  ;;  %1589 = vst.msk [vmem:[#allocation2 + $0x1c0] sm:$0xff] %vm1532_vm4, %v1476_v23  ;;  %v1152_v33 = vadd.f32 %v8184_v10, %v1151_v29  ;;  %v2054_v35 = vld [vmem:[#allocation3 + $0x58] sm:$0x7f]  ;;  %v2603_v36 = vpack.c.bf16 %v2576_v31, %v2575_v27  ;;  %v3020_v37 = vld [vmem:[#allocation4 + $0x4a] sm:$0xff] }
 0x1c5   : > { %v1697_v38 = vld [vmem:[#allocation2 + $0x1a0] ss:$2 sm:$0xff]  ;;  %v1479_v40 = vmax.f32 %v1157_v28, 0.0  ;;  %v2055_v42 = vmax.bf16 %v2054_v35, %v2053_v34  ;;  %2169 = vst.msk [vmem:[#allocation5 + $0x78] sm:$0xff] %vm1532_vm4, %v2153_v30  ;;  %v3049_v43 = vpack.c.bf16 %v3020_v37, %v3019_v32  ;;  %v2893_v46 = vld [vmem:[#allocation4 + $0x51] sm:$0xff] }
 0x1c6   : > { %v1478_v44 = vmax.f32 %v1152_v33, 0.0  ;;  %v7036_v45 = vpop.f32.mrb[60].mxu0  ;;  %v2894_v47 = vld [vmem:[#allocation4 + $0x59] sm:$0xff]  ;;  %2619 = vst.msk [vmem:[#allocation5 + $0x68] sm:$0xff] %vm1532_vm4, %v2603_v36  ;;  %v1894_v55 = vmax.f32 %v1697_v38, %v1809_v39  ;;  %v2466_v9 = vld [vmem:[#allocation4 + $0xf0] sm:$0xff] }
 0x1c7   : > { %v1699_v49 = vld [vmem:[#allocation2 + $0x1b0] ss:$2 sm:$0xff]  ;;  %v1811_v50 = vld [vmem:[#allocation2 + $0x1b1] ss:$2 sm:$0xff]  ;;  %1592 = vst.msk [vmem:[#allocation2 + $0x1d8] sm:$0xff] %vm1532_vm4, %v1479_v40  ;;  %v1167_v51 = vadd.f32 %v8184_v10, %v7036_v45  ;;  %2829 = vrot.lane.b32.xlu0 %v2794_v41, %s7470_s30  ;;  %2510 = vrot.lane.b32.xlu1 %v2794_v41, %s7471_s14  ;;  %v1161_v52 = vpop.f32.mrb[61].mxu0  ;;  %v2056_v53 = vunpack.c.l.bf16 %v2055_v42  ;;  %v2057_v54 = vunpack.c.h.bf16 %v2055_v42  ;;  %v2922_v60 = vpack.c.bf16 %v2894_v47, %v2893_v46 }
 0x1c8   : > { %3065 = vst.msk [vmem:[#allocation5 + $0x40] sm:$0xff] %vm1532_vm4, %v3049_v43  ;;  %v1895_v56 = vmax.f32 %v1699_v49, %v1811_v50  ;;  %1591 = vst.msk [vmem:[#allocation2 + $0x1d0] sm:$0xff] %vm1532_vm4, %v1478_v44  ;;  %v1162_v57 = vadd.f32 %v8184_v10, %v1161_v52  ;;  %v2467_v11 = vld [vmem:[#allocation4 + $0xf8] sm:$0xff] }
 0x1c9   : > { %v1481_v58 = vmax.f32 %v1167_v51, 0.0  ;;  %2058 = vst.msk [vmem:[#allocation4 + $0x61] sm:$0xff] %vm1532_vm4, %v2056_v53  ;;  %v8216_v15 = vpack.c.bf16 %v2467_v11, %v2466_v9  ;;  %v2639_v20 = vld [vmem:[#allocation4 + $0x52] sm:$0xff] }
 0x1ca   : > { %2059 = vst.msk [vmem:[#allocation4 + $0x69] sm:$0x3f] %vm2023_vm6, %v2057_v54  ;;  %v1937_v61 = vpack.c.bf16 %v1895_v56, %v1894_v55  ;;  %v1480_v62 = vmax.f32 %v1162_v57, 0.0  ;;  %v7039_v63 = vpop.f32.mrb[62].mxu0  ;;  %v3021_v36 = vld [vmem:[#allocation4 + $0x52] sm:$0xff] }
 0x1cb   : > { %1594 = vst.msk [vmem:[#allocation2 + $0x1e8] sm:$0xff] %vm1532_vm4, %v1481_v58  ;;  %v1177_v0 = vadd.f32 %v8184_v10, %v7039_v63  ;;  %2957 = vrot.lane.b32.xlu0 %v2922_v60, %s7471_s14  ;;  %2254 = vrot.lane.b32.xlu1 %v2922_v60, %s7469_s13  ;;  %v1171_v1 = vpop.f32.mrb[63].mxu0  ;;  %v1701_v3 = vld [vmem:[#allocation2 + $0x1c0] ss:$2 sm:$0xff]  ;;  %v1813_v5 = vld [vmem:[#allocation2 + $0x1c1] ss:$2 sm:$0xff] }
 0x1cc   : > { %1965 = vst.msk [vmem:[#allocation3 + $0x68] sm:$0xff] %vm1532_vm4, %v1937_v61  ;;  %1593 = vst.msk [vmem:[#allocation2 + $0x1e0] sm:$0xff] %vm1532_vm4, %v1480_v62  ;;  %v1172_v2 = vadd.f32 %v8184_v10, %v1171_v1  ;;  %v1896_v16 = vmax.f32 %v1701_v3, %v1813_v5  ;;  %v2060_v38 = vld [vmem:[#allocation3 + $0x60] sm:$0x7f] }
 0x1cd   : > { %v1483_v6 = vmax.f32 %v1177_v0, 0.0  ;;  %2179 = vst.msk [vmem:[#allocation5 + $0x168] sm:$0xff] %vm1532_vm4, %v8216_v15 }
 0x1ce   : > { %v1482_v7 = vmax.f32 %v1172_v2, 0.0  ;;  %v7042_v8 = vpop.f32.mrb[64].mxu0 }
 0x1cf   : > { %v1703_v12 = vld [vmem:[#allocation2 + $0x1d0] ss:$2 sm:$0xff]  ;;  %v1815_v13 = vld [vmem:[#allocation2 + $0x1d1] ss:$2 sm:$0xff]  ;;  %1596 = vst.msk [vmem:[#allocation2 + $0x1f8] sm:$0xff] %vm1532_vm4, %v1483_v6  ;;  %v1187_v14 = vadd.f32 %v8184_v10, %v7042_v8  ;;  %v1181_v59 = vpop.f32.mrb[65].mxu0 }
 0x1d0   : > { %v1897_v17 = vmax.f32 %v1703_v12, %v1815_v13  ;;  %1595 = vst.msk [vmem:[#allocation2 + $0x1f0] sm:$0xff] %vm1532_vm4, %v1482_v7  ;;  %v1182_v18 = vadd.f32 %v8184_v10, %v1181_v59  ;;  %v2640_v21 = vld [vmem:[#allocation4 + $0x5a] sm:$0xff] }
 0x1d1   : > { %v1485_v22 = vmax.f32 %v1187_v14, 0.0  ;;  %v2667_v23 = vpack.c.bf16 %v2640_v21, %v2639_v20  ;;  %v2767_v24 = vld [vmem:[#allocation4 + $0x60] sm:$0xff]  ;;  %v2768_v25 = vld [vmem:[#allocation4 + $0x68] sm:$0xff] }
 0x1d2   : > { %v1938_v26 = vpack.c.bf16 %v1897_v17, %v1896_v16  ;;  %v1484_v27 = vmax.f32 %v1182_v18, 0.0  ;;  %v7045_v28 = vpop.f32.mrb[66].mxu0  ;;  %v2128_v29 = vld [vmem:[#allocation4 + $0x60] sm:$0xff]  ;;  %v2129_v30 = vld [vmem:[#allocation4 + $0x68] sm:$0xff]  ;;  %v2795_v45 = vpack.c.bf16 %v2768_v25, %v2767_v24 }
 0x1d3   : > { %v2577_v31 = vld [vmem:[#allocation4 + $0x61] sm:$0xff]  ;;  %1598 = vst.msk [vmem:[#allocation2 + $0x208] sm:$0xff] %vm1532_vm4, %v1485_v22  ;;  %v1197_v32 = vadd.f32 %v8184_v10, %v7045_v28  ;;  %2703 = vrot.lane.b32.xlu0 %v2667_v23, %s7469_s13  ;;  %2383 = vrot.lane.b32.xlu1 %v2667_v23, %s7470_s30  ;;  %v1191_v33 = vpop.f32.mrb[67].mxu0  ;;  %v2154_v34 = vpack.c.bf16 %v2129_v30, %v2128_v29  ;;  %v2578_v35 = vld [vmem:[#allocation4 + $0x69] sm:$0xff] }
 0x1d4   : > { %1966 = vst.msk [vmem:[#allocation3 + $0x70] sm:$0xff] %vm1532_vm4, %v1938_v26  ;;  %1597 = vst.msk [vmem:[#allocation2 + $0x200] sm:$0xff] %vm1532_vm4, %v1484_v27  ;;  %v1192_v37 = vadd.f32 %v8184_v10, %v1191_v33  ;;  %v2061_v39 = vld [vmem:[#allocation3 + $0x68] sm:$0x7f]  ;;  %v2604_v40 = vpack.c.bf16 %v2578_v35, %v2577_v31  ;;  %v3022_v41 = vld [vmem:[#allocation4 + $0x5a] sm:$0xff] }
 0x1d5   : > { %v1705_v42 = vld [vmem:[#allocation2 + $0x1e0] ss:$2 sm:$0xff]  ;;  %v1817_v43 = vld [vmem:[#allocation2 + $0x1e1] ss:$2 sm:$0xff]  ;;  %v1487_v44 = vmax.f32 %v1197_v32, 0.0  ;;  %v2062_v46 = vmax.bf16 %v2061_v39, %v2060_v38  ;;  %2170 = vst.msk [vmem:[#allocation5 + $0x90] sm:$0xff] %vm1532_vm4, %v2154_v34  ;;  %v3050_v47 = vpack.c.bf16 %v3022_v41, %v3021_v36 }
 0x1d6   : > { %v1486_v49 = vmax.f32 %v1192_v37, 0.0  ;;  %v7048_v50 = vpop.f32.mrb[68].mxu0  ;;  %v2895_v51 = vld [vmem:[#allocation4 + $0x61] sm:$0xff]  ;;  %v2896_v52 = vld [vmem:[#allocation4 + $0x69] sm:$0xff]  ;;  %2620 = vst.msk [vmem:[#allocation5 + $0x80] sm:$0xff] %vm1532_vm4, %v2604_v40  ;;  %v1898_v60 = vmax.f32 %v1705_v42, %v1817_v43 }
 0x1d7   : > { %v1707_v53 = vld [vmem:[#allocation2 + $0x1f0] ss:$2 sm:$0xff]  ;;  %v1819_v54 = vld [vmem:[#allocation2 + $0x1f1] ss:$2 sm:$0xff]  ;;  %1600 = vst.msk [vmem:[#allocation2 + $0x218] sm:$0xff] %vm1532_vm4, %v1487_v44  ;;  %v1207_v55 = vadd.f32 %v8184_v10, %v7048_v50  ;;  %2831 = vrot.lane.b32.xlu0 %v2795_v45, %s7470_s30  ;;  %2512 = vrot.lane.b32.xlu1 %v2795_v45, %s7471_s14  ;;  %v1201_v56 = vpop.f32.mrb[69].mxu0  ;;  %v2063_v57 = vunpack.c.l.bf16 %v2062_v46  ;;  %v2064_v58 = vunpack.c.h.bf16 %v2062_v46  ;;  %v2923_v0 = vpack.c.bf16 %v2896_v52, %v2895_v51 }
 0x1d8   : > { %3066 = vst.msk [vmem:[#allocation5 + $0x58] sm:$0xff] %vm1532_vm4, %v3050_v47  ;;  %v1899_v61 = vmax.f32 %v1707_v53, %v1819_v54  ;;  %1599 = vst.msk [vmem:[#allocation2 + $0x210] sm:$0xff] %vm1532_vm4, %v1486_v49  ;;  %v1202_v62 = vadd.f32 %v8184_v10, %v1201_v56  ;;  %v2641_v22 = vld [vmem:[#allocation4 + $0x62] sm:$0xff] }
 0x1d9   : > { %v1489_v63 = vmax.f32 %v1207_v55, 0.0  ;;  %2065 = vst.msk [vmem:[#allocation4 + $0x71] sm:$0xff] %vm1532_vm4, %v2063_v57  ;;  %v3023_v38 = vld [vmem:[#allocation4 + $0x62] sm:$0xff] }
 0x1da   : > { %2066 = vst.msk [vmem:[#allocation4 + $0x79] sm:$0x3f] %vm2023_vm6, %v2064_v58  ;;  %v1939_v1 = vpack.c.bf16 %v1899_v61, %v1898_v60  ;;  %v1488_v2 = vmax.f32 %v1202_v62, 0.0  ;;  %v7051_v3 = vpop.f32.mrb[70].mxu0  ;;  %v2915_v55 = vld [vmem:[#allocation4 + $0x101] sm:$0xff]  ;;  %v2916_v56 = vld [vmem:[#allocation4 + $0x109] sm:$0xff] }
 0x1db   : > { %1602 = vst.msk [vmem:[#allocation2 + $0x228] sm:$0xff] %vm1532_vm4, %v1489_v63  ;;  %v1217_v5 = vadd.f32 %v8184_v10, %v7051_v3  ;;  %2959 = vrot.lane.b32.xlu0 %v2923_v0, %s7471_s14  ;;  %2256 = vrot.lane.b32.xlu1 %v2923_v0, %s7469_s13  ;;  %v1211_v6 = vpop.f32.mrb[71].mxu0  ;;  %v1709_v8 = vld [vmem:[#allocation2 + $0x200] ss:$2 sm:$0xff]  ;;  %v1821_v9 = vld [vmem:[#allocation2 + $0x201] ss:$2 sm:$0xff]  ;;  %v8264_v0 = vpack.c.bf16 %v2916_v56, %v2915_v55 }
 0x1dc   : > { %1967 = vst.msk [vmem:[#allocation3 + $0x78] sm:$0xff] %vm1532_vm4, %v1939_v1  ;;  %1601 = vst.msk [vmem:[#allocation2 + $0x220] sm:$0xff] %vm1532_vm4, %v1488_v2  ;;  %v1212_v7 = vadd.f32 %v8184_v10, %v1211_v6  ;;  %v1900_v18 = vmax.f32 %v1709_v8, %v1821_v9  ;;  %v2067_v35 = vld [vmem:[#allocation3 + $0x70] sm:$0x7f] }
 0x1dd   : > { %v1491_v11 = vmax.f32 %v1217_v5, 0.0  ;;  %2630 = vst.msk [vmem:[#allocation5 + $0x170] sm:$0xff] %vm1532_vm4, %v8264_v0 }
 0x1de   : > { %v1490_v12 = vmax.f32 %v1212_v7, 0.0  ;;  %v7054_v13 = vpop.f32.mrb[72].mxu0 }
 0x1df   : > { %v1711_v14 = vld [vmem:[#allocation2 + $0x210] ss:$2 sm:$0xff]  ;;  %v1823_v59 = vld [vmem:[#allocation2 + $0x211] ss:$2 sm:$0xff]  ;;  %1604 = vst.msk [vmem:[#allocation2 + $0x238] sm:$0xff] %vm1532_vm4, %v1491_v11  ;;  %v1227_v16 = vadd.f32 %v8184_v10, %v7054_v13  ;;  %v1221_v17 = vpop.f32.mrb[73].mxu0 }
 0x1e0   : > { %v1901_v20 = vmax.f32 %v1711_v14, %v1823_v59  ;;  %1603 = vst.msk [vmem:[#allocation2 + $0x230] sm:$0xff] %vm1532_vm4, %v1490_v12  ;;  %v1222_v21 = vadd.f32 %v8184_v10, %v1221_v17  ;;  %v2642_v23 = vld [vmem:[#allocation4 + $0x6a] sm:$0xff]  ;;  %v2661_v11 = vld [vmem:[#allocation4 + $0x102] sm:$0xff] }
 0x1e1   : > { %v1493_v24 = vmax.f32 %v1227_v16, 0.0  ;;  %v2668_v25 = vpack.c.bf16 %v2642_v23, %v2641_v22  ;;  %v2769_v26 = vld [vmem:[#allocation4 + $0x70] sm:$0xff]  ;;  %v2770_v27 = vld [vmem:[#allocation4 + $0x78] sm:$0xff] }
 0x1e2   : > { %v1940_v28 = vpack.c.bf16 %v1901_v20, %v1900_v18  ;;  %v1492_v29 = vmax.f32 %v1222_v21, 0.0  ;;  %v7057_v30 = vpop.f32.mrb[74].mxu0  ;;  %v2130_v31 = vld [vmem:[#allocation4 + $0x70] sm:$0xff]  ;;  %v2131_v32 = vld [vmem:[#allocation4 + $0x78] sm:$0xff]  ;;  %v2796_v40 = vpack.c.bf16 %v2770_v27, %v2769_v26 }
 0x1e3   : > { %1606 = vst.msk [vmem:[#allocation2 + $0x248] sm:$0xff] %vm1532_vm4, %v1493_v24  ;;  %v1237_v33 = vadd.f32 %v8184_v10, %v7057_v30  ;;  %2705 = vrot.lane.b32.xlu0 %v2668_v25, %s7469_s13  ;;  %2385 = vrot.lane.b32.xlu1 %v2668_v25, %s7470_s30  ;;  %v1231_v34 = vpop.f32.mrb[75].mxu0  ;;  %v2155_v36 = vpack.c.bf16 %v2131_v32, %v2130_v31  ;;  %v2579_v37 = vld [vmem:[#allocation4 + $0x71] sm:$0xff]  ;;  %v2580_v42 = vld [vmem:[#allocation4 + $0x79] sm:$0xff]  ;;  %v1825_v45 = vld [vmem:[#allocation2 + $0x221] ss:$2 sm:$0xff] }
 0x1e4   : > { %1968 = vst.msk [vmem:[#allocation3 + $0x80] sm:$0xff] %vm1532_vm4, %v1940_v28  ;;  %1605 = vst.msk [vmem:[#allocation2 + $0x240] sm:$0xff] %vm1532_vm4, %v1492_v29  ;;  %v1232_v39 = vadd.f32 %v8184_v10, %v1231_v34  ;;  %v2068_v41 = vld [vmem:[#allocation3 + $0x78] sm:$0x7f]  ;;  %v3024_v43 = vld [vmem:[#allocation4 + $0x6a] sm:$0xff]  ;;  %v2605_v50 = vpack.c.bf16 %v2580_v42, %v2579_v37 }
 0x1e5   : > { %v1713_v44 = vld [vmem:[#allocation2 + $0x220] ss:$2 sm:$0xff]  ;;  %v1495_v46 = vmax.f32 %v1237_v33, 0.0  ;;  %v2897_v47 = vld [vmem:[#allocation4 + $0x71] sm:$0xff]  ;;  %v2069_v49 = vmax.bf16 %v2068_v41, %v2067_v35  ;;  %2171 = vst.msk [vmem:[#allocation5 + $0xa8] sm:$0xff] %vm1532_vm4, %v2155_v36  ;;  %v3051_v51 = vpack.c.bf16 %v3024_v43, %v3023_v38 }
 0x1e6   : > { %v1494_v52 = vmax.f32 %v1232_v39, 0.0  ;;  %v7060_v53 = vpop.f32.mrb[76].mxu0  ;;  %v2898_v54 = vld [vmem:[#allocation4 + $0x79] sm:$0xff]  ;;  %2621 = vst.msk [vmem:[#allocation5 + $0x98] sm:$0xff] %vm1532_vm4, %v2605_v50  ;;  %v1902_v1 = vmax.f32 %v1713_v44, %v1825_v45  ;;  %v2662_v12 = vld [vmem:[#allocation4 + $0x10a] sm:$0xff] }
 0x1e7   : > { %v1715_v57 = vld [vmem:[#allocation2 + $0x230] ss:$2 sm:$0xff]  ;;  %v1827_v58 = vld [vmem:[#allocation2 + $0x231] ss:$2 sm:$0xff]  ;;  %1608 = vst.msk [vmem:[#allocation2 + $0x258] sm:$0xff] %vm1532_vm4, %v1495_v46  ;;  %v1247_v60 = vadd.f32 %v8184_v10, %v7060_v53  ;;  %2833 = vrot.lane.b32.xlu0 %v2796_v40, %s7470_s30  ;;  %2514 = vrot.lane.b32.xlu1 %v2796_v40, %s7471_s14  ;;  %v1241_v61 = vpop.f32.mrb[77].mxu0  ;;  %v2070_v62 = vunpack.c.l.bf16 %v2069_v49  ;;  %v2071_v63 = vunpack.c.h.bf16 %v2069_v49  ;;  %v2924_v6 = vpack.c.bf16 %v2898_v54, %v2897_v47 }
 0x1e8   : > { %3067 = vst.msk [vmem:[#allocation5 + $0x70] sm:$0xff] %vm1532_vm4, %v3051_v51  ;;  %v1903_v2 = vmax.f32 %v1715_v57, %v1827_v58  ;;  %1607 = vst.msk [vmem:[#allocation2 + $0x250] sm:$0xff] %vm1532_vm4, %v1494_v52  ;;  %v1242_v3 = vadd.f32 %v8184_v10, %v1241_v61  ;;  %v8277_v59 = vpack.c.bf16 %v2662_v12, %v2661_v11  ;;  %v2339_v23 = vld [vmem:[#allocation4 + $0xf2] sm:$0xff]  ;;  %v2340_v28 = vld [vmem:[#allocation4 + $0xfa] sm:$0xff] }
 0x1e9   : > { %v1497_v5 = vmax.f32 %v1247_v60, 0.0  ;;  %2072 = vst.msk [vmem:[#allocation4 + $0x81] sm:$0xff] %vm1532_vm4, %v2070_v62  ;;  %v2643_v32 = vld [vmem:[#allocation4 + $0x72] sm:$0xff]  ;;  %v8288_v34 = vpack.c.bf16 %v2340_v28, %v2339_v23 }
 0x1ea   : > { %2073 = vst.msk [vmem:[#allocation4 + $0x89] sm:$0x3f] %vm2023_vm6, %v2071_v63  ;;  %v1941_v7 = vpack.c.bf16 %v1903_v2, %v1902_v1  ;;  %v1496_v8 = vmax.f32 %v1242_v3, 0.0  ;;  %v7063_v9 = vpop.f32.mrb[78].mxu0  ;;  %v3025_v49 = vld [vmem:[#allocation4 + $0x72] sm:$0xff] }
 0x1eb   : > { %1610 = vst.msk [vmem:[#allocation2 + $0x268] sm:$0xff] %vm1532_vm4, %v1497_v5  ;;  %v1257_v13 = vadd.f32 %v8184_v10, %v7063_v9  ;;  %2961 = vrot.lane.b32.xlu0 %v2924_v6, %s7471_s14  ;;  %2258 = vrot.lane.b32.xlu1 %v2924_v6, %s7469_s13  ;;  %v1251_v14 = vpop.f32.mrb[79].mxu0  ;;  %v1717_v17 = vld [vmem:[#allocation2 + $0x240] ss:$2 sm:$0xff]  ;;  %v1829_v18 = vld [vmem:[#allocation2 + $0x241] ss:$2 sm:$0xff] }
 0x1ec   : > { %1969 = vst.msk [vmem:[#allocation3 + $0x88] sm:$0xff] %vm1532_vm4, %v1941_v7  ;;  %1609 = vst.msk [vmem:[#allocation2 + $0x260] sm:$0xff] %vm1532_vm4, %v1496_v8  ;;  %v1252_v16 = vadd.f32 %v8184_v10, %v1251_v14  ;;  %v1904_v29 = vmax.f32 %v1717_v17, %v1829_v18  ;;  %v2074_v46 = vld [vmem:[#allocation3 + $0x80] sm:$0x7f] }
 0x1ed   : > { %v1499_v20 = vmax.f32 %v1257_v13, 0.0  ;;  %3077 = vst.msk [vmem:[#allocation5 + $0x160] sm:$0xff] %vm1532_vm4, %v8277_v59  ;;  %3076 = vst.msk [vmem:[#allocation5 + $0x148] sm:$0xff] %vm1532_vm4, %v8288_v34  ;;  %v8304_v5 = vld [vmem:[%s9418_s3 + $0x80] sm:$0xff]  }
 0x1ee   : > { %v1498_v21 = vmax.f32 %v1252_v16, 0.0  ;;  %v7066_v22 = vpop.f32.mrb[80].mxu0  ;;  %7112 = vmatprep.subr.bf16.mxu1 %v8304_v5 }
 0x1ef   : > { %v1719_v24 = vld [vmem:[#allocation2 + $0x250] ss:$2 sm:$0xff]  ;;  %v1831_v25 = vld [vmem:[#allocation2 + $0x251] ss:$2 sm:$0xff]  ;;  %1612 = vst.msk [vmem:[#allocation2 + $0x278] sm:$0xff] %vm1532_vm4, %v1499_v20  ;;  %v1267_v26 = vadd.f32 %v8184_v10, %v7066_v22  ;;  %v1261_v27 = vpop.f32.mrb[81].mxu0 }
 0x1f0   : > { %v1905_v30 = vmax.f32 %v1719_v24, %v1831_v25  ;;  %1611 = vst.msk [vmem:[#allocation2 + $0x270] sm:$0xff] %vm1532_vm4, %v1498_v21  ;;  %v1262_v31 = vadd.f32 %v8184_v10, %v1261_v27  ;;  %v2644_v33 = vld [vmem:[#allocation4 + $0x7a] sm:$0xff] }
 0x1f1   : > { %v1501_v35 = vmax.f32 %v1267_v26, 0.0  ;;  %v2669_v36 = vpack.c.bf16 %v2644_v33, %v2643_v32  ;;  %v2771_v37 = vld [vmem:[#allocation4 + $0x80] sm:$0xff]  ;;  %v2772_v41 = vld [vmem:[#allocation4 + $0x88] sm:$0xff] }
 0x1f2   : > { %v1942_v38 = vpack.c.bf16 %v1905_v30, %v1904_v29  ;;  %v1500_v39 = vmax.f32 %v1262_v31, 0.0  ;;  %v7069_v40 = vpop.f32.mrb[82].mxu0  ;;  %v2132_v42 = vld [vmem:[#allocation4 + $0x80] sm:$0xff]  ;;  %v2133_v43 = vld [vmem:[#allocation4 + $0x88] sm:$0xff]  ;;  %v2797_v58 = vpack.c.bf16 %v2772_v41, %v2771_v37 }
 0x1f3   : > { %1614 = vst.msk [vmem:[#allocation2 + $0x288] sm:$0xff] %vm1532_vm4, %v1501_v35  ;;  %v1277_v44 = vadd.f32 %v8184_v10, %v7069_v40  ;;  %2707 = vrot.lane.b32.xlu0 %v2669_v36, %s7469_s13  ;;  %2387 = vrot.lane.b32.xlu1 %v2669_v36, %s7470_s30  ;;  %v1271_v45 = vpop.f32.mrb[83].mxu0  ;;  %v2156_v47 = vpack.c.bf16 %v2133_v43, %v2132_v42  ;;  %v2075_v51 = vld [vmem:[#allocation3 + $0x88] sm:$0x7f]  ;;  %v3026_v62 = vld [vmem:[#allocation4 + $0x7a] sm:$0xff] }
 0x1f4   : > { %1970 = vst.msk [vmem:[#allocation3 + $0x90] sm:$0xff] %vm1532_vm4, %v1942_v38  ;;  %1613 = vst.msk [vmem:[#allocation2 + $0x280] sm:$0xff] %vm1532_vm4, %v1500_v39  ;;  %v1272_v50 = vadd.f32 %v8184_v10, %v1271_v45  ;;  %v2581_v52 = vld [vmem:[#allocation4 + $0x81] sm:$0xff]  ;;  %v2582_v53 = vld [vmem:[#allocation4 + $0x89] sm:$0xff]  ;;  %v2076_v60 = vmax.bf16 %v2075_v51, %v2074_v46  ;;  %v3052_v6 = vpack.c.bf16 %v3026_v62, %v3025_v49 }
 0x1f5   : > { %v1721_v54 = vld [vmem:[#allocation2 + $0x260] ss:$2 sm:$0xff]  ;;  %v1833_v55 = vld [vmem:[#allocation2 + $0x261] ss:$2 sm:$0xff]  ;;  %v1503_v56 = vmax.f32 %v1277_v44, 0.0  ;;  %v2374_v57 = vpop.permute.xlu1 %2373  ;;  %2172 = vst.msk [vmem:[#allocation5 + $0xc0] sm:$0xff] %vm1532_vm4, %v2156_v47  ;;  %v2606_v61 = vpack.c.bf16 %v2582_v53, %v2581_v52 }
 0x1f6   : > { %v1502_v63 = vmax.f32 %v1272_v50, 0.0  ;;  %2422 = vst.msk [vmem:[#allocation5] sm:$0xff] %vm2421_vm7, %v2374_v57  ;;  %v7072_v1 = vpop.f32.mrb[84].mxu0  ;;  %v2899_v2 = vld [vmem:[#allocation4 + $0x81] sm:$0xff]  ;;  %v2900_v3 = vld [vmem:[#allocation4 + $0x89] sm:$0xff]  ;;  %v2077_v12 = vunpack.c.l.bf16 %v2076_v60  ;;  %v2078_v13 = vunpack.c.h.bf16 %v2076_v60  ;;  %v1906_v14 = vmax.f32 %v1721_v54, %v1833_v55 }
 0x1f7   : > { %v1723_v7 = vld [vmem:[#allocation2 + $0x270] ss:$2 sm:$0xff]  ;;  %v1835_v8 = vld [vmem:[#allocation2 + $0x271] ss:$2 sm:$0xff]  ;;  %1616 = vst.msk [vmem:[#allocation2 + $0x298] sm:$0xff] %vm1532_vm4, %v1503_v56  ;;  %v1287_v9 = vadd.f32 %v8184_v10, %v7072_v1  ;;  %2835 = vrot.lane.b32.xlu0 %v2797_v58, %s7470_s30  ;;  %2516 = vrot.lane.b32.xlu1 %v2797_v58, %s7471_s14  ;;  %v1281_v11 = vpop.f32.mrb[85].mxu0  ;;  %v2925_v21 = vpack.c.bf16 %v2900_v3, %v2899_v2 }
 0x1f8   : > { %2622 = vst.msk [vmem:[#allocation5 + $0xb0] sm:$0xff] %vm1532_vm4, %v2606_v61  ;;  %v1907_v16 = vmax.f32 %v1723_v7, %v1835_v8  ;;  %1615 = vst.msk [vmem:[#allocation2 + $0x290] sm:$0xff] %vm1532_vm4, %v1502_v63  ;;  %v1282_v17 = vadd.f32 %v8184_v10, %v1281_v11  ;;  %v2645_v42 = vld [vmem:[#allocation4 + $0x82] sm:$0xff] }
 0x1f9   : > { %3068 = vst.msk [vmem:[#allocation5 + $0x88] sm:$0xff] %vm1532_vm4, %v3052_v6  ;;  %v1505_v18 = vmax.f32 %v1287_v9, 0.0  ;;  %v2503_v20 = vpop.permute.xlu1 %2502  ;;  %2079 = vst.msk [vmem:[#allocation4 + $0x91] sm:$0xff] %vm1532_vm4, %v2077_v12  ;;  %v3027_v61 = vld [vmem:[#allocation4 + $0x82] sm:$0xff] }
 0x1fa   : > { %2080 = vst.msk [vmem:[#allocation4 + $0x99] sm:$0x3f] %vm2023_vm6, %v2078_v13  ;;  %v1943_v22 = vpack.c.bf16 %v1907_v16, %v1906_v14  ;;  %v1504_v23 = vmax.f32 %v1282_v17, 0.0  ;;  %v7075_v24 = vpop.f32.mrb[86].mxu0 }
 0x1fb   : > { %2551 = vst.msk [vmem:[#allocation5] sm:$0xff] %vm2550_vm8, %v2503_v20  ;;  %v1297_v25 = vadd.f32 %v8184_v10, %v7075_v24  ;;  %2963 = vrot.lane.b32.xlu0 %v2925_v21, %s7471_s14  ;;  %2260 = vrot.lane.b32.xlu1 %v2925_v21, %s7469_s13  ;;  %v1291_v26 = vpop.f32.mrb[87].mxu0  ;;  %v1725_v28 = vld [vmem:[#allocation2 + $0x280] ss:$2 sm:$0xff]  ;;  %v1837_v29 = vld [vmem:[#allocation2 + $0x281] ss:$2 sm:$0xff] }
 0x1fc   : > { %1618 = vst.msk [vmem:[#allocation2 + $0x2a8] sm:$0xff] %vm1532_vm4, %v1505_v18  ;;  %1971 = vst.msk [vmem:[#allocation3 + $0x98] sm:$0xff] %vm1532_vm4, %v1943_v22  ;;  %v1292_v27 = vadd.f32 %v8184_v10, %v1291_v26  ;;  %v1908_v39 = vmax.f32 %v1725_v28, %v1837_v29  ;;  %v2081_v1 = vld [vmem:[#allocation3 + $0x90] sm:$0x7f] }
 0x1fd   : > { %1617 = vst.msk [vmem:[#allocation2 + $0x2a0] sm:$0xff] %vm1532_vm4, %v1504_v23  ;;  %v1507_v30 = vmax.f32 %v1297_v25, 0.0  ;;  %v2247_v31 = vpop.permute.xlu1 %2246 }
 0x1fe   : > { %v1506_v32 = vmax.f32 %v1292_v27, 0.0  ;;  %2294 = vst.msk [vmem:[#allocation5 + $0x18] sm:$0xff] %vm2292_vm5, %v2247_v31  ;;  %v7078_v33 = vpop.f32.mrb[88].mxu0 }
 0x1ff   : > { %v1727_v35 = vld [vmem:[#allocation2 + $0x290] ss:$2 sm:$0xff]  ;;  %v1839_v36 = vld [vmem:[#allocation2 + $0x291] ss:$2 sm:$0xff]  ;;  %1620 = vst.msk [vmem:[#allocation2 + $0x2b8] sm:$0xff] %vm1532_vm4, %v1507_v30  ;;  %v1307_v37 = vadd.f32 %v8184_v10, %v7078_v33  ;;  %v1301_v38 = vpop.f32.mrb[89].mxu0 }
 0x200   : > { %v1909_v40 = vmax.f32 %v1727_v35, %v1839_v36  ;;  %1619 = vst.msk [vmem:[#allocation2 + $0x2b0] sm:$0xff] %vm1532_vm4, %v1506_v32  ;;  %v1302_v41 = vadd.f32 %v8184_v10, %v1301_v38  ;;  %v2646_v43 = vld [vmem:[#allocation4 + $0x8a] sm:$0xff] }
 0x201   : > { %v1509_v44 = vmax.f32 %v1307_v37, 0.0  ;;  %v2670_v45 = vpack.c.bf16 %v2646_v43, %v2645_v42  ;;  %v2773_v46 = vld [vmem:[#allocation4 + $0x90] sm:$0xff]  ;;  %v2902_v49 = vld [vmem:[#allocation4 + $0x99] sm:$0xff] }
 0x202   : > { %v2901_v47 = vld [vmem:[#allocation4 + $0x91] sm:$0xff]  ;;  %v1944_v50 = vpack.c.bf16 %v1909_v40, %v1908_v39  ;;  %v1508_v51 = vmax.f32 %v1302_v41, 0.0  ;;  %v7081_v52 = vpop.f32.mrb[90].mxu0 }
 0x203   : > { %v2774_v53 = vld [vmem:[#allocation4 + $0x98] sm:$0xff]  ;;  %v2926_v54 = vpack.c.bf16 %v2902_v49, %v2901_v47  ;;  %v2134_v55 = vld [vmem:[#allocation4 + $0x90] sm:$0xff]  ;;  %1622 = vst.msk [vmem:[#allocation2 + $0x2c8] sm:$0xff] %vm1532_vm4, %v1509_v44  ;;  %v1317_v57 = vadd.f32 %v8184_v10, %v7081_v52  ;;  %2709 = vrot.lane.b32.xlu0 %v2670_v45, %s7469_s13  ;;  %2389 = vrot.lane.b32.xlu1 %v2670_v45, %s7470_s30  ;;  %v1311_v58 = vpop.f32.mrb[91].mxu0 }
 0x204   : > { %v2135_v56 = vld [vmem:[#allocation4 + $0x98] sm:$0xff]  ;;  %v3028_v62 = vld [vmem:[#allocation4 + $0x8a] sm:$0xff]  ;;  %1972 = vst.msk [vmem:[#allocation3 + $0xa0] sm:$0xff] %vm1532_vm4, %v1944_v50  ;;  %1621 = vst.msk [vmem:[#allocation2 + $0x2c0] sm:$0xff] %vm1532_vm4, %v1508_v51  ;;  %v1312_v63 = vadd.f32 %v8184_v10, %v1311_v58  ;;  %v2798_v12 = vpack.c.bf16 %v2774_v53, %v2773_v46 }
 0x205   : > { %v2157_v60 = vpack.c.bf16 %v2135_v56, %v2134_v55  ;;  %v2082_v2 = vld [vmem:[#allocation3 + $0x98] sm:$0x7f]  ;;  %2623 = vst.msk [vmem:[#allocation5 + $0xc8] sm:$0xff] %vm1532_vm4, %v2926_v54  ;;  %v3053_v3 = vpack.c.bf16 %v3028_v62, %v3027_v61  ;;  %v1729_v6 = vld [vmem:[#allocation2 + $0x2a0] ss:$2 sm:$0xff]  ;;  %v1511_v8 = vmax.f32 %v1317_v57, 0.0  ;;  %v2696_v9 = vpop.permute.xlu0 %2695 }
 0x206   : > { %v1841_v7 = vld [vmem:[#allocation2 + $0x2a1] ss:$2 sm:$0xff]  ;;  %v2824_v11 = vpop.permute.xlu1 %2823  ;;  %v2083_v13 = vmax.bf16 %v2082_v2, %v2081_v1  ;;  %v1510_v14 = vmax.f32 %v1312_v63, 0.0  ;;  %2743 = vst.msk [vmem:[#allocation5 + $0x8] sm:$0xff] %vm2292_vm5, %v2696_v9  ;;  %v7084_v16 = vpop.f32.mrb[92].mxu0  ;;  %v2647_v47 = vld [vmem:[#allocation4 + $0x92] sm:$0xff] }
 0x207   : > { %2173 = vst.msk [vmem:[#allocation5 + $0xd8] sm:$0xff] %vm1532_vm4, %v2157_v60  ;;  %3069 = vst.msk [vmem:[#allocation5 + $0xa0] sm:$0xff] %vm1532_vm4, %v3053_v3  ;;  %v1731_v17 = vld [vmem:[#allocation2 + $0x2b0] ss:$2 sm:$0xff]  ;;  %v1843_v18 = vld [vmem:[#allocation2 + $0x2b1] ss:$2 sm:$0xff]  ;;  %v1327_v20 = vadd.f32 %v8184_v10, %v7084_v16  ;;  %2837 = vrot.lane.b32.xlu0 %v2798_v12, %s7470_s30  ;;  %2518 = vrot.lane.b32.xlu1 %v2798_v12, %s7471_s14  ;;  %v1910_v24 = vmax.f32 %v1729_v6, %v1841_v7 }
 0x208   : > { %1624 = vst.msk [vmem:[#allocation2 + $0x2d8] sm:$0xff] %vm1532_vm4, %v1511_v8  ;;  %v1321_v21 = vpop.f32.mrb[93].mxu0  ;;  %v2084_v22 = vunpack.c.l.bf16 %v2083_v13  ;;  %v2085_v23 = vunpack.c.h.bf16 %v2083_v13  ;;  %v1911_v25 = vmax.f32 %v1731_v17, %v1843_v18  ;;  %1623 = vst.msk [vmem:[#allocation2 + $0x2d0] sm:$0xff] %vm1532_vm4, %v1510_v14  ;;  %v3029_v6 = vld [vmem:[#allocation4 + $0x92] sm:$0xff]  ;;  %v3079_v9 = vld [vmem:[#allocation5] sm:$0xff] }
 0x209   : > { %2871 = vst.msk [vmem:[#allocation5 + $0x8] sm:$0xff] %vm2421_vm7, %v2824_v11  ;;  %v1322_v26 = vadd.f32 %v8184_v10, %v1321_v21  ;;  %v1513_v27 = vmax.f32 %v1327_v20, 0.0  ;;  %v2952_v28 = vpop.permute.xlu0 %2951 }
 0x20a   : > { %v2376_v29 = vpop.permute.xlu1 %2375  ;;  %2086 = vst.msk [vmem:[#allocation4 + $0xa1] sm:$0xff] %vm1532_vm4, %v2084_v22  ;;  %v1945_v30 = vpack.c.bf16 %v1911_v25, %v1910_v24  ;;  %v7087_v32 = vpop.f32.mrb[94].mxu0 }
 0x20b   : > { %2087 = vst.msk [vmem:[#allocation4 + $0xa9] sm:$0x3f] %vm2023_vm6, %v2085_v23  ;;  %v1512_v31 = vmax.f32 %v1322_v26, 0.0  ;;  %v1337_v33 = vadd.f32 %v8184_v10, %v7087_v32  ;;  %2965 = vrot.lane.b32.xlu0 %v2926_v54, %s7471_s14  ;;  %2262 = vrot.lane.b32.xlu1 %v2926_v54, %s7469_s13  ;;  %v1331_v35 = vpop.f32.mrb[95].mxu0  ;;  %v1733_v37 = vld [vmem:[#allocation2 + $0x2c0] ss:$2 sm:$0xff] }
 0x20c   : > { %2999 = vst.msk [vmem:[#allocation5 + $0x8] sm:$0xff] %vm2550_vm8, %v2952_v28  ;;  %v1332_v36 = vadd.f32 %v8184_v10, %v1331_v35  ;;  %v1845_v38 = vld [vmem:[#allocation2 + $0x2c1] ss:$2 sm:$0xff] }
 0x20d   : > { %2423 = vst.msk [vmem:[#allocation5 + $0x18] sm:$0xff] %vm2421_vm7, %v2376_v29  ;;  %v1515_v39 = vmax.f32 %v1337_v33, 0.0  ;;  %v1912_v49 = vmax.f32 %v1733_v37, %v1845_v38  ;;  %v2088_v14 = vld [vmem:[#allocation3 + $0xa0] sm:$0x7f] }
 0x20e   : > { %1626 = vst.msk [vmem:[#allocation2 + $0x2e8] sm:$0xff] %vm1532_vm4, %v1513_v27  ;;  %1973 = vst.msk [vmem:[#allocation3 + $0xa8] sm:$0xff] %vm1532_vm4, %v1945_v30  ;;  %v2505_v40 = vpop.permute.xlu1 %2504  ;;  %v1514_v41 = vmax.f32 %v1332_v36, 0.0  ;;  %v7090_v42 = vpop.f32.mrb[96].mxu0 }
 0x20f   : > { %1625 = vst.msk [vmem:[#allocation2 + $0x2e0] sm:$0xff] %vm1532_vm4, %v1512_v31  ;;  %v1735_v43 = vld [vmem:[#allocation2 + $0x2d0] ss:$2 sm:$0xff]  ;;  %v1847_v44 = vld [vmem:[#allocation2 + $0x2d1] ss:$2 sm:$0xff]  ;;  %1628 = vst.msk [vmem:[#allocation2 + $0x2f8] sm:$0xff] %vm1532_vm4, %v1515_v39  ;;  %v1347_v45 = vadd.f32 %v8184_v10, %v7090_v42 }
 0x210   : > { %2552 = vst.msk [vmem:[#allocation5 + $0x18] sm:$0xff] %vm2550_vm8, %v2505_v40  ;;  %v1341_v46 = vpop.f32.mrb[97].mxu0  ;;  %v1913_v50 = vmax.f32 %v1735_v43, %v1847_v44 }
 0x211   : > { %1627 = vst.msk [vmem:[#allocation2 + $0x2f0] sm:$0xff] %vm1532_vm4, %v1514_v41  ;;  %v1342_v51 = vadd.f32 %v8184_v10, %v1341_v46  ;;  %v2648_v52 = vld [vmem:[#allocation4 + $0x9a] sm:$0xff]  ;;  %v1517_v55 = vmax.f32 %v1347_v45, 0.0 }
 0x212   : > { %v2775_v53 = vld [vmem:[#allocation4 + $0xa0] sm:$0xff]  ;;  %v2776_v54 = vld [vmem:[#allocation4 + $0xa8] sm:$0xff]  ;;  %v2249_v56 = vpop.permute.xlu1 %2248  ;;  %v2671_v58 = vpack.c.bf16 %v2648_v52, %v2647_v47  ;;  %v1946_v63 = vpack.c.bf16 %v1913_v50, %v1912_v49  ;;  %v7093_v2 = vpop.f32.mrb[98].mxu0  ;;  %v8389_v41 = vld [vmem:[#allocation13] ss:$0 sm:$0xff] }
 0x213   : > { %v3080_v57 = vld [vmem:[#allocation5 + $0x8] sm:$0xff]  ;;  %v2799_v60 = vpack.c.bf16 %v2776_v54, %v2775_v53  ;;  %v2903_v61 = vld [vmem:[#allocation4 + $0xa1] sm:$0xff]  ;;  %v1516_v1 = vmax.f32 %v1342_v51, 0.0  ;;  %2295 = vst.msk [vmem:[#allocation5 + $0x30] sm:$0xff] %vm2292_vm5, %v2249_v56  ;;  %v1357_v8 = vadd.f32 %v8184_v10, %v7093_v2  ;;  %v1351_v11 = vpop.f32.mrb[99].mxu0 }
 0x214   : > { %v2904_v62 = vld [vmem:[#allocation4 + $0xa9] sm:$0xff]  ;;  %3358 = vmatprep.mubr.bf16.mxu1 %v3080_v57  ;;  %v3030_v7 = vld [vmem:[#allocation4 + $0x9a] sm:$0xff]  ;;  %1630 = vst.msk [vmem:[#allocation2 + $0x308] sm:$0xff] %vm1532_vm4, %v1517_v55  ;;  %2711 = vrot.lane.b32.xlu0 %v2671_v58, %s7469_s13  ;;  %1974 = vst.msk [vmem:[#allocation3 + $0xb0] sm:$0xff] %vm1532_vm4, %v1946_v63  ;;  %v1352_v13 = vadd.f32 %v8184_v10, %v1351_v11 }
 0x215   : > { %v2927_v3 = vpack.c.bf16 %v2904_v62, %v2903_v61  ;;  %2391 = vrot.lane.b32.xlu1 %v2671_v58, %s7470_s30  ;;  %2174 = vst.msk [vmem:[#allocation5 + $0xf0] sm:$0xff] %vm1532_vm4, %v2799_v60  ;;  %v3054_v12 = vpack.c.bf16 %v3030_v7, %v3029_v6  ;;  %1629 = vst.msk [vmem:[#allocation2 + $0x300] sm:$0xff] %vm1532_vm4, %v1516_v1  ;;  %3359 = vmatmul.mubr.bf16.vlgmr.msra.gmra.mrb[0].mxu1 %v3079_v9  ;;  %v2089_v16 = vld [vmem:[#allocation3 + $0xa8] sm:$0x7f]  ;;  %v1519_v20 = vmax.f32 %v1357_v8, 0.0  ;;  %v2698_v21 = vpop.permute.xlu0 %2697 }
 0x216   : > { %v1737_v17 = vld [vmem:[#allocation2 + $0x2e0] ss:$2 sm:$0xff]  ;;  %v1849_v18 = vld [vmem:[#allocation2 + $0x2e1] ss:$2 sm:$0xff]  ;;  %v2378_v22 = vpop.permute.xlu1 %2377  ;;  %v2090_v23 = vmax.bf16 %v2089_v16, %v2088_v14  ;;  %7113 = vmatpush3.bf16.msra.mxu1 %v8304_v5  ;;  %v1518_v24 = vmax.f32 %v1352_v13, 0.0  ;;  %2744 = vst.msk [vmem:[#allocation5 + $0x20] sm:$0xff] %vm2292_vm5, %v2698_v21 }
 0x217   : > { %2624 = vst.msk [vmem:[#allocation5 + $0xe0] sm:$0xff] %vm1532_vm4, %v2927_v3  ;;  %3070 = vst.msk [vmem:[#allocation5 + $0xb8] sm:$0xff] %vm1532_vm4, %v3054_v12  ;;  %v7096_v25 = vpop.f32.mrb[100].mxu0  ;;  %v1914_v31 = vmax.f32 %v1737_v17, %v1849_v18  ;;  %v2649_v56 = vld [vmem:[#allocation4 + $0xa2] sm:$0xff] }
 0x218   : > { %2424 = vst.msk [vmem:[#allocation5 + $0x30] sm:$0xff] %vm2421_vm7, %v2378_v22  ;;  %v1739_v26 = vld [vmem:[#allocation2 + $0x2f0] ss:$2 sm:$0xff]  ;;  %v1851_v27 = vld [vmem:[#allocation2 + $0x2f1] ss:$2 sm:$0xff]  ;;  %v1367_v28 = vadd.f32 %v8184_v10, %v7096_v25  ;;  %2839 = vrot.lane.b32.xlu0 %v2799_v60, %s7470_s30  ;;  %v1361_v29 = vpop.f32.mrb[101].mxu0  ;;  %v2091_v5 = vunpack.c.l.bf16 %v2090_v23  ;;  %v2092_v30 = vunpack.c.h.bf16 %v2090_v23 }
 0x219   : > { %1632 = vst.msk [vmem:[#allocation2 + $0x318] sm:$0xff] %vm1532_vm4, %v1519_v20  ;;  %2520 = vrot.lane.b32.xlu1 %v2799_v60, %s7471_s14  ;;  %v1915_v32 = vmax.f32 %v1739_v26, %v1851_v27  ;;  %1631 = vst.msk [vmem:[#allocation2 + $0x310] sm:$0xff] %vm1532_vm4, %v1518_v24  ;;  %v1362_v33 = vadd.f32 %v8184_v10, %v1361_v29  ;;  %v2826_v36 = vpop.permute.xlu0 %2825  ;;  %v3031_v13 = vld [vmem:[#allocation4 + $0xa2] sm:$0xff] }
 0x21a   : > { %v1521_v35 = vmax.f32 %v1367_v28, 0.0  ;;  %v2507_v37 = vpop.permute.xlu1 %2506  ;;  %2093 = vst.msk [vmem:[#allocation4 + $0xb1] sm:$0xff] %vm1532_vm4, %v2091_v5  ;;  %v7099_v40 = vpop.f32.mrb[102].mxu0 }
 0x21b   : > { %2094 = vst.msk [vmem:[#allocation4 + $0xb9] sm:$0x3f] %vm2023_vm6, %v2092_v30  ;;  %v1947_v38 = vpack.c.bf16 %v1915_v32, %v1914_v31  ;;  %v1520_v39 = vmax.f32 %v1362_v33, 0.0  ;;  %v1377_v10 = vadd.f32 %v8389_v41, %v7099_v40  ;;  %v1371_v42 = vpop.f32.mrb[103].mxu0  ;;  %v2095_v21 = vld [vmem:[#allocation3 + $0xb0] sm:$0x7f] }
 0x21c   : > { %2872 = vst.msk [vmem:[#allocation5 + $0x20] sm:$0xff] %vm2421_vm7, %v2826_v36  ;;  %2967 = vrot.lane.b32.xlu0 %v2927_v3, %s7471_s14  ;;  %v1372_v43 = vadd.f32 %v8389_v41, %v1371_v42  ;;  %v1741_v44 = vld [vmem:[#allocation2 + $0x300] ss:$2 sm:$0xff]  ;;  %v1853_v45 = vld [vmem:[#allocation2 + $0x301] ss:$2 sm:$0xff] }
 0x21d   : > { %2553 = vst.msk [vmem:[#allocation5 + $0x30] sm:$0xff] %vm2550_vm8, %v2507_v37  ;;  %2264 = vrot.lane.b32.xlu1 %v2927_v3, %s7469_s13  ;;  %v1523_v46 = vmax.f32 %v1377_v10, 0.0  ;;  %v2954_v47 = vpop.permute.xlu0 %2953  ;;  %v1916_v57 = vmax.f32 %v1741_v44, %v1853_v45 }
 0x21e   : > { %1634 = vst.msk [vmem:[#allocation2 + $0x328] sm:$0xff] %vm1532_vm4, %v1521_v35  ;;  %1975 = vst.msk [vmem:[#allocation3 + $0xb8] sm:$0xff] %vm1532_vm4, %v1947_v38  ;;  %v2251_v49 = vpop.permute.xlu1 %2250  ;;  %v1522_v50 = vmax.f32 %v1372_v43, 0.0  ;;  %v7102_v51 = vpop.f32.mrb[104].mxu0  ;;  %v3082_v35 = vld [vmem:[#allocation5 + $0x18] sm:$0xff] }
 0x21f   : > { %1633 = vst.msk [vmem:[#allocation2 + $0x320] sm:$0xff] %vm1532_vm4, %v1520_v39  ;;  %1636 = vst.msk [vmem:[#allocation2 + $0x338] sm:$0xff] %vm1532_vm4, %v1523_v46  ;;  %v1387_v54 = vadd.f32 %v8389_v41, %v7102_v51  ;;  %v1381_v55 = vpop.f32.mrb[105].mxu0 }
 0x220   : > { %3000 = vst.msk [vmem:[#allocation5 + $0x20] sm:$0xff] %vm2550_vm8, %v2954_v47  ;;  %v1743_v52 = vld [vmem:[#allocation2 + $0x310] ss:$2 sm:$0xff]  ;;  %v1855_v53 = vld [vmem:[#allocation2 + $0x311] ss:$2 sm:$0xff]  ;;  %v1382_v60 = vadd.f32 %v8389_v41, %v1381_v55 }
 0x221   : > { %2296 = vst.msk [vmem:[#allocation5 + $0x48] sm:$0xff] %vm2292_vm5, %v2251_v49  ;;  %v1917_v58 = vmax.f32 %v1743_v52, %v1855_v53  ;;  %v2650_v61 = vld [vmem:[#allocation4 + $0xaa] sm:$0xff]  ;;  %v1525_v1 = vmax.f32 %v1387_v54, 0.0 }
 0x222   : > { %1635 = vst.msk [vmem:[#allocation2 + $0x330] sm:$0xff] %vm1532_vm4, %v1522_v50  ;;  %v2777_v62 = vld [vmem:[#allocation4 + $0xb0] sm:$0xff]  ;;  %v2778_v63 = vld [vmem:[#allocation4 + $0xb8] sm:$0xff]  ;;  %v2672_v2 = vpack.c.bf16 %v2650_v61, %v2649_v56  ;;  %v1524_v9 = vmax.f32 %v1382_v60, 0.0  ;;  %v7105_v11 = vpop.f32.mrb[106].mxu0 }
 0x223   : > { %v2800_v3 = vpack.c.bf16 %v2778_v63, %v2777_v62  ;;  %v2905_v6 = vld [vmem:[#allocation4 + $0xb1] sm:$0xff]  ;;  %v2906_v7 = vld [vmem:[#allocation4 + $0xb9] sm:$0xff]  ;;  %v1948_v8 = vpack.c.bf16 %v1917_v58, %v1916_v57  ;;  %1638 = vst.msk [vmem:[#allocation2 + $0x348] sm:$0xff] %vm1532_vm4, %v1525_v1  ;;  %v1397_v16 = vadd.f32 %v8389_v41, %v7105_v11  ;;  %v1391_v17 = vpop.f32.mrb[107].mxu0 }
 0x224   : > { %v2928_v12 = vpack.c.bf16 %v2906_v7, %v2905_v6  ;;  %v3032_v14 = vld [vmem:[#allocation4 + $0xaa] sm:$0xff]  ;;  %2713 = vrot.lane.b32.xlu0 %v2672_v2, %s7469_s13  ;;  %2393 = vrot.lane.b32.xlu1 %v2672_v2, %s7470_s30  ;;  %1637 = vst.msk [vmem:[#allocation2 + $0x340] sm:$0xff] %vm1532_vm4, %v1524_v9  ;;  %v1392_v20 = vadd.f32 %v8389_v41, %v1391_v17  ;;  %v2651_v61 = vld [vmem:[#allocation4 + $0xb2] sm:$0xff] }
 0x225   : > { %2175 = vst.msk [vmem:[#allocation5 + $0x108] sm:$0xff] %vm1532_vm4, %v2800_v3  ;;  %v3055_v18 = vpack.c.bf16 %v3032_v14, %v3031_v13  ;;  %1976 = vst.msk [vmem:[#allocation3 + $0xc0] sm:$0xff] %vm1532_vm4, %v1948_v8  ;;  %v2096_v22 = vld [vmem:[#allocation3 + $0xb8] sm:$0x7f]  ;;  %v1527_v25 = vmax.f32 %v1397_v16, 0.0  ;;  %v2700_v26 = vpop.permute.xlu0 %2699  ;;  %v2380_v27 = vpop.permute.xlu1 %2379 }
 0x226   : > { %2625 = vst.msk [vmem:[#allocation5 + $0xf8] sm:$0xff] %vm1532_vm4, %v2928_v12  ;;  %v1745_v23 = vld [vmem:[#allocation2 + $0x320] ss:$2 sm:$0xff]  ;;  %v1857_v24 = vld [vmem:[#allocation2 + $0x321] ss:$2 sm:$0xff]  ;;  %v2097_v29 = vmax.bf16 %v2096_v22, %v2095_v21  ;;  %v1526_v5 = vmax.f32 %v1392_v20, 0.0 }
 0x227   : > { %v3083_v28 = vld [vmem:[#allocation5 + $0x20] sm:$0xff]  ;;  %3071 = vst.msk [vmem:[#allocation5 + $0xd0] sm:$0xff] %vm1532_vm4, %v3055_v18  ;;  %v7108_v30 = vpop.f32.mrb[108].mxu0  ;;  %1640 = vst.msk [vmem:[#allocation2 + $0x358] sm:$0xff] %vm1532_vm4, %v1527_v25  ;;  %v1918_v39 = vmax.f32 %v1745_v23, %v1857_v24 }
 0x228   : > { %2745 = vst.msk [vmem:[#allocation5 + $0x38] sm:$0xff] %vm2292_vm5, %v2700_v26  ;;  %3366 = vmatprep.mubr.bf16.mxu1 %v3083_v28  ;;  %v1407_v33 = vadd.f32 %v8389_v41, %v7108_v30  ;;  %2841 = vrot.lane.b32.xlu0 %v2800_v3, %s7470_s30  ;;  %v1401_v36 = vpop.f32.mrb[109].mxu0  ;;  %v2098_v37 = vunpack.c.l.bf16 %v2097_v29  ;;  %v2099_v38 = vunpack.c.h.bf16 %v2097_v29  ;;  %v7257_v24 = vld [vmem:[%s9418_s3 + $0x88] sm:$0xff]  }
 0x229   : > { %2425 = vst.msk [vmem:[#allocation5 + $0x48] sm:$0xff] %vm2421_vm7, %v2380_v27  ;;  %v1747_v31 = vld [vmem:[#allocation2 + $0x330] ss:$2 sm:$0xff]  ;;  %v1859_v32 = vld [vmem:[#allocation2 + $0x331] ss:$2 sm:$0xff]  ;;  %2522 = vrot.lane.b32.xlu1 %v2800_v3, %s7471_s14  ;;  %3367 = vmatmul.mubr.bf16.gmra.mrb[4].mxu1 %v3082_v35  ;;  %v1402_v10 = vadd.f32 %v8389_v41, %v1401_v36  ;;  %v2828_v43 = vpop.permute.xlu0 %2827  ;;  %v2509_v44 = vpop.permute.xlu1 %2508 }
 0x22a   : > { %v1919_v40 = vmax.f32 %v1747_v31, %v1859_v32  ;;  %1639 = vst.msk [vmem:[#allocation2 + $0x350] sm:$0xff] %vm1532_vm4, %v1526_v5  ;;  %v1529_v42 = vmax.f32 %v1407_v33, 0.0  ;;  %2100 = vst.msk [vmem:[#allocation4 + $0xc1] sm:$0xff] %vm1532_vm4, %v2098_v37  ;;  %v7111_v47 = vpop.f32.mrb[110].mxu0  ;;  %v3085_v27 = vld [vmem:[#allocation5 + $0x30] sm:$0xff]  ;;  %7114 = vmatprep.subr.bf16.mxu1 %v7257_v24 }
 0x22b   : > { %2101 = vst.msk [vmem:[#allocation4 + $0xc9] sm:$0x3f] %vm2023_vm6, %v2099_v38  ;;  %v1528_v46 = vmax.f32 %v1402_v10, 0.0  ;;  %v1417_v49 = vadd.f32 %v8389_v41, %v7111_v47  ;;  %v1411_v50 = vpop.f32.mrb[111].mxu0  ;;  %v1749_v52 = vld [vmem:[#allocation2 + $0x340] ss:$2 sm:$0xff]  ;;  %7115 = vmatpush3.bf16.msra.mxu1 %v7257_v24 }
 0x22c   : > { %v1949_v45 = vpack.c.bf16 %v1919_v40, %v1918_v39  ;;  %2873 = vst.msk [vmem:[#allocation5 + $0x38] sm:$0xff] %vm2421_vm7, %v2828_v43  ;;  %2969 = vrot.lane.b32.xlu0 %v2928_v12, %s7471_s14  ;;  %v1412_v51 = vadd.f32 %v8389_v41, %v1411_v50  ;;  %v1861_v53 = vld [vmem:[#allocation2 + $0x341] ss:$2 sm:$0xff] }
 0x22d   : > { %2554 = vst.msk [vmem:[#allocation5 + $0x48] sm:$0xff] %vm2550_vm8, %v2509_v44  ;;  %2266 = vrot.lane.b32.xlu1 %v2928_v12, %s7469_s13  ;;  %v1531_v54 = vmax.f32 %v1417_v49, 0.0  ;;  %v2956_v55 = vpop.permute.xlu0 %2955  ;;  %v2253_v56 = vpop.permute.xlu1 %2252  ;;  %v1920_v62 = vmax.f32 %v1749_v52, %v1861_v53  ;;  %v2102_v12 = vld [vmem:[#allocation3 + $0xc0] sm:$0x7f] }
 0x22e   : > { %1642 = vst.msk [vmem:[#allocation2 + $0x368] sm:$0xff] %vm1532_vm4, %v1529_v42  ;;  %1977 = vst.msk [vmem:[#allocation3 + $0xc8] sm:$0xff] %vm1532_vm4, %v1949_v45  ;;  %v1530_v57 = vmax.f32 %v1412_v51, 0.0 }
 0x22f   : > { %1641 = vst.msk [vmem:[#allocation2 + $0x360] sm:$0xff] %vm1532_vm4, %v1528_v46  ;;  %1644 = vst.msk [vmem:[#allocation2 + $0x378] sm:$0xff] %vm1532_vm4, %v1531_v54 }
 0x230   : > { %3001 = vst.msk [vmem:[#allocation5 + $0x38] sm:$0xff] %vm2550_vm8, %v2956_v55 }
 0x231   : > { %2297 = vst.msk [vmem:[#allocation5 + $0x60] sm:$0xff] %vm2292_vm5, %v2253_v56  ;;  %v1751_v58 = vld [vmem:[#allocation2 + $0x350] ss:$2 sm:$0xff]  ;;  %v1863_v60 = vld [vmem:[#allocation2 + $0x351] ss:$2 sm:$0xff]  ;;  %v2779_v1 = vld [vmem:[#allocation4 + $0xc0] sm:$0xff] }
 0x232   : > { %v1921_v63 = vmax.f32 %v1751_v58, %v1863_v60  ;;  %1643 = vst.msk [vmem:[#allocation2 + $0x370] sm:$0xff] %vm1532_vm4, %v1530_v57  ;;  %v2652_v41 = vld [vmem:[#allocation4 + $0xba] sm:$0xff]  ;;  %v2780_v2 = vld [vmem:[#allocation4 + $0xc8] sm:$0xff] }
 0x233   : > { %v2673_v3 = vpack.c.bf16 %v2652_v41, %v2651_v61  ;;  %v2801_v6 = vpack.c.bf16 %v2780_v2, %v2779_v1  ;;  %v2907_v7 = vld [vmem:[#allocation4 + $0xc1] sm:$0xff]  ;;  %v2908_v8 = vld [vmem:[#allocation4 + $0xc9] sm:$0xff] }
 0x234   : > { %v1950_v9 = vpack.c.bf16 %v1921_v63, %v1920_v62  ;;  %v2929_v11 = vpack.c.bf16 %v2908_v8, %v2907_v7  ;;  %v2653_v35 = vld [vmem:[#allocation4 + $0xc2] sm:$0xff]  ;;  %v3088_v51 = vld [vmem:[#allocation5 + $0x48] sm:$0xff] }
 0x235   : > { %2715 = vrot.lane.b32.xlu0 %v2673_v3, %s7469_s13  ;;  %2395 = vrot.lane.b32.xlu1 %v2673_v3, %s7470_s30  ;;  %v2103_v13 = vld [vmem:[#allocation3 + $0xc8] sm:$0x7f]  ;;  %2176 = vst.msk [vmem:[#allocation5 + $0x120] sm:$0xff] %vm1532_vm4, %v2801_v6  ;;  %3072 = vst.msk [vmem:[#allocation5 + $0xe8] sm:$0xff] %vm1532_vm4, %v2673_v3  ;;  %v2702_v18 = vpop.permute.xlu0 %2701  ;;  %v2382_v20 = vpop.permute.xlu1 %2381 }
 0x236   : > { %1978 = vst.msk [vmem:[#allocation3 + $0xd0] sm:$0xff] %vm1532_vm4, %v1950_v9  ;;  %v2104_v14 = vmax.bf16 %v2103_v13, %v2102_v12  ;;  %2626 = vst.msk [vmem:[#allocation5 + $0x110] sm:$0xff] %vm1532_vm4, %v2929_v11  ;;  %v1753_v16 = vld [vmem:[#allocation2 + $0x360] ss:$2 sm:$0xff]  ;;  %v1865_v17 = vld [vmem:[#allocation2 + $0x361] ss:$2 sm:$0xff] }
 0x237   : > { %v3086_v21 = vld [vmem:[#allocation5 + $0x38] sm:$0xff]  ;;  %2746 = vst.msk [vmem:[#allocation5 + $0x50] sm:$0xff] %vm2292_vm5, %v2702_v18  ;;  %v1922_v28 = vmax.f32 %v1753_v16, %v1865_v17  ;;  %v2788_v17 = vld [vmem:[#allocation4 + $0x108] sm:$0xff]  ;;  %v2210_v18 = vld [vmem:[#allocation4 + $0xf1] sm:$0xff] }
 0x238   : > { %2426 = vst.msk [vmem:[#allocation5 + $0x60] sm:$0xff] %vm2421_vm7, %v2382_v20  ;;  %3374 = vmatprep.mubr.bf16.mxu1 %v3086_v21  ;;  %v2105_v22 = vunpack.c.l.bf16 %v2104_v14  ;;  %v2106_v23 = vunpack.c.h.bf16 %v2104_v14  ;;  %v2787_v16 = vld [vmem:[#allocation4 + $0x100] sm:$0xff] }
 0x239   : > { %v1755_v25 = vld [vmem:[#allocation2 + $0x370] ss:$2 sm:$0xff]  ;;  %v1867_v26 = vld [vmem:[#allocation2 + $0x371] ss:$2 sm:$0xff]  ;;  %2843 = vrot.lane.b32.xlu0 %v2801_v6, %s7470_s30  ;;  %2524 = vrot.lane.b32.xlu1 %v2801_v6, %s7471_s14  ;;  %v2830_v5 = vpop.permute.xlu0 %2829  ;;  %v2511_v30 = vpop.permute.xlu1 %2510 }
 0x23a   : > { %v1923_v29 = vmax.f32 %v1755_v25, %v1867_v26  ;;  %3375 = vmatmul.mubr.bf16.gmra.mrb[8].mxu1 %v3085_v27  ;;  %2107 = vst.msk [vmem:[#allocation4 + $0xd1] sm:$0xff] %vm1532_vm4, %v2105_v22  ;;  %v2211_v20 = vld [vmem:[#allocation4 + $0xf9] sm:$0xff] }
 0x23b   : > { %2108 = vst.msk [vmem:[#allocation4 + $0xd9] sm:$0x3f] %vm2023_vm6, %v2106_v23  ;;  %v2805_v23 = vpack.c.bf16 %v2788_v17, %v2787_v16  ;;  %v2227_v24 = vpack.c.bf16 %v2211_v20, %v2210_v18 }
 0x23c   : > { %v1951_v31 = vpack.c.bf16 %v1923_v29, %v1922_v28  ;;  %2874 = vst.msk [vmem:[#allocation5 + $0x50] sm:$0xff] %vm2421_vm7, %v2830_v5  ;;  %v2789_v29 = vld [vmem:[#allocation4 + $0x110] sm:$0xff]  ;;  %v2790_v5 = vld [vmem:[#allocation4 + $0x118] sm:$0xff] }
 0x23d   : > { %2555 = vst.msk [vmem:[#allocation5 + $0x60] sm:$0xff] %vm2550_vm8, %v2511_v30  ;;  %2971 = vrot.lane.b32.xlu0 %v2929_v11, %s7471_s14  ;;  %2268 = vrot.lane.b32.xlu1 %v2929_v11, %s7469_s13  ;;  %v2958_v32 = vpop.permute.xlu0 %2957  ;;  %v2255_v33 = vpop.permute.xlu1 %2254  ;;  %v2109_v44 = vld [vmem:[#allocation3 + $0xd0] sm:$0x7f] }
 0x23e   : > { %1979 = vst.msk [vmem:[#allocation3 + $0xd8] sm:$0xff] %vm1532_vm4, %v1951_v31 }
 0x23f   : > { %3002 = vst.msk [vmem:[#allocation5 + $0x50] sm:$0xff] %vm2550_vm8, %v2958_v32  ;;  %v2806_v32 = vpack.c.bf16 %v2790_v5, %v2789_v29 }
 0x240   : > { %2298 = vst.msk [vmem:[#allocation5 + $0x78] sm:$0xff] %vm2292_vm5, %v2255_v33  ;;  %v2917_v33 = vld [vmem:[#allocation4 + $0x111] sm:$0xff] }
 0x241   : > { %v2654_v36 = vld [vmem:[#allocation4 + $0xca] sm:$0xff] }
 0x242   : > { %v2781_v37 = vld [vmem:[#allocation4 + $0xd0] sm:$0xff]  ;;  %v2782_v38 = vld [vmem:[#allocation4 + $0xd8] sm:$0xff]  ;;  %v2674_v39 = vpack.c.bf16 %v2654_v36, %v2653_v35 }
 0x243   : > { %v2802_v40 = vpack.c.bf16 %v2782_v38, %v2781_v37  ;;  %v2909_v10 = vld [vmem:[#allocation4 + $0xd1] sm:$0xff]  ;;  %v2910_v42 = vld [vmem:[#allocation4 + $0xd9] sm:$0xff] }
 0x244   : > { %v2930_v43 = vpack.c.bf16 %v2910_v42, %v2909_v10  ;;  %2717 = vrot.lane.b32.xlu0 %v2674_v39, %s7469_s13  ;;  %2397 = vrot.lane.b32.xlu1 %v2674_v39, %s7470_s30  ;;  %3073 = vst.msk [vmem:[#allocation5 + $0x100] sm:$0xff] %vm1532_vm4, %v2674_v39  ;;  %v2655_v58 = vld [vmem:[#allocation4 + $0xd2] sm:$0xff]  ;;  %v3091_v12 = vld [vmem:[#allocation5 + $0x60] sm:$0xff] }
 0x245   : > { %2177 = vst.msk [vmem:[#allocation5 + $0x138] sm:$0xff] %vm1532_vm4, %v2802_v40  ;;  %v2110_v45 = vld [vmem:[#allocation3 + $0xd8] sm:$0x7f]  ;;  %v2704_v47 = vpop.permute.xlu0 %2703  ;;  %v2384_v49 = vpop.permute.xlu1 %2383 }
 0x246   : > { %2627 = vst.msk [vmem:[#allocation5 + $0x128] sm:$0xff] %vm1532_vm4, %v2930_v43  ;;  %v2111_v46 = vmax.bf16 %v2110_v45, %v2109_v44  ;;  %v3089_v50 = vld [vmem:[#allocation5 + $0x50] sm:$0xff] }
 0x247   : > { %2747 = vst.msk [vmem:[#allocation5 + $0x68] sm:$0xff] %vm2292_vm5, %v2704_v47  ;;  %3382 = vmatprep.mubr.bf16.mxu1 %v3089_v50  ;;  %v2918_v35 = vld [vmem:[#allocation4 + $0x119] sm:$0xff] }
 0x248   : > { %2427 = vst.msk [vmem:[#allocation5 + $0x78] sm:$0xff] %vm2421_vm7, %v2384_v49  ;;  %2845 = vrot.lane.b32.xlu0 %v2802_v40, %s7470_s30  ;;  %v2112_v52 = vunpack.c.l.bf16 %v2111_v46  ;;  %v2113_v53 = vunpack.c.h.bf16 %v2111_v46  ;;  %2526 = vrot.lane.b32.xlu1 %v2802_v40, %s7471_s14 }
 0x249   : > { %3383 = vmatmul.mubr.bf16.gmra.mrb[12].mxu1 %v3088_v51  ;;  %v2832_v54 = vpop.permute.xlu0 %2831  ;;  %v2513_v55 = vpop.permute.xlu1 %2512 }
 0x24a   : > { %2114 = vst.msk [vmem:[#allocation4 + $0xe1] sm:$0xff] %vm1532_vm4, %v2112_v52 }
 0x24b   : > { %2115 = vst.msk [vmem:[#allocation4 + $0xe9] sm:$0x3f] %vm2023_vm6, %v2113_v53 }
 0x24c   : > { %2875 = vst.msk [vmem:[#allocation5 + $0x68] sm:$0xff] %vm2421_vm7, %v2832_v54  ;;  %2973 = vrot.lane.b32.xlu0 %v2930_v43, %s7471_s14  ;;  %2270 = vrot.lane.b32.xlu1 %v2930_v43, %s7469_s13 }
 0x24d   : > { %2556 = vst.msk [vmem:[#allocation5 + $0x78] sm:$0xff] %vm2550_vm8, %v2513_v55  ;;  %v2960_v56 = vpop.permute.xlu0 %2959  ;;  %v2257_v57 = vpop.permute.xlu1 %2256 }
 0x24e   : > { %3003 = vst.msk [vmem:[#allocation5 + $0x68] sm:$0xff] %vm2550_vm8, %v2960_v56 }
 0x24f   : > { %2299 = vst.msk [vmem:[#allocation5 + $0x90] sm:$0xff] %vm2292_vm5, %v2257_v57 }
 0x250   : > { %2530 = vrot.lane.b32.xlu1 %v8216_v15, %s7471_s14 }
 0x251   : > { %v2656_v60 = vld [vmem:[#allocation4 + $0xda] sm:$0xff] }
 0x252   : > { %v2783_v61 = vld [vmem:[#allocation4 + $0xe0] sm:$0xff]  ;;  %v2784_v62 = vld [vmem:[#allocation4 + $0xe8] sm:$0xff]  ;;  %v2675_v63 = vpack.c.bf16 %v2656_v60, %v2655_v58 }
 0x253   : > { %v2803_v41 = vpack.c.bf16 %v2784_v62, %v2783_v61  ;;  %v2911_v1 = vld [vmem:[#allocation4 + $0xe1] sm:$0xff]  ;;  %v2912_v2 = vld [vmem:[#allocation4 + $0xe9] sm:$0xff] }
 0x254   : > { %v2657_v3 = vld [vmem:[#allocation4 + $0xe2] sm:$0xff]  ;;  %v2931_v6 = vpack.c.bf16 %v2912_v2, %v2911_v1  ;;  %v2658_v7 = vld [vmem:[#allocation4 + $0xea] sm:$0xff]  ;;  %2719 = vrot.lane.b32.xlu0 %v2675_v63, %s7469_s13  ;;  %3074 = vst.msk [vmem:[#allocation5 + $0x118] sm:$0xff] %vm1532_vm4, %v2675_v63  ;;  %2399 = vrot.lane.b32.xlu1 %v2675_v63, %s7470_s30 }
 0x255   : > { %v2676_v8 = vpack.c.bf16 %v2658_v7, %v2657_v3  ;;  %2178 = vst.msk [vmem:[#allocation5 + $0x150] sm:$0xff] %vm1532_vm4, %v2803_v41  ;;  %v2706_v15 = vpop.permute.xlu0 %2705  ;;  %v2386_v9 = vpop.permute.xlu1 %2385  ;;  %v3092_v11 = vld [vmem:[#allocation5 + $0x68] sm:$0xff]  ;;  %v3094_v28 = vld [vmem:[#allocation5 + $0x78] sm:$0xff] }
 0x256   : > { %2628 = vst.msk [vmem:[#allocation5 + $0x140] sm:$0xff] %vm1532_vm4, %v2931_v6  ;;  %3390 = vmatprep.mubr.bf16.mxu1 %v3092_v11 }
 0x257   : > { %3075 = vst.msk [vmem:[#allocation5 + $0x130] sm:$0xff] %vm1532_vm4, %v2676_v8  ;;  %3391 = vmatmul.mubr.bf16.gmra.mrb[16].mxu1 %v3091_v12 }
 0x258   : > { %2748 = vst.msk [vmem:[#allocation5 + $0x80] sm:$0xff] %vm2292_vm5, %v2706_v15  ;;  %2847 = vrot.lane.b32.xlu0 %v2803_v41, %s7470_s30  ;;  %2528 = vrot.lane.b32.xlu1 %v2803_v41, %s7471_s14  ;;  %v3046_v15 = vld [vmem:[#allocation4 + $0x11a] sm:$0xff] }
 0x259   : > { %2428 = vst.msk [vmem:[#allocation5 + $0x90] sm:$0xff] %vm2421_vm7, %v2386_v9  ;;  %v2834_v13 = vpop.permute.xlu0 %2833  ;;  %v2515_v14 = vpop.permute.xlu1 %2514 }
 0x25a   : > { %2876 = vst.msk [vmem:[#allocation5 + $0x80] sm:$0xff] %vm2421_vm7, %v2834_v13 }
 0x25b   : > { %2557 = vst.msk [vmem:[#allocation5 + $0x90] sm:$0xff] %vm2550_vm8, %v2515_v14 }
 0x25c   : > { %2975 = vrot.lane.b32.xlu0 %v2931_v6, %s7471_s14  ;;  %2272 = vrot.lane.b32.xlu1 %v2931_v6, %s7469_s13 }
 0x25d   : > { %v2962_v21 = vpop.permute.xlu0 %2961  ;;  %v2259_v22 = vpop.permute.xlu1 %2258 }
 0x25e   : > { %3004 = vst.msk [vmem:[#allocation5 + $0x80] sm:$0xff] %vm2550_vm8, %v2962_v21 }
 0x25f   : > { %2300 = vst.msk [vmem:[#allocation5 + $0xa8] sm:$0xff] %vm2292_vm5, %v2259_v22 }
 0x260   : > { %2721 = vrot.lane.b32.xlu0 %v2676_v8, %s7469_s13  ;;  %2401 = vrot.lane.b32.xlu1 %v2676_v8, %s7470_s30  ;;  %v3045_v8 = vld [vmem:[#allocation4 + $0x112] sm:$0xff] }
 0x261   : > { %v3062_v9 = vpack.c.bf16 %v3046_v15, %v3045_v8  ;;  %v3105_v8 = vld [vmem:[#allocation5 + $0xd0] sm:$0xff] }
 0x263   : > { %3078 = vst.msk [vmem:[#allocation5 + $0x178] sm:$0xff] %vm1532_vm4, %v3062_v9  ;;  %v3108_v9 = vld [vmem:[#allocation5 + $0xe8] sm:$0xff] }
 0x264   : > { %2851 = vrot.lane.b32.xlu0 %v2805_v23, %s7470_s30  ;;  %2274 = vrot.lane.b32.xlu1 %v2227_v24, %s7469_s13 }
 0x265   : > { %v2708_v25 = vpop.permute.xlu0 %2707  ;;  %v2388_v26 = vpop.permute.xlu1 %2387  ;;  %v3095_v27 = vld [vmem:[#allocation5 + $0x80] sm:$0xff] }
 0x266   : > { %2749 = vst.msk [vmem:[#allocation5 + $0x98] sm:$0xff] %vm2292_vm5, %v2708_v25  ;;  %3398 = vmatprep.mubr.bf16.mxu1 %v3095_v27 }
 0x267   : > { %2429 = vst.msk [vmem:[#allocation5 + $0xa8] sm:$0xff] %vm2421_vm7, %v2388_v26  ;;  %3399 = vmatmul.mubr.bf16.gmra.mrb[20].mxu1 %v3094_v28 }
 0x268   : > { %2979 = vrot.lane.b32.xlu0 %v8264_v0, %s7471_s14  ;;  %2403 = vrot.lane.b32.xlu1 %v8288_v34, %s7470_s30  ;;  %v2934_v34 = vpack.c.bf16 %v2918_v35, %v2917_v33 }
 0x269   : > { %v2836_v30 = vpop.permute.xlu0 %2835  ;;  %v2517_v31 = vpop.permute.xlu1 %2516 }
 0x26a   : > { %2877 = vst.msk [vmem:[#allocation5 + $0x98] sm:$0xff] %vm2421_vm7, %v2836_v30 }
 0x26b   : > { %2558 = vst.msk [vmem:[#allocation5 + $0xa8] sm:$0xff] %vm2550_vm8, %v2517_v31 }
 0x26c   : > { %2725 = vrot.lane.b32.xlu0 %v8277_v59, %s7469_s13  ;;  %2532 = vrot.lane.b32.xlu1 %v2805_v23, %s7471_s14  ;;  %v3097_v59 = vld [vmem:[#allocation5 + $0x90] sm:$0xff] }
 0x26d   : > { %v2964_v0 = vpop.permute.xlu0 %2963  ;;  %v2261_v36 = vpop.permute.xlu1 %2260 }
 0x26e   : > { %3005 = vst.msk [vmem:[#allocation5 + $0x98] sm:$0xff] %vm2550_vm8, %v2964_v0 }
 0x26f   : > { %2301 = vst.msk [vmem:[#allocation5 + $0xc0] sm:$0xff] %vm2292_vm5, %v2261_v36 }
 0x270   : > { %2853 = vrot.lane.b32.xlu0 %v2806_v32, %s7470_s30 }
 0x272   : > { %v3100_v47 = vld [vmem:[#allocation5 + $0xa8] sm:$0xff] }
 0x274   : > { %2981 = vrot.lane.b32.xlu0 %v2934_v34, %s7471_s14 }
 0x275   : > { %v2710_v37 = vpop.permute.xlu0 %2709  ;;  %v2390_v38 = vpop.permute.xlu1 %2389  ;;  %v3098_v39 = vld [vmem:[#allocation5 + $0x98] sm:$0xff] }
 0x276   : > { %2750 = vst.msk [vmem:[#allocation5 + $0xb0] sm:$0xff] %vm2292_vm5, %v2710_v37  ;;  %3406 = vmatprep.mubr.bf16.mxu1 %v3098_v39 }
 0x277   : > { %2430 = vst.msk [vmem:[#allocation5 + $0xc0] sm:$0xff] %vm2421_vm7, %v2390_v38  ;;  %3407 = vmatmul.mubr.bf16.gmra.mrb[24].mxu1 %v3097_v59 }
 0x279   : > { %v2838_v40 = vpop.permute.xlu0 %2837  ;;  %v2519_v10 = vpop.permute.xlu1 %2518 }
 0x27a   : > { %2878 = vst.msk [vmem:[#allocation5 + $0xb0] sm:$0xff] %vm2421_vm7, %v2838_v40 }
 0x27b   : > { %2559 = vst.msk [vmem:[#allocation5 + $0xc0] sm:$0xff] %vm2550_vm8, %v2519_v10 }
 0x27d   : > { %v2966_v42 = vpop.permute.xlu0 %2965  ;;  %v2263_v43 = vpop.permute.xlu1 %2262 }
 0x27e   : > { %3006 = vst.msk [vmem:[#allocation5 + $0xb0] sm:$0xff] %vm2550_vm8, %v2966_v42 }
 0x27f   : > { %2302 = vst.msk [vmem:[#allocation5 + $0xd8] sm:$0xff] %vm2292_vm5, %v2263_v43 }
 0x282   : > { %v3103_v56 = vld [vmem:[#allocation5 + $0xc0] sm:$0xff] }
 0x285   : > { %v3101_v46 = vld [vmem:[#allocation5 + $0xb0] sm:$0xff] }
 0x286   : > { %v2712_v44 = vpop.permute.xlu0 %2711  ;;  %3414 = vmatprep.mubr.bf16.mxu1 %v3101_v46 }
 0x287   : > { %v2392_v45 = vpop.permute.xlu1 %2391  ;;  %2751 = vst.msk [vmem:[#allocation5 + $0xc8] sm:$0xff] %vm2292_vm5, %v2712_v44  ;;  %3415 = vmatmul.mubr.bf16.gmra.mrb[28].mxu1 %v3100_v47 }
 0x288   : > { %2431 = vst.msk [vmem:[#allocation5 + $0xd8] sm:$0xff] %vm2421_vm7, %v2392_v45 }
 0x28a   : > { %v2840_v49 = vpop.permute.xlu0 %2839 }
 0x28b   : > { %v2521_v50 = vpop.permute.xlu1 %2520  ;;  %2879 = vst.msk [vmem:[#allocation5 + $0xc8] sm:$0xff] %vm2421_vm7, %v2840_v49 }
 0x28c   : > { %2560 = vst.msk [vmem:[#allocation5 + $0xd8] sm:$0xff] %vm2550_vm8, %v2521_v50  ;;  %v3081_v50 = vld [vmem:[#allocation5 + $0x10] sm:$0xff] }
 0x28e   : > { %v2968_v51 = vpop.permute.xlu0 %2967 }
 0x28f   : > { %v2265_v52 = vpop.permute.xlu1 %2264  ;;  %3007 = vst.msk [vmem:[#allocation5 + $0xc8] sm:$0xff] %vm2550_vm8, %v2968_v51  ;;  %v3084_v51 = vld [vmem:[#allocation5 + $0x28] sm:$0xff] }
 0x290   : > { %2303 = vst.msk [vmem:[#allocation5 + $0xf0] sm:$0xff] %vm2292_vm5, %v2265_v52  ;;  %v3087_v52 = vld [vmem:[#allocation5 + $0x40] sm:$0xff] }
 0x293   : > { %v3106_v1 = vld [vmem:[#allocation5 + $0xd8] sm:$0xff] }
 0x296   : > { %v2714_v53 = vpop.permute.xlu0 %2713  ;;  %v2394_v54 = vpop.permute.xlu1 %2393  ;;  %v3104_v55 = vld [vmem:[#allocation5 + $0xc8] sm:$0xff] }
 0x297   : > { %2752 = vst.msk [vmem:[#allocation5 + $0xe0] sm:$0xff] %vm2292_vm5, %v2714_v53  ;;  %3422 = vmatprep.mubr.bf16.mxu1 %v3104_v55 }
 0x298   : > { %2432 = vst.msk [vmem:[#allocation5 + $0xf0] sm:$0xff] %vm2421_vm7, %v2394_v54  ;;  %3423 = vmatmul.mubr.bf16.gmra.mrb[32].mxu1 %v3103_v56 }
 0x29a   : > { %v2842_v57 = vpop.permute.xlu0 %2841 }
 0x29b   : > { %v2523_v58 = vpop.permute.xlu1 %2522  ;;  %2880 = vst.msk [vmem:[#allocation5 + $0xe0] sm:$0xff] %vm2421_vm7, %v2842_v57  ;;  %v3090_v57 = vld [vmem:[#allocation5 + $0x58] sm:$0xff] }
 0x29c   : > { %2561 = vst.msk [vmem:[#allocation5 + $0xf0] sm:$0xff] %vm2550_vm8, %v2523_v58 }
 0x29e   : > { %v2970_v60 = vpop.permute.xlu0 %2969 }
 0x29f   : > { %v2267_v61 = vpop.permute.xlu1 %2266  ;;  %3008 = vst.msk [vmem:[#allocation5 + $0xe0] sm:$0xff] %vm2550_vm8, %v2970_v60  ;;  %v3093_v60 = vld [vmem:[#allocation5 + $0x70] sm:$0xff] }
 0x2a0   : > { %2304 = vst.msk [vmem:[#allocation5 + $0x108] sm:$0xff] %vm2292_vm5, %v2267_v61 }
 0x2a3   : > { %v3109_v14 = vld [vmem:[#allocation5 + $0xf0] sm:$0xff] }
 0x2a6   : > { %v3107_v41 = vld [vmem:[#allocation5 + $0xe0] sm:$0xff] }
 0x2a7   : > { %v2716_v62 = vpop.permute.xlu0 %2715  ;;  %v2396_v63 = vpop.permute.xlu1 %2395  ;;  %3430 = vmatprep.mubr.bf16.mxu1 %v3107_v41 }
 0x2a8   : > { %2753 = vst.msk [vmem:[#allocation5 + $0xf8] sm:$0xff] %vm2292_vm5, %v2716_v62  ;;  %3431 = vmatmul.mubr.bf16.gmra.mrb[36].mxu1 %v3106_v1  ;;  %v3096_v62 = vld [vmem:[#allocation5 + $0x88] sm:$0xff] }
 0x2a9   : > { %2433 = vst.msk [vmem:[#allocation5 + $0x108] sm:$0xff] %vm2421_vm7, %v2396_v63  ;;  %v3099_v63 = vld [vmem:[#allocation5 + $0xa0] sm:$0xff] }
 0x2ab   : > { %v2844_v2 = vpop.permute.xlu0 %2843  ;;  %v2525_v3 = vpop.permute.xlu1 %2524 }
 0x2ac   : > { %2881 = vst.msk [vmem:[#allocation5 + $0xf8] sm:$0xff] %vm2421_vm7, %v2844_v2 }
 0x2ad   : > { %2562 = vst.msk [vmem:[#allocation5 + $0x108] sm:$0xff] %vm2550_vm8, %v2525_v3 }
 0x2af   : > { %v2972_v6 = vpop.permute.xlu0 %2971  ;;  %v2269_v7 = vpop.permute.xlu1 %2268 }
 0x2b0   : > { %3009 = vst.msk [vmem:[#allocation5 + $0xf8] sm:$0xff] %vm2550_vm8, %v2972_v6  ;;  %v3102_v6 = vld [vmem:[#allocation5 + $0xb8] sm:$0xff] }
 0x2b1   : > { %2305 = vst.msk [vmem:[#allocation5 + $0x120] sm:$0xff] %vm2292_vm5, %v2269_v7 }
 0x2b4   : > { %v3112_v25 = vld [vmem:[#allocation5 + $0x108] sm:$0xff] }
 0x2b6   : > { %v2718_v11 = vpop.permute.xlu0 %2717  ;;  %v2398_v12 = vpop.permute.xlu1 %2397 }
 0x2b7   : > { %2754 = vst.msk [vmem:[#allocation5 + $0x110] sm:$0xff] %vm2292_vm5, %v2718_v11  ;;  %v3110_v13 = vld [vmem:[#allocation5 + $0xf8] sm:$0xff]  ;;  %v3111_v11 = vld [vmem:[#allocation5 + $0x100] sm:$0xff] }
 0x2b8   : > { %2434 = vst.msk [vmem:[#allocation5 + $0x120] sm:$0xff] %vm2421_vm7, %v2398_v12  ;;  %3438 = vmatprep.mubr.bf16.mxu1 %v3110_v13 }
 0x2b9   : > { %3439 = vmatmul.mubr.bf16.gmra.mrb[40].mxu1 %v3109_v14 }
 0x2ba   : > { %v2846_v16 = vpop.permute.xlu0 %2845  ;;  %v2527_v17 = vpop.permute.xlu1 %2526 }
 0x2bb   : > { %2882 = vst.msk [vmem:[#allocation5 + $0x110] sm:$0xff] %vm2421_vm7, %v2846_v16 }
 0x2bc   : > { %2563 = vst.msk [vmem:[#allocation5 + $0x120] sm:$0xff] %vm2550_vm8, %v2527_v17 }
 0x2be   : > { %v2974_v18 = vpop.permute.xlu0 %2973  ;;  %v2271_v20 = vpop.permute.xlu1 %2270 }
 0x2bf   : > { %3010 = vst.msk [vmem:[#allocation5 + $0x110] sm:$0xff] %vm2550_vm8, %v2974_v18  ;;  %v3114_v18 = vld [vmem:[#allocation5 + $0x118] sm:$0xff] }
 0x2c0   : > { %2306 = vst.msk [vmem:[#allocation5 + $0x138] sm:$0xff] %vm2292_vm5, %v2271_v20 }
 0x2c2   : > { %v2531_v21 = vpop.permute.xlu1 %2530 }
 0x2c3   : > { %v3115_v33 = vld [vmem:[#allocation5 + $0x120] sm:$0xff] }
 0x2c6   : > { %v2720_v22 = vpop.permute.xlu0 %2719  ;;  %v3113_v23 = vld [vmem:[#allocation5 + $0x110] sm:$0xff]  ;;  %v2400_v24 = vpop.permute.xlu1 %2399 }
 0x2c7   : > { %2755 = vst.msk [vmem:[#allocation5 + $0x128] sm:$0xff] %vm2292_vm5, %v2720_v22  ;;  %3446 = vmatprep.mubr.bf16.mxu1 %v3113_v23  ;;  %v3120_v22 = vld [vmem:[#allocation5 + $0x148] sm:$0xff]  ;;  %v3123_v23 = vld [vmem:[#allocation5 + $0x160] sm:$0xff] }
 0x2c8   : > { %2435 = vst.msk [vmem:[#allocation5 + $0x138] sm:$0xff] %vm2421_vm7, %v2400_v24  ;;  %3447 = vmatmul.mubr.bf16.gmra.mrb[44].mxu1 %v3112_v25 }
 0x2ca   : > { %v2848_v26 = vpop.permute.xlu0 %2847  ;;  %v2529_v27 = vpop.permute.xlu1 %2528 }
 0x2cb   : > { %2883 = vst.msk [vmem:[#allocation5 + $0x128] sm:$0xff] %vm2421_vm7, %v2848_v26  ;;  %v3126_v26 = vld [vmem:[#allocation5 + $0x178] sm:$0xff] }
 0x2cc   : > { %2564 = vst.msk [vmem:[#allocation5 + $0x138] sm:$0xff] %vm2550_vm8, %v2529_v27 }
 0x2ce   : > { %v2976_v28 = vpop.permute.xlu0 %2975  ;;  %v2273_v29 = vpop.permute.xlu1 %2272 }
 0x2cf   : > { %3011 = vst.msk [vmem:[#allocation5 + $0x128] sm:$0xff] %vm2550_vm8, %v2976_v28 }
 0x2d0   : > { %2307 = vst.msk [vmem:[#allocation5 + $0x150] sm:$0xff] %vm2292_vm5, %v2273_v29 }
 0x2d2   : > { %v2722_v5 = vpop.permute.xlu0 %2721  ;;  %v2402_v30 = vpop.permute.xlu1 %2401 }
 0x2d3   : > { %2756 = vst.msk [vmem:[#allocation5 + $0x140] sm:$0xff] %vm2292_vm5, %v2722_v5  ;;  %v3118_v34 = vld [vmem:[#allocation5 + $0x138] sm:$0xff] }
 0x2d4   : > { %2884 = vst.msk [vmem:[#allocation5 + $0x140] sm:$0xff] %vm2421_vm7, %v8049_v19  ;;  %2436 = vst.msk [vmem:[#allocation5 + $0x150] sm:$0xff] %vm2421_vm7, %v2402_v30 }
 0x2d5   : > { %3012 = vst.msk [vmem:[#allocation5 + $0x140] sm:$0xff] %vm2550_vm8, %v8069_v48  ;;  %2565 = vst.msk [vmem:[#allocation5 + $0x150] sm:$0xff] %vm2550_vm8, %v2531_v21  ;;  %v3117_v21 = vld [vmem:[#allocation5 + $0x130] sm:$0xff] }
 0x2d6   : > { %v2852_v31 = vpop.permute.xlu0 %2851  ;;  %v3116_v32 = vld [vmem:[#allocation5 + $0x128] sm:$0xff]  ;;  %v2275_v35 = vpop.permute.xlu1 %2274 }
 0x2d7   : > { %2885 = vst.msk [vmem:[#allocation5 + $0x158] sm:$0xff] %vm2421_vm7, %v2852_v31  ;;  %3454 = vmatprep.mubr.bf16.mxu1 %v3116_v32 }
 0x2d8   : > { %3455 = vmatmul.mubr.bf16.gmra.mrb[48].mxu1 %v3115_v33  ;;  %2308 = vst.msk [vmem:[#allocation5 + $0x168] sm:$0xff] %vm2292_vm5, %v2275_v35 }
 0x2da   : > { %v2980_v0 = vpop.permute.xlu0 %2979  ;;  %v2404_v19 = vpop.permute.xlu1 %2403 }
 0x2db   : > { %3013 = vst.msk [vmem:[#allocation5 + $0x158] sm:$0xff] %vm2550_vm8, %v2980_v0 }
 0x2dc   : > { %v3119_v36 = vld [vmem:[#allocation5 + $0x140] sm:$0xff]  ;;  %2437 = vst.msk [vmem:[#allocation5 + $0x168] sm:$0xff] %vm2421_vm7, %v2404_v19  ;;  %v3121_v40 = vld [vmem:[#allocation5 + $0x150] sm:$0xff]  ;;  %v7258_v19 = vld [vmem:[%s9420_s5 + $0xc0] sm:$0xff]  }
 0x2dd   : > { %3462 = vmatprep.mubr.bf16.mxu1 %v3119_v36  ;;  %v7259_v36 = vld [vmem:[%s9420_s5 + $0x80] sm:$0xff]   ;;  %6878 = vmatprep.subr.bf16.mxu0 %v7258_v19 }
 0x2de   : > { %v2726_v48 = vpop.permute.xlu0 %2725  ;;  %v2533_v37 = vpop.permute.xlu1 %2532  ;;  %6879 = vmatpush3.bf16.msra.mxu0 %v7259_v36 }
 0x2df   : > { %2758 = vst.msk [vmem:[#allocation5 + $0x170] sm:$0xff] %vm2292_vm5, %v2726_v48  ;;  %6880 = vmatprep.subr.bf16.mxu0 %v7260_v4 }
 0x2e0   : > { %3463 = vmatmul.mubr.bf16.gmra.mrb[52].mxu1 %v3118_v34  ;;  %2566 = vst.msk [vmem:[#allocation5 + $0x168] sm:$0xff] %vm2550_vm8, %v2533_v37 }
 0x2e2   : > { %v2854_v38 = vpop.permute.xlu0 %2853  ;;  %v3122_v39 = vld [vmem:[#allocation5 + $0x158] sm:$0xff] }
 0x2e3   : > { %2886 = vst.msk [vmem:[#allocation5 + $0x170] sm:$0xff] %vm2421_vm7, %v2854_v38  ;;  %3470 = vmatprep.mubr.bf16.mxu1 %v3122_v39 }
 0x2e6   : > { %v2982_v59 = vpop.permute.xlu0 %2981 }
 0x2e7   : > { %3014 = vst.msk [vmem:[#allocation5 + $0x170] sm:$0xff] %vm2550_vm8, %v2982_v59  ;;  %v3124_v47 = vld [vmem:[#allocation5 + $0x168] sm:$0xff] }
 0x2e8   : > { %3471 = vmatmul.mubr.bf16.gmra.mrb[56].mxu1 %v3121_v40  ;;  %v6712_v10 = vpop.f32.mrb[0].mxu1 }
 0x2e9   : > { %v6713_v42 = vpop.f32.mrb[1].mxu1 }
 0x2ea   : > { %v8564_v43 = vadd.f32 %v6713_v42, %v6712_v10  ;;  %v6715_v44 = vpop.f32.mrb[2].mxu1 }
 0x2eb   : > { %v6716_v45 = vpop.f32.mrb[3].mxu1 }
 0x2ec   : > { %v8566_v46 = vadd.f32 %v6716_v45, %v6715_v44 }
 0x2ee   : > { %v3125_v49 = vld [vmem:[#allocation5 + $0x170] sm:$0xff] }
 0x2ef   : > { %3478 = vmatprep.mubr.bf16.mxu1 %v3125_v49 }
 0x2f0   : > { %3479 = vmatmul.mubr.bf16.gmra.mrb[60].mxu1 %v3124_v47 }
 0x2f1   : > { %7116 = vmatprep.mubr.msk.bf16.mxu1 %vm1532_vm4, %v3081_v50 }
 0x2f8   : > { %7117 = vmatmul.mubr.msk.bf16.vlgmr.msra.gmra.mrb[64].mxu1 %vm1532_vm4, %v3084_v51 }
 0x2f9   : > { %7120 = vmatprep.mubr.msk.bf16.mxu1 %vm1532_vm4, %v3087_v52 }
 0x2fc   : > { %v6718_v53 = vpop.f32.mrb[4].mxu1 }
 0x2fd   : > { %v6719_v54 = vpop.f32.mrb[5].mxu1 }
 0x2fe   : > { %v8571_v55 = vadd.f32 %v6719_v54, %v6718_v53  ;;  %v6721_v56 = vpop.f32.mrb[6].mxu1  ;;  %v7261_v54 = vld [vmem:[%s9420_s5 + $0x88] sm:$0xff]  }
 0x2ff   : > { %v6722_v58 = vpop.f32.mrb[7].mxu1  ;;  %6881 = vmatpush3.bf16.msra.mxu0 %v7261_v54 }
 0x300   : > { %7121 = vmatmul.mubr.msk.bf16.gmra.mrb[68].mxu1 %vm1532_vm4, %v3090_v57  ;;  %v8574_v61 = vadd.f32 %v6722_v58, %v6721_v56  ;;  %v3947_v57 = vld [vmem:[#allocation8 + $0x1] sm:$0xff]  ;;  %v4423_v58 = vld [vmem:[#allocation8 + $0x4b] sm:$0xff] }
 0x301   : > { %7124 = vmatprep.mubr.msk.bf16.mxu1 %vm1532_vm4, %v3093_v60  ;;  %v6494_v60 = vpack.c.bf16 %v3947_v57, %v3947_v57 }
 0x303   : > { %3992 = vrot.lane.b32.xlu0 %v6494_v60, %s7470_s30 }
 0x308   : > { %7125 = vmatmul.mubr.msk.bf16.gmra.mrb[72].mxu1 %vm1532_vm4, %v3096_v62  ;;  %v6567_v62 = vpack.c.bf16 %v4423_v58, %v4423_v58 }
 0x309   : > { %7128 = vmatprep.mubr.msk.bf16.mxu1 %vm1532_vm4, %v3099_v63  ;;  %v4112_v63 = vld [vmem:[#allocation8 + $0x49] sm:$0xff] }
 0x30a   : > { %4475 = vrot.lane.b32.xlu1 %v6567_v62, %s7470_s30 }
 0x30d   : > { %v6724_v41 = vpop.f32.mrb[8].mxu1 }
 0x30e   : > { %v6725_v1 = vpop.f32.mrb[9].mxu1 }
 0x30f   : > { %v8579_v2 = vadd.f32 %v6725_v1, %v6724_v41  ;;  %v6727_v3 = vpop.f32.mrb[10].mxu1  ;;  %v6524_v41 = vpack.c.bf16 %v4112_v63, %v4112_v63 }
 0x310   : > { %v6728_v7 = vpop.f32.mrb[11].mxu1  ;;  %7129 = vmatmul.mubr.msk.bf16.gmra.mrb[76].mxu1 %vm1532_vm4, %v3102_v6 }
 0x311   : > { %v8582_v15 = vadd.f32 %v6728_v7, %v6727_v3  ;;  %7132 = vmatprep.mubr.msk.bf16.mxu1 %vm1532_vm4, %v3105_v8  ;;  %4165 = vrot.lane.b32.xlu0 %v6524_v41, %s7470_s30  ;;  %v4113_v3 = vld [vmem:[#allocation8 + $0x51] sm:$0xff] }
 0x312   : > { %4010 = vrot.lane.b32.xlu1 %v6524_v41, %s7470_s30  ;;  %v8660_v7 = vpack.c.bf16 %v4113_v3, %v4113_v3  ;;  %v7268_v3 = vld [vmem:[%s9420_s5 + $0xe8] sm:$0xff]  }
 0x315   : > { %4321 = vrot.lane.b32.xlu0 %v6567_v62, %s7470_s30 }
 0x316   : > { %4167 = vrot.lane.b32.xlu1 %v8660_v7, %s7470_s30 }
 0x318   : > { %7133 = vmatmul.mubr.msk.bf16.gmra.mrb[80].mxu1 %vm1532_vm4, %v3108_v9 }
 0x319   : > { %7136 = vmatprep.mubr.msk.bf16.mxu1 %vm1532_vm4, %v3111_v11 }
 0x31c   : > { %v6730_v12 = vpop.f32.mrb[12].mxu1 }
 0x31d   : > { %v6731_v13 = vpop.f32.mrb[13].mxu1 }
 0x31e   : > { %v8587_v14 = vadd.f32 %v6731_v13, %v6730_v12  ;;  %v6733_v16 = vpop.f32.mrb[14].mxu1  ;;  %v7262_v13 = vld [vmem:[%s9420_s5 + $0xd0] sm:$0xff]  }
 0x31f   : > { %v6734_v17 = vpop.f32.mrb[15].mxu1  ;;  %6882 = vmatprep.subr.bf16.mxu0 %v7262_v13  ;;  %v7271_v13 = vld [vmem:[%s9420_s5] sm:$0xff]  }
 0x320   : > { %v8589_v20 = vadd.f32 %v6734_v17, %v6733_v16  ;;  %7137 = vmatmul.mubr.msk.bf16.gmra.mrb[84].mxu1 %vm1532_vm4, %v3114_v18  ;;  %v7263_v16 = vld [vmem:[%s9420_s5 + $0x90] sm:$0xff]  }
 0x321   : > { %7140 = vmatprep.mubr.msk.bf16.mxu1 %vm1532_vm4, %v3117_v21  ;;  %6883 = vmatpush3.bf16.msra.mxu0 %v7263_v16  ;;  %v7272_v16 = vld [vmem:[%s9420_s5 + $0x48] sm:$0xff]  }
 0x328   : > { %7141 = vmatmul.mubr.msk.bf16.gmra.mrb[88].mxu1 %vm1532_vm4, %v3120_v22 }
 0x329   : > { %7144 = vmatprep.mubr.msk.bf16.mxu1 %vm1532_vm4, %v3123_v23 }
 0x32a   : > { %v6736_v24 = vpop.f32.mrb[16].mxu1 }
 0x32b   : > { %v6737_v25 = vpop.f32.mrb[17].mxu1 }
 0x32c   : > { %v8595_v27 = vadd.f32 %v6737_v25, %v6736_v24  ;;  %v6739_v28 = vpop.f32.mrb[18].mxu1  ;;  %v7264_v25 = vld [vmem:[%s9420_s5 + $0xd8] sm:$0xff]  }
 0x32d   : > { %v6740_v29 = vpop.f32.mrb[19].mxu1  ;;  %6884 = vmatprep.subr.bf16.mxu0 %v7264_v25  ;;  %v4356_v25 = vld [vmem:[#allocation8 + $0x4a] sm:$0xff] }
 0x32e   : > { %v8597_v5 = vadd.f32 %v6740_v29, %v6739_v28 }
 0x330   : > { %7145 = vmatmul.mubr.msk.bf16.gmra.mrb[92].mxu1 %vm1532_vm4, %v3126_v26  ;;  %v7265_v26 = vld [vmem:[%s9420_s5 + $0x98] sm:$0xff]  }
 0x331   : > { %6885 = vmatpush3.bf16.msra.mxu0 %v7265_v26  ;;  %v3888_v26 = vld [vmem:[#allocation8 + $0x48] sm:$0xff] }
 0x33a   : > { %v6742_v30 = vpop.f32.mrb[20].mxu1 }
 0x33b   : > { %v6743_v31 = vpop.f32.mrb[21].mxu1 }
 0x33c   : > { %v8600_v32 = vadd.f32 %v6743_v31, %v6742_v30  ;;  %v6745_v33 = vpop.f32.mrb[22].mxu1 }
 0x33d   : > { %v6746_v35 = vpop.f32.mrb[23].mxu1 }
 0x33e   : > { %v8602_v0 = vadd.f32 %v6746_v35, %v6745_v33 }
 0x34a   : > { %v6748_v48 = vpop.f32.mrb[24].mxu1 }
 0x34b   : > { %v6749_v34 = vpop.f32.mrb[25].mxu1 }
 0x34c   : > { %v8610_v37 = vadd.f32 %v6749_v34, %v6748_v48  ;;  %v6751_v38 = vpop.f32.mrb[26].mxu1 }
 0x34d   : > { %v6752_v39 = vpop.f32.mrb[27].mxu1 }
 0x34e   : > { %v8640_v59 = vadd.f32 %v6752_v39, %v6751_v38 }
 0x35a   : > { %v6754_v40 = vpop.f32.mrb[28].mxu1 }
 0x35b   : > { %v6755_v10 = vpop.f32.mrb[29].mxu1 }
 0x35c   : > { %v8642_v42 = vadd.f32 %v6755_v10, %v6754_v40  ;;  %v6757_v44 = vpop.f32.mrb[30].mxu1  ;;  %v4512_v40 = vld [vmem:[#allocation8 + $0x4c] sm:$0xff] }
 0x35d   : > { %v6758_v45 = vpop.f32.mrb[31].mxu1  ;;  %v6578_v10 = vpack.c.bf16 %v4512_v40, %v4512_v40 }
 0x35e   : > { %v8644_v47 = vadd.f32 %v6758_v45, %v6757_v44  ;;  %v7266_v45 = vld [vmem:[%s9420_s5 + $0xe0] sm:$0xff]  }
 0x35f   : > { %4568 = vst.msk [vmem:[#allocation9 + $0x9c] sm:$0xf] %vm3935_vm10, %v6578_v10  ;;  %6886 = vmatprep.subr.bf16.mxu0 %v7266_v45 }
 0x36b   : > { %v6760_v49 = vpop.f32.mrb[32].mxu1 }
 0x36c   : > { %v6761_v50 = vpop.f32.mrb[33].mxu1 }
 0x36d   : > { %v8646_v51 = vadd.f32 %v6761_v50, %v6760_v49  ;;  %v6763_v52 = vpop.f32.mrb[34].mxu1  ;;  %v7267_v49 = vld [vmem:[%s9420_s5 + $0xa0] sm:$0xff]  }
 0x36e   : > { %v6764_v53 = vpop.f32.mrb[35].mxu1  ;;  %6887 = vmatpush3.bf16.msra.mxu0 %v7267_v49 }
 0x36f   : > { %v8654_v56 = vadd.f32 %v6764_v53, %v6763_v52  ;;  %6888 = vmatprep.subr.bf16.mxu0 %v7268_v3 }
 0x37b   : > { %v6766_v1 = vpop.f32.mrb[36].mxu1 }
 0x37c   : > { %v6767_v6 = vpop.f32.mrb[37].mxu1 }
 0x37d   : > { %v8662_v8 = vadd.f32 %v6767_v6, %v6766_v1  ;;  %v6769_v9 = vpop.f32.mrb[38].mxu1  ;;  %v7269_v6 = vld [vmem:[%s9420_s5 + $0xa8] sm:$0xff]  }
 0x37e   : > { %v6770_v11 = vpop.f32.mrb[39].mxu1  ;;  %6889 = vmatpush3.bf16.msra.mxu0 %v7269_v6 }
 0x37f   : > { %v8667_v12 = vadd.f32 %v6770_v11, %v6769_v9  ;;  %v7270_v9 = vld [vmem:[%s9420_s5 + $0x40] sm:$0xff]  }
 0x380   : > { %6826 = vmatprep.subr.bf16.mxu1 %v7270_v9 }
 0x381   : > { %6827 = vmatpush3.bf16.msra.mxu1 %v7271_v13 }
 0x382   : > { %6828 = vmatprep.subr.bf16.mxu1 %v7272_v16 }
 0x38c   : > { %v6772_v17 = vpop.f32.mrb[40].mxu1 }
 0x38d   : > { %v6773_v18 = vpop.f32.mrb[41].mxu1 }
 0x38e   : > { %v8675_v21 = vadd.f32 %v6773_v18, %v6772_v17  ;;  %v6775_v22 = vpop.f32.mrb[42].mxu1  ;;  %v3879_v17 = vld [vmem:[#allocation8] sm:$0xff] }
 0x38f   : > { %v6776_v23 = vpop.f32.mrb[43].mxu1 }
 0x390   : > { %v8677_v24 = vadd.f32 %v6776_v23, %v6775_v22  ;;  %v6483_v23 = vpack.c.bf16 %v3879_v17, %v3879_v17 }
 0x392   : > { %3936 = vst.msk [vmem:[#allocation9] sm:$0xf] %vm3935_vm10, %v6483_v23 }
 0x39b   : > { %v6778_v28 = vpop.f32.mrb[44].mxu1 }
 0x39c   : > { %v6779_v29 = vpop.f32.mrb[45].mxu1 }
 0x39d   : > { %v8685_v30 = vadd.f32 %v6779_v29, %v6778_v28  ;;  %v6781_v31 = vpop.f32.mrb[46].mxu1  ;;  %v6556_v29 = vpack.c.bf16 %v4356_v25, %v4356_v25 }
 0x39e   : > { %v6782_v33 = vpop.f32.mrb[47].mxu1 }
 0x39f   : > { %v8687_v35 = vadd.f32 %v6782_v33, %v6781_v31  ;;  %v7273_v31 = vld [vmem:[%s9420_s5 + $0x8] sm:$0xff]   ;;  %v6492_v33 = vpack.c.bf16 %v3888_v26, %v3888_v26  ;;  %4412 = vst.msk [vmem:[#allocation9 + $0x98] sm:$0xf] %vm3935_vm10, %v6556_v29  ;;  %4257 = vst.msk [vmem:[#allocation9 + $0xa8] sm:$0xf] %vm3935_vm10, %v6556_v29 }
 0x3a0   : > { %4102 = vst.msk [vmem:[#allocation9 + $0xb8] sm:$0xf] %vm3935_vm10, %v6556_v29  ;;  %6829 = vmatpush3.bf16.msra.mxu1 %v7273_v31 }
 0x3a1   : > { %3945 = vst.msk [vmem:[#allocation9 + $0xb4] sm:$0xf] %vm3935_vm10, %v6492_v33 }
 0x3ab   : > { %v6784_v19 = vpop.f32.mrb[48].mxu1 }
 0x3ac   : > { %v6785_v36 = vpop.f32.mrb[49].mxu1 }
 0x3ad   : > { %v8689_v48 = vadd.f32 %v6785_v36, %v6784_v19  ;;  %v6787_v34 = vpop.f32.mrb[50].mxu1  ;;  %v7274_v36 = vld [vmem:[%s9420_s5 + $0x50] sm:$0xff]  }
 0x3ae   : > { %v6788_v38 = vpop.f32.mrb[51].mxu1  ;;  %6830 = vmatprep.subr.bf16.mxu1 %v7274_v36 }
 0x3af   : > { %v8691_v39 = vadd.f32 %v6788_v38, %v6787_v34  ;;  %v4037_v34 = vld [vmem:[#allocation8 + $0x2] sm:$0xff]  ;;  %v8734_v38 = vld [vmem:[#allocation15] ss:$0 sm:$0xff] }
 0x3b0   : > { %v6505_v40 = vpack.c.bf16 %v4037_v34, %v4037_v34  ;;  %v3369_v10 = vadd.f32 %v8571_v55, %v8734_v38  ;;  %v3361_v49 = vadd.f32 %v8564_v43, %v8734_v38  ;;  %v3372_v55 = vadd.f32 %v8574_v61, %v8734_v38 }
 0x3b1   : > { %v3385_v61 = vadd.f32 %v8587_v14, %v8734_v38  ;;  %v3377_v13 = vadd.f32 %v8579_v2, %v8734_v38  ;;  %v3380_v26 = vadd.f32 %v8582_v15, %v8734_v38  ;;  %v3401_v15 = vadd.f32 %v8600_v32, %v8734_v38 }
 0x3b2   : > { %4093 = vst.msk [vmem:[#allocation9 + $0x4] sm:$0xf] %vm3935_vm10, %v6505_v40 }
 0x3b3   : > { %v6790_v44 = vpop.f32.mrb[52].mxu1 }
 0x3b4   : > { %v6791_v50 = vpop.f32.mrb[53].mxu1 }
 0x3b5   : > { %v8700_v52 = vadd.f32 %v6791_v50, %v6790_v44  ;;  %v6793_v53 = vpop.f32.mrb[54].mxu1  ;;  %v7275_v44 = vld [vmem:[%s9420_s5 + $0x10] sm:$0xff]   ;;  %v7276_v50 = vld [vmem:[%s9420_s5 + $0x58] sm:$0xff]  }
 0x3b6   : > { %v6794_v4 = vpop.f32.mrb[55].mxu1  ;;  %6831 = vmatpush3.bf16.msra.mxu1 %v7275_v44 }
 0x3b7   : > { %v8702_v54 = vadd.f32 %v6794_v4, %v6793_v53  ;;  %6832 = vmatprep.subr.bf16.mxu1 %v7276_v50  ;;  %v3393_v50 = vadd.f32 %v8595_v27, %v8734_v38 }
 0x3bb   : > { %v6796_v57 = vpop.f32.mrb[56].mxu1 }
 0x3bc   : > { %v6797_v58 = vpop.f32.mrb[57].mxu1 }
 0x3bd   : > { %v8704_v60 = vadd.f32 %v6797_v58, %v6796_v57  ;;  %v6799_v62 = vpop.f32.mrb[58].mxu1 }
 0x3be   : > { %v6800_v63 = vpop.f32.mrb[59].mxu1 }
 0x3bf   : > { %v8706_v41 = vadd.f32 %v6800_v63, %v6799_v62  ;;  %v3364_v62 = vadd.f32 %v8566_v46, %v8734_v38 }
 0x3c3   : > { %v6802_v1 = vpop.f32.mrb[60].mxu1 }
 0x3c4   : > { %v6803_v11 = vpop.f32.mrb[61].mxu1 }
 0x3c5   : > { %v8723_v18 = vadd.f32 %v6803_v11, %v6802_v1  ;;  %v6805_v22 = vpop.f32.mrb[62].mxu1 }
 0x3c6   : > { %v6806_v28 = vpop.f32.mrb[63].mxu1 }
 0x3c7   : > { %v8728_v19 = vadd.f32 %v6806_v28, %v6805_v22  ;;  %v3388_v22 = vadd.f32 %v8589_v20, %v8734_v38 }
 0x3cb   : > { %v7118_v45 = vpop.f32.mrb[64].mxu1 }
 0x3cc   : > { %v3530_v53 = vadd.f32 %v7118_v45, %v3369_v10  ;;  %v3521_v4 = vpop.f32.mrb[65].mxu1 }
 0x3cd   : > { %v3522_v57 = vadd.f32 %v3521_v4, %v3361_v49  ;;  %v7119_v58 = vpop.f32.mrb[66].mxu1 }
 0x3ce   : > { %v3650_v63 = vmax.f32 %v3530_v53, 0.0  ;;  %v3533_v1 = vadd.f32 %v7119_v58, %v3372_v55  ;;  %v3524_v3 = vpop.f32.mrb[67].mxu1  ;;  %v3404_v55 = vadd.f32 %v8602_v0, %v8734_v38 }
 0x3cf   : > { %v3648_v43 = vmax.f32 %v3522_v57, 0.0  ;;  %v3525_v6 = vadd.f32 %v3524_v3, %v3364_v62 }
 0x3d0   : > { %3683 = vst.msk [vmem:[#allocation6 + $0x10] sm:$0xff] %vm3680_vm9, %v3650_v63  ;;  %v3651_v9 = vmax.f32 %v3533_v1, 0.0  ;;  %v3396_v63 = vadd.f32 %v8597_v5, %v8734_v38  ;;  %v3417_v5 = vadd.f32 %v8642_v42, %v8734_v38 }
 0x3d1   : > { %3681 = vst.msk [vmem:[#allocation6] sm:$0xff] %vm3680_vm9, %v3648_v43  ;;  %v3649_v11 = vmax.f32 %v3525_v6, 0.0 }
 0x3d2   : > { %3684 = vst.msk [vmem:[#allocation6 + $0x18] sm:$0xff] %vm3680_vm9, %v3651_v9 }
 0x3d3   : > { %3682 = vst.msk [vmem:[#allocation6 + $0x8] sm:$0xff] %vm3680_vm9, %v3649_v11  ;;  %v7122_v46 = vpop.f32.mrb[68].mxu1 }
 0x3d4   : > { %v3546_v16 = vadd.f32 %v7122_v46, %v3385_v61  ;;  %v3537_v17 = vpop.f32.mrb[69].mxu1 }
 0x3d5   : > { %v3538_v23 = vadd.f32 %v3537_v17, %v3377_v13  ;;  %v7123_v25 = vpop.f32.mrb[70].mxu1 }
 0x3d6   : > { %v3654_v28 = vmax.f32 %v3546_v16, 0.0  ;;  %v3549_v29 = vadd.f32 %v7123_v25, %v3388_v22  ;;  %v3540_v31 = vpop.f32.mrb[71].mxu1  ;;  %v3409_v22 = vadd.f32 %v8610_v37, %v8734_v38 }
 0x3d7   : > { %v3652_v14 = vmax.f32 %v3538_v23, 0.0  ;;  %v3541_v33 = vadd.f32 %v3540_v31, %v3380_v26  ;;  %v3420_v26 = vadd.f32 %v8644_v47, %v8734_v38 }
 0x3d8   : > { %3687 = vst.msk [vmem:[#allocation6 + $0x30] sm:$0xff] %vm3680_vm9, %v3654_v28  ;;  %v3655_v36 = vmax.f32 %v3549_v29, 0.0 }
 0x3d9   : > { %v3715_v34 = vld [vmem:[#allocation6 + $0x10] ss:$2 sm:$0xff]  ;;  %v3747_v2 = vld [vmem:[#allocation6 + $0x11] ss:$2 sm:$0xff]  ;;  %3685 = vst.msk [vmem:[#allocation6 + $0x20] sm:$0xff] %vm3680_vm9, %v3652_v14  ;;  %v3653_v40 = vmax.f32 %v3541_v33, 0.0  ;;  %v3412_v14 = vadd.f32 %v8640_v59, %v8734_v38 }
 0x3da   : > { %v3777_v10 = vmax.f32 %v3715_v34, %v3747_v2  ;;  %v3713_v20 = vld [vmem:[#allocation6] ss:$2 sm:$0xff]  ;;  %v3745_v44 = vld [vmem:[#allocation6 + $0x1] ss:$2 sm:$0xff]  ;;  %3688 = vst.msk [vmem:[#allocation6 + $0x38] sm:$0xff] %vm3680_vm9, %v3655_v36 }
 0x3db   : > { %v3776_v45 = vmax.f32 %v3713_v20, %v3745_v44  ;;  %3686 = vst.msk [vmem:[#allocation6 + $0x28] sm:$0xff] %vm3680_vm9, %v3653_v40  ;;  %v7126_v49 = vpop.f32.mrb[72].mxu1 }
 0x3dc   : > { %v3562_v53 = vadd.f32 %v7126_v49, %v3401_v15  ;;  %v3553_v4 = vpop.f32.mrb[73].mxu1  ;;  %v4476_v49 = vpop.permute.xlu1 %4475 }
 0x3dd   : > { %v3792_v57 = vpack.c.bf16 %v3777_v10, %v3776_v45  ;;  %v3554_v58 = vadd.f32 %v3553_v4, %v3393_v50  ;;  %v7127_v62 = vpop.f32.mrb[74].mxu1  ;;  %v3993_v45 = vpop.permute.xlu0 %3992  ;;  %4501 = vst.msk [vmem:[#allocation9 + $0x98] sm:$0xf] %vm4025_vm11, %v4476_v49  ;;  %v3452_v49 = vadd.f32 %v8687_v35, %v8734_v38 }
 0x3de   : > { %v3658_v1 = vmax.f32 %v3562_v53, 0.0  ;;  %v3565_v32 = vadd.f32 %v7127_v62, %v3404_v55  ;;  %v3556_v3 = vpop.f32.mrb[75].mxu1  ;;  %v3433_v55 = vadd.f32 %v8662_v8, %v8734_v38  ;;  %4026 = vst.msk [vmem:[#allocation9] sm:$0xf] %vm4025_vm11, %v3993_v45  ;;  %v7278_v8 = vld [vmem:[%s9420_s5 + $0xf0] sm:$0xff]  }
 0x3df   : > { %3800 = vst.msk [vmem:[#allocation7] sm:$0xff] %vm3680_vm9, %v3792_v57  ;;  %v3656_v43 = vmax.f32 %v3554_v58, 0.0  ;;  %v3557_v6 = vadd.f32 %v3556_v3, %v3396_v63  ;;  %v7277_v57 = vld [vmem:[%s9420_s5 + $0x18] sm:$0xff]   ;;  %v3425_v63 = vadd.f32 %v8646_v51, %v8734_v38  ;;  %v7280_v3 = vld [vmem:[%s9420_s5 + $0xb0] sm:$0xff]   ;;  %6890 = vmatprep.subr.bf16.mxu0 %v7278_v8 }
 0x3e0   : > { %3691 = vst.msk [vmem:[#allocation6 + $0x50] sm:$0xff] %vm3680_vm9, %v3658_v1  ;;  %v3659_v27 = vmax.f32 %v3565_v32, 0.0  ;;  %v7279_v32 = vld [vmem:[%s9420_s5 + $0x60] sm:$0xff]   ;;  %6833 = vmatpush3.bf16.msra.mxu1 %v7277_v57  ;;  %6891 = vmatpush3.bf16.msra.mxu0 %v7280_v3 }
 0x3e1   : > { %v3719_v9 = vld [vmem:[#allocation6 + $0x30] ss:$2 sm:$0xff]  ;;  %v3751_v11 = vld [vmem:[#allocation6 + $0x31] ss:$2 sm:$0xff]  ;;  %3689 = vst.msk [vmem:[#allocation6 + $0x40] sm:$0xff] %vm3680_vm9, %v3656_v43  ;;  %v3657_v0 = vmax.f32 %v3557_v6, 0.0  ;;  %6834 = vmatprep.subr.bf16.mxu1 %v7279_v32 }
 0x3e2   : > { %v3779_v61 = vmax.f32 %v3719_v9, %v3751_v11  ;;  %v3717_v46 = vld [vmem:[#allocation6 + $0x20] ss:$2 sm:$0xff]  ;;  %v3749_v13 = vld [vmem:[#allocation6 + $0x21] ss:$2 sm:$0xff]  ;;  %3692 = vst.msk [vmem:[#allocation6 + $0x58] sm:$0xff] %vm3680_vm9, %v3659_v27  ;;  %v3436_v27 = vadd.f32 %v8667_v12, %v8734_v38 }
 0x3e3   : > { %v3778_v16 = vmax.f32 %v3717_v46, %v3749_v13  ;;  %3690 = vst.msk [vmem:[#allocation6 + $0x48] sm:$0xff] %vm3680_vm9, %v3657_v0  ;;  %v7130_v17 = vpop.f32.mrb[76].mxu1  ;;  %v3428_v0 = vadd.f32 %v8654_v56, %v8734_v38  ;;  %v7281_v56 = vld [vmem:[%s9420_s5 + $0x20] sm:$0xff]  }
 0x3e4   : > { %v3578_v23 = vadd.f32 %v7130_v17, %v3417_v5  ;;  %v3569_v25 = vpop.f32.mrb[77].mxu1  ;;  %v4011_v17 = vpop.permute.xlu1 %4010  ;;  %6835 = vmatpush3.bf16.msra.mxu1 %v7281_v56  ;;  %v3465_v56 = vadd.f32 %v8700_v52, %v8734_v38  ;;  %v3468_v52 = vadd.f32 %v8702_v54, %v8734_v38 }
 0x3e5   : > { %v3793_v28 = vpack.c.bf16 %v3779_v61, %v3778_v16  ;;  %v3570_v29 = vadd.f32 %v3569_v25, %v3409_v22  ;;  %v7131_v31 = vpop.f32.mrb[78].mxu1  ;;  %v8820_v61 = vpop.permute.xlu0 %4165  ;;  %4035 = vst.msk [vmem:[#allocation9 + $0xb4] sm:$0xf] %vm4025_vm11, %v4011_v17  ;;  %v7282_v25 = vld [vmem:[%s9420_s5 + $0x68] sm:$0xff]  }
 0x3e6   : > { %v3662_v33 = vmax.f32 %v3578_v23, 0.0  ;;  %v3581_v42 = vadd.f32 %v7131_v31, %v3420_v26  ;;  %v3572_v36 = vpop.f32.mrb[79].mxu1  ;;  %v3823_v34 = vld [vmem:[#allocation7] sm:$0xf0]  ;;  %v3822_v47 = vld [vmem:[#allocation7] sm:$0xf]  ;;  %6836 = vmatprep.subr.bf16.mxu1 %v7282_v25 }
 0x3e7   : > { %3801 = vst.msk [vmem:[#allocation7 + $0x8] sm:$0xff] %vm3680_vm9, %v3793_v28  ;;  %v3660_v2 = vmax.f32 %v3570_v29, 0.0  ;;  %v3573_v40 = vadd.f32 %v3572_v36, %v3412_v14  ;;  %v3825_v37 = vrot.slane %v3823_v34, 4  ;;  %v7287_v25 = vld [vmem:[%s9420_s5 + $0x38] sm:$0xff]  }
 0x3e8   : > { %3695 = vst.msk [vmem:[#allocation6 + $0x70] sm:$0xff] %vm3680_vm9, %v3662_v33  ;;  %v3663_v10 = vmax.f32 %v3581_v42, 0.0 }
 0x3e9   : > { %v3723_v20 = vld [vmem:[#allocation6 + $0x50] ss:$2 sm:$0xff]  ;;  %v3755_v44 = vld [vmem:[#allocation6 + $0x51] ss:$2 sm:$0xff]  ;;  %3693 = vst.msk [vmem:[#allocation6 + $0x60] sm:$0xff] %vm3680_vm9, %v3660_v2  ;;  %v3661_v15 = vmax.f32 %v3573_v40, 0.0  ;;  %v3827_v59 = vmax.bf16 %v3825_v37, %v3822_v47  ;;  %v4322_v42 = vpop.permute.xlu0 %4321  ;;  %v3449_v40 = vadd.f32 %v8685_v30, %v8734_v38  ;;  %v4168_v37 = vpop.permute.xlu1 %4167 }
 0x3ea   : > { %v3781_v50 = vmax.f32 %v3723_v20, %v3755_v44  ;;  %v3721_v53 = vld [vmem:[#allocation6 + $0x40] ss:$2 sm:$0xff]  ;;  %v3753_v4 = vld [vmem:[#allocation6 + $0x41] ss:$2 sm:$0xff]  ;;  %3696 = vst.msk [vmem:[#allocation6 + $0x78] sm:$0xff] %vm3680_vm9, %v3663_v10  ;;  %v3441_v44 = vadd.f32 %v8675_v21, %v8734_v38  ;;  %v3444_v21 = vadd.f32 %v8677_v24, %v8734_v38 }
 0x3eb   : > { %v3780_v58 = vmax.f32 %v3721_v53, %v3753_v4  ;;  %3694 = vst.msk [vmem:[#allocation6 + $0x68] sm:$0xff] %vm3680_vm9, %v3661_v15  ;;  %v7134_v62 = vpop.f32.mrb[80].mxu1  ;;  %v3828_v1 = vunpack.c.l.bf16 %v3827_v59  ;;  %v7283_v10 = vld [vmem:[%s9420_s5 + $0x28] sm:$0xff]   ;;  %v7284_v30 = vld [vmem:[%s9420_s5 + $0x70] sm:$0xff]  }
 0x3ec   : > { %v3594_v43 = vadd.f32 %v7134_v62, %v3433_v55  ;;  %v3585_v6 = vpop.f32.mrb[81].mxu1  ;;  %4346 = vst.msk [vmem:[#allocation9 + $0xa8] sm:$0xf] %vm4025_vm11, %v4322_v42  ;;  %4191 = vst.msk [vmem:[#allocation9 + $0xb8] sm:$0xf] %vm4025_vm11, %v4168_v37  ;;  %6837 = vmatpush3.bf16.msra.mxu1 %v7283_v10  ;;  %v3460_v42 = vadd.f32 %v8691_v39, %v8734_v38 }
 0x3ed   : > { %v3794_v51 = vpack.c.bf16 %v3781_v50, %v3780_v58  ;;  %v3586_v9 = vadd.f32 %v3585_v6, %v3425_v63  ;;  %v7135_v11 = vpop.f32.mrb[82].mxu1  ;;  %3830 = vst.msk [vmem:[#allocation8 + $0xa] sm:$0x7f] %vm3829_vm12, %v3828_v1  ;;  %6838 = vmatprep.subr.bf16.mxu1 %v7284_v30 }
 0x3ee   : > { %v3666_v46 = vmax.f32 %v3594_v43, 0.0  ;;  %v3597_v13 = vadd.f32 %v7135_v11, %v3436_v27  ;;  %v3588_v5 = vpop.f32.mrb[83].mxu1  ;;  %v3832_v16 = vld [vmem:[#allocation7 + $0x8] sm:$0xf0]  ;;  %v3831_v28 = vld [vmem:[#allocation7 + $0x8] sm:$0xf] }
 0x3ef   : > { %3802 = vst.msk [vmem:[#allocation7 + $0x10] sm:$0xff] %vm3680_vm9, %v3794_v51  ;;  %v3664_v12 = vmax.f32 %v3586_v9, 0.0  ;;  %v3589_v22 = vadd.f32 %v3588_v5, %v3428_v0  ;;  %v3834_v23 = vrot.slane %v3832_v16, 4  ;;  %v7285_v51 = vld [vmem:[%s9420_s5 + $0x30] sm:$0xff]   ;;  %v7286_v9 = vld [vmem:[%s9420_s5 + $0x78] sm:$0xff]  }
 0x3f0   : > { %3699 = vst.msk [vmem:[#allocation6 + $0x90] sm:$0xff] %vm3680_vm9, %v3666_v46  ;;  %v3667_v26 = vmax.f32 %v3597_v13, 0.0  ;;  %6839 = vmatpush3.bf16.msra.mxu1 %v7285_v51 }
 0x3f1   : > { %v3727_v29 = vld [vmem:[#allocation6 + $0x70] ss:$2 sm:$0xff]  ;;  %v3759_v31 = vld [vmem:[#allocation6 + $0x71] ss:$2 sm:$0xff]  ;;  %3697 = vst.msk [vmem:[#allocation6 + $0x80] sm:$0xff] %vm3680_vm9, %v3664_v12  ;;  %v3665_v14 = vmax.f32 %v3589_v22, 0.0  ;;  %v3836_v33 = vmax.bf16 %v3834_v23, %v3831_v28  ;;  %6840 = vmatprep.subr.bf16.mxu1 %v7286_v9 }
 0x3f2   : > { %v3783_v36 = vmax.f32 %v3727_v29, %v3759_v31  ;;  %v3725_v34 = vld [vmem:[#allocation6 + $0x60] ss:$2 sm:$0xff]  ;;  %v3757_v2 = vld [vmem:[#allocation6 + $0x61] ss:$2 sm:$0xff]  ;;  %3700 = vst.msk [vmem:[#allocation6 + $0x98] sm:$0xff] %vm3680_vm9, %v3667_v26  ;;  %v3457_v29 = vadd.f32 %v8689_v48, %v8734_v38 }
 0x3f3   : > { %v3782_v47 = vmax.f32 %v3725_v34, %v3757_v2  ;;  %3698 = vst.msk [vmem:[#allocation6 + $0x88] sm:$0xff] %vm3680_vm9, %v3665_v14  ;;  %v7138_v20 = vpop.f32.mrb[84].mxu1  ;;  %v3837_v15 = vunpack.c.l.bf16 %v3836_v33 }
 0x3f4   : > { %v3610_v59 = vadd.f32 %v7138_v20, %v3449_v40  ;;  %v3601_v45 = vpop.f32.mrb[85].mxu1  ;;  %v4104_v50 = vld [vmem:[#allocation8 + $0x9] sm:$0xff]  ;;  %6841 = vmatpush3.bf16.msra.mxu1 %v7287_v25 }
 0x3f5   : > { %v3880_v53 = vld [vmem:[#allocation8 + $0x8] sm:$0xff]  ;;  %v3795_v4 = vpack.c.bf16 %v3783_v36, %v3782_v47  ;;  %v3602_v55 = vadd.f32 %v3601_v45, %v3441_v44  ;;  %v7139_v57 = vpop.f32.mrb[86].mxu1  ;;  %v6516_v58 = vpack.c.bf16 %v4104_v50, %v4104_v50  ;;  %3838 = vst.msk [vmem:[#allocation8 + $0x13] sm:$0x7f] %vm3829_vm12, %v3837_v15 }
 0x3f6   : > { %v4193_v62 = vld [vmem:[#allocation8 + $0xa] sm:$0xff]  ;;  %v3670_v63 = vmax.f32 %v3610_v59, 0.0  ;;  %v3613_v1 = vadd.f32 %v7139_v57, %v3452_v49  ;;  %v3604_v8 = vpop.f32.mrb[87].mxu1  ;;  %v3840_v3 = vld [vmem:[#allocation7 + $0x10] sm:$0xf0]  ;;  %v6484_v43 = vpack.c.bf16 %v3880_v53, %v3880_v53 }
 0x3f7   : > { %v4260_v32 = vld [vmem:[#allocation8 + $0xb] sm:$0xff]  ;;  %v6527_v35 = vpack.c.bf16 %v4193_v62, %v4193_v62  ;;  %3803 = vst.msk [vmem:[#allocation7 + $0x18] sm:$0xff] %vm3680_vm9, %v3795_v4  ;;  %v3668_v6 = vmax.f32 %v3602_v55, 0.0  ;;  %v3605_v27 = vadd.f32 %v3604_v8, %v3444_v21  ;;  %4149 = vrot.lane.b32.xlu0 %v6516_v58, %s7470_s30  ;;  %3994 = vrot.lane.b32.xlu1 %v6516_v58, %s7470_s30  ;;  %v3842_v24 = vrot.slane %v3840_v3, 4 }
 0x3f8   : > { %3703 = vst.msk [vmem:[#allocation6 + $0xb0] sm:$0xff] %vm3680_vm9, %v3670_v63  ;;  %v3671_v11 = vmax.f32 %v3613_v1, 0.0  ;;  %v3839_v0 = vld [vmem:[#allocation7 + $0x10] sm:$0xf]  ;;  %v6538_v16 = vpack.c.bf16 %v4260_v32, %v4260_v32 }
 0x3f9   : > { %3937 = vst.msk [vmem:[#allocation9 + $0x14] sm:$0xf] %vm3935_vm10, %v6484_v43  ;;  %4249 = vst.msk [vmem:[#allocation9 + $0x8] sm:$0xf] %vm3935_vm10, %v6527_v35  ;;  %v3731_v46 = vld [vmem:[#allocation6 + $0x90] ss:$2 sm:$0xff]  ;;  %v3844_v17 = vmax.bf16 %v3842_v24, %v3839_v0  ;;  %v3481_v43 = vadd.f32 %v8723_v18, %v8734_v38  ;;  %v3473_v24 = vadd.f32 %v8704_v60, %v8734_v38 }
 0x3fa   : > { %4094 = vst.msk [vmem:[#allocation9 + $0x18] sm:$0xf] %vm3935_vm10, %v6527_v35  ;;  %v3763_v13 = vld [vmem:[#allocation6 + $0x91] ss:$2 sm:$0xff]  ;;  %v3669_v5 = vmax.f32 %v3605_v27, 0.0  ;;  %v3484_v18 = vadd.f32 %v8728_v19, %v8734_v38  ;;  %v3476_v0 = vadd.f32 %v8706_v41, %v8734_v38 }
 0x3fb   : > { %3701 = vst.msk [vmem:[#allocation6 + $0xa0] sm:$0xff] %vm3680_vm9, %v3668_v6  ;;  %v3785_v12 = vmax.f32 %v3731_v46, %v3763_v13  ;;  %v3729_v22 = vld [vmem:[#allocation6 + $0x80] ss:$2 sm:$0xff]  ;;  %v3761_v23 = vld [vmem:[#allocation6 + $0x81] ss:$2 sm:$0xff]  ;;  %3704 = vst.msk [vmem:[#allocation6 + $0xb8] sm:$0xff] %vm3680_vm9, %v3671_v11  ;;  %4305 = vrot.lane.b32.xlu0 %v6538_v16, %s7470_s30  ;;  %v3845_v31 = vunpack.c.l.bf16 %v3844_v17 }
 0x3fc   : > { %v3784_v26 = vmax.f32 %v3729_v22, %v3761_v23  ;;  %3702 = vst.msk [vmem:[#allocation6 + $0xa8] sm:$0xff] %vm3680_vm9, %v3669_v5  ;;  %v7142_v28 = vpop.f32.mrb[88].mxu1  ;;  %v4416_v36 = vld [vmem:[#allocation8 + $0x13] sm:$0xff] }
 0x3fd   : > { %v3626_v14 = vadd.f32 %v7142_v28, %v3465_v56  ;;  %v3617_v33 = vpop.f32.mrb[89].mxu1  ;;  %v4105_v34 = vld [vmem:[#allocation8 + $0x11] sm:$0xff]  ;;  %v6560_v47 = vpack.c.bf16 %v4416_v36, %v4416_v36  ;;  %3846 = vst.msk [vmem:[#allocation8 + $0x1c] sm:$0x7f] %vm3829_vm12, %v3845_v31 }
 0x3fe   : > { %v4349_v2 = vld [vmem:[#allocation8 + $0x12] sm:$0xff]  ;;  %v3796_v40 = vpack.c.bf16 %v3785_v12, %v3784_v26  ;;  %v3618_v37 = vadd.f32 %v3617_v33, %v3457_v29  ;;  %v7143_v10 = vpop.f32.mrb[90].mxu1  ;;  %v6517_v20 = vpack.c.bf16 %v4105_v34, %v4105_v34  ;;  %v3848_v54 = vld [vmem:[#allocation7 + $0x18] sm:$0xf0] }
 0x3ff   : > { %v3881_v48 = vld [vmem:[#allocation8 + $0x10] sm:$0xff]  ;;  %v3674_v15 = vmax.f32 %v3626_v14, 0.0  ;;  %v3629_v30 = vadd.f32 %v7143_v10, %v3468_v52  ;;  %v3620_v59 = vpop.f32.mrb[91].mxu1  ;;  %v6549_v45 = vpack.c.bf16 %v4349_v2, %v4349_v2  ;;  %4461 = vrot.lane.b32.xlu0 %v6560_v47, %s7470_s30  ;;  %v3850_v53 = vrot.slane %v3848_v54, 4  ;;  %v3847_v21 = vld [vmem:[#allocation7 + $0x18] sm:$0xf] }
 0x400   : > { %v4505_v44 = vld [vmem:[#allocation8 + $0x14] sm:$0xff]  ;;  %v6485_v49 = vpack.c.bf16 %v3881_v48, %v3881_v48  ;;  %3804 = vst.msk [vmem:[#allocation7 + $0x20] sm:$0xff] %vm3680_vm9, %v3796_v40  ;;  %v3672_v39 = vmax.f32 %v3618_v37, 0.0  ;;  %v3621_v50 = vadd.f32 %v3620_v59, %v3460_v42  ;;  %4151 = vrot.lane.b32.xlu1 %v6517_v20, %s7470_s30 }
 0x401   : > { %v7291_v4 = vld [vmem:[%s9420_s5 + $0xf8] sm:$0xff]   ;;  %v6571_v55 = vpack.c.bf16 %v4505_v44, %v4505_v44  ;;  %3707 = vst.msk [vmem:[#allocation6 + $0xd0] sm:$0xff] %vm3680_vm9, %v3674_v15  ;;  %v3675_v57 = vmax.f32 %v3629_v30, 0.0  ;;  %v3852_v1 = vmax.bf16 %v3850_v53, %v3847_v21 }
 0x402   : > { %4405 = vst.msk [vmem:[#allocation9 + $0xc] sm:$0xf] %vm3935_vm10, %v6549_v45  ;;  %3938 = vst.msk [vmem:[#allocation9 + $0x28] sm:$0xf] %vm3935_vm10, %v6485_v49  ;;  %v3735_v58 = vld [vmem:[#allocation6 + $0xb0] ss:$2 sm:$0xff]  ;;  %6892 = vmatprep.subr.bf16.mxu0 %v7291_v4 }
 0x403   : > { %4250 = vst.msk [vmem:[#allocation9 + $0x1c] sm:$0xf] %vm3935_vm10, %v6549_v45  ;;  %4095 = vst.msk [vmem:[#allocation9 + $0x2c] sm:$0xf] %vm3935_vm10, %v6549_v45  ;;  %v3767_v62 = vld [vmem:[#allocation6 + $0xb1] ss:$2 sm:$0xff]  ;;  %3996 = vrot.lane.b32.xlu0 %v6517_v20, %s7470_s30  ;;  %v3853_v51 = vunpack.c.l.bf16 %v3852_v1 }
 0x404   : > { %3705 = vst.msk [vmem:[#allocation6 + $0xc0] sm:$0xff] %vm3680_vm9, %v3672_v39  ;;  %v3673_v63 = vmax.f32 %v3621_v50, 0.0  ;;  %v3787_v8 = vmax.f32 %v3735_v58, %v3767_v62  ;;  %v3733_v32 = vld [vmem:[#allocation6 + $0xa0] ss:$2 sm:$0xff]  ;;  %v3765_v3 = vld [vmem:[#allocation6 + $0xa1] ss:$2 sm:$0xff]  ;;  %4307 = vrot.lane.b32.xlu1 %v6560_v47, %s7470_s30 }
 0x405   : > { %4561 = vst.msk [vmem:[#allocation9 + $0x10] sm:$0xf] %vm3935_vm10, %v6571_v55  ;;  %v7292_v35 = vld [vmem:[%s9420_s5 + $0xb8] sm:$0xff]   ;;  %v3786_v6 = vmax.f32 %v3733_v32, %v3765_v3  ;;  %v7146_v27 = vpop.f32.mrb[92].mxu1  ;;  %v4106_v46 = vld [vmem:[#allocation8 + $0x19] sm:$0xff] }
 0x406   : > { %3708 = vst.msk [vmem:[#allocation6 + $0xd8] sm:$0xff] %vm3680_vm9, %v3675_v57  ;;  %3706 = vst.msk [vmem:[#allocation6 + $0xc8] sm:$0xff] %vm3680_vm9, %v3673_v63  ;;  %v3642_v9 = vadd.f32 %v7146_v27, %v3481_v43  ;;  %v3633_v11 = vpop.f32.mrb[93].mxu1  ;;  %v4417_v13 = vld [vmem:[#allocation8 + $0x1b] sm:$0xff]  ;;  %6893 = vmatpush3.bf16.msra.mxu0 %v7292_v35  ;;  %v6518_v22 = vpack.c.bf16 %v4106_v46, %v4106_v46 }
 0x407   : > { %v4350_v5 = vld [vmem:[#allocation8 + $0x1a] sm:$0xff]  ;;  %v3797_v16 = vpack.c.bf16 %v3787_v8, %v3786_v6  ;;  %v3634_v17 = vadd.f32 %v3633_v11, %v3473_v24  ;;  %v7147_v12 = vpop.f32.mrb[94].mxu1  ;;  %v6561_v23 = vpack.c.bf16 %v4417_v13, %v4417_v13  ;;  %3854 = vst.msk [vmem:[#allocation8 + $0x25] sm:$0x7f] %vm3829_vm12, %v3853_v51  ;;  %v3856_v19 = vld [vmem:[#allocation7 + $0x20] sm:$0xf0] }
 0x408   : > { %v3882_v60 = vld [vmem:[#allocation8 + $0x18] sm:$0xff]  ;;  %v3678_v25 = vmax.f32 %v3642_v9, 0.0  ;;  %v3645_v26 = vadd.f32 %v7147_v12, %v3484_v18  ;;  %v3636_v28 = vpop.f32.mrb[95].mxu1  ;;  %v6550_v29 = vpack.c.bf16 %v4350_v5, %v4350_v5  ;;  %4153 = vrot.lane.b32.xlu0 %v6518_v22, %s7470_s30  ;;  %v3858_v14 = vrot.slane %v3856_v19, 4  ;;  %v3855_v42 = vld [vmem:[#allocation7 + $0x20] sm:$0xf] }
 0x409   : > { %v4506_v56 = vld [vmem:[#allocation8 + $0x1c] sm:$0xff]  ;;  %v6486_v31 = vpack.c.bf16 %v3882_v60, %v3882_v60  ;;  %3805 = vst.msk [vmem:[#allocation7 + $0x28] sm:$0xff] %vm3680_vm9, %v3797_v16  ;;  %v3676_v41 = vmax.f32 %v3634_v17, 0.0  ;;  %v3637_v38 = vadd.f32 %v3636_v28, %v3476_v0  ;;  %4463 = vrot.lane.b32.xlu1 %v6561_v23, %s7470_s30  ;;  %v4357_v19 = vld [vmem:[#allocation8 + $0x52] sm:$0xff] }
 0x40a   : > { %v6572_v33 = vpack.c.bf16 %v4506_v56, %v4506_v56  ;;  %3711 = vst.msk [vmem:[#allocation6 + $0xf0] sm:$0xff] %vm3680_vm9, %v3678_v25  ;;  %v3679_v52 = vmax.f32 %v3645_v26, 0.0  ;;  %v3860_v40 = vmax.bf16 %v3858_v14, %v3855_v42  ;;  %v8937_v63 = vld [vmem:[%s9420_s5 + $0x100] sm:$0xff]  }
 0x40b   : > { %4406 = vst.msk [vmem:[#allocation9 + $0x20] sm:$0xf] %vm3935_vm10, %v6550_v29  ;;  %4251 = vst.msk [vmem:[#allocation9 + $0x30] sm:$0xf] %vm3935_vm10, %v6550_v29  ;;  %v3677_v2 = vmax.f32 %v3637_v38, 0.0  ;;  %7174 = vmatprep.subr.bf16.mxu1 %v8937_v63  ;;  %7148 = vmatprep.subr.bf16.mxu0 %v8937_v63 }
 0x40c   : > { %3939 = vst.msk [vmem:[#allocation9 + $0x3c] sm:$0xf] %vm3935_vm10, %v6486_v31  ;;  %4096 = vst.msk [vmem:[#allocation9 + $0x40] sm:$0xf] %vm3935_vm10, %v6550_v29  ;;  %4309 = vrot.lane.b32.xlu0 %v6561_v23, %s7470_s30  ;;  %v3861_v48 = vunpack.c.l.bf16 %v3860_v40 }
 0x40d   : > { %v3739_v36 = vld [vmem:[#allocation6 + $0xd0] ss:$2 sm:$0xff]  ;;  %v3771_v34 = vld [vmem:[#allocation6 + $0xd1] ss:$2 sm:$0xff]  ;;  %3709 = vst.msk [vmem:[#allocation6 + $0xe0] sm:$0xff] %vm3680_vm9, %v3676_v41  ;;  %3712 = vst.msk [vmem:[#allocation6 + $0xf8] sm:$0xff] %vm3680_vm9, %v3679_v52  ;;  %3998 = vrot.lane.b32.xlu1 %v6518_v22, %s7470_s30  ;;  %v6557_v41 = vpack.c.bf16 %v4357_v19, %v4357_v19 }
 0x40e   : > { %4562 = vst.msk [vmem:[#allocation9 + $0x24] sm:$0xf] %vm3935_vm10, %v6572_v33  ;;  %v3789_v37 = vmax.f32 %v3739_v36, %v3771_v34  ;;  %v3737_v10 = vld [vmem:[#allocation6 + $0xc0] ss:$2 sm:$0xff]  ;;  %v3769_v47 = vld [vmem:[#allocation6 + $0xc1] ss:$2 sm:$0xff] }
 0x40f   : > { %v3788_v20 = vmax.f32 %v3737_v10, %v3769_v47  ;;  %3710 = vst.msk [vmem:[#allocation6 + $0xe8] sm:$0xff] %vm3680_vm9, %v3677_v2  ;;  %v4418_v44 = vld [vmem:[#allocation8 + $0x23] sm:$0xff] }
 0x410   : > { %v4107_v15 = vld [vmem:[#allocation8 + $0x21] sm:$0xff]  ;;  %v6562_v54 = vpack.c.bf16 %v4418_v44, %v4418_v44  ;;  %3862 = vst.msk [vmem:[#allocation8 + $0x2e] sm:$0x7f] %vm3829_vm12, %v3861_v48  ;;  %v3864_v53 = vld [vmem:[#allocation7 + $0x28] sm:$0xf0] }
 0x411   : > { %v4351_v30 = vld [vmem:[#allocation8 + $0x22] sm:$0xff]  ;;  %v3798_v59 = vpack.c.bf16 %v3789_v37, %v3788_v20  ;;  %v6519_v45 = vpack.c.bf16 %v4107_v15, %v4107_v15  ;;  %v3866_v57 = vrot.slane %v3864_v53, 4  ;;  %4413 = vst.msk [vmem:[#allocation9 + $0xac] sm:$0xf] %vm3935_vm10, %v6557_v41  ;;  %4258 = vst.msk [vmem:[#allocation9 + $0xbc] sm:$0xf] %vm3935_vm10, %v6557_v41 }
 0x412   : > { %v6551_v49 = vpack.c.bf16 %v4351_v30, %v4351_v30  ;;  %v3883_v39 = vld [vmem:[#allocation8 + $0x20] sm:$0xff]  ;;  %4465 = vrot.lane.b32.xlu0 %v6562_v54, %s7470_s30  ;;  %v3863_v21 = vld [vmem:[#allocation7 + $0x28] sm:$0xf]  ;;  %4103 = vst.msk [vmem:[#allocation9 + $0xcc] sm:$0xf] %vm3935_vm10, %v6557_v41  ;;  %v4424_v15 = vld [vmem:[#allocation8 + $0x53] sm:$0xff] }
 0x413   : > { %v4507_v50 = vld [vmem:[#allocation8 + $0x24] sm:$0xff]  ;;  %v6487_v4 = vpack.c.bf16 %v3883_v39, %v3883_v39  ;;  %3806 = vst.msk [vmem:[#allocation7 + $0x30] sm:$0xff] %vm3680_vm9, %v3798_v59  ;;  %4155 = vrot.lane.b32.xlu1 %v6519_v45, %s7470_s30  ;;  %v3868_v58 = vmax.bf16 %v3866_v57, %v3863_v21  ;;  %v4358_v44 = vld [vmem:[#allocation8 + $0x5a] sm:$0xff] }
 0x414   : > { %v6573_v55 = vpack.c.bf16 %v4507_v50, %v4507_v50  ;;  %4407 = vst.msk [vmem:[#allocation9 + $0x34] sm:$0xf] %vm3935_vm10, %v6551_v49  ;;  %4252 = vst.msk [vmem:[#allocation9 + $0x44] sm:$0xf] %vm3935_vm10, %v6551_v49  ;;  %v6558_v30 = vpack.c.bf16 %v4358_v44, %v4358_v44  ;;  %v4359_v39 = vld [vmem:[#allocation8 + $0x62] sm:$0xff] }
 0x415   : > { %4097 = vst.msk [vmem:[#allocation9 + $0x54] sm:$0xf] %vm3935_vm10, %v6551_v49  ;;  %3940 = vst.msk [vmem:[#allocation9 + $0x50] sm:$0xf] %vm3935_vm10, %v6487_v4  ;;  %v3869_v62 = vunpack.c.l.bf16 %v3868_v58  ;;  %v4425_v50 = vld [vmem:[#allocation8 + $0x5b] sm:$0xff]  ;;  %v6559_v53 = vpack.c.bf16 %v4359_v39, %v4359_v39  ;;  %v4426_v21 = vld [vmem:[#allocation8 + $0x63] sm:$0xff] }
 0x416   : > { %4563 = vst.msk [vmem:[#allocation9 + $0x38] sm:$0xf] %vm3935_vm10, %v6573_v55  ;;  %4000 = vrot.lane.b32.xlu0 %v6519_v45, %s7470_s30  ;;  %4414 = vst.msk [vmem:[#allocation9 + $0xc0] sm:$0xf] %vm3935_vm10, %v6558_v30  ;;  %v3889_v45 = vld [vmem:[#allocation8 + $0x50] sm:$0xff]  ;;  %v6569_v4 = vpack.c.bf16 %v4425_v50, %v4425_v50  ;;  %v4114_v55 = vld [vmem:[#allocation8 + $0x59] sm:$0xff]  ;;  %v6570_v58 = vpack.c.bf16 %v4426_v21, %v4426_v21 }
 0x417   : > { %4311 = vrot.lane.b32.xlu1 %v6562_v54, %s7470_s30  ;;  %v4108_v1 = vld [vmem:[#allocation8 + $0x29] sm:$0xff]  ;;  %3870 = vst.msk [vmem:[#allocation8 + $0x37] sm:$0x7f] %vm3829_vm12, %v3869_v62  ;;  %v6493_v49 = vpack.c.bf16 %v3889_v45, %v3889_v45  ;;  %v6526_v57 = vpack.c.bf16 %v4114_v55, %v4114_v55  ;;  %v4513_v62 = vld [vmem:[#allocation8 + $0x54] sm:$0xff] }
 0x418   : > { %v4419_v8 = vld [vmem:[#allocation8 + $0x2b] sm:$0xff]  ;;  %v6520_v3 = vpack.c.bf16 %v4108_v1, %v4108_v1  ;;  %4259 = vst.msk [vmem:[#allocation9 + $0xd0] sm:$0xf] %vm3935_vm10, %v6558_v30  ;;  %4415 = vst.msk [vmem:[#allocation9 + $0xd4] sm:$0xf] %vm3935_vm10, %v6559_v53  ;;  %v4514_v1 = vld [vmem:[#allocation8 + $0x5c] sm:$0xff] }
 0x419   : > { %v4352_v32 = vld [vmem:[#allocation8 + $0x2a] sm:$0xff]  ;;  %v6563_v43 = vpack.c.bf16 %v4419_v8, %v4419_v8  ;;  %3946 = vst.msk [vmem:[#allocation9 + $0xc8] sm:$0xf] %vm3935_vm10, %v6493_v49 }
 0x41a   : > { %v6552_v35 = vpack.c.bf16 %v4352_v32, %v4352_v32  ;;  %v3884_v6 = vld [vmem:[#allocation8 + $0x28] sm:$0xff]  ;;  %v3872_v24 = vld [vmem:[#allocation7 + $0x30] sm:$0xf0]  ;;  %4157 = vrot.lane.b32.xlu0 %v6520_v3, %s7470_s30  ;;  %v3871_v18 = vld [vmem:[#allocation7 + $0x30] sm:$0xf]  ;;  %v6579_v32 = vpack.c.bf16 %v4513_v62, %v4513_v62 }
 0x41b   : > { %v4508_v27 = vld [vmem:[#allocation8 + $0x2c] sm:$0xff]  ;;  %v6488_v51 = vpack.c.bf16 %v3884_v6, %v3884_v6  ;;  %4467 = vrot.lane.b32.xlu1 %v6563_v43, %s7470_s30  ;;  %v3874_v11 = vrot.slane %v3872_v24, 4  ;;  %v4515_v8 = vld [vmem:[#allocation8 + $0x64] sm:$0xff] }
 0x41c   : > { %v6574_v9 = vpack.c.bf16 %v4508_v27, %v4508_v27  ;;  %4408 = vst.msk [vmem:[#allocation9 + $0x48] sm:$0xf] %vm3935_vm10, %v6552_v35  ;;  %4253 = vst.msk [vmem:[#allocation9 + $0x58] sm:$0xf] %vm3935_vm10, %v6552_v35 }
 0x41d   : > { %4098 = vst.msk [vmem:[#allocation9 + $0x68] sm:$0xf] %vm3935_vm10, %v6552_v35  ;;  %3941 = vst.msk [vmem:[#allocation9 + $0x64] sm:$0xf] %vm3935_vm10, %v6488_v51  ;;  %v3876_v0 = vmax.bf16 %v3874_v11, %v3871_v18 }
 0x41e   : > { %4564 = vst.msk [vmem:[#allocation9 + $0x4c] sm:$0xf] %vm3935_vm10, %v6574_v9  ;;  %4313 = vrot.lane.b32.xlu0 %v6563_v43, %s7470_s30  ;;  %v4420_v13 = vld [vmem:[#allocation8 + $0x33] sm:$0xff]  ;;  %v6581_v43 = vpack.c.bf16 %v4515_v8, %v4515_v8  ;;  %4569 = vst.msk [vmem:[#allocation9 + $0xb0] sm:$0xf] %vm3935_vm10, %v6579_v32 }
 0x41f   : > { %4002 = vrot.lane.b32.xlu1 %v6520_v3, %s7470_s30  ;;  %v3877_v46 = vunpack.c.l.bf16 %v3876_v0  ;;  %v4109_v5 = vld [vmem:[#allocation8 + $0x31] sm:$0xff]  ;;  %v6564_v17 = vpack.c.bf16 %v4420_v13, %v4420_v13  ;;  %v6580_v3 = vpack.c.bf16 %v4514_v1, %v4514_v1  ;;  %v7303_v13 = vld [vmem:[%s9420_s5 + $0x108] sm:$0xff]  }
 0x420   : > { %v4353_v16 = vld [vmem:[#allocation8 + $0x32] sm:$0xff]  ;;  %v6521_v12 = vpack.c.bf16 %v4109_v5, %v4109_v5  ;;  %4571 = vst.msk [vmem:[#allocation9 + $0xd8] sm:$0xf] %vm3935_vm10, %v6581_v43 }
 0x421   : > { %3878 = vst.msk [vmem:[#allocation8 + $0x40] sm:$0x7f] %vm3829_vm12, %v3877_v46  ;;  %v6553_v22 = vpack.c.bf16 %v4353_v16, %v4353_v16  ;;  %v3885_v23 = vld [vmem:[#allocation8 + $0x30] sm:$0xff]  ;;  %v3886_v60 = vld [vmem:[#allocation8 + $0x38] sm:$0xff] }
 0x422   : > { %v4509_v56 = vld [vmem:[#allocation8 + $0x34] sm:$0xff]  ;;  %v6489_v25 = vpack.c.bf16 %v3885_v23, %v3885_v23  ;;  %v6490_v26 = vpack.c.bf16 %v3886_v60, %v3886_v60  ;;  %4469 = vrot.lane.b32.xlu0 %v6564_v17, %s7470_s30  ;;  %4570 = vst.msk [vmem:[#allocation9 + $0xc4] sm:$0xf] %vm3935_vm10, %v6580_v3 }
 0x423   : > { %v6575_v28 = vpack.c.bf16 %v4509_v56, %v4509_v56  ;;  %4159 = vrot.lane.b32.xlu1 %v6521_v12, %s7470_s30  ;;  %4409 = vst.msk [vmem:[#allocation9 + $0x5c] sm:$0xf] %vm3935_vm10, %v6553_v22  ;;  %4254 = vst.msk [vmem:[#allocation9 + $0x6c] sm:$0xf] %vm3935_vm10, %v6553_v22  ;;  %v7315_v56 = vld [vmem:[%s9420_s5 + $0x118] sm:$0xff]  }
 0x424   : > { %4099 = vst.msk [vmem:[#allocation9 + $0x7c] sm:$0xf] %vm3935_vm10, %v6553_v22  ;;  %3942 = vst.msk [vmem:[#allocation9 + $0x78] sm:$0xf] %vm3935_vm10, %v6489_v25 }
 0x425   : > { %3943 = vst.msk [vmem:[#allocation9 + $0x8c] sm:$0xf] %vm3935_vm10, %v6490_v26  ;;  %4565 = vst.msk [vmem:[#allocation9 + $0x60] sm:$0xf] %vm3935_vm10, %v6575_v28 }
 0x426   : > { %4004 = vrot.lane.b32.xlu0 %v6521_v12, %s7470_s30 }
 0x427   : > { %4315 = vrot.lane.b32.xlu1 %v6564_v17, %s7470_s30  ;;  %v7308_v17 = vld [vmem:[%s9420_s5 + $0x110] sm:$0xff]  }
 0x428   : > { %v4110_v29 = vld [vmem:[#allocation8 + $0x39] sm:$0xff]  ;;  %v4045_v33 = vld [vmem:[#allocation8 + $0x42] sm:$0xff] }
 0x429   : > { %v4421_v31 = vld [vmem:[#allocation8 + $0x3b] sm:$0xff]  ;;  %v6522_v38 = vpack.c.bf16 %v4110_v29, %v4110_v29  ;;  %v6513_v42 = vpack.c.bf16 %v4045_v33, %v4045_v33  ;;  %v4511_v40 = vld [vmem:[#allocation8 + $0x44] sm:$0xff] }
 0x42a   : > { %v6565_v14 = vpack.c.bf16 %v4421_v31, %v4421_v31  ;;  %v4354_v52 = vld [vmem:[#allocation8 + $0x3a] sm:$0xff]  ;;  %v6577_v47 = vpack.c.bf16 %v4511_v40, %v4511_v40  ;;  %v4422_v20 = vld [vmem:[#allocation8 + $0x43] sm:$0xff] }
 0x42b   : > { %v6554_v36 = vpack.c.bf16 %v4354_v52, %v4354_v52  ;;  %v3887_v34 = vld [vmem:[#allocation8 + $0x40] sm:$0xff]  ;;  %4161 = vrot.lane.b32.xlu0 %v6522_v38, %s7470_s30  ;;  %4101 = vst.msk [vmem:[#allocation9 + $0xa4] sm:$0xf] %vm3935_vm10, %v6513_v42  ;;  %4411 = vst.msk [vmem:[#allocation9 + $0x84] sm:$0xf] %vm3935_vm10, %v6513_v42  ;;  %v6566_v59 = vpack.c.bf16 %v4422_v20, %v4422_v20 }
 0x42c   : > { %v4510_v2 = vld [vmem:[#allocation8 + $0x3c] sm:$0xff]  ;;  %4471 = vrot.lane.b32.xlu1 %v6565_v14, %s7470_s30  ;;  %v6491_v37 = vpack.c.bf16 %v3887_v34, %v3887_v34  ;;  %4256 = vst.msk [vmem:[#allocation9 + $0x94] sm:$0xf] %vm3935_vm10, %v6513_v42  ;;  %4567 = vst.msk [vmem:[#allocation9 + $0x88] sm:$0xf] %vm3935_vm10, %v6577_v47 }
 0x42d   : > { %v6576_v10 = vpack.c.bf16 %v4510_v2, %v4510_v2  ;;  %4410 = vst.msk [vmem:[#allocation9 + $0x70] sm:$0xf] %vm3935_vm10, %v6554_v36  ;;  %4255 = vst.msk [vmem:[#allocation9 + $0x80] sm:$0xf] %vm3935_vm10, %v6554_v36  ;;  %v4111_v48 = vld [vmem:[#allocation8 + $0x41] sm:$0xff] }
 0x42e   : > { %4100 = vst.msk [vmem:[#allocation9 + $0x90] sm:$0xf] %vm3935_vm10, %v6554_v36  ;;  %3944 = vst.msk [vmem:[#allocation9 + $0xa0] sm:$0xf] %vm3935_vm10, %v6491_v37  ;;  %v6523_v54 = vpack.c.bf16 %v4111_v48, %v4111_v48 }
 0x42f   : > { %4190 = vst.msk [vmem:[#allocation9 + $0xa4] sm:$0xf] %vm4025_vm11, %v8820_v61  ;;  %4317 = vrot.lane.b32.xlu0 %v6565_v14, %s7470_s30  ;;  %v6568_v61 = vpack.c.bf16 %v4424_v15, %v4424_v15 }
 0x430   : > { %4566 = vst.msk [vmem:[#allocation9 + $0x74] sm:$0xf] %vm3935_vm10, %v6576_v10  ;;  %4006 = vrot.lane.b32.xlu1 %v6522_v38, %s7470_s30 }
 0x433   : > { %4473 = vrot.lane.b32.xlu0 %v6566_v59, %s7470_s30 }
 0x434   : > { %4163 = vrot.lane.b32.xlu1 %v6523_v54, %s7470_s30 }
 0x437   : > { %4477 = vrot.lane.b32.xlu0 %v6568_v61, %s7470_s30 }
 0x438   : > { %4319 = vrot.lane.b32.xlu1 %v6566_v59, %s7470_s30 }
 0x43b   : > { %4008 = vrot.lane.b32.xlu0 %v6523_v54, %s7470_s30 }
 0x43c   : > { %4323 = vrot.lane.b32.xlu1 %v6568_v61, %s7470_s30 }
 0x43f   : > { %4012 = vrot.lane.b32.xlu0 %v8660_v7, %s7470_s30 }
 0x440   : > { %4479 = vrot.lane.b32.xlu1 %v6569_v4, %s7470_s30 }
 0x443   : > { %4325 = vrot.lane.b32.xlu0 %v6569_v4, %s7470_s30 }
 0x444   : > { %4169 = vrot.lane.b32.xlu1 %v6526_v57, %s7470_s30 }
 0x448   : > { %4481 = vrot.lane.b32.xlu1 %v6570_v58, %s7470_s30 }
 0x469   : > { %v4150_v7 = vpop.permute.xlu0 %4149  ;;  %v3995_v35 = vpop.permute.xlu1 %3994 }
 0x46a   : > { %4182 = vst.msk [vmem:[#allocation9 + $0x4] sm:$0xf] %vm4025_vm11, %v4150_v7  ;;  %4027 = vst.msk [vmem:[#allocation9 + $0x14] sm:$0xf] %vm4025_vm11, %v3995_v35 }
 0x46d   : > { %v4306_v6 = vpop.permute.xlu0 %4305 }
 0x46e   : > { %4338 = vst.msk [vmem:[#allocation9 + $0x8] sm:$0xf] %vm4025_vm11, %v4306_v6 }
 0x471   : > { %v4462_v27 = vpop.permute.xlu0 %4461  ;;  %v7288_v0 = vld [vmem:[#allocation9] ss:$20 sps:$4 sm:$0xff]  }
 0x472   : > { %v4152_v24 = vpop.permute.xlu1 %4151  ;;  %4494 = vst.msk [vmem:[#allocation9 + $0xc] sm:$0xf] %vm4025_vm11, %v4462_v27 }
 0x473   : > { %4183 = vst.msk [vmem:[#allocation9 + $0x18] sm:$0xf] %vm4025_vm11, %v4152_v24  ;;  %v4599_v24 = vld [vmem:[#allocation9 + $0xb4] sm:$0xff] }
 0x475   : > { %v3997_v51 = vpop.permute.xlu0 %3996 }
 0x476   : > { %v4308_v9 = vpop.permute.xlu1 %4307  ;;  %4028 = vst.msk [vmem:[#allocation9 + $0x28] sm:$0xf] %vm4025_vm11, %v3997_v51  ;;  %v7311_v51 = vld [vmem:[#allocation9 + $0xa4] ss:$20 sps:$4 sm:$0xff]  }
 0x477   : > { %4339 = vst.msk [vmem:[#allocation9 + $0x1c] sm:$0xf] %vm4025_vm11, %v4308_v9 }
 0x47a   : > { %v4154_v11 = vpop.permute.xlu0 %4153  ;;  %v7290_v46 = vld [vmem:[#allocation9 + $0x4] ss:$20 sps:$4 sm:$0xff]  }
 0x47b   : > { %v4464_v18 = vpop.permute.xlu1 %4463  ;;  %4184 = vst.msk [vmem:[#allocation9 + $0x2c] sm:$0xf] %vm4025_vm11, %v4154_v11  ;;  %5092 = vmatprep.mubr.bf16.mxu1 %v7290_v46 }
 0x47c   : > { %4495 = vst.msk [vmem:[#allocation9 + $0x20] sm:$0xf] %vm4025_vm11, %v4464_v18  ;;  %5093 = vmatmul.mubr.bf16.vlgmr.msra.gmra.mrb[96].mxu1 %v7288_v0 }
 0x47d   : > { %7178 = vmatpush3.bf16.msra.mxu1 %v8937_v63 }
 0x47e   : > { %v4310_v5 = vpop.permute.xlu0 %4309  ;;  %7175 = vmatprep.subr.bf16.mxu1 %v7303_v13  ;;  %v7293_v23 = vld [vmem:[#allocation9 + $0x8] ss:$20 sps:$4 sm:$0xff]  }
 0x47f   : > { %v3999_v16 = vpop.permute.xlu1 %3998  ;;  %4340 = vst.msk [vmem:[#allocation9 + $0x30] sm:$0xf] %vm4025_vm11, %v4310_v5 }
 0x480   : > { %4029 = vst.msk [vmem:[#allocation9 + $0x3c] sm:$0xf] %vm4025_vm11, %v3999_v16 }
 0x481   : > { %7179 = vmatpush3.bf16.msra.mxu1 %v7303_v13 }
 0x482   : > { %7176 = vmatprep.subr.bf16.mxu1 %v7308_v17  ;;  %v4578_v29 = vld [vmem:[#allocation9 + $0x28] sm:$0xff] }
 0x483   : > { %v7295_v60 = vld [vmem:[#allocation9 + $0xc] ss:$20 sps:$4 sm:$0xff]  }
 0x484   : > { %v4466_v12 = vpop.permute.xlu0 %4465  ;;  %5172 = vmatprep.mubr.bf16.mxu0 %v7295_v60  ;;  %v7322_v60 = vld [vmem:[#allocation9 + $0x10] ss:$20 sps:$4 sm:$0xff]  }
 0x485   : > { %v4156_v22 = vpop.permute.xlu1 %4155  ;;  %4496 = vst.msk [vmem:[#allocation9 + $0x34] sm:$0xf] %vm4025_vm11, %v4466_v12  ;;  %5173 = vmatmul.mubr.bf16.vlgmr.msra.gmra.mrb[112].mxu0 %v7293_v23  ;;  %7180 = vmatpush3.bf16.msra.mxu1 %v7308_v17 }
 0x486   : > { %4185 = vst.msk [vmem:[#allocation9 + $0x40] sm:$0xf] %vm4025_vm11, %v4156_v22  ;;  %7149 = vmatpush3.bf16.msra.mxu0 %v8937_v63  ;;  %7177 = vmatprep.subr.bf16.mxu1 %v7315_v56 }
 0x487   : > { %7150 = vmatprep.subr.bf16.mxu0 %v7303_v13 }
 0x488   : > { %v4001_v25 = vpop.permute.xlu0 %4000 }
 0x489   : > { %v4312_v26 = vpop.permute.xlu1 %4311  ;;  %4030 = vst.msk [vmem:[#allocation9 + $0x50] sm:$0xf] %vm4025_vm11, %v4001_v25  ;;  %7181 = vmatpush3.bf16.msra.mxu1 %v7315_v56  ;;  %v7323_v25 = vld [vmem:[#allocation9 + $0x88] ss:$20 sps:$4 sm:$0xff]  }
 0x48a   : > { %4341 = vst.msk [vmem:[#allocation9 + $0x44] sm:$0xf] %vm4025_vm11, %v4312_v26  ;;  %7151 = vmatpush3.bf16.msra.mxu0 %v7303_v13  ;;  %v7324_v26 = vld [vmem:[#allocation9 + $0x38] ss:$20 sps:$4 sm:$0xff]  }
 0x48b   : > { %7152 = vmatprep.subr.bf16.mxu0 %v7308_v17 }
 0x48c   : > { %v4158_v28 = vpop.permute.xlu0 %4157  ;;  %v4579_v42 = vld [vmem:[#allocation9 + $0x30] sm:$0xff] }
 0x48d   : > { %v4468_v19 = vpop.permute.xlu1 %4467  ;;  %v4581_v31 = vld [vmem:[#allocation9 + $0x3c] sm:$0xff]  ;;  %4186 = vst.msk [vmem:[#allocation9 + $0x54] sm:$0xf] %vm4025_vm11, %v4158_v28  ;;  %v7326_v28 = vld [vmem:[#allocation9 + $0xd8] ss:$0 sps:$4 sm:$0xff]  }
 0x48e   : > { %v7296_v41 = vld [vmem:[#allocation9 + $0x2c] ss:$20 sps:$4 sm:$0xff]   ;;  %4497 = vst.msk [vmem:[#allocation9 + $0x48] sm:$0xf] %vm4025_vm11, %v4468_v19  ;;  %v6414_v38 = vcombine.low %v4578_v29, %v4581_v31  ;;  %7153 = vmatpush3.bf16.msra.mxu0 %v7308_v17 }
 0x48f   : > { %5100 = vmatprep.mubr.bf16.mxu1 %v7296_v41  ;;  %7154 = vmatprep.subr.bf16.mxu0 %v7315_v56  ;;  %v7319_v17 = vld [vmem:[#allocation9 + $0x60] ss:$20 sps:$4 sm:$0xff]  }
 0x490   : > { %5101 = vmatmul.mubr.bf16.gmra.mrb[100].mxu1 %v6414_v38  ;;  %v4314_v63 = vpop.permute.xlu0 %4313 }
 0x491   : > { %v4003_v14 = vpop.permute.xlu1 %4002  ;;  %4342 = vst.msk [vmem:[#allocation9 + $0x58] sm:$0xf] %vm4025_vm11, %v4314_v63 }
 0x492   : > { %4031 = vst.msk [vmem:[#allocation9 + $0x64] sm:$0xf] %vm4025_vm11, %v4003_v14  ;;  %7155 = vmatpush3.bf16.msra.mxu0 %v7315_v56  ;;  %v7325_v56 = vld [vmem:[#allocation9 + $0xb0] ss:$20 sps:$4 sm:$0xff]   ;;  %v6408_v14 = vld [vmem:[#allocation16] ss:$0 sm:$0xff] }
 0x494   : > { %v4470_v33 = vpop.permute.xlu0 %4469  ;;  %v4584_v20 = vld [vmem:[#allocation9 + $0x50] sm:$0xff] }
 0x495   : > { %v4160_v52 = vpop.permute.xlu1 %4159  ;;  %v4582_v36 = vld [vmem:[#allocation9 + $0x44] sm:$0xff]  ;;  %4498 = vst.msk [vmem:[#allocation9 + $0x5c] sm:$0xf] %vm4025_vm11, %v4470_v33 }
 0x496   : > { %v7298_v34 = vld [vmem:[#allocation9 + $0x34] ss:$20 sps:$4 sm:$0xff]   ;;  %4187 = vst.msk [vmem:[#allocation9 + $0x68] sm:$0xf] %vm4025_vm11, %v4160_v52  ;;  %v6416_v2 = vcombine.low %v4579_v42, %v4582_v36 }
 0x497   : > { %5180 = vmatprep.mubr.bf16.mxu0 %v7298_v34 }
 0x498   : > { %5181 = vmatmul.mubr.bf16.gmra.mrb[116].mxu0 %v6416_v2  ;;  %v4005_v40 = vpop.permute.xlu0 %4004 }
 0x499   : > { %v4316_v37 = vpop.permute.xlu1 %4315  ;;  %4032 = vst.msk [vmem:[#allocation9 + $0x78] sm:$0xf] %vm4025_vm11, %v4005_v40 }
 0x49a   : > { %4343 = vst.msk [vmem:[#allocation9 + $0x6c] sm:$0xf] %vm4025_vm11, %v4316_v37 }
 0x49c   : > { %v4585_v45 = vld [vmem:[#allocation9 + $0x58] sm:$0xff] }
 0x49d   : > { %v4162_v10 = vpop.permute.xlu0 %4161  ;;  %v4587_v48 = vld [vmem:[#allocation9 + $0x64] sm:$0xff] }
 0x49e   : > { %v4472_v47 = vpop.permute.xlu1 %4471  ;;  %v7301_v44 = vld [vmem:[#allocation9 + $0x54] ss:$20 sps:$4 sm:$0xff]   ;;  %4188 = vst.msk [vmem:[#allocation9 + $0x7c] sm:$0xf] %vm4025_vm11, %v4162_v10  ;;  %v6419_v15 = vcombine.low %v4584_v20, %v4587_v48 }
 0x49f   : > { %4499 = vst.msk [vmem:[#allocation9 + $0x70] sm:$0xf] %vm4025_vm11, %v4472_v47  ;;  %5108 = vmatprep.mubr.bf16.mxu1 %v7301_v44 }
 0x4a0   : > { %5109 = vmatmul.mubr.bf16.gmra.mrb[104].mxu1 %v6419_v15 }
 0x4a1   : > { %v4318_v30 = vpop.permute.xlu0 %4317 }
 0x4a2   : > { %v4007_v59 = vpop.permute.xlu1 %4006  ;;  %4344 = vst.msk [vmem:[#allocation9 + $0x80] sm:$0xf] %vm4025_vm11, %v4318_v30 }
 0x4a3   : > { %4033 = vst.msk [vmem:[#allocation9 + $0x8c] sm:$0xf] %vm4025_vm11, %v4007_v59 }
 0x4a5   : > { %v4474_v54 = vpop.permute.xlu0 %4473  ;;  %v4590_v21 = vld [vmem:[#allocation9 + $0x78] sm:$0xff] }
 0x4a6   : > { %v4164_v61 = vpop.permute.xlu1 %4163  ;;  %v4588_v49 = vld [vmem:[#allocation9 + $0x6c] sm:$0xff]  ;;  %4500 = vst.msk [vmem:[#allocation9 + $0x84] sm:$0xf] %vm4025_vm11, %v4474_v54 }
 0x4a7   : > { %v7304_v39 = vld [vmem:[#allocation9 + $0x5c] ss:$20 sps:$4 sm:$0xff]   ;;  %4189 = vst.msk [vmem:[#allocation9 + $0x90] sm:$0xf] %vm4025_vm11, %v4164_v61  ;;  %v6421_v50 = vcombine.low %v4585_v45, %v4588_v49 }
 0x4a8   : > { %5188 = vmatprep.mubr.bf16.mxu0 %v7304_v39 }
 0x4a9   : > { %5189 = vmatmul.mubr.bf16.gmra.mrb[120].mxu0 %v6421_v50  ;;  %v4478_v53 = vpop.permute.xlu0 %4477 }
 0x4aa   : > { %v4320_v4 = vpop.permute.xlu1 %4319  ;;  %4502 = vst.msk [vmem:[#allocation9 + $0xac] sm:$0xf] %vm4025_vm11, %v4478_v53 }
 0x4ab   : > { %4345 = vst.msk [vmem:[#allocation9 + $0x94] sm:$0xf] %vm4025_vm11, %v4320_v4 }
 0x4ad   : > { %v4009_v55 = vpop.permute.xlu0 %4008  ;;  %v4591_v8 = vld [vmem:[#allocation9 + $0x80] sm:$0xff] }
 0x4ae   : > { %v4324_v57 = vpop.permute.xlu1 %4323  ;;  %v4593_v58 = vld [vmem:[#allocation9 + $0x8c] sm:$0xff]  ;;  %4034 = vst.msk [vmem:[#allocation9 + $0xa0] sm:$0xf] %vm4025_vm11, %v4009_v55  ;;  %v7309_v43 = vld [vmem:[#allocation9 + $0x84] ss:$20 sps:$4 sm:$0xff]  }
 0x4af   : > { %v7306_v62 = vld [vmem:[#allocation9 + $0x7c] ss:$20 sps:$4 sm:$0xff]   ;;  %4347 = vst.msk [vmem:[#allocation9 + $0xbc] sm:$0xf] %vm4025_vm11, %v4324_v57  ;;  %v6424_v1 = vcombine.low %v4590_v21, %v4593_v58  ;;  %5196 = vmatprep.mubr.bf16.mxu0 %v7309_v43 }
 0x4b0   : > { %5116 = vmatprep.mubr.bf16.mxu1 %v7306_v62 }
 0x4b1   : > { %5117 = vmatmul.mubr.bf16.gmra.mrb[108].mxu1 %v6424_v1  ;;  %v4013_v7 = vpop.permute.xlu0 %4012 }
 0x4b2   : > { %v4480_v32 = vpop.permute.xlu1 %4479  ;;  %v4594_v3 = vld [vmem:[#allocation9 + $0x94] sm:$0xff]  ;;  %4036 = vst.msk [vmem:[#allocation9 + $0xc8] sm:$0xf] %vm4025_vm11, %v4013_v7  ;;  %5124 = vmatprep.mubr.bf16.mxu1 %v7311_v51 }
 0x4b3   : > { %4503 = vst.msk [vmem:[#allocation9 + $0xc0] sm:$0xf] %vm4025_vm11, %v4480_v32  ;;  %v6426_v35 = vcombine.low %v4591_v8, %v4594_v3 }
 0x4b5   : > { %5197 = vmatmul.mubr.bf16.gmra.mrb[124].mxu0 %v6426_v35  ;;  %v4596_v27 = vld [vmem:[#allocation9 + $0xa0] sm:$0xff]  ;;  %v4326_v9 = vpop.permute.xlu0 %4325 }
 0x4b6   : > { %v4170_v6 = vpop.permute.xlu1 %4169  ;;  %4348 = vst.msk [vmem:[#allocation9 + $0xd0] sm:$0xf] %vm4025_vm11, %v4326_v9  ;;  %v6429_v11 = vcombine.low %v4596_v27, %v4599_v24  ;;  %v7316_v46 = vld [vmem:[#allocation9 + $0xa8] ss:$20 sps:$4 sm:$0xff]  }
 0x4b7   : > { %4192 = vst.msk [vmem:[#allocation9 + $0xcc] sm:$0xf] %vm4025_vm11, %v4170_v6 }
 0x4b9   : > { %5125 = vmatmul.mubr.bf16.gmra.mrb[112].mxu1 %v6429_v11 }
 0x4ba   : > { %v4482_v18 = vpop.permute.xlu1 %4481  ;;  %v7313_v0 = vld [vmem:[#allocation9 + $0xac] ss:$20 sps:$4 sm:$0xff]  }
 0x4bb   : > { %4504 = vst.msk [vmem:[#allocation9 + $0xd4] sm:$0xf] %vm4025_vm11, %v4482_v18  ;;  %5204 = vmatprep.mubr.bf16.mxu0 %v7313_v0 }
 0x4bd   : > { %5205 = vmatmul.mubr.bf16.gmra.mrb[128].mxu0 %v7316_v46 }
 0x4be   : > { %v4602_v13 = vld [vmem:[#allocation9 + $0xc8] sm:$0xff] }
 0x4bf   : > { %v6435_v5 = vcombine.high %v4602_v13, %v4602_v13  ;;  %v6434_v16 = vcombine.low %v4602_v13, %v4602_v13 }
 0x4c1   : > { %5132 = vmatprep.mubr.bf16.mxu1 %v6435_v5 }
 0x4c2   : > { %5133 = vmatmul.mubr.bf16.gmra.mrb[116].mxu1 %v6434_v16  ;;  %v4603_v12 = vld [vmem:[#allocation9 + $0xd0] sm:$0xff] }
 0x4c3   : > { %7160 = vmatprep.mubr.msk.bf16.mxu1 %vm3680_vm9, %v7319_v17  ;;  %v6437_v22 = vcombine.high %v4603_v12, %v4603_v12  ;;  %v6436_v23 = vcombine.low %v4603_v12, %v4603_v12 }
 0x4c5   : > { %5212 = vmatprep.mubr.bf16.mxu0 %v6437_v22 }
 0x4c6   : > { %5213 = vmatmul.mubr.bf16.gmra.mrb[132].mxu0 %v6436_v23 }
 0x4c7   : > { %7156 = vmatprep.mubr.msk.bf16.mxu0 %vm3680_vm9, %v7322_v60 }
 0x4ca   : > { %7161 = vmatmul.mubr.msk.bf16.vlgmr.msra.gmra.mrb[120].mxu1 %vm3680_vm9, %v7323_v25 }
 0x4cb   : > { %7164 = vmatprep.mubr.msk.bf16.mxu1 %vm3680_vm9, %v7325_v56 }
 0x4ce   : > { %7157 = vmatmul.mubr.msk.bf16.vlgmr.msra.gmra.mrb[136].mxu0 %vm3680_vm9, %v7324_v26 }
 0x4d2   : > { %7165 = vmatmul.mubr.msk.bf16.gmra.mrb[124].mxu1 %vm3680_vm9, %v7326_v28 }
 0x54f   : > { %v6842_v19 = vpop.f32.mrb[96].mxu1 }
 0x550   : > { %v6843_v29 = vpop.f32.mrb[97].mxu1 }
 0x551   : > { %v6844_v31 = vadd.f32 %v6843_v29, %v6842_v19  ;;  %v6845_v41 = vpop.f32.mrb[98].mxu1 }
 0x552   : > { %v6846_v38 = vpop.f32.mrb[99].mxu1 }
 0x553   : > { %v6847_v63 = vadd.f32 %v6846_v38, %v6845_v41  ;;  %v5095_v42 = vadd.f32 %v6844_v31, %v6408_v14 }
 0x555   : > { %v5098_v40 = vadd.f32 %v6847_v63, %v6408_v14 }
 0x558   : > { %v6894_v33 = vpop.f32.mrb[112].mxu0 }
 0x559   : > { %v6895_v52 = vpop.f32.mrb[113].mxu0 }
 0x55a   : > { %v6896_v36 = vadd.f32 %v6895_v52, %v6894_v33  ;;  %v6897_v34 = vpop.f32.mrb[114].mxu0 }
 0x55b   : > { %v6898_v2 = vpop.f32.mrb[115].mxu0 }
 0x55c   : > { %v6899_v37 = vadd.f32 %v6898_v2, %v6897_v34  ;;  %v9054_v10 = vadd.f32 %v6896_v36, %v5095_v42 }
 0x55e   : > { %v9056_v47 = vadd.f32 %v6899_v37, %v5098_v40 }
 0x563   : > { %v6848_v20 = vpop.f32.mrb[100].mxu1 }
 0x564   : > { %v6849_v48 = vpop.f32.mrb[101].mxu1 }
 0x565   : > { %v6850_v44 = vadd.f32 %v6849_v48, %v6848_v20  ;;  %v6851_v15 = vpop.f32.mrb[102].mxu1 }
 0x566   : > { %v6852_v30 = vpop.f32.mrb[103].mxu1 }
 0x567   : > { %v6853_v59 = vadd.f32 %v6852_v30, %v6851_v15  ;;  %v5103_v45 = vadd.f32 %v6850_v44, %v6408_v14 }
 0x569   : > { %v5106_v53 = vadd.f32 %v6853_v59, %v6408_v14 }
 0x56b   : > { %v6900_v54 = vpop.f32.mrb[116].mxu0 }
 0x56c   : > { %v6901_v61 = vpop.f32.mrb[117].mxu0 }
 0x56d   : > { %v6902_v49 = vadd.f32 %v6901_v61, %v6900_v54  ;;  %v6903_v39 = vpop.f32.mrb[118].mxu0 }
 0x56e   : > { %v6904_v50 = vpop.f32.mrb[119].mxu0 }
 0x56f   : > { %v6905_v4 = vadd.f32 %v6904_v50, %v6903_v39  ;;  %v9058_v55 = vadd.f32 %v6902_v49, %v5103_v45  ;;  %v7472_v39 = vmov 1966171168  }
 0x570   : > { %v5335_v50 = vunpack.c.l.s4 %v7472_v39 }
 0x571   : > { %v9060_v57 = vadd.f32 %v6905_v4, %v5106_v53  ;;  %v5337_v53 = vlaneseq }
 0x573   : > { %v6854_v21 = vpop.f32.mrb[104].mxu1 }
 0x574   : > { %v6855_v58 = vpop.f32.mrb[105].mxu1 }
 0x575   : > { %v6856_v62 = vadd.f32 %v6855_v58, %v6854_v21  ;;  %v6857_v1 = vpop.f32.mrb[106].mxu1 }
 0x576   : > { %v6858_v8 = vpop.f32.mrb[107].mxu1 }
 0x577   : > { %v6859_v32 = vadd.f32 %v6858_v8, %v6857_v1  ;;  %v5111_v7 = vadd.f32 %v6856_v62, %v6408_v14 }
 0x579   : > { %v5114_v24 = vadd.f32 %v6859_v32, %v6408_v14 }
 0x57c   : > { %v6906_v3 = vpop.f32.mrb[120].mxu0 }
 0x57d   : > { %v6907_v43 = vpop.f32.mrb[121].mxu0 }
 0x57e   : > { %v6908_v35 = vadd.f32 %v6907_v43, %v6906_v3  ;;  %v6909_v6 = vpop.f32.mrb[122].mxu0 }
 0x57f   : > { %v6910_v27 = vpop.f32.mrb[123].mxu0 }
 0x580   : > { %v6911_v51 = vadd.f32 %v6910_v27, %v6909_v6  ;;  %v5191_v9 = vadd.f32 %v6908_v35, %v5111_v7  ;;  %v5336_v27 = vunpack.c.0.s8 %v5335_v50 }
 0x582   : > { %v5194_v11 = vadd.f32 %v6911_v51, %v5114_v24  ;;  %v5338_v24 = vshrl.u32 %v5337_v53, 7 }
 0x584   : > { %v6860_v18 = vpop.f32.mrb[108].mxu1 }
 0x585   : > { %v6861_v0 = vpop.f32.mrb[109].mxu1 }
 0x586   : > { %v6862_v46 = vadd.f32 %v6861_v0, %v6860_v18  ;;  %v6863_v13 = vpop.f32.mrb[110].mxu1 }
 0x587   : > { %v6864_v5 = vpop.f32.mrb[111].mxu1 }
 0x588   : > { %v6865_v16 = vadd.f32 %v6864_v5, %v6863_v13  ;;  %v6912_v17 = vpop.f32.mrb[124].mxu0  ;;  %v5119_v22 = vadd.f32 %v6862_v46, %v6408_v14  ;;  %v9078_v46 = vsub.s32 %v5336_v27, %v5338_v24 }
 0x589   : > { %v6913_v12 = vpop.f32.mrb[125].mxu0 }
 0x58a   : > { %v6914_v23 = vadd.f32 %v6913_v12, %v6912_v17  ;;  %v6915_v60 = vpop.f32.mrb[126].mxu0  ;;  %v5122_v25 = vadd.f32 %v6865_v16, %v6408_v14  ;;  %v6049_v12 = vld [vmem:[%s9084_s9 + $0x18] sm:$0x1] }
 0x58b   : > { %v6916_v56 = vpop.f32.mrb[127].mxu0 }
 0x58c   : > { %v6917_v26 = vadd.f32 %v6916_v56, %v6915_v60  ;;  %v6866_v28 = vpop.f32.mrb[112].mxu1  ;;  %v5199_v19 = vadd.f32 %v6914_v23, %v5119_v22 }
 0x58d   : > { %v6867_v29 = vpop.f32.mrb[113].mxu1 }
 0x58e   : > { %v6869_v31 = vpop.f32.mrb[114].mxu1  ;;  %v5202_v41 = vadd.f32 %v6917_v26, %v5122_v25 }
 0x58f   : > { %v6870_v38 = vpop.f32.mrb[115].mxu1 }
 0x590   : > { %v6918_v63 = vpop.f32.mrb[128].mxu0 }
 0x591   : > { %v6919_v33 = vpop.f32.mrb[129].mxu0 }
 0x592   : > { %v6921_v52 = vpop.f32.mrb[130].mxu0 }
 0x593   : > { %v6922_v42 = vpop.f32.mrb[131].mxu0 }
 0x595   : > { %v6872_v36 = vpop.f32.mrb[116].mxu1 }
 0x596   : > { %v6873_v34 = vpop.f32.mrb[117].mxu1 }
 0x597   : > { %v6875_v2 = vpop.f32.mrb[118].mxu1 }
 0x598   : > { %v6876_v40 = vpop.f32.mrb[119].mxu1 }
 0x599   : > { %v6924_v37 = vpop.f32.mrb[132].mxu0 }
 0x59a   : > { %v6925_v20 = vpop.f32.mrb[133].mxu0 }
 0x59b   : > { %v6927_v48 = vpop.f32.mrb[134].mxu0 }
 0x59c   : > { %v6928_v14 = vpop.f32.mrb[135].mxu0 }
 0x59d   : > { %v7162_v44 = vpop.f32.mrb[120].mxu1 }
 0x59e   : > { %v5279_v15 = vadd.f32 %v7162_v44, %v5199_v19  ;;  %v5270_v30 = vpop.f32.mrb[121].mxu1 }
 0x59f   : > { %v5271_v59 = vadd.f32 %v5270_v30, %v5191_v9  ;;  %v7163_v54 = vpop.f32.mrb[122].mxu1 }
 0x5a0   : > { %v5306_v61 = vmax.f32 %v5279_v15, 0.0  ;;  %v5282_v45 = vadd.f32 %v7163_v54, %v5202_v41  ;;  %v5273_v49 = vpop.f32.mrb[123].mxu1 }
 0x5a1   : > { %v5304_v4 = vmax.f32 %v5271_v59, 0.0  ;;  %v5274_v21 = vadd.f32 %v5273_v49, %v5194_v11  ;;  %v7158_v58 = vpop.f32.mrb[136].mxu0 }
 0x5a2   : > { %5317 = vst.msk [vmem:[#allocation10 + $0x30] sm:$0xff] %vm3680_vm9, %v5306_v61  ;;  %v5307_v62 = vmax.f32 %v5282_v45, 0.0  ;;  %v5263_v1 = vadd.f32 %v7158_v58, %v9058_v55  ;;  %v5254_v8 = vpop.f32.mrb[137].mxu0 }
 0x5a3   : > { %5315 = vst.msk [vmem:[#allocation10 + $0x20] sm:$0xff] %vm3680_vm9, %v5304_v4  ;;  %v5305_v32 = vmax.f32 %v5274_v21, 0.0  ;;  %v5255_v3 = vadd.f32 %v5254_v8, %v9054_v10  ;;  %v7159_v43 = vpop.f32.mrb[138].mxu0 }
 0x5a4   : > { %5318 = vst.msk [vmem:[#allocation10 + $0x38] sm:$0xff] %vm3680_vm9, %v5307_v62  ;;  %v5302_v7 = vmax.f32 %v5263_v1, 0.0  ;;  %v5266_v35 = vadd.f32 %v7159_v43, %v9060_v57  ;;  %v5257_v6 = vpop.f32.mrb[139].mxu0 }
 0x5a5   : > { %5316 = vst.msk [vmem:[#allocation10 + $0x28] sm:$0xff] %vm3680_vm9, %v5305_v32  ;;  %v5300_v51 = vmax.f32 %v5255_v3, 0.0  ;;  %v5258_v55 = vadd.f32 %v5257_v6, %v9056_v47  ;;  %v7166_v9 = vpop.f32.mrb[124].mxu1 }
 0x5a6   : > { %5313 = vst.msk [vmem:[#allocation10 + $0x10] sm:$0xff] %vm3680_vm9, %v5302_v7  ;;  %v5303_v11 = vmax.f32 %v5266_v35, 0.0  ;;  %v5286_v10 = vpop.f32.mrb[125].mxu1 }
 0x5a7   : > { %5311 = vst.msk [vmem:[#allocation10] sm:$0xff] %vm3680_vm9, %v5300_v51  ;;  %v5301_v18 = vmax.f32 %v5258_v55, 0.0  ;;  %v7167_v0 = vpop.f32.mrb[126].mxu1  ;;  %v5929_v51 = vld [vmem:[%s9084_s9 + $0x14] sm:$0x1] }
 0x5a8   : > { %5314 = vst.msk [vmem:[#allocation10 + $0x18] sm:$0xff] %vm3680_vm9, %v5303_v11  ;;  %v5289_v57 = vpop.f32.mrb[127].mxu1 }
 0x5a9   : > { %5312 = vst.msk [vmem:[#allocation10 + $0x8] sm:$0xff] %vm3680_vm9, %v5301_v18  ;;  %v5933_v47 = vld [vmem:[#allocation10 + $0x33] ss:$88 sm:$0x1]  ;;  %v5899_v18 = vld [vmem:[%s9084_s9 + $0x13] sm:$0x1] }
 0x5aa   : > { %v5934_v13 = vpack.c.bf16 %v5933_v47, %v5933_v47  ;;  %v5903_v5 = vld [vmem:[#allocation10 + $0x31] ss:$88 sm:$0x1]  ;;  %v5963_v16 = vld [vmem:[#allocation10 + $0x37] ss:$88 sm:$0x1] }
 0x5ab   : > { %v6047_v17 = vld [vmem:[#allocation10 + $0x3c] ss:$88 sm:$0x1]  ;;  %v5904_v22 = vpack.c.bf16 %v5903_v5, %v5903_v5  ;;  %v5964_v23 = vpack.c.bf16 %v5963_v16, %v5963_v16  ;;  %v5753_v25 = vld [vmem:[#allocation10 + $0x25] ss:$88 sm:$0x1] }
 0x5ac   : > { %v6048_v60 = vpack.c.bf16 %v6047_v17, %v6047_v17  ;;  %v5942_v56 = vrot.slane %v5934_v13, %v9078_v46  ;;  %v5813_v26 = vld [vmem:[#allocation10 + $0x29] ss:$88 sm:$0x1]  ;;  %v5754_v29 = vpack.c.bf16 %v5753_v25, %v5753_v25  ;;  %v5723_v31 = vld [vmem:[#allocation10 + $0x21] ss:$88 sm:$0x1] }
 0x5ad   : > { %v5912_v19 = vrot.slane %v5904_v22, %v9078_v46  ;;  %v5972_v63 = vrot.slane %v5964_v23, %v9078_v46  ;;  %v5814_v33 = vpack.c.bf16 %v5813_v26, %v5813_v26  ;;  %v5724_v36 = vpack.c.bf16 %v5723_v31, %v5723_v31  ;;  %v5873_v34 = vld [vmem:[#allocation10 + $0x2f] ss:$88 sm:$0x1]  ;;  %v5783_v2 = vld [vmem:[#allocation10 + $0x27] ss:$88 sm:$0x1] }
 0x5ae   : > { %v6050_v41 = vsel %vm9090_vm15, %v6048_v60, %v6049_v12  ;;  %v5949_v38 = vrot.slane %v5942_v56, %v9078_v46  ;;  %v5762_v42 = vrot.slane %v5754_v29, %v9078_v46  ;;  %v5843_v40 = vld [vmem:[#allocation10 + $0x2d] ss:$88 sm:$0x1]  ;;  %v5573_v37 = vld [vmem:[#allocation10 + $0x15] ss:$88 sm:$0x1]  ;;  %v5874_v15 = vpack.c.bf16 %v5873_v34, %v5873_v34 }
 0x5af   : > { %6051 = vst [vmem:[%s9084_s9 + $0x18] sm:$0x1] %v6050_v41  ;;  %v5919_v52 = vrot.slane %v5912_v19, %v9078_v46  ;;  %v5543_v20 = vld [vmem:[#allocation10 + $0x13] ss:$88 sm:$0x1]  ;;  %v5979_v48 = vrot.slane %v5972_v63, %v9078_v46  ;;  %v5822_v44 = vrot.slane %v5814_v33, %v9078_v46  ;;  %v5732_v59 = vrot.slane %v5724_v36, %v9078_v46 }
 0x5b0   : > { %5950 = vrot.lane.b32.xlu0 %v5949_v38, %s7470_s30  ;;  %v5769_v14 = vrot.slane %v5762_v42, %v9078_v46  ;;  %v5331_v30 = vld [vmem:[#allocation10 + $0x1] ss:$88 sm:$0x1]  ;;  %v5784_v54 = vpack.c.bf16 %v5783_v2, %v5783_v2  ;;  %v5844_v61 = vpack.c.bf16 %v5843_v40, %v5843_v40  ;;  %v5574_v45 = vpack.c.bf16 %v5573_v37, %v5573_v37  ;;  %v5603_v49 = vld [vmem:[#allocation10 + $0x17] ss:$88 sm:$0x1] }
 0x5b1   : > { %5920 = vrot.lane.b32.xlu1 %v5919_v52, %s7470_s30  ;;  %v5393_v39 = vld [vmem:[#allocation10 + $0x5] ss:$88 sm:$0x1]  ;;  %v5544_v50 = vpack.c.bf16 %v5543_v20, %v5543_v20  ;;  %v5332_v53 = vpack.c.bf16 %v5331_v30, %v5331_v30  ;;  %v5363_v4 = vld [vmem:[#allocation10 + $0x3] ss:$88 sm:$0x1]  ;;  %v5829_v21 = vrot.slane %v5822_v44, %v9078_v46  ;;  %v5882_v58 = vrot.slane %v5874_v15, %v9078_v46 }
 0x5b2   : > { %v5604_v62 = vpack.c.bf16 %v5603_v49, %v5603_v49  ;;  %v5394_v1 = vpack.c.bf16 %v5393_v39, %v5393_v39  ;;  %v5739_v8 = vrot.slane %v5732_v59, %v9078_v46  ;;  %v5792_v32 = vrot.slane %v5784_v54, %v9078_v46  ;;  %v5633_v6 = vld [vmem:[#allocation10 + $0x1b] ss:$88 sm:$0x1]  ;;  %v9126_v24 = vld [vmem:[#allocation10 + $0x1d] ss:$88 sm:$0x1] }
 0x5b3   : > { %v9115_v3 = vrot.slane %v5844_v61, %v9078_v46  ;;  %v5582_v43 = vrot.slane %v5574_v45, %v9078_v46  ;;  %v9120_v7 = vrot.slane %v5544_v50, %v9078_v46  ;;  %v5364_v35 = vpack.c.bf16 %v5363_v4, %v5363_v4  ;;  %v5927_v55 = vld [vmem:[#allocation10 + $0x32] ss:$88 sm:$0x1]  ;;  %v5897_v0 = vld [vmem:[#allocation10 + $0x30] ss:$88 sm:$0x1] }
 0x5b4   : > { %5770 = vrot.lane.b32.xlu0 %v5769_v14, %s7470_s30  ;;  %v9124_v27 = vrot.slane %v5332_v53, %v9078_v46  ;;  %v5889_v9 = vrot.slane %v5882_v58, %v9078_v46  ;;  %v9131_v11 = vrot.slane %v5604_v62, %v9078_v46  ;;  %v9134_v10 = vrot.slane %v5394_v1, %v9078_v46  ;;  %v5957_v57 = vld [vmem:[#allocation10 + $0x36] ss:$88 sm:$0x1]  ;;  %v5959_v47 = vld [vmem:[%s9084_s9 + $0x15] sm:$0x1] }
 0x5b5   : > { %5980 = vrot.lane.b32.xlu1 %v5979_v48, %s7470_s30  ;;  %v5799_v13 = vrot.slane %v5792_v32, %v9078_v46  ;;  %v5859_v5 = vrot.slane %v9115_v3, %v9078_v46  ;;  %v5589_v16 = vrot.slane %v5582_v43, %v9078_v46  ;;  %v9142_v17 = vld [vmem:[#allocation10 + $0x1f] ss:$88 sm:$0x1]  ;;  %v5747_v12 = vld [vmem:[#allocation10 + $0x24] ss:$88 sm:$0x1]  ;;  %v5559_v22 = vrot.slane %v9120_v7, %v9078_v46 }
 0x5b6   : > { %v9148_v23 = vrot.slane %v5364_v35, %v9078_v46  ;;  %v5634_v60 = vpack.c.bf16 %v5633_v6, %v5633_v6  ;;  %v5928_v56 = vpack.c.bf16 %v5927_v55, %v5927_v55  ;;  %v5749_v25 = vld [vmem:[%s9084_s9 + $0xe] sm:$0x1]  ;;  %v5807_v26 = vld [vmem:[#allocation10 + $0x28] ss:$88 sm:$0x1]  ;;  %v5347_v31 = vrot.slane %v9124_v27, %v9078_v46 }
 0x5b7   : > { %v5809_v19 = vld [vmem:[%s9084_s9 + $0x10] sm:$0x1]  ;;  %v5717_v29 = vld [vmem:[#allocation10 + $0x20] ss:$88 sm:$0x1]  ;;  %v5664_v41 = vpack.c.bf16 %v9126_v24, %v9126_v24  ;;  %v5898_v38 = vpack.c.bf16 %v5897_v0, %v5897_v0  ;;  %v5958_v63 = vpack.c.bf16 %v5957_v57, %v5957_v57  ;;  %v5619_v2 = vrot.slane %v9131_v11, %v9078_v46 }
 0x5b8   : > { %5830 = vrot.lane.b32.xlu0 %v5829_v21, %s7470_s30  ;;  %v5719_v33 = vld [vmem:[%s9084_s9 + $0xd] sm:$0x1]  ;;  %v5867_v52 = vld [vmem:[#allocation10 + $0x2e] ss:$88 sm:$0x1]  ;;  %v5409_v40 = vrot.slane %v9134_v10, %v9078_v46  ;;  %v5694_v37 = vpack.c.bf16 %v9142_v17, %v9142_v17  ;;  %v5930_v20 = vsel %vm9090_vm15, %v5928_v56, %v5929_v51  ;;  %v5748_v54 = vpack.c.bf16 %v5747_v12, %v5747_v12 }
 0x5b9   : > { %5740 = vrot.lane.b32.xlu1 %v5739_v8, %s7470_s30  ;;  %v5869_v42 = vld [vmem:[%s9084_s9 + $0x12] sm:$0x1]  ;;  %v5777_v36 = vld [vmem:[#allocation10 + $0x26] ss:$88 sm:$0x1]  ;;  %v5900_v30 = vsel %vm9090_vm15, %v5898_v38, %v5899_v18  ;;  %v5960_v59 = vsel %vm9090_vm15, %v5958_v63, %v5959_v47  ;;  %v5808_v61 = vpack.c.bf16 %v5807_v26, %v5807_v26  ;;  %v9178_v50 = vrot.slane %v5634_v60, %v9078_v46 }
 0x5ba   : > { %v5779_v34 = vld [vmem:[%s9084_s9 + $0xf] sm:$0x1]  ;;  %v5837_v48 = vld [vmem:[#allocation10 + $0x2a] ss:$88 sm:$0x1]  ;;  %v5718_v53 = vpack.c.bf16 %v5717_v29, %v5717_v29  ;;  %v5868_v4 = vpack.c.bf16 %v5867_v52, %v5867_v52  ;;  %v5778_v21 = vpack.c.bf16 %v5777_v36, %v5777_v36  ;;  %v5750_v32 = vsel %vm9090_vm15, %v5748_v54, %v5749_v25 }
 0x5bb   : > { %v5839_v14 = vld [vmem:[%s9084_s9 + $0x11] sm:$0x1]  ;;  %v5569_v44 = vld [vmem:[%s9084_s9 + $0x8] sm:$0x1]  ;;  %5931 = vst [vmem:[%s9084_s9 + $0x14] sm:$0x1] %v5930_v20  ;;  %v5810_v3 = vsel %vm9090_vm15, %v5808_v61, %v5809_v19  ;;  %v5838_v43 = vpack.c.bf16 %v5837_v48, %v5837_v48  ;;  %v5702_v10 = vrot.slane %v5694_v37, %v9078_v46  ;;  %v5649_v11 = vrot.slane %v9178_v50, %v9078_v46 }
 0x5bc   : > { %5890 = vrot.lane.b32.xlu0 %v5889_v9, %s7470_s30  ;;  %v5567_v15 = vld [vmem:[#allocation10 + $0x14] ss:$88 sm:$0x1]  ;;  %v5539_v45 = vld [vmem:[%s9084_s9 + $0x7] sm:$0x1]  ;;  %v5720_v0 = vsel %vm9090_vm15, %v5718_v53, %v5719_v33  ;;  %v5870_v57 = vsel %vm9090_vm15, %v5868_v4, %v5869_v42  ;;  %v5780_v47 = vsel %vm9090_vm15, %v5778_v21, %v5779_v34 }
 0x5bd   : > { %5800 = vrot.lane.b32.xlu1 %v5799_v13, %s7470_s30  ;;  %v5537_v49 = vld [vmem:[#allocation10 + $0x12] ss:$88 sm:$0x1]  ;;  %v5322_v39 = vld [vmem:[#allocation10] ss:$88 sm:$0x1]  ;;  %v5568_v35 = vpack.c.bf16 %v5567_v15, %v5567_v15  ;;  %v5840_v56 = vsel %vm9090_vm15, %v5838_v43, %v5839_v14  ;;  %v5709_v28 = vrot.slane %v5702_v10, %v9078_v46 }
 0x5be   : > { %5901 = vst [vmem:[%s9084_s9 + $0x13] sm:$0x1] %v5900_v30  ;;  %5961 = vst [vmem:[%s9084_s9 + $0x15] sm:$0x1] %v5960_v59  ;;  %v5327_v58 = vld [vmem:[%s9084_s9] sm:$0x1]  ;;  %v5538_v13 = vpack.c.bf16 %v5537_v49, %v5537_v49  ;;  %v5323_v26 = vpack.c.bf16 %v5322_v39, %v5322_v39 }
 0x5bf   : > { %v5597_v62 = vld [vmem:[#allocation10 + $0x16] ss:$88 sm:$0x1]  ;;  %v5599_v1 = vld [vmem:[%s9084_s9 + $0x9] sm:$0x1]  ;;  %v5570_v25 = vsel %vm9090_vm15, %v5568_v35, %v5569_v44 }
 0x5c0   : > { %5590 = vrot.lane.b32.xlu0 %v5589_v16, %s7470_s30  ;;  %v5387_v8 = vld [vmem:[#allocation10 + $0x4] ss:$88 sm:$0x1]  ;;  %v5389_v6 = vld [vmem:[%s9084_s9 + $0x2] sm:$0x1]  ;;  %v5598_v19 = vpack.c.bf16 %v5597_v62, %v5597_v62  ;;  %v5540_v33 = vsel %vm9090_vm15, %v5538_v13, %v5539_v45  ;;  %v5328_v27 = vsel %vm9090_vm15, %v5323_v26, %v5327_v58 }
 0x5c1   : > { %5860 = vrot.lane.b32.xlu1 %v5859_v5, %s7470_s30  ;;  %v5359_v51 = vld [vmem:[%s9084_s9 + $0x1] sm:$0x1]  ;;  %v5357_v55 = vld [vmem:[#allocation10 + $0x2] ss:$88 sm:$0x1]  ;;  %v5388_v52 = vpack.c.bf16 %v5387_v8, %v5387_v8  ;;  %5329 = vst [vmem:[%s9084_s9] sm:$0x1] %v5328_v27 }
 0x5c2   : > { %v5627_v9 = vld [vmem:[#allocation10 + $0x18] ss:$88 sm:$0x1]  ;;  %v5629_v18 = vld [vmem:[%s9084_s9 + $0xa] sm:$0x1]  ;;  %v5358_v42 = vpack.c.bf16 %v5357_v55, %v5357_v55  ;;  %v5672_v55 = vrot.slane %v5664_v41, %v9078_v46 }
 0x5c3   : > { %5751 = vst [vmem:[%s9084_s9 + $0xe] sm:$0x1] %v5750_v32  ;;  %5811 = vst [vmem:[%s9084_s9 + $0x10] sm:$0x1] %v5810_v3  ;;  %v5659_v16 = vld [vmem:[%s9084_s9 + $0xb] sm:$0x1]  ;;  %v5628_v36 = vpack.c.bf16 %v5627_v9, %v5627_v9  ;;  %v5390_v7 = vsel %vm9090_vm15, %v5388_v52, %v5389_v6 }
 0x5c4   : > { %v5657_v5 = vld [vmem:[#allocation10 + $0x1c] ss:$88 sm:$0x1]  ;;  %v5687_v12 = vld [vmem:[#allocation10 + $0x1e] ss:$88 sm:$0x1]  ;;  %5348 = vrot.lane.b32.xlu0 %v5347_v31, %s7470_s30  ;;  %v5600_v31 = vsel %vm9090_vm15, %v5598_v19, %v5599_v1 }
 0x5c5   : > { %v5689_v60 = vld [vmem:[%s9084_s9 + $0xc] sm:$0x1]  ;;  %5721 = vst [vmem:[%s9084_s9 + $0xd] sm:$0x1] %v5720_v0  ;;  %5871 = vst [vmem:[%s9084_s9 + $0x12] sm:$0x1] %v5870_v57  ;;  %5560 = vrot.lane.b32.xlu1 %v5559_v22, %s7470_s30  ;;  %v5658_v14 = vpack.c.bf16 %v5657_v5, %v5657_v5  ;;  %v5688_v44 = vpack.c.bf16 %v5687_v12, %v5687_v12  ;;  %v5360_v22 = vsel %vm9090_vm15, %v5358_v42, %v5359_v51 }
 0x5c6   : > { %5781 = vst [vmem:[%s9084_s9 + $0xf] sm:$0x1] %v5780_v47  ;;  %v5417_v29 = vld [vmem:[#allocation10 + $0x6] ss:$88 sm:$0x1]  ;;  %v5630_v54 = vsel %vm9090_vm15, %v5628_v36, %v5629_v18  ;;  %v5379_v51 = vrot.slane %v9148_v23, %v9078_v46  ;;  %v5679_v57 = vrot.slane %v5672_v55, %v9078_v46 }
 0x5c7   : > { %v5419_v38 = vld [vmem:[%s9084_s9 + $0x3] sm:$0x1]  ;;  %v5447_v63 = vld [vmem:[#allocation10 + $0xa] ss:$88 sm:$0x1]  ;;  %v5418_v61 = vpack.c.bf16 %v5417_v29, %v5417_v29  ;;  %v5660_v49 = vsel %vm9090_vm15, %v5658_v14, %v5659_v16  ;;  %v5690_v39 = vsel %vm9090_vm15, %v5688_v44, %v5689_v60 }
 0x5c8   : > { %5841 = vst [vmem:[%s9084_s9 + $0x11] sm:$0x1] %v5840_v56  ;;  %5571 = vst [vmem:[%s9084_s9 + $0x8] sm:$0x1] %v5570_v25  ;;  %v5449_v34 = vld [vmem:[%s9084_s9 + $0x4] sm:$0x1]  ;;  %v5448_v53 = vpack.c.bf16 %v5447_v63, %v5447_v63  ;;  %5410 = vrot.lane.b32.xlu0 %v5409_v40, %s7470_s30 }
 0x5c9   : > { %v5477_v20 = vld [vmem:[#allocation10 + $0xc] ss:$88 sm:$0x1]  ;;  %v5507_v48 = vld [vmem:[#allocation10 + $0xe] ss:$88 sm:$0x1]  ;;  %v5420_v8 = vsel %vm9090_vm15, %v5418_v61, %v5419_v38  ;;  %5620 = vrot.lane.b32.xlu1 %v5619_v2, %s7470_s30 }
 0x5ca   : > { %5541 = vst [vmem:[%s9084_s9 + $0x7] sm:$0x1] %v5540_v33  ;;  %v6017_v15 = vld [vmem:[#allocation10 + $0x3a] ss:$88 sm:$0x1]  ;;  %v5478_v4 = vpack.c.bf16 %v5477_v20, %v5477_v20  ;;  %v5508_v32 = vpack.c.bf16 %v5507_v48, %v5507_v48  ;;  %v5450_v35 = vsel %vm9090_vm15, %v5448_v53, %v5449_v34 }
 0x5cb   : > { %v5987_v30 = vld [vmem:[#allocation10 + $0x38] ss:$88 sm:$0x1]  ;;  %v5453_v59 = vld [vmem:[#allocation10 + $0xb] ss:$88 sm:$0x1]  ;;  %v6018_v3 = vpack.c.bf16 %v6017_v15, %v6017_v15 }
 0x5cc   : > { %5601 = vst [vmem:[%s9084_s9 + $0x9] sm:$0x1] %v5600_v31  ;;  %v5479_v45 = vld [vmem:[%s9084_s9 + $0x5] sm:$0x1]  ;;  %5391 = vst [vmem:[%s9084_s9 + $0x2] sm:$0x1] %v5390_v7  ;;  %v5988_v43 = vpack.c.bf16 %v5987_v30, %v5987_v30  ;;  %v5454_v40 = vpack.c.bf16 %v5453_v59, %v5453_v59  ;;  %5650 = vrot.lane.b32.xlu0 %v5649_v11, %s7470_s30 }
 0x5cd   : > { %5361 = vst [vmem:[%s9084_s9 + $0x1] sm:$0x1] %v5360_v22  ;;  %5631 = vst [vmem:[%s9084_s9 + $0xa] sm:$0x1] %v5630_v54  ;;  %v5509_v21 = vld [vmem:[%s9084_s9 + $0x6] sm:$0x1]  ;;  %v5480_v6 = vsel %vm9090_vm15, %v5478_v4, %v5479_v45  ;;  %5380 = vrot.lane.b32.xlu1 %v5379_v51, %s7470_s30 }
 0x5ce   : > { %v6019_v58 = vld [vmem:[%s9084_s9 + $0x17] sm:$0x1]  ;;  %v5989_v62 = vld [vmem:[%s9084_s9 + $0x16] sm:$0x1]  ;;  %5661 = vst [vmem:[%s9084_s9 + $0xb] sm:$0x1] %v5660_v49  ;;  %v5510_v17 = vsel %vm9090_vm15, %v5508_v32, %v5509_v21  ;;  %v5462_v0 = vrot.slane %v5454_v40, %v9078_v46 }
 0x5cf   : > { %v5423_v1 = vld [vmem:[#allocation10 + $0x9] ss:$88 sm:$0x1]  ;;  %5691 = vst [vmem:[%s9084_s9 + $0xc] sm:$0x1] %v5690_v39  ;;  %v6020_v2 = vsel %vm9090_vm15, %v6018_v3, %v6019_v58  ;;  %v5990_v37 = vsel %vm9090_vm15, %v5988_v43, %v5989_v62 }
 0x5d0   : > { %5421 = vst [vmem:[%s9084_s9 + $0x3] sm:$0x1] %v5420_v8  ;;  %5451 = vst [vmem:[%s9084_s9 + $0x4] sm:$0x1] %v5450_v35  ;;  %v5424_v50 = vpack.c.bf16 %v5423_v1, %v5423_v1  ;;  %5710 = vrot.lane.b32.xlu0 %v5709_v28, %s7470_s30  ;;  %v5469_v5 = vrot.slane %v5462_v0, %v9078_v46  ;;  %v5953_v36 = vld [vmem:[%s9084_s9 + $0x14] sm:$0x1] }
 0x5d1   : > { %5481 = vst [vmem:[%s9084_s9 + $0x5] sm:$0x1] %v5480_v6  ;;  %v5513_v9 = vld [vmem:[#allocation10 + $0xf] ss:$88 sm:$0x1]  ;;  %5680 = vrot.lane.b32.xlu1 %v5679_v57, %s7470_s30 }
 0x5d2   : > { %5511 = vst [vmem:[%s9084_s9 + $0x6] sm:$0x1] %v5510_v17  ;;  %6021 = vst [vmem:[%s9084_s9 + $0x17] sm:$0x1] %v6020_v2  ;;  %v5514_v23 = vpack.c.bf16 %v5513_v9, %v5513_v9  ;;  %v5432_v24 = vrot.slane %v5424_v50, %v9078_v46  ;;  %v5773_v31 = vld [vmem:[%s9084_s9 + $0xe] sm:$0x1] }
 0x5d3   : > { %5991 = vst [vmem:[%s9084_s9 + $0x16] sm:$0x1] %v5990_v37  ;;  %v5483_v18 = vld [vmem:[#allocation10 + $0xd] ss:$88 sm:$0x1] }
 0x5d4   : > { %v5484_v41 = vpack.c.bf16 %v5483_v18, %v5483_v18  ;;  %v5993_v47 = vld [vmem:[#allocation10 + $0x39] ss:$88 sm:$0x1]  ;;  %v6023_v13 = vld [vmem:[#allocation10 + $0x3b] ss:$88 sm:$0x1]  ;;  %v5522_v16 = vrot.slane %v5514_v23, %v9078_v46  ;;  %v5439_v60 = vrot.slane %v5432_v24, %v9078_v46  ;;  %5470 = vrot.lane.b32.xlu0 %v5469_v5, %s7470_s30 }
 0x5d5   : > { %v5994_v12 = vpack.c.bf16 %v5993_v47, %v5993_v47  ;;  %v6024_v25 = vpack.c.bf16 %v6023_v13, %v6023_v13  ;;  %v5983_v14 = vld [vmem:[%s9084_s9 + $0x15] sm:$0x1]  ;;  %v5833_v59 = vld [vmem:[%s9084_s9 + $0x10] sm:$0x1]  ;;  %v5743_v61 = vld [vmem:[%s9084_s9 + $0xd] sm:$0x1] }
 0x5d6   : > { %v5492_v56 = vrot.slane %v5484_v41, %v9078_v46  ;;  %5440 = vrot.lane.b32.xlu1 %v5439_v60, %s7470_s30  ;;  %v5529_v26 = vrot.slane %v5522_v16, %v9078_v46  ;;  %v5893_v49 = vld [vmem:[%s9084_s9 + $0x12] sm:$0x1]  ;;  %v5803_v4 = vld [vmem:[%s9084_s9 + $0xf] sm:$0x1]  ;;  %v5593_v1 = vld [vmem:[%s9084_s9 + $0x8] sm:$0x1] }
 0x5d7   : > { %v6002_v19 = vrot.slane %v5994_v12, %v9078_v46  ;;  %v6032_v38 = vrot.slane %v6024_v25, %v9078_v46  ;;  %v5863_v8 = vld [vmem:[%s9084_s9 + $0x11] sm:$0x1]  ;;  %v5353_v40 = vld [vmem:[%s9084_s9] sm:$0x1]  ;;  %v5563_v6 = vld [vmem:[%s9084_s9 + $0x7] sm:$0x1] }
 0x5d8   : > { %v5499_v29 = vrot.slane %v5492_v56, %v9078_v46  ;;  %5530 = vrot.lane.b32.xlu0 %v5529_v26, %s7470_s30  ;;  %v5413_v2 = vld [vmem:[%s9084_s9 + $0x2] sm:$0x1]  ;;  %v5623_v51 = vld [vmem:[%s9084_s9 + $0x9] sm:$0x1]  ;;  %v5653_v18 = vld [vmem:[%s9084_s9 + $0xa] sm:$0x1] }
 0x5d9   : > { %v6009_v63 = vrot.slane %v6002_v19, %v9078_v46  ;;  %v6039_v33 = vrot.slane %v6032_v38, %v9078_v46  ;;  %v5923_v46 = vld [vmem:[%s9084_s9 + $0x13] sm:$0x1]  ;;  %v5383_v23 = vld [vmem:[%s9084_s9 + $0x1] sm:$0x1]  ;;  %v5713_v41 = vld [vmem:[%s9084_s9 + $0xc] sm:$0x1] }
 0x5da   : > { %5500 = vrot.lane.b32.xlu1 %v5499_v29, %s7470_s30  ;;  %v5683_v13 = vld [vmem:[%s9084_s9 + $0xb] sm:$0x1]  ;;  %v5473_v60 = vld [vmem:[%s9084_s9 + $0x4] sm:$0x1]  ;;  %v5443_v25 = vld [vmem:[%s9084_s9 + $0x3] sm:$0x1] }
 0x5db   : > { %v5533_v38 = vld [vmem:[%s9084_s9 + $0x6] sm:$0x1] }
 0x5dc   : > { %6010 = vrot.lane.b32.xlu0 %v6009_v63, %s7470_s30 }
 0x5de   : > { %6040 = vrot.lane.b32.xlu1 %v6039_v33, %s7470_s30  ;;  %v5503_v33 = vld [vmem:[%s9084_s9 + $0x5] sm:$0x1] }
 0x622   : > { %v5951_v42 = vpop.permute.xlu0 %5950 }
 0x623   : > { %v5954_v34 = vsel %vm9312_vm1, %v5951_v42, %v5953_v36  ;;  %v5921_v20 = vpop.permute.xlu1 %5920 }
 0x624   : > { %5955 = vst [vmem:[%s9084_s9 + $0x14] sm:$0x1] %v5954_v34  ;;  %v5924_v48 = vsel %vm9312_vm1, %v5921_v20, %v5923_v46  ;;  %v6013_v20 = vld [vmem:[%s9084_s9 + $0x16] sm:$0x1] }
 0x625   : > { %5925 = vst [vmem:[%s9084_s9 + $0x13] sm:$0x1] %v5924_v48  ;;  %v6043_v48 = vld [vmem:[%s9084_s9 + $0x17] sm:$0x1] }
 0x626   : > { %v5771_v27 = vpop.permute.xlu0 %5770 }
 0x627   : > { %v5981_v44 = vpop.permute.xlu1 %5980  ;;  %v5774_v15 = vsel %vm9312_vm1, %v5771_v27, %v5773_v31 }
 0x628   : > { %v5984_v30 = vsel %vm9312_vm1, %v5981_v44, %v5983_v14  ;;  %5775 = vst [vmem:[%s9084_s9 + $0xe] sm:$0x1] %v5774_v15 }
 0x629   : > { %5985 = vst [vmem:[%s9084_s9 + $0x15] sm:$0x1] %v5984_v30 }
 0x62a   : > { %v5831_v7 = vpop.permute.xlu0 %5830 }
 0x62b   : > { %v5834_v22 = vsel %vm9312_vm1, %v5831_v7, %v5833_v59  ;;  %v5741_v54 = vpop.permute.xlu1 %5740 }
 0x62c   : > { %5835 = vst [vmem:[%s9084_s9 + $0x10] sm:$0x1] %v5834_v22  ;;  %v5744_v45 = vsel %vm9312_vm1, %v5741_v54, %v5743_v61 }
 0x62d   : > { %5745 = vst [vmem:[%s9084_s9 + $0xd] sm:$0x1] %v5744_v45 }
 0x62e   : > { %v5891_v39 = vpop.permute.xlu0 %5890 }
 0x62f   : > { %v5894_v53 = vsel %vm9312_vm1, %v5891_v39, %v5893_v49  ;;  %v5801_v21 = vpop.permute.xlu1 %5800 }
 0x630   : > { %5895 = vst [vmem:[%s9084_s9 + $0x12] sm:$0x1] %v5894_v53  ;;  %v5804_v58 = vsel %vm9312_vm1, %v5801_v21, %v5803_v4 }
 0x631   : > { %5805 = vst [vmem:[%s9084_s9 + $0xf] sm:$0x1] %v5804_v58 }
 0x632   : > { %v5591_v62 = vpop.permute.xlu0 %5590 }
 0x633   : > { %v5861_v32 = vpop.permute.xlu1 %5860  ;;  %v5594_v3 = vsel %vm9312_vm1, %v5591_v62, %v5593_v1 }
 0x634   : > { %v5864_v43 = vsel %vm9312_vm1, %v5861_v32, %v5863_v8  ;;  %5595 = vst [vmem:[%s9084_s9 + $0x8] sm:$0x1] %v5594_v3 }
 0x635   : > { %5865 = vst [vmem:[%s9084_s9 + $0x11] sm:$0x1] %v5864_v43 }
 0x636   : > { %v5349_v10 = vpop.permute.xlu0 %5348 }
 0x637   : > { %v5561_v35 = vpop.permute.xlu1 %5560  ;;  %v5354_v11 = vsel %vm9312_vm1, %v5349_v10, %v5353_v40 }
 0x638   : > { %v5564_v17 = vsel %vm9312_vm1, %v5561_v35, %v5563_v6  ;;  %5355 = vst [vmem:[%s9084_s9] sm:$0x1] %v5354_v11 }
 0x639   : > { %5565 = vst [vmem:[%s9084_s9 + $0x7] sm:$0x1] %v5564_v17 }
 0x63a   : > { %v5411_v37 = vpop.permute.xlu0 %5410 }
 0x63b   : > { %v5621_v55 = vpop.permute.xlu1 %5620  ;;  %v5414_v50 = vsel %vm9312_vm1, %v5411_v37, %v5413_v2 }
 0x63c   : > { %v5624_v9 = vsel %vm9312_vm1, %v5621_v55, %v5623_v51  ;;  %5415 = vst [vmem:[%s9084_s9 + $0x2] sm:$0x1] %v5414_v50 }
 0x63d   : > { %5625 = vst [vmem:[%s9084_s9 + $0x9] sm:$0x1] %v5624_v9 }
 0x63e   : > { %v5651_v28 = vpop.permute.xlu0 %5650 }
 0x63f   : > { %v5381_v0 = vpop.permute.xlu1 %5380  ;;  %v5654_v57 = vsel %vm9312_vm1, %v5651_v28, %v5653_v18 }
 0x640   : > { %v5384_v24 = vsel %vm9312_vm1, %v5381_v0, %v5383_v23  ;;  %5655 = vst [vmem:[%s9084_s9 + $0xa] sm:$0x1] %v5654_v57 }
 0x641   : > { %5385 = vst [vmem:[%s9084_s9 + $0x1] sm:$0x1] %v5384_v24 }
 0x642   : > { %v5711_v47 = vpop.permute.xlu0 %5710 }
 0x643   : > { %v5681_v5 = vpop.permute.xlu1 %5680  ;;  %v5714_v16 = vsel %vm9312_vm1, %v5711_v47, %v5713_v41 }
 0x644   : > { %v5684_v12 = vsel %vm9312_vm1, %v5681_v5, %v5683_v13  ;;  %5715 = vst [vmem:[%s9084_s9 + $0xc] sm:$0x1] %v5714_v16 }
 0x645   : > { %5685 = vst [vmem:[%s9084_s9 + $0xb] sm:$0x1] %v5684_v12 }
 0x646   : > { %v5471_v56 = vpop.permute.xlu0 %5470 }
 0x647   : > { %v5474_v19 = vsel %vm9312_vm1, %v5471_v56, %v5473_v60 }
 0x648   : > { %v5441_v26 = vpop.permute.xlu1 %5440  ;;  %5475 = vst [vmem:[%s9084_s9 + $0x4] sm:$0x1] %v5474_v19 }
 0x649   : > { %v5444_v29 = vsel %vm9312_vm1, %v5441_v26, %v5443_v25 }
 0x64a   : > { %5445 = vst [vmem:[%s9084_s9 + $0x3] sm:$0x1] %v5444_v29  ;;  %v5531_v63 = vpop.permute.xlu0 %5530 }
 0x64b   : > { %v5534_v36 = vsel %vm9312_vm1, %v5531_v63, %v5533_v38 }
 0x64c   : > { %v5501_v42 = vpop.permute.xlu1 %5500  ;;  %5535 = vst [vmem:[%s9084_s9 + $0x6] sm:$0x1] %v5534_v36 }
 0x64d   : > { %v5504_v34 = vsel %vm9312_vm1, %v5501_v42, %v5503_v33 }
 0x64e   : > { %5505 = vst [vmem:[%s9084_s9 + $0x5] sm:$0x1] %v5504_v34  ;;  %v6011_v46 = vpop.permute.xlu0 %6010 }
 0x64f   : > { %v6014_v31 = vsel %vm9312_vm1, %v6011_v46, %v6013_v20 }
 0x650   : > { %v6041_v27 = vpop.permute.xlu1 %6040  ;;  %6015 = vst [vmem:[%s9084_s9 + $0x16] sm:$0x1] %v6014_v31 }
 0x651   : > { %v6044_v14 = vsel %vm9312_vm1, %v6041_v27, %v6043_v48 }
 0x652   : > { %6045 = vst [vmem:[%s9084_s9 + $0x17] sm:$0x1] %v6044_v14 }
 0x653 PF: > { %s20_s24 = sadd.s32 1, %s7459_s24  }
 0x654   : > { %p17_p8 = scmp.ge.s32.totalorder %s20_s24, 4  }
 0x656   :  { %19 = sbr.rel (!%p17_p8) target bundleno = 3 (0x3), region = 285 }
 0x65d   :  { %6071 = vsyncpa [#allocation12], 1 }
 0x65e   :  { %6073 = vsyncpa [#allocation12 + $0x1], 1 }
 0x65f   :  { %6074 = vsyncpa [#allocation14], 1 }
 0x660   :  { %6075 = vsyncpa [#allocation17], 1 }

</bundles_post_ra>
